<compile_context>
chip_gen: v7x
topology: tpu7x:2x2x1
jax: 0.10.0
libtpu: 0.0.40
codegen_flags: <defaults>
</compile_context>

<pallas_src>
import jax
import jax.numpy as jnp
from jax.experimental import pallas as pl
from jax.experimental.pallas import tpu as pltpu

INPUT = 1024
HIDDEN = 2000
OUTPUT = 1024
LANE = 128
PAD = ((HIDDEN + LANE - 1) // LANE) * LANE  # 2048: shared padded feature dim
N_LAYERS = 7


# ---------------------------------------------------------------------------
# Fused kernel: grid = (layer,).  Activation lives in VMEM scratch.
# ---------------------------------------------------------------------------
def _fused_mlp_kernel(x_ref, w_ref, s_ref, b_ref, o_ref, act_ref):
    l = pl.program_id(0)
    last = pl.num_programs(0) - 1

    # Layer 0 pulls the (padded, bf16) input into the resident activation.
    @pl.when(l == 0)
    def _():
        act_ref[...] = x_ref[...]

    # int8 -> bf16 is exact; per-output-channel scale is applied to the f32
    # accumulator after the MXU matmul, bias added in f32.
    w_bf16 = w_ref[0].astype(jnp.bfloat16)                       # (K, N)
    acc = jnp.dot(act_ref[...], w_bf16,
                  preferred_element_type=jnp.float32)            # (B, N) f32
    acc = acc * s_ref[l] + b_ref[l]

    # Hidden layers: tanh back into the resident activation.
    @pl.when(l < last)
    def _():
        act_ref[...] = jnp.tanh(acc).astype(act_ref.dtype)

    # Final layer: single write of the (resident) output block.
    @pl.when(l == last)
    def _():
        o_ref[...] = acc.astype(o_ref.dtype)


def fused_mlp(x_pad, w_q, s_stack, b_stack):
    """x_pad: (B, 2048) bf16, w_q: (7, 2048, 2048) int8,
    s_stack / b_stack: (7, 1, 2048) f32."""
    B, Kp = x_pad.shape
    L, Kw, Np = w_q.shape
    assert Kp == Kw == PAD and Np == PAD and L == N_LAYERS

    flops = 2 * B * Kp * Np * L
    bytes_accessed = (
        w_q.size * w_q.dtype.itemsize
        + s_stack.size * s_stack.dtype.itemsize
        + b_stack.size * b_stack.dtype.itemsize
        + x_pad.size * x_pad.dtype.itemsize
        + B * Np * 4
    )

    return pl.pallas_call(
        _fused_mlp_kernel,
        out_shape=jax.ShapeDtypeStruct((B, Np), jnp.float32),
        grid_spec=pltpu.PrefetchScalarGridSpec(
            num_scalar_prefetch=0,
            grid=(L,),
            in_specs=[
                pl.BlockSpec((B, Kp), lambda l: (0, 0)),        # x: loaded once
                pl.BlockSpec((1, Kp, Np), lambda l: (l, 0, 0)),  # weights (int8)
                pl.BlockSpec((L, 1, Np), lambda l: (0, 0, 0)),   # scales, once
                pl.BlockSpec((L, 1, Np), lambda l: (0, 0, 0)),   # biases, once
            ],
            out_specs=pl.BlockSpec((B, Np), lambda l: (0, 0)),   # resident output
            scratch_shapes=[
                pltpu.VMEM((B, Kp), jnp.bfloat16),               # resident activation
            ],
        ),
        compiler_params=pltpu.CompilerParams(
            dimension_semantics=("arbitrary",),                  # layers are sequential
            vmem_limit_bytes=40 * 1024 * 1024,
        ),
        cost_estimate=pl.CostEstimate(
            flops=flops,
            transcendentals=B * Np * (L - 1),
            bytes_accessed=int(bytes_accessed),
        ),
    )(x_pad, w_q, s_stack, b_stack)


# ---------------------------------------------------------------------------
# Parameter init (mirrors torch xavier_uniform_ weights + default bias init),
# then per-output-channel symmetric int8 quantization.
# ---------------------------------------------------------------------------
def _init_linear(key, fan_in, fan_out):
    kw, kb = jax.random.split(key)
    limit = (6.0 / (fan_in + fan_out)) ** 0.5
    w = jax.random.uniform(kw, (fan_out, fan_in), jnp.float32, -limit, limit)
    bound = 1.0 / (fan_in ** 0.5)
    b = jax.random.uniform(kb, (fan_out,), jnp.float32, -bound, bound)
    return w, b


def _quantize_per_channel(w):
    """w: (PAD, PAD) f32, output channels along last axis -> (int8, (1,PAD) f32)."""
    amax = jnp.max(jnp.abs(w), axis=0, keepdims=True)
    scale = jnp.where(amax > 0.0, amax / 127.0, 1.0)
    q = jnp.clip(jnp.round(w / scale), -127.0, 127.0).astype(jnp.int8)
    return q, scale


def init_net_params(key):
    dims = [(INPUT, HIDDEN)] + [(HIDDEN, HIDDEN)] * 5 + [(HIDDEN, OUTPUT)]
    keys = jax.random.split(key, len(dims))
    qs, ss, bs = [], [], []
    for k, (fi, fo) in zip(keys, dims):
        w, b = _init_linear(k, fi, fo)
        # torch layout (out, in) -> (in, out), zero-padded to (2048, 2048)
        wt = jnp.zeros((PAD, PAD), jnp.float32).at[:fi, :fo].set(w.T)
        q, s = _quantize_per_channel(wt)
        bp = jnp.zeros((1, PAD), jnp.float32).at[0, :fo].set(b)
        qs.append(q)
        ss.append(s)
        bs.append(bp)
    w_q = jnp.stack(qs)        # (7, 2048, 2048) int8
    s_stack = jnp.stack(ss)    # (7, 1, 2048) f32
    b_stack = jnp.stack(bs)    # (7, 1, 2048) f32
    return w_q, s_stack, b_stack


# ---------------------------------------------------------------------------
# Forward pass: 6 x (Linear + tanh) + final Linear, one fused kernel.
# ---------------------------------------------------------------------------
@jax.jit
def net_forward(x, w_q, s_stack, b_stack):
    B = x.shape[0]
    Bp = max(8, ((B + 7) // 8) * 8)   # pad batch to a sublane multiple
    x_pad = jnp.zeros((Bp, PAD), jnp.bfloat16).at[:B, :INPUT].set(
        x.astype(jnp.bfloat16)
    )
    out = fused_mlp(x_pad, w_q, s_stack, b_stack)
    return out[:B, :OUTPUT]


if __name__ == "__main__":
    key = jax.random.PRNGKey(0)
    k_param, k_x = jax.random.split(key)

    w_q, s_stack, b_stack = init_net_params(k_param)

    batch = 8  # feature dims are fixed by the module (1024 / 2000 / 1024)
    x = jax.random.normal(k_x, (batch, INPUT), jnp.float32)

    out = net_forward(x, w_q, s_stack, b_stack)
    jax.block_until_ready(out)

    # Pure-JAX reference using the SAME int8 weights / scales / bf16 activations.
    Bp = max(8, ((batch + 7) // 8) * 8)
    h = jnp.zeros((Bp, PAD), jnp.bfloat16).at[:batch, :INPUT].set(
        x.astype(jnp.bfloat16)
    )
    acc = None
    for l in range(N_LAYERS):
        acc = (
            jnp.dot(h, w_q[l].astype(jnp.bfloat16),
                    preferred_element_type=jnp.float32)
            * s_stack[l] + b_stack[l]
        )
        if l < N_LAYERS - 1:
            h = jnp.tanh(acc).astype(jnp.bfloat16)
    ref = acc[:batch, :OUTPUT]

    assert out.shape == (batch, OUTPUT)
    err = float(jnp.max(jnp.abs(out - ref)))
    assert jnp.allclose(out, ref, atol=2e-2, rtol=2e-2), err

    print("KERNEL_OK")
</pallas_src>

<mosaic_0001>
module attributes {stable_mosaic.version = 11 : i64} {
  func.func @_fused_mlp_kernel(%arg0: i32, %arg1: memref<8x2048xbf16, #tpu.memory_space<vmem>>, %arg2: memref<1x2048x2048xi8, #tpu.memory_space<vmem>>, %arg3: memref<7x1x2048xf32, #tpu.memory_space<vmem>>, %arg4: memref<7x1x2048xf32, #tpu.memory_space<vmem>>, %arg5: memref<8x2048xf32, #tpu.memory_space<vmem>>, %arg6: memref<8x2048xbf16, #tpu.memory_space<vmem>>) attributes {dimension_semantics = [#tpu.dimension_semantics<arbitrary>], iteration_bounds = array<i64: 7>, scalar_prefetch = 0 : i64, scratch_operands = 1 : i64, tpu.core_type = #tpu.core_type<tc>, window_params = [{pipeline_mode = #tpu.pipeline_mode<synchronous>, transform_indices = @transform_0, window_bounds = array<i64: 8, 2048>}, {transform_indices = @transform_1, window_bounds = array<i64: 1, 2048, 2048>}, {pipeline_mode = #tpu.pipeline_mode<synchronous>, transform_indices = @transform_2, window_bounds = array<i64: 7, 1, 2048>}, {pipeline_mode = #tpu.pipeline_mode<synchronous>, transform_indices = @transform_3, window_bounds = array<i64: 7, 1, 2048>}, {pipeline_mode = #tpu.pipeline_mode<synchronous>, transform_indices = @transform_4, window_bounds = array<i64: 8, 2048>}]} {
    %c0_i32 = arith.constant 0 : i32
    %0 = arith.cmpi eq, %arg0, %c0_i32 : i32
    %1 = arith.extui %0 : i1 to i32
    %c0_i32_0 = arith.constant 0 : i32
    %2 = arith.cmpi ne, %1, %c0_i32_0 : i32
    scf.if %2 {
      %c0_12 = arith.constant 0 : index
      %c0_13 = arith.constant 0 : index
      %24 = vector.load %arg1[%c0_12, %c0_13] : memref<8x2048xbf16, #tpu.memory_space<vmem>>, vector<8x2048xbf16>
      %c0_14 = arith.constant 0 : index
      %c0_15 = arith.constant 0 : index
      %25 = vector.load %arg6[%c0_14, %c0_15] : memref<8x2048xbf16, #tpu.memory_space<vmem>>, vector<8x2048xbf16>
      tpu.vector_store %arg6[%c0_14, %c0_15], %24 {strides = array<i32>} : memref<8x2048xbf16, #tpu.memory_space<vmem>>, vector<8x2048xbf16>,
    } else {
    }
    %c0 = arith.constant 0 : index
    %c0_1 = arith.constant 0 : index
    %c0_2 = arith.constant 0 : index
    %3 = vector.load %arg2[%c0, %c0_1, %c0_2] : memref<1x2048x2048xi8, #tpu.memory_space<vmem>>, vector<1x2048x2048xi8>
    %4 = vector.shape_cast %3 : vector<1x2048x2048xi8> to vector<2048x2048xi8>
    %5 = arith.sitofp %4 : vector<2048x2048xi8> to vector<2048x2048xbf16>
    %c0_3 = arith.constant 0 : index
    %c0_4 = arith.constant 0 : index
    %6 = vector.load %arg6[%c0_3, %c0_4] : memref<8x2048xbf16, #tpu.memory_space<vmem>>, vector<8x2048xbf16>
    %cst = arith.constant dense<0.000000e+00> : vector<8x2048xf32>
    %7 = tpu.matmul %6, %5, %cst {dimension_numbers = #tpu.dot_dimension_numbers<[1], [0], [0], [1], [0, 0, 1, 1], [], []>} : vector<8x2048xbf16>, vector<2048x2048xbf16>, vector<8x2048xf32> -> vector<8x2048xf32>
    %8 = arith.index_cast %arg0 : i32 to index
    %c0_5 = arith.constant 0 : index
    %c0_6 = arith.constant 0 : index
    %9 = vector.load %arg3[%8, %c0_5, %c0_6] : memref<7x1x2048xf32, #tpu.memory_space<vmem>>, vector<1x1x2048xf32>
    %10 = vector.shape_cast %9 : vector<1x1x2048xf32> to vector<1x2048xf32>
    %11 = vector.broadcast %10 : vector<1x2048xf32> to vector<8x2048xf32>
    %12 = arith.mulf %7, %11 : vector<8x2048xf32>
    %13 = arith.index_cast %arg0 : i32 to index
    %c0_7 = arith.constant 0 : index
    %c0_8 = arith.constant 0 : index
    %14 = vector.load %arg4[%13, %c0_7, %c0_8] : memref<7x1x2048xf32, #tpu.memory_space<vmem>>, vector<1x1x2048xf32>
    %15 = vector.shape_cast %14 : vector<1x1x2048xf32> to vector<1x2048xf32>
    %16 = vector.broadcast %15 : vector<1x2048xf32> to vector<8x2048xf32>
    %17 = arith.addf %12, %16 : vector<8x2048xf32>
    %c6_i32 = arith.constant 6 : i32
    %18 = arith.cmpi slt, %arg0, %c6_i32 : i32
    %19 = arith.extui %18 : i1 to i32
    %c0_i32_9 = arith.constant 0 : i32
    %20 = arith.cmpi ne, %19, %c0_i32_9 : i32
    scf.if %20 {
      %24 = math.tanh %17 : vector<8x2048xf32>
      %25 = arith.truncf %24 : vector<8x2048xf32> to vector<8x2048xbf16>
      %c0_12 = arith.constant 0 : index
      %c0_13 = arith.constant 0 : index
      %26 = vector.load %arg6[%c0_12, %c0_13] : memref<8x2048xbf16, #tpu.memory_space<vmem>>, vector<8x2048xbf16>
      tpu.vector_store %arg6[%c0_12, %c0_13], %25 {strides = array<i32>} : memref<8x2048xbf16, #tpu.memory_space<vmem>>, vector<8x2048xbf16>,
    } else {
    }
    %c6_i32_10 = arith.constant 6 : i32
    %21 = arith.cmpi eq, %arg0, %c6_i32_10 : i32
    %22 = arith.extui %21 : i1 to i32
    %c0_i32_11 = arith.constant 0 : i32
    %23 = arith.cmpi ne, %22, %c0_i32_11 : i32
    scf.if %23 {
      %c0_12 = arith.constant 0 : index
      %c0_13 = arith.constant 0 : index
      %24 = vector.load %arg5[%c0_12, %c0_13] : memref<8x2048xf32, #tpu.memory_space<vmem>>, vector<8x2048xf32>
      tpu.vector_store %arg5[%c0_12, %c0_13], %17 {strides = array<i32>} : memref<8x2048xf32, #tpu.memory_space<vmem>>, vector<8x2048xf32>,
    } else {
    }
    return
  }
  func.func @transform_0(%arg0: i32) -> (i32, i32) {
    %c0_i32 = arith.constant 0 : i32
    %c0_i32_0 = arith.constant 0 : i32
    %c0_i32_1 = arith.constant 0 : i32
    return %c0_i32, %c0_i32_0 : i32, i32
  }
  func.func @transform_1(%arg0: i32) -> (i32, i32, i32) {
    %c0_i32 = arith.constant 0 : i32
    %c0_i32_0 = arith.constant 0 : i32
    %c0_i32_1 = arith.constant 0 : i32
    return %arg0, %c0_i32, %c0_i32_0 : i32, i32, i32
  }
  func.func @transform_2(%arg0: i32) -> (i32, i32, i32) {
    %c0_i32 = arith.constant 0 : i32
    %c0_i32_0 = arith.constant 0 : i32
    %c0_i32_1 = arith.constant 0 : i32
    %c0_i32_2 = arith.constant 0 : i32
    return %c0_i32, %c0_i32_0, %c0_i32_1 : i32, i32, i32
  }
  func.func @transform_3(%arg0: i32) -> (i32, i32, i32) {
    %c0_i32 = arith.constant 0 : i32
    %c0_i32_0 = arith.constant 0 : i32
    %c0_i32_1 = arith.constant 0 : i32
    %c0_i32_2 = arith.constant 0 : i32
    return %c0_i32, %c0_i32_0, %c0_i32_1 : i32, i32, i32
  }
  func.func @transform_4(%arg0: i32) -> (i32, i32) {
    %c0_i32 = arith.constant 0 : i32
    %c0_i32_0 = arith.constant 0 : i32
    %c0_i32_1 = arith.constant 0 : i32
    return %c0_i32, %c0_i32_0 : i32, i32
  }
}

</mosaic_0001>

<bundles_post_ra>
// kernel: net_forward.1
= control target key start
LH: loop header
LB: loop body
LE: loop exit
PB: predicated region body
PF: predicated region fallthrough
CT: control target
= control target key end

     0   :  { %9 = vsyncpa [#allocation4], 0  ;;  %s8554_s0 = inlined_call_operand.vmem [shape: bf16[8,2048], index: 0, kind: input, shape index: {}]   ;;  %s8555_s1 = inlined_call_operand.hbm [shape: s8[7,2048,2048], index: 1, kind: input, shape index: {}]   ;;  %s8556_s2 = inlined_call_operand.hbm [shape: f32[7,1,2048], index: 2, kind: input, shape index: {}]   ;;  %s8557_s3 = inlined_call_operand.hbm [shape: f32[7,1,2048], index: 3, kind: input, shape index: {}]   ;;  %s8558_s4 = inlined_call_operand.vmem [shape: f32[8,2048], index: 4, kind: output, shape index: {}]  }
   0x1   :  { %11 = vsyncpa [#allocation4 + $0x1], 0 }
   0x2   :  { %12 = vsyncpa [#allocation6], 0  ;;  %s6938_s15 = smov 0   ;;  %s6940_s16 = smov 0  }
   0x3   :  { %s6942_s17 = smov 0   ;;  %s6944_s18 = smov 0  }
   0x4 LB: > { %s6957_s19 = sadd.s32 4294967295, %s6904_s18   ;;  %p59_p0 = scmp.ne.s32.totalorder %s6896_s16, %s6892_s15  ;;  %s6904_s18 = sphi %s6944_s18, %s8574_s18   ;;  %s6900_s17 = sphi %s6942_s17, %s8573_s17   ;;  %s6896_s16 = sphi %s6940_s16, %s8572_s16   ;;  %s6892_s15 = sphi %s6938_s15, %s8571_s15  }
   0x5   : > { %p8559_p1 = scmp.eq.s32.totalorder %s6957_s19, 0  ;;  %p6390_p2 = scmp.ge.s32.totalorder %s6904_s18, 1 }
   0x6   : > { %p133_p3 = scmp.lt.s32.totalorder %s6904_s18, 8  ;;  %s6906_s22 = smov [#allocation5]  }
   0x7   : > { %p6966_p5 = por %p8559_p1, %p59_p0  ;;  %s148_s23 = sshll.u32 %s6906_s22, 4  ;;  %s149_s23 = int_to_ptr.vmem [resolvable:$true] %s148_s23 }
   0x8   : > { %p6970_p6 = pnand %p6390_p2, %p133_p3  ;;  %s6907_s25 = smov [#allocation7]  }
   0x9   : > { %s8562_s20 = scalar_select %p6966_p5, 1, 0 }
   0xa   : > { %s8563_s21 = scalar_select %p6970_p6, 1, 0 }
   0xb   : > { %p6674_p7 = pneg %p6970_p6  ;;  %s161_s26 = sshll.u32 %s6907_s25, 4  ;;  %s6982_s26 = int_to_ptr.vmem [resolvable:$true] %s161_s26 }
   0xc   : > { %s6780_s29 = scalar_lea.hbm %s8556_s2, 1792 }
   0xd   : > { %p6978_p8 = pnand %p6674_p7, %p8559_p1  ;;  %p6781_p9 = scmp.ne.s32.totalorder %s8556_s2, %s6780_s29 }
   0xe   : > { %p6787_p13 = scmp.lt.u32.totalorder %s6780_s29, %s8556_s2 }
   0xf   : > { %p6782_p10 = pneg %p6978_p8 }
  0x11   : > { %p6783_p11 = pnand %p6782_p10, %p6781_p9 }
  0x13   : > { %p6784_p12 = pneg %p6783_p11 }
  0x15   : > { %p6789_p0 = pnand %p6787_p13, %p6784_p12 }
  0x17   : > { %6792 = shalt.err (!%p6789_p0)
}
  0x18   : > { %s6793_s8 = scalar_lea.vmem %s149_s23, 1792  ;;  %p6801_p4 = scmp.lt.s32.totalorder %s149_s23, %s149_s23 }
  0x19   : > { %p6794_p2 = scmp.ne.s32.totalorder %s149_s23, %s6793_s8  ;;  %p6802_p1 = scmp.lt.s32.totalorder %s6793_s8, %s6793_s8 }
  0x1b   : > { %p6796_p3 = pnand %p6794_p2, %p6782_p10  ;;  %p6803_p5 = por %p6802_p1, %p6801_p4 }
  0x1d   : > { %p6797_p7 = pneg %p6796_p3 }
  0x1f   : > { %p6804_p6 = pnand %p6803_p5, %p6797_p7 }
  0x21   : > { %6807 = shalt.err (!%p6804_p6)
}
  0x22   : > { %s6908_s9 = smov 256   ;;  %s6909_s10 = smov 16  }
  0x23   : > { %6677 = dma.hbm_to_vmem [thread:$0]  (!%p6978_p8), %s8556_s2, 1792, %s149_s23, [#allocation6], %s6908_s9, %s6908_s9, %s6909_s10  }
  0x24   : > { %s6808_s15 = scalar_lea.hbm %s8557_s3, 1792 }
  0x25   : > { %p6809_p9 = scmp.ne.s32.totalorder %s8557_s3, %s6808_s15  ;;  %p6815_p5 = scmp.lt.u32.totalorder %s6808_s15, %s8557_s3 }
  0x27   : > { %p6811_p1 = pnand %p6809_p9, %p6782_p10 }
  0x29   : > { %p6812_p4 = pneg %p6811_p1 }
  0x2b   : > { %p6817_p6 = pnand %p6815_p5, %p6812_p4 }
  0x2d   : > { %6820 = shalt.err (!%p6817_p6)
}
  0x2e   : > { %s6821_s23 = scalar_lea.vmem %s6982_s26, 1792  ;;  %p6829_p0 = scmp.lt.s32.totalorder %s6982_s26, %s6982_s26 }
  0x2f   : > { %p6822_p11 = scmp.ne.s32.totalorder %s6982_s26, %s6821_s23  ;;  %p6830_p2 = scmp.lt.s32.totalorder %s6821_s23, %s6821_s23 }
  0x31   : > { %p6824_p12 = pnand %p6822_p11, %p6782_p10  ;;  %p6831_p3 = por %p6830_p2, %p6829_p0 }
  0x33   : > { %p6825_p13 = pneg %p6824_p12 }
  0x35   : > { %p6832_p7 = pnand %p6831_p3, %p6825_p13 }
  0x37   : > { %6835 = shalt.err (!%p6832_p7)
}
  0x38   : > { %6680 = dma.hbm_to_vmem [thread:$0]  (!%p6978_p8), %s8557_s3, 1792, %s6982_s26, [#allocation6], %s6908_s9, %s6908_s9, %s6909_s10  }
  0x39   : > { %s7032_s5 = sadd.s32 1, %s6904_s18   ;;  %s46_s6 = sadd.s32 1, %s6900_s17 }
  0x3a   : > { %s43_s24 = ssub.s32 %s6904_s18, %s7032_s5  ;;  %p53_p10 = scmp.ne.s32.totalorder %s6900_s17, %s6896_s16 }
  0x3b   : > { %p44_p9 = scmp.eq.s32.totalorder %s43_s24, 0  ;;  %p54_p1 = scmp.eq.s32.totalorder %s6904_s18, 0 }
  0x3c   : > { %p6687_p4 = scmp.lt.s32.totalorder %s6904_s18, 7  ;;  %s175_s7 = sand.u32 1, %s6900_s17  }
  0x3d   : > { %s7043_s8 = scalar_select %p44_p9, %s6900_s17, %s46_s6  }
  0x3e   : > { %p55_p5 = por %p54_p1, %p53_p10  ;;  %s6394_s11 = sshll.u32 %s175_s7, 13 }
  0x3f   : > { %s6431_s12 = sshll.u32 %s6904_s18, 17  ;;  %s179_s26 = scalar_lea.vmem [#allocation3], %s6394_s11 }
  0x40   : > { %s7049_s15 = scalar_lea.hbm %s8555_s1, %s6431_s12  ;;  %s186_s9 = sshll.u32 %s179_s26, 4  ;;  %s7055_s9 = int_to_ptr.vmem [resolvable:$true] %s186_s9 }
  0x41   : > { %p7051_p8 = pnand %p6687_p4, %p55_p5  ;;  %s7057_s18 = scalar_lea.sflag [#allocation4], %s175_s7 }
  0x42   : > { %s6836_s22 = scalar_lea.hbm %s7049_s15, 131072  ;;  %s6841_s28 = scalar_lea.hbm %s8555_s1, 917504 }
  0x43   : > { %p6837_p6 = scmp.ne.s32.totalorder %s7049_s15, %s6836_s22  ;;  %p6838_p11 = pneg %p7051_p8 }
  0x44   : > { %p6842_p0 = scmp.lt.u32.totalorder %s7049_s15, %s8555_s1  ;;  %p6843_p2 = scmp.lt.u32.totalorder %s6841_s28, %s6836_s22 }
  0x45   : > { %p6839_p12 = pnand %p6838_p11, %p6837_p6  ;;  %p6845_p7 = scmp.lt.u32.totalorder %s6836_s22, %s7049_s15 }
  0x46   : > { %p6844_p3 = por %p6843_p2, %p6842_p0 }
  0x47   : > { %p6840_p13 = pneg %p6839_p12 }
  0x48   : > { %p6846_p10 = por %p6845_p7, %p6844_p3 }
  0x4a   : > { %p6847_p9 = pnand %p6846_p10, %p6840_p13 }
  0x4c   : > { %6850 = shalt.err (!%p6847_p9)
}
  0x4d   : > { %s6851_s30 = scalar_lea.vmem %s7055_s9, 131072  ;;  %s6910_s6 = smov [#allocation3]  }
  0x4e   : > { %p6852_p1 = scmp.ne.s32.totalorder %s7055_s9, %s6851_s30  ;;  %s6856_s24 = sshll.u32 %s6910_s6, 4  ;;  %s6857_s24 = int_to_ptr.vmem [resolvable:$false] %s6856_s24 }
  0x4f   : > { %s6858_s7 = scalar_lea.vmem %s6857_s24, 262144  ;;  %p6859_p6 = scmp.lt.s32.totalorder %s7055_s9, %s6857_s24 }
  0x50   : > { %p6854_p4 = pnand %p6852_p1, %p6838_p11  ;;  %p6860_p12 = scmp.lt.s32.totalorder %s6858_s7, %s6851_s30 }
  0x52   : > { %p6855_p5 = pneg %p6854_p4  ;;  %p6861_p0 = por %p6860_p12, %p6859_p6 }
  0x54   : > { %p6862_p2 = pnand %p6861_p0, %p6855_p5 }
  0x56   : > { %6865 = shalt.err (!%p6862_p2)
}
  0x57   : > { %s6911_s11 = smov 2048   ;;  %s6912_s12 = smov 128  }
  0x58   : > { %6684 = dma.hbm_to_vmem [thread:$0]  (!%p7051_p8), %s7049_s15, 131072, %s7055_s9, %s7057_s18, %s6911_s11, %s6911_s11, %s6912_s12  }
  0x59   : > { %p8566_p11 = scmp.ne.s32.totalorder %s8563_s21, 0 }
  0x5a   : > { %s200_s13 = sand.u32 (!%p8566_p11), 1, %s6896_s16   ;;  %p8567_p13 = scmp.ne.s32.totalorder (!%p8566_p11), %s8562_s20, 0 }
  0x5b   : > { %198 = sbr.rel (%p8566_p11) target bundleno = 2404 (0x964), region = 36  ;;  %s6398_s14 = sshll.u32 (!%p8566_p11), %s200_s13, 13 }
  0x5c   : > { %s201_s26 = scalar_lea.sflag (!%p8566_p11), [#allocation4], %s200_s13  ;;  %s7088_s22 = scalar_lea.vmem (!%p8566_p11), [#allocation3], %s6398_s14 }
  0x62   : > { %6883 = dma.done.wait (%p8567_p13), %s201_s26, 131072  }
  0x63   : > { %6885 = vsyncadd (%p8567_p13), %s201_s26, 4294836224  ;;  %p8568_p3 = scmp.eq.s32.totalorder %s6957_s19, 0 }
  0x65   : > { %6887 = dma.done.wait (%p8568_p3), [#allocation6], 3584   ;;  %p8569_p8 = pmov %p8568_p3 }
  0x66   : > { %p8570_p7 = scmp.ne.s32.totalorder %s6957_s19, 0 }
  0x67   : > { %6889 = vsyncadd (%p8569_p8), [#allocation6], 4294963712  ;;  %v236_v0 = vld [vmem:[%s8554_s0] sm:$0xff] (!%p8570_p7)  ;;  %v237_v1 = vld [vmem:[%s8554_s0 + $0x8] sm:$0xff] (!%p8570_p7) }
  0x68   : > { %235 = sbr.rel (%p8570_p7) target bundleno = 111 (0x6f), region = 52  ;;  %v238_v2 = vld [vmem:[%s8554_s0 + $0x10] sm:$0xff] (!%p8570_p7)  ;;  %244 = vst [vmem:[#allocation2] sm:$0xff] (!%p8570_p7), %v236_v0  ;;  %245 = vst [vmem:[#allocation2 + $0x8] sm:$0xff] (!%p8570_p7), %v237_v1  ;;  %v239_v3 = vld [vmem:[%s8554_s0 + $0x18] sm:$0xff] (!%p8570_p7) }
  0x69   : > { %246 = vst [vmem:[#allocation2 + $0x10] sm:$0xff] (!%p8570_p7), %v238_v2  ;;  %v240_v4 = vld [vmem:[%s8554_s0 + $0x20] sm:$0xff] (!%p8570_p7)  ;;  %v241_v5 = vld [vmem:[%s8554_s0 + $0x28] sm:$0xff] (!%p8570_p7)  ;;  %247 = vst [vmem:[#allocation2 + $0x18] sm:$0xff] (!%p8570_p7), %v239_v3 }
  0x6a   : > { %248 = vst [vmem:[#allocation2 + $0x20] sm:$0xff] (!%p8570_p7), %v240_v4  ;;  %249 = vst [vmem:[#allocation2 + $0x28] sm:$0xff] (!%p8570_p7), %v241_v5  ;;  %v242_v6 = vld [vmem:[%s8554_s0 + $0x30] sm:$0xff] (!%p8570_p7)  ;;  %v243_v7 = vld [vmem:[%s8554_s0 + $0x38] sm:$0xff] (!%p8570_p7) }
  0x6b   : > { %250 = vst [vmem:[#allocation2 + $0x30] sm:$0xff] (!%p8570_p7), %v242_v6  ;;  %251 = vst [vmem:[#allocation2 + $0x38] sm:$0xff] (!%p8570_p7), %v243_v7 }
  0x6f PF: > { %v253_v8 = vld [vmem:[%s7088_s22 + $0x8] sm:$0xff]  ;;  %v255_v9 = vld [vmem:[%s7088_s22 + $0x18] sm:$0xff]  ;;  %v252_v10 = vld [vmem:[%s7088_s22] sm:$0xff]  ;;  %s6418_s12 = sshll.u32 %s6957_s19, 4  ;;  %p6419_p10 = scmp.ge.s32.totalorder %s6957_s19, 6 }
  0x70   : > { %v1277_v11 = vunpack.c.l.s8.bf16 %v253_v8  ;;  %v1293_v12 = vunpack.c.h.s8.bf16 %v253_v8  ;;  %v1279_v13 = vunpack.c.l.s8.bf16 %v255_v9  ;;  %v1295_v14 = vunpack.c.h.s8.bf16 %v255_v9  ;;  %v254_v15 = vld [vmem:[%s7088_s22 + $0x10] sm:$0xff]  ;;  %v269_v18 = vld [vmem:[%s7088_s22 + $0x88] sm:$0xff]  ;;  %v271_v19 = vld [vmem:[%s7088_s22 + $0x98] sm:$0xff]  ;;  %s7623_s13 = scalar_lea.vmem [#allocation5], %s6418_s12  ;;  %s7632_s14 = scalar_lea.vmem [#allocation7], %s6418_s12 }
  0x71   : > { %v1276_v16 = vunpack.c.l.s8.bf16 %v252_v10  ;;  %v1278_v17 = vunpack.c.l.s8.bf16 %v254_v15  ;;  %v1292_v20 = vunpack.c.h.s8.bf16 %v252_v10  ;;  %v1294_v21 = vunpack.c.h.s8.bf16 %v254_v15  ;;  %v268_v24 = vld [vmem:[%s7088_s22 + $0x80] sm:$0xff]  ;;  %v270_v25 = vld [vmem:[%s7088_s22 + $0x90] sm:$0xff]  ;;  %v285_v30 = vld [vmem:[%s7088_s22 + $0x108] sm:$0xff] }
  0x72   : > { %3388 = vmatprep.subr.bf16.mxu0 %v1277_v11  ;;  %3716 = vmatprep.subr.bf16.mxu1 %v1279_v13  ;;  %v1309_v22 = vunpack.c.l.s8.bf16 %v269_v18  ;;  %v1311_v23 = vunpack.c.l.s8.bf16 %v271_v19  ;;  %v1308_v26 = vunpack.c.l.s8.bf16 %v268_v24  ;;  %v1310_v27 = vunpack.c.l.s8.bf16 %v270_v25  ;;  %v287_v31 = vld [vmem:[%s7088_s22 + $0x118] sm:$0xff]  ;;  %v284_v36 = vld [vmem:[%s7088_s22 + $0x100] sm:$0xff]  ;;  %v286_v37 = vld [vmem:[%s7088_s22 + $0x110] sm:$0xff] }
  0x73   : > { %3389 = vmatpush1.bf16.msra.mxu0 %v1276_v16  ;;  %3717 = vmatpush1.bf16.msra.mxu1 %v1278_v17  ;;  %v1325_v28 = vunpack.c.h.s8.bf16 %v269_v18  ;;  %v1327_v29 = vunpack.c.h.s8.bf16 %v271_v19  ;;  %v1324_v32 = vunpack.c.h.s8.bf16 %v268_v24  ;;  %v1326_v33 = vunpack.c.h.s8.bf16 %v270_v25  ;;  %v7136_v38 = vld [vmem:[#allocation2] sm:$0xff]  ;;  %v301_v44 = vld [vmem:[%s7088_s22 + $0x188] sm:$0xff]  ;;  %v303_v45 = vld [vmem:[%s7088_s22 + $0x198] sm:$0xff] }
  0x74   : > { %3390 = vmatprep.subr.bf16.mxu0 %v1293_v12  ;;  %3718 = vmatprep.subr.bf16.mxu1 %v1295_v14  ;;  %v1341_v34 = vunpack.c.l.s8.bf16 %v285_v30  ;;  %v1343_v35 = vunpack.c.l.s8.bf16 %v287_v31  ;;  %v1340_v39 = vunpack.c.l.s8.bf16 %v284_v36  ;;  %v1342_v40 = vunpack.c.l.s8.bf16 %v286_v37  ;;  %v300_v50 = vld [vmem:[%s7088_s22 + $0x180] sm:$0xff]  ;;  %v302_v51 = vld [vmem:[%s7088_s22 + $0x190] sm:$0xff]  ;;  %v317_v56 = vld [vmem:[%s7088_s22 + $0x208] sm:$0xff] }
  0x75   : > { %v1357_v41 = vunpack.c.h.s8.bf16 %v285_v30  ;;  %v1359_v42 = vunpack.c.h.s8.bf16 %v287_v31  ;;  %v7140_v43 = vcombine.high %v7136_v38, %v7136_v38  ;;  %v1356_v46 = vunpack.c.h.s8.bf16 %v284_v36  ;;  %v319_v57 = vld [vmem:[%s7088_s22 + $0x218] sm:$0xff]  ;;  %v316_v62 = vld [vmem:[%s7088_s22 + $0x200] sm:$0xff]  ;;  %v318_v63 = vld [vmem:[%s7088_s22 + $0x210] sm:$0xff] }
  0x76   : > { %v1358_v47 = vunpack.c.h.s8.bf16 %v286_v37  ;;  %v1373_v48 = vunpack.c.l.s8.bf16 %v301_v44  ;;  %v1375_v49 = vunpack.c.l.s8.bf16 %v303_v45  ;;  %v1372_v52 = vunpack.c.l.s8.bf16 %v300_v50  ;;  %v333_v4 = vld [vmem:[%s7088_s22 + $0x288] sm:$0xff]  ;;  %v335_v5 = vld [vmem:[%s7088_s22 + $0x298] sm:$0xff]  ;;  %v332_v10 = vld [vmem:[%s7088_s22 + $0x280] sm:$0xff] }
  0x77   : > { %3391 = vmatpush1.bf16.msra.mxu0 %v1292_v20  ;;  %3719 = vmatpush1.bf16.msra.mxu1 %v1294_v21  ;;  %v1374_v53 = vunpack.c.l.s8.bf16 %v302_v51  ;;  %v1389_v54 = vunpack.c.h.s8.bf16 %v301_v44  ;;  %v1391_v55 = vunpack.c.h.s8.bf16 %v303_v45  ;;  %v1388_v58 = vunpack.c.h.s8.bf16 %v300_v50  ;;  %v334_v11 = vld [vmem:[%s7088_s22 + $0x290] sm:$0xff]  ;;  %v349_v16 = vld [vmem:[%s7088_s22 + $0x308] sm:$0xff]  ;;  %v351_v17 = vld [vmem:[%s7088_s22 + $0x318] sm:$0xff] }
  0x78   : > { %3392 = vmatprep.subr.bf16.mxu0 %v1309_v22  ;;  %3720 = vmatprep.subr.bf16.mxu1 %v1311_v23  ;;  %v1390_v59 = vunpack.c.h.s8.bf16 %v302_v51  ;;  %v1405_v60 = vunpack.c.l.s8.bf16 %v317_v56  ;;  %v1407_v61 = vunpack.c.l.s8.bf16 %v319_v57  ;;  %v1404_v0 = vunpack.c.l.s8.bf16 %v316_v62  ;;  %v348_v22 = vld [vmem:[%s7088_s22 + $0x300] sm:$0xff]  ;;  %v350_v23 = vld [vmem:[%s7088_s22 + $0x310] sm:$0xff]  ;;  %v7172_v51 = vld [vmem:[#allocation2 + $0x8] sm:$0xff] }
  0x79   : > { %3420 = vmatprep.mubr.bf16.mxu0 %v7140_v43  ;;  %3748 = vmatprep.mubr.bf16.mxu1 %v7140_v43  ;;  %v1406_v1 = vunpack.c.l.s8.bf16 %v318_v63  ;;  %v1421_v2 = vunpack.c.h.s8.bf16 %v317_v56  ;;  %v1423_v3 = vunpack.c.h.s8.bf16 %v319_v57  ;;  %v1420_v6 = vunpack.c.h.s8.bf16 %v316_v62  ;;  %v397_v56 = vld [vmem:[%s7088_s22 + $0x488] sm:$0xff]  ;;  %v399_v57 = vld [vmem:[%s7088_s22 + $0x498] sm:$0xff]  ;;  %v396_v62 = vld [vmem:[%s7088_s22 + $0x480] sm:$0xff] }
  0x7a   : > { %v1422_v7 = vunpack.c.h.s8.bf16 %v318_v63  ;;  %v1437_v8 = vunpack.c.l.s8.bf16 %v333_v4  ;;  %v1439_v9 = vunpack.c.l.s8.bf16 %v335_v5  ;;  %v1436_v12 = vunpack.c.l.s8.bf16 %v332_v10  ;;  %v398_v63 = vld [vmem:[%s7088_s22 + $0x490] sm:$0xff] }
  0x7b   : > { %3393 = vmatpush1.bf16.msra.mxu0 %v1308_v26  ;;  %3721 = vmatpush1.bf16.msra.mxu1 %v1310_v27  ;;  %v1438_v13 = vunpack.c.l.s8.bf16 %v334_v11  ;;  %v1453_v14 = vunpack.c.h.s8.bf16 %v333_v4  ;;  %v1455_v15 = vunpack.c.h.s8.bf16 %v335_v5  ;;  %v1452_v18 = vunpack.c.h.s8.bf16 %v332_v10  ;;  %v413_v4 = vld [vmem:[%s7088_s22 + $0x508] sm:$0xff]  ;;  %v415_v5 = vld [vmem:[%s7088_s22 + $0x518] sm:$0xff]  ;;  %v412_v10 = vld [vmem:[%s7088_s22 + $0x500] sm:$0xff] }
  0x7c   : > { %3394 = vmatprep.subr.bf16.mxu0 %v1325_v28  ;;  %3722 = vmatprep.subr.bf16.mxu1 %v1327_v29  ;;  %v1454_v19 = vunpack.c.h.s8.bf16 %v334_v11  ;;  %v1469_v20 = vunpack.c.l.s8.bf16 %v349_v16  ;;  %v1471_v21 = vunpack.c.l.s8.bf16 %v351_v17  ;;  %v1468_v24 = vunpack.c.l.s8.bf16 %v348_v22  ;;  %v365_v28 = vld [vmem:[%s7088_s22 + $0x388] sm:$0xff]  ;;  %v367_v29 = vld [vmem:[%s7088_s22 + $0x398] sm:$0xff]  ;;  %v414_v11 = vld [vmem:[%s7088_s22 + $0x510] sm:$0xff] }
  0x7d   : > { %v1470_v25 = vunpack.c.l.s8.bf16 %v350_v23  ;;  %v1485_v26 = vunpack.c.h.s8.bf16 %v349_v16  ;;  %v1487_v27 = vunpack.c.h.s8.bf16 %v351_v17  ;;  %v1484_v30 = vunpack.c.h.s8.bf16 %v348_v22  ;;  %v429_v16 = vld [vmem:[%s7088_s22 + $0x588] sm:$0xff]  ;;  %v431_v17 = vld [vmem:[%s7088_s22 + $0x598] sm:$0xff]  ;;  %v428_v22 = vld [vmem:[%s7088_s22 + $0x580] sm:$0xff] }
  0x7e   : > { %v1486_v31 = vunpack.c.h.s8.bf16 %v350_v23  ;;  %v7170_v50 = vcombine.low %v7136_v38, %v7136_v38  ;;  %v430_v23 = vld [vmem:[%s7088_s22 + $0x590] sm:$0xff] }
  0x7f   : > { %3395 = vmatpush1.bf16.msra.mxu0 %v1324_v32  ;;  %3723 = vmatpush1.bf16.msra.mxu1 %v1326_v33  ;;  %v1501_v32 = vunpack.c.l.s8.bf16 %v365_v28  ;;  %v1503_v33 = vunpack.c.l.s8.bf16 %v367_v29 }
  0x80   : > { %3396 = vmatprep.subr.bf16.mxu0 %v1341_v34  ;;  %3724 = vmatprep.subr.bf16.mxu1 %v1343_v35  ;;  %v364_v34 = vld [vmem:[%s7088_s22 + $0x380] sm:$0xff]  ;;  %v366_v35 = vld [vmem:[%s7088_s22 + $0x390] sm:$0xff] }
  0x81   : > { %v1500_v36 = vunpack.c.l.s8.bf16 %v364_v34  ;;  %v1502_v37 = vunpack.c.l.s8.bf16 %v366_v35  ;;  %v1516_v44 = vunpack.c.h.s8.bf16 %v364_v34  ;;  %v1518_v45 = vunpack.c.h.s8.bf16 %v366_v35  ;;  %v444_v34 = vld [vmem:[%s7088_s22 + $0x600] sm:$0xff]  ;;  %v446_v35 = vld [vmem:[%s7088_s22 + $0x610] sm:$0xff] }
  0x83   : > { %3397 = vmatpush1.bf16.msra.mxu0 %v1340_v39  ;;  %3725 = vmatpush1.bf16.msra.mxu1 %v1342_v40  ;;  %v1517_v39 = vunpack.c.h.s8.bf16 %v365_v28  ;;  %v1519_v40 = vunpack.c.h.s8.bf16 %v367_v29  ;;  %v445_v28 = vld [vmem:[%s7088_s22 + $0x608] sm:$0xff]  ;;  %v447_v29 = vld [vmem:[%s7088_s22 + $0x618] sm:$0xff] }
  0x84   : > { %3398 = vmatprep.subr.bf16.mxu0 %v1357_v41  ;;  %3726 = vmatprep.subr.bf16.mxu1 %v1359_v42  ;;  %v381_v41 = vld [vmem:[%s7088_s22 + $0x408] sm:$0xff]  ;;  %v383_v42 = vld [vmem:[%s7088_s22 + $0x418] sm:$0xff] }
  0x87   : > { %3399 = vmatpush1.bf16.msra.mxu0 %v1356_v46  ;;  %3727 = vmatpush1.bf16.msra.mxu1 %v1358_v47  ;;  %v1533_v46 = vunpack.c.l.s8.bf16 %v381_v41  ;;  %v1535_v47 = vunpack.c.l.s8.bf16 %v383_v42 }
  0x88   : > { %3400 = vmatprep.subr.bf16.mxu0 %v1373_v48  ;;  %3728 = vmatprep.subr.bf16.mxu1 %v1375_v49  ;;  %v380_v48 = vld [vmem:[%s7088_s22 + $0x400] sm:$0xff]  ;;  %v382_v49 = vld [vmem:[%s7088_s22 + $0x410] sm:$0xff] }
  0x89   : > { %v1548_v38 = vunpack.c.h.s8.bf16 %v380_v48 }
  0x8b   : > { %3401 = vmatpush1.bf16.msra.mxu0 %v1372_v52  ;;  %3729 = vmatpush1.bf16.msra.mxu1 %v1374_v53  ;;  %v1532_v52 = vunpack.c.l.s8.bf16 %v380_v48  ;;  %v1534_v53 = vunpack.c.l.s8.bf16 %v382_v49  ;;  %v460_v48 = vld [vmem:[%s7088_s22 + $0x680] sm:$0xff] }
  0x8c   : > { %3402 = vmatprep.subr.bf16.mxu0 %v1389_v54  ;;  %3730 = vmatprep.subr.bf16.mxu1 %v1391_v55  ;;  %v1549_v54 = vunpack.c.h.s8.bf16 %v381_v41  ;;  %v1551_v55 = vunpack.c.h.s8.bf16 %v383_v42  ;;  %v461_v41 = vld [vmem:[%s7088_s22 + $0x688] sm:$0xff]  ;;  %v463_v42 = vld [vmem:[%s7088_s22 + $0x698] sm:$0xff] }
  0x8f   : > { %3403 = vmatpush1.bf16.msra.mxu0 %v1388_v58  ;;  %3731 = vmatpush1.bf16.msra.mxu1 %v1390_v59  ;;  %v7178_v58 = vcombine.high %v7172_v51, %v7172_v51  ;;  %v1550_v59 = vunpack.c.h.s8.bf16 %v382_v49  ;;  %v462_v49 = vld [vmem:[%s7088_s22 + $0x690] sm:$0xff] }
  0x90   : > { %3404 = vmatprep.subr.bf16.mxu0 %v1405_v60  ;;  %3732 = vmatprep.subr.bf16.mxu1 %v1407_v61  ;;  %v1565_v60 = vunpack.c.l.s8.bf16 %v397_v56  ;;  %v1567_v61 = vunpack.c.l.s8.bf16 %v399_v57 }
  0x93   : > { %3405 = vmatpush1.bf16.msra.mxu0 %v1404_v0  ;;  %3733 = vmatpush1.bf16.msra.mxu1 %v1406_v1  ;;  %v1564_v0 = vunpack.c.l.s8.bf16 %v396_v62  ;;  %v1566_v1 = vunpack.c.l.s8.bf16 %v398_v63 }
  0x94   : > { %3406 = vmatprep.subr.bf16.mxu0 %v1421_v2  ;;  %3734 = vmatprep.subr.bf16.mxu1 %v1423_v3  ;;  %v1581_v2 = vunpack.c.h.s8.bf16 %v397_v56  ;;  %v1583_v3 = vunpack.c.h.s8.bf16 %v399_v57  ;;  %v477_v56 = vld [vmem:[%s7088_s22 + $0x708] sm:$0xff]  ;;  %v479_v57 = vld [vmem:[%s7088_s22 + $0x718] sm:$0xff] }
  0x97   : > { %3407 = vmatpush1.bf16.msra.mxu0 %v1420_v6  ;;  %3735 = vmatpush1.bf16.msra.mxu1 %v1422_v7  ;;  %v1580_v6 = vunpack.c.h.s8.bf16 %v396_v62  ;;  %v1582_v7 = vunpack.c.h.s8.bf16 %v398_v63  ;;  %v476_v62 = vld [vmem:[%s7088_s22 + $0x700] sm:$0xff]  ;;  %v478_v63 = vld [vmem:[%s7088_s22 + $0x710] sm:$0xff] }
  0x98   : > { %3408 = vmatprep.subr.bf16.mxu0 %v1437_v8  ;;  %3736 = vmatprep.subr.bf16.mxu1 %v1439_v9  ;;  %v1597_v8 = vunpack.c.l.s8.bf16 %v413_v4  ;;  %v1599_v9 = vunpack.c.l.s8.bf16 %v415_v5 }
  0x9b   : > { %3409 = vmatpush1.bf16.msra.mxu0 %v1436_v12  ;;  %3737 = vmatpush1.bf16.msra.mxu1 %v1438_v13  ;;  %v1596_v12 = vunpack.c.l.s8.bf16 %v412_v10  ;;  %v1598_v13 = vunpack.c.l.s8.bf16 %v414_v11 }
  0x9c   : > { %3410 = vmatprep.subr.bf16.mxu0 %v1453_v14  ;;  %3738 = vmatprep.subr.bf16.mxu1 %v1455_v15  ;;  %v1613_v14 = vunpack.c.h.s8.bf16 %v413_v4  ;;  %v1615_v15 = vunpack.c.h.s8.bf16 %v415_v5  ;;  %v493_v4 = vld [vmem:[%s7088_s22 + $0x788] sm:$0xff]  ;;  %v495_v5 = vld [vmem:[%s7088_s22 + $0x798] sm:$0xff] }
  0x9f   : > { %3411 = vmatpush1.bf16.msra.mxu0 %v1452_v18  ;;  %3739 = vmatpush1.bf16.msra.mxu1 %v1454_v19  ;;  %v1612_v18 = vunpack.c.h.s8.bf16 %v412_v10  ;;  %v1614_v19 = vunpack.c.h.s8.bf16 %v414_v11  ;;  %v492_v10 = vld [vmem:[%s7088_s22 + $0x780] sm:$0xff]  ;;  %v494_v11 = vld [vmem:[%s7088_s22 + $0x790] sm:$0xff] }
  0xa0   : > { %3412 = vmatprep.subr.bf16.mxu0 %v1469_v20  ;;  %3740 = vmatprep.subr.bf16.mxu1 %v1471_v21  ;;  %v1629_v20 = vunpack.c.l.s8.bf16 %v429_v16  ;;  %v1631_v21 = vunpack.c.l.s8.bf16 %v431_v17 }
  0xa3   : > { %3413 = vmatpush1.bf16.msra.mxu0 %v1468_v24  ;;  %3741 = vmatpush1.bf16.msra.mxu1 %v1470_v25  ;;  %v1628_v24 = vunpack.c.l.s8.bf16 %v428_v22  ;;  %v1630_v25 = vunpack.c.l.s8.bf16 %v430_v23 }
  0xa4   : > { %3414 = vmatprep.subr.bf16.mxu0 %v1485_v26  ;;  %3742 = vmatprep.subr.bf16.mxu1 %v1487_v27  ;;  %v1645_v26 = vunpack.c.h.s8.bf16 %v429_v16  ;;  %v1647_v27 = vunpack.c.h.s8.bf16 %v431_v17  ;;  %v509_v16 = vld [vmem:[%s7088_s22 + $0x808] sm:$0xff]  ;;  %v511_v17 = vld [vmem:[%s7088_s22 + $0x818] sm:$0xff] }
  0xa7   : > { %3415 = vmatpush1.bf16.msra.mxu0 %v1484_v30  ;;  %3743 = vmatpush1.bf16.msra.mxu1 %v1486_v31  ;;  %v1644_v30 = vunpack.c.h.s8.bf16 %v428_v22  ;;  %v1646_v31 = vunpack.c.h.s8.bf16 %v430_v23  ;;  %v508_v22 = vld [vmem:[%s7088_s22 + $0x800] sm:$0xff]  ;;  %v510_v23 = vld [vmem:[%s7088_s22 + $0x810] sm:$0xff] }
  0xa8   : > { %3416 = vmatprep.subr.bf16.mxu0 %v1501_v32  ;;  %3744 = vmatprep.subr.bf16.mxu1 %v1503_v33  ;;  %v1661_v32 = vunpack.c.l.s8.bf16 %v445_v28  ;;  %v1663_v33 = vunpack.c.l.s8.bf16 %v447_v29 }
  0xab   : > { %3417 = vmatpush1.bf16.msra.mxu0 %v1500_v36  ;;  %3745 = vmatpush1.bf16.msra.mxu1 %v1502_v37  ;;  %v1660_v36 = vunpack.c.l.s8.bf16 %v444_v34  ;;  %v1662_v37 = vunpack.c.l.s8.bf16 %v446_v35 }
  0xac   : > { %3418 = vmatprep.subr.bf16.mxu0 %v1517_v39  ;;  %3746 = vmatprep.subr.bf16.mxu1 %v1519_v40  ;;  %v1677_v39 = vunpack.c.h.s8.bf16 %v445_v28  ;;  %v1679_v40 = vunpack.c.h.s8.bf16 %v447_v29  ;;  %v1805_v28 = vunpack.c.h.s8.bf16 %v509_v16  ;;  %v1807_v29 = vunpack.c.h.s8.bf16 %v511_v17 }
  0xaf   : > { %3419 = vmatpush1.bf16.msra.mxu0 %v1516_v44  ;;  %3747 = vmatpush1.bf16.msra.mxu1 %v1518_v45  ;;  %v1676_v44 = vunpack.c.h.s8.bf16 %v444_v34  ;;  %v1678_v45 = vunpack.c.h.s8.bf16 %v446_v35 }
  0xb0   : > { %3429 = vmatprep.subr.bf16.mxu0 %v1533_v46  ;;  %3757 = vmatprep.subr.bf16.mxu1 %v1535_v47  ;;  %v1693_v46 = vunpack.c.l.s8.bf16 %v461_v41  ;;  %v1695_v47 = vunpack.c.l.s8.bf16 %v463_v42 }
  0xb2   : > { %3421 = vmatmul.mubr.bf16.vlgmr.msra.gmra.mrb[0].mxu0 %v7170_v50  ;;  %3749 = vmatmul.mubr.bf16.vlgmr.msra.gmra.mrb[0].mxu1 %v7170_v50 }
  0xb3   : > { %3430 = vmatpush1.bf16.msra.mxu0 %v1532_v52  ;;  %3758 = vmatpush1.bf16.msra.mxu1 %v1534_v53  ;;  %v1692_v52 = vunpack.c.l.s8.bf16 %v460_v48  ;;  %v1694_v53 = vunpack.c.l.s8.bf16 %v462_v49 }
  0xb4   : > { %3431 = vmatprep.subr.bf16.mxu0 %v1549_v54  ;;  %3759 = vmatprep.subr.bf16.mxu1 %v1551_v55  ;;  %v1709_v54 = vunpack.c.h.s8.bf16 %v461_v41  ;;  %v1711_v55 = vunpack.c.h.s8.bf16 %v463_v42 }
  0xb5   : > { %3461 = vmatprep.mubr.bf16.mxu0 %v7178_v58  ;;  %3789 = vmatprep.mubr.bf16.mxu1 %v7178_v58 }
  0xb7   : > { %3432 = vmatpush1.bf16.msra.mxu0 %v1548_v38  ;;  %3760 = vmatpush1.bf16.msra.mxu1 %v1550_v59  ;;  %v1708_v38 = vunpack.c.h.s8.bf16 %v460_v48  ;;  %v1710_v59 = vunpack.c.h.s8.bf16 %v462_v49 }
  0xb8   : > { %3433 = vmatprep.subr.bf16.mxu0 %v1565_v60  ;;  %3761 = vmatprep.subr.bf16.mxu1 %v1567_v61  ;;  %v1725_v60 = vunpack.c.l.s8.bf16 %v477_v56  ;;  %v1727_v61 = vunpack.c.l.s8.bf16 %v479_v57 }
  0xbb   : > { %3434 = vmatpush1.bf16.msra.mxu0 %v1564_v0  ;;  %3762 = vmatpush1.bf16.msra.mxu1 %v1566_v1  ;;  %v1724_v0 = vunpack.c.l.s8.bf16 %v476_v62  ;;  %v1726_v1 = vunpack.c.l.s8.bf16 %v478_v63 }
  0xbc   : > { %3435 = vmatprep.subr.bf16.mxu0 %v1581_v2  ;;  %3763 = vmatprep.subr.bf16.mxu1 %v1583_v3  ;;  %v1741_v2 = vunpack.c.h.s8.bf16 %v477_v56  ;;  %v1743_v3 = vunpack.c.h.s8.bf16 %v479_v57 }
  0xbf   : > { %3436 = vmatpush1.bf16.msra.mxu0 %v1580_v6  ;;  %3764 = vmatpush1.bf16.msra.mxu1 %v1582_v7  ;;  %v1740_v6 = vunpack.c.h.s8.bf16 %v476_v62  ;;  %v1742_v7 = vunpack.c.h.s8.bf16 %v478_v63 }
  0xc0   : > { %3437 = vmatprep.subr.bf16.mxu0 %v1597_v8  ;;  %3765 = vmatprep.subr.bf16.mxu1 %v1599_v9  ;;  %v1757_v8 = vunpack.c.l.s8.bf16 %v493_v4  ;;  %v1759_v9 = vunpack.c.l.s8.bf16 %v495_v5 }
  0xc3   : > { %3438 = vmatpush1.bf16.msra.mxu0 %v1596_v12  ;;  %3766 = vmatpush1.bf16.msra.mxu1 %v1598_v13  ;;  %v1756_v12 = vunpack.c.l.s8.bf16 %v492_v10  ;;  %v1758_v13 = vunpack.c.l.s8.bf16 %v494_v11 }
  0xc4   : > { %3439 = vmatprep.subr.bf16.mxu0 %v1613_v14  ;;  %3767 = vmatprep.subr.bf16.mxu1 %v1615_v15  ;;  %v1773_v14 = vunpack.c.h.s8.bf16 %v493_v4  ;;  %v1775_v15 = vunpack.c.h.s8.bf16 %v495_v5 }
  0xc7   : > { %3440 = vmatpush1.bf16.msra.mxu0 %v1612_v18  ;;  %3768 = vmatpush1.bf16.msra.mxu1 %v1614_v19  ;;  %v1772_v18 = vunpack.c.h.s8.bf16 %v492_v10  ;;  %v1774_v19 = vunpack.c.h.s8.bf16 %v494_v11 }
  0xc8   : > { %3441 = vmatprep.subr.bf16.mxu0 %v1629_v20  ;;  %3769 = vmatprep.subr.bf16.mxu1 %v1631_v21  ;;  %v1789_v20 = vunpack.c.l.s8.bf16 %v509_v16  ;;  %v1791_v21 = vunpack.c.l.s8.bf16 %v511_v17 }
  0xcb   : > { %3442 = vmatpush1.bf16.msra.mxu0 %v1628_v24  ;;  %3770 = vmatpush1.bf16.msra.mxu1 %v1630_v25  ;;  %v7216_v24 = vcombine.low %v7172_v51, %v7172_v51  ;;  %v7218_v25 = vld [vmem:[#allocation2 + $0x10] sm:$0xff]  ;;  %v1804_v51 = vunpack.c.h.s8.bf16 %v508_v22 }
  0xcc   : > { %3443 = vmatprep.subr.bf16.mxu0 %v1645_v26  ;;  %3771 = vmatprep.subr.bf16.mxu1 %v1647_v27  ;;  %v1788_v26 = vunpack.c.l.s8.bf16 %v508_v22  ;;  %v1790_v27 = vunpack.c.l.s8.bf16 %v510_v23 }
  0xcf   : > { %3444 = vmatpush1.bf16.msra.mxu0 %v1644_v30  ;;  %3772 = vmatpush1.bf16.msra.mxu1 %v1646_v31  ;;  %v525_v30 = vld [vmem:[%s7088_s22 + $0x888] sm:$0xff]  ;;  %v527_v31 = vld [vmem:[%s7088_s22 + $0x898] sm:$0xff] }
  0xd0   : > { %3445 = vmatprep.subr.bf16.mxu0 %v1661_v32  ;;  %3773 = vmatprep.subr.bf16.mxu1 %v1663_v33  ;;  %v7224_v32 = vcombine.high %v7218_v25, %v7218_v25  ;;  %v1806_v33 = vunpack.c.h.s8.bf16 %v510_v23  ;;  %v1821_v34 = vunpack.c.l.s8.bf16 %v525_v30  ;;  %v1823_v35 = vunpack.c.l.s8.bf16 %v527_v31 }
  0xd1   : > { %v1837_v41 = vunpack.c.h.s8.bf16 %v525_v30  ;;  %v1839_v42 = vunpack.c.h.s8.bf16 %v527_v31 }
  0xd3   : > { %3446 = vmatpush1.bf16.msra.mxu0 %v1660_v36  ;;  %3774 = vmatpush1.bf16.msra.mxu1 %v1662_v37  ;;  %v524_v36 = vld [vmem:[%s7088_s22 + $0x880] sm:$0xff]  ;;  %v526_v37 = vld [vmem:[%s7088_s22 + $0x890] sm:$0xff] }
  0xd4   : > { %3447 = vmatprep.subr.bf16.mxu0 %v1677_v39  ;;  %3775 = vmatprep.subr.bf16.mxu1 %v1679_v40  ;;  %v1820_v39 = vunpack.c.l.s8.bf16 %v524_v36  ;;  %v1822_v40 = vunpack.c.l.s8.bf16 %v526_v37 }
  0xd7   : > { %3448 = vmatpush1.bf16.msra.mxu0 %v1676_v44  ;;  %3776 = vmatpush1.bf16.msra.mxu1 %v1678_v45  ;;  %v541_v44 = vld [vmem:[%s7088_s22 + $0x908] sm:$0xff]  ;;  %v543_v45 = vld [vmem:[%s7088_s22 + $0x918] sm:$0xff] }
  0xd8   : > { %3449 = vmatprep.subr.bf16.mxu0 %v1693_v46  ;;  %3777 = vmatprep.subr.bf16.mxu1 %v1695_v47  ;;  %v1836_v46 = vunpack.c.h.s8.bf16 %v524_v36  ;;  %v1838_v47 = vunpack.c.h.s8.bf16 %v526_v37  ;;  %v1853_v48 = vunpack.c.l.s8.bf16 %v541_v44  ;;  %v1855_v49 = vunpack.c.l.s8.bf16 %v543_v45 }
  0xd9   : > { %v1869_v56 = vunpack.c.h.s8.bf16 %v541_v44  ;;  %v1871_v57 = vunpack.c.h.s8.bf16 %v543_v45 }
  0xdb   : > { %3450 = vmatpush1.bf16.msra.mxu0 %v1692_v52  ;;  %3778 = vmatpush1.bf16.msra.mxu1 %v1694_v53  ;;  %v540_v52 = vld [vmem:[%s7088_s22 + $0x900] sm:$0xff]  ;;  %v542_v53 = vld [vmem:[%s7088_s22 + $0x910] sm:$0xff] }
  0xdc   : > { %3451 = vmatprep.subr.bf16.mxu0 %v1709_v54  ;;  %3779 = vmatprep.subr.bf16.mxu1 %v1711_v55  ;;  %v1852_v54 = vunpack.c.l.s8.bf16 %v540_v52  ;;  %v1854_v55 = vunpack.c.l.s8.bf16 %v542_v53 }
  0xdf   : > { %3452 = vmatpush1.bf16.msra.mxu0 %v1708_v38  ;;  %3780 = vmatpush1.bf16.msra.mxu1 %v1710_v59  ;;  %v557_v38 = vld [vmem:[%s7088_s22 + $0x988] sm:$0xff]  ;;  %v559_v59 = vld [vmem:[%s7088_s22 + $0x998] sm:$0xff] }
  0xe0   : > { %3453 = vmatprep.subr.bf16.mxu0 %v1725_v60  ;;  %3781 = vmatprep.subr.bf16.mxu1 %v1727_v61  ;;  %v1868_v60 = vunpack.c.h.s8.bf16 %v540_v52  ;;  %v1870_v61 = vunpack.c.h.s8.bf16 %v542_v53  ;;  %v1885_v62 = vunpack.c.l.s8.bf16 %v557_v38  ;;  %v1887_v63 = vunpack.c.l.s8.bf16 %v559_v59 }
  0xe1   : > { %v1901_v4 = vunpack.c.h.s8.bf16 %v557_v38  ;;  %v1903_v5 = vunpack.c.h.s8.bf16 %v559_v59 }
  0xe3   : > { %3454 = vmatpush1.bf16.msra.mxu0 %v1724_v0  ;;  %3782 = vmatpush1.bf16.msra.mxu1 %v1726_v1  ;;  %v556_v0 = vld [vmem:[%s7088_s22 + $0x980] sm:$0xff]  ;;  %v558_v1 = vld [vmem:[%s7088_s22 + $0x990] sm:$0xff] }
  0xe4   : > { %3455 = vmatprep.subr.bf16.mxu0 %v1741_v2  ;;  %3783 = vmatprep.subr.bf16.mxu1 %v1743_v3  ;;  %v1884_v2 = vunpack.c.l.s8.bf16 %v556_v0  ;;  %v1886_v3 = vunpack.c.l.s8.bf16 %v558_v1 }
  0xe7   : > { %3456 = vmatpush1.bf16.msra.mxu0 %v1740_v6  ;;  %3784 = vmatpush1.bf16.msra.mxu1 %v1742_v7  ;;  %v573_v6 = vld [vmem:[%s7088_s22 + $0xa08] sm:$0xff]  ;;  %v575_v7 = vld [vmem:[%s7088_s22 + $0xa18] sm:$0xff] }
  0xe8   : > { %3457 = vmatprep.subr.bf16.mxu0 %v1757_v8  ;;  %3785 = vmatprep.subr.bf16.mxu1 %v1759_v9  ;;  %v1900_v8 = vunpack.c.h.s8.bf16 %v556_v0  ;;  %v1902_v9 = vunpack.c.h.s8.bf16 %v558_v1  ;;  %v1917_v10 = vunpack.c.l.s8.bf16 %v573_v6  ;;  %v1919_v11 = vunpack.c.l.s8.bf16 %v575_v7 }
  0xe9   : > { %v1933_v16 = vunpack.c.h.s8.bf16 %v573_v6  ;;  %v1935_v17 = vunpack.c.h.s8.bf16 %v575_v7 }
  0xeb   : > { %3458 = vmatpush1.bf16.msra.mxu0 %v1756_v12  ;;  %3786 = vmatpush1.bf16.msra.mxu1 %v1758_v13  ;;  %v572_v12 = vld [vmem:[%s7088_s22 + $0xa00] sm:$0xff]  ;;  %v574_v13 = vld [vmem:[%s7088_s22 + $0xa10] sm:$0xff] }
  0xec   : > { %3459 = vmatprep.subr.bf16.mxu0 %v1773_v14  ;;  %3787 = vmatprep.subr.bf16.mxu1 %v1775_v15  ;;  %v1916_v14 = vunpack.c.l.s8.bf16 %v572_v12  ;;  %v1918_v15 = vunpack.c.l.s8.bf16 %v574_v13 }
  0xef   : > { %3460 = vmatpush1.bf16.msra.mxu0 %v1772_v18  ;;  %3788 = vmatpush1.bf16.msra.mxu1 %v1774_v19  ;;  %v589_v18 = vld [vmem:[%s7088_s22 + $0xa88] sm:$0xff]  ;;  %v591_v19 = vld [vmem:[%s7088_s22 + $0xa98] sm:$0xff] }
  0xf0   : > { %3470 = vmatprep.subr.bf16.mxu0 %v1789_v20  ;;  %3798 = vmatprep.subr.bf16.mxu1 %v1791_v21  ;;  %v1932_v20 = vunpack.c.h.s8.bf16 %v572_v12  ;;  %v1934_v21 = vunpack.c.h.s8.bf16 %v574_v13  ;;  %v1949_v22 = vunpack.c.l.s8.bf16 %v589_v18  ;;  %v1951_v23 = vunpack.c.l.s8.bf16 %v591_v19 }
  0xf1   : > { %v1965_v30 = vunpack.c.h.s8.bf16 %v589_v18  ;;  %v1967_v31 = vunpack.c.h.s8.bf16 %v591_v19 }
  0xf2   : > { %3462 = vmatmul.mubr.bf16.vlgmr.msra.gmra.mrb[0].mxu0 %v7216_v24  ;;  %3790 = vmatmul.mubr.bf16.vlgmr.msra.gmra.mrb[0].mxu1 %v7216_v24 }
  0xf3   : > { %3471 = vmatpush1.bf16.msra.mxu0 %v1788_v26  ;;  %3799 = vmatpush1.bf16.msra.mxu1 %v1790_v27  ;;  %v588_v26 = vld [vmem:[%s7088_s22 + $0xa80] sm:$0xff]  ;;  %v590_v27 = vld [vmem:[%s7088_s22 + $0xa90] sm:$0xff] }
  0xf4   : > { %3472 = vmatprep.subr.bf16.mxu0 %v1805_v28  ;;  %3800 = vmatprep.subr.bf16.mxu1 %v1807_v29  ;;  %v1948_v28 = vunpack.c.l.s8.bf16 %v588_v26  ;;  %v1950_v29 = vunpack.c.l.s8.bf16 %v590_v27 }
  0xf5   : > { %3502 = vmatprep.mubr.bf16.mxu0 %v7224_v32  ;;  %3830 = vmatprep.mubr.bf16.mxu1 %v7224_v32 }
  0xf7   : > { %3473 = vmatpush1.bf16.msra.mxu0 %v1804_v51  ;;  %3801 = vmatpush1.bf16.msra.mxu1 %v1806_v33  ;;  %v605_v51 = vld [vmem:[%s7088_s22 + $0xb08] sm:$0xff]  ;;  %v607_v33 = vld [vmem:[%s7088_s22 + $0xb18] sm:$0xff] }
  0xf8   : > { %3474 = vmatprep.subr.bf16.mxu0 %v1821_v34  ;;  %3802 = vmatprep.subr.bf16.mxu1 %v1823_v35  ;;  %v1964_v34 = vunpack.c.h.s8.bf16 %v588_v26  ;;  %v1966_v35 = vunpack.c.h.s8.bf16 %v590_v27  ;;  %v1981_v36 = vunpack.c.l.s8.bf16 %v605_v51  ;;  %v1983_v37 = vunpack.c.l.s8.bf16 %v607_v33 }
  0xf9   : > { %v1997_v44 = vunpack.c.h.s8.bf16 %v605_v51  ;;  %v1999_v45 = vunpack.c.h.s8.bf16 %v607_v33 }
  0xfb   : > { %3475 = vmatpush1.bf16.msra.mxu0 %v1820_v39  ;;  %3803 = vmatpush1.bf16.msra.mxu1 %v1822_v40  ;;  %v604_v39 = vld [vmem:[%s7088_s22 + $0xb00] sm:$0xff]  ;;  %v606_v40 = vld [vmem:[%s7088_s22 + $0xb10] sm:$0xff] }
  0xfc   : > { %3476 = vmatprep.subr.bf16.mxu0 %v1837_v41  ;;  %3804 = vmatprep.subr.bf16.mxu1 %v1839_v42  ;;  %v1980_v41 = vunpack.c.l.s8.bf16 %v604_v39  ;;  %v1982_v42 = vunpack.c.l.s8.bf16 %v606_v40 }
  0xff   : > { %3477 = vmatpush1.bf16.msra.mxu0 %v1836_v46  ;;  %3805 = vmatpush1.bf16.msra.mxu1 %v1838_v47  ;;  %v621_v46 = vld [vmem:[%s7088_s22 + $0xb88] sm:$0xff]  ;;  %v623_v47 = vld [vmem:[%s7088_s22 + $0xb98] sm:$0xff] }
 0x100   : > { %3478 = vmatprep.subr.bf16.mxu0 %v1853_v48  ;;  %3806 = vmatprep.subr.bf16.mxu1 %v1855_v49  ;;  %v1996_v48 = vunpack.c.h.s8.bf16 %v604_v39  ;;  %v1998_v49 = vunpack.c.h.s8.bf16 %v606_v40  ;;  %v2013_v52 = vunpack.c.l.s8.bf16 %v621_v46  ;;  %v2015_v53 = vunpack.c.l.s8.bf16 %v623_v47 }
 0x101   : > { %v2029_v38 = vunpack.c.h.s8.bf16 %v621_v46  ;;  %v2031_v59 = vunpack.c.h.s8.bf16 %v623_v47 }
 0x103   : > { %3479 = vmatpush1.bf16.msra.mxu0 %v1852_v54  ;;  %3807 = vmatpush1.bf16.msra.mxu1 %v1854_v55  ;;  %v620_v54 = vld [vmem:[%s7088_s22 + $0xb80] sm:$0xff]  ;;  %v622_v55 = vld [vmem:[%s7088_s22 + $0xb90] sm:$0xff] }
 0x104   : > { %3480 = vmatprep.subr.bf16.mxu0 %v1869_v56  ;;  %3808 = vmatprep.subr.bf16.mxu1 %v1871_v57  ;;  %v2012_v56 = vunpack.c.l.s8.bf16 %v620_v54  ;;  %v2014_v57 = vunpack.c.l.s8.bf16 %v622_v55 }
 0x107   : > { %3481 = vmatpush1.bf16.msra.mxu0 %v1868_v60  ;;  %3809 = vmatpush1.bf16.msra.mxu1 %v1870_v61  ;;  %v637_v60 = vld [vmem:[%s7088_s22 + $0xc08] sm:$0xff]  ;;  %v639_v61 = vld [vmem:[%s7088_s22 + $0xc18] sm:$0xff] }
 0x108   : > { %3482 = vmatprep.subr.bf16.mxu0 %v1885_v62  ;;  %3810 = vmatprep.subr.bf16.mxu1 %v1887_v63  ;;  %v2028_v62 = vunpack.c.h.s8.bf16 %v620_v54  ;;  %v2030_v63 = vunpack.c.h.s8.bf16 %v622_v55  ;;  %v2045_v0 = vunpack.c.l.s8.bf16 %v637_v60  ;;  %v2047_v1 = vunpack.c.l.s8.bf16 %v639_v61 }
 0x10b   : > { %3483 = vmatpush1.bf16.msra.mxu0 %v1884_v2  ;;  %3811 = vmatpush1.bf16.msra.mxu1 %v1886_v3  ;;  %v636_v2 = vld [vmem:[%s7088_s22 + $0xc00] sm:$0xff]  ;;  %v638_v3 = vld [vmem:[%s7088_s22 + $0xc10] sm:$0xff] }
 0x10c   : > { %3484 = vmatprep.subr.bf16.mxu0 %v1901_v4  ;;  %3812 = vmatprep.subr.bf16.mxu1 %v1903_v5  ;;  %v7262_v4 = vcombine.low %v7218_v25, %v7218_v25  ;;  %v7264_v5 = vld [vmem:[#allocation2 + $0x18] sm:$0xff]  ;;  %v2044_v6 = vunpack.c.l.s8.bf16 %v636_v2  ;;  %v2046_v7 = vunpack.c.l.s8.bf16 %v638_v3  ;;  %v2060_v25 = vunpack.c.h.s8.bf16 %v636_v2 }
 0x10d   : > { %v7270_v12 = vcombine.high %v7264_v5, %v7264_v5  ;;  %v2062_v13 = vunpack.c.h.s8.bf16 %v638_v3 }
 0x10f   : > { %3485 = vmatpush1.bf16.msra.mxu0 %v1900_v8  ;;  %3813 = vmatpush1.bf16.msra.mxu1 %v1902_v9  ;;  %v2061_v8 = vunpack.c.h.s8.bf16 %v637_v60  ;;  %v2063_v9 = vunpack.c.h.s8.bf16 %v639_v61 }
 0x110   : > { %3486 = vmatprep.subr.bf16.mxu0 %v1917_v10  ;;  %3814 = vmatprep.subr.bf16.mxu1 %v1919_v11  ;;  %v653_v10 = vld [vmem:[%s7088_s22 + $0xc88] sm:$0xff]  ;;  %v655_v11 = vld [vmem:[%s7088_s22 + $0xc98] sm:$0xff] }
 0x113   : > { %3487 = vmatpush1.bf16.msra.mxu0 %v1916_v14  ;;  %3815 = vmatpush1.bf16.msra.mxu1 %v1918_v15  ;;  %v2077_v14 = vunpack.c.l.s8.bf16 %v653_v10  ;;  %v2079_v15 = vunpack.c.l.s8.bf16 %v655_v11 }
 0x114   : > { %3488 = vmatprep.subr.bf16.mxu0 %v1933_v16  ;;  %3816 = vmatprep.subr.bf16.mxu1 %v1935_v17  ;;  %v652_v16 = vld [vmem:[%s7088_s22 + $0xc80] sm:$0xff]  ;;  %v654_v17 = vld [vmem:[%s7088_s22 + $0xc90] sm:$0xff] }
 0x115   : > { %v2076_v18 = vunpack.c.l.s8.bf16 %v652_v16  ;;  %v2078_v19 = vunpack.c.l.s8.bf16 %v654_v17  ;;  %v2092_v26 = vunpack.c.h.s8.bf16 %v652_v16  ;;  %v2094_v27 = vunpack.c.h.s8.bf16 %v654_v17 }
 0x117   : > { %3489 = vmatpush1.bf16.msra.mxu0 %v1932_v20  ;;  %3817 = vmatpush1.bf16.msra.mxu1 %v1934_v21  ;;  %v2093_v20 = vunpack.c.h.s8.bf16 %v653_v10  ;;  %v2095_v21 = vunpack.c.h.s8.bf16 %v655_v11 }
 0x118   : > { %3490 = vmatprep.subr.bf16.mxu0 %v1949_v22  ;;  %3818 = vmatprep.subr.bf16.mxu1 %v1951_v23  ;;  %v669_v22 = vld [vmem:[%s7088_s22 + $0xd08] sm:$0xff]  ;;  %v671_v23 = vld [vmem:[%s7088_s22 + $0xd18] sm:$0xff] }
 0x11b   : > { %3491 = vmatpush1.bf16.msra.mxu0 %v1948_v28  ;;  %3819 = vmatpush1.bf16.msra.mxu1 %v1950_v29  ;;  %v2109_v28 = vunpack.c.l.s8.bf16 %v669_v22  ;;  %v2111_v29 = vunpack.c.l.s8.bf16 %v671_v23 }
 0x11c   : > { %3492 = vmatprep.subr.bf16.mxu0 %v1965_v30  ;;  %3820 = vmatprep.subr.bf16.mxu1 %v1967_v31  ;;  %v668_v30 = vld [vmem:[%s7088_s22 + $0xd00] sm:$0xff]  ;;  %v670_v31 = vld [vmem:[%s7088_s22 + $0xd10] sm:$0xff] }
 0x11d   : > { %v2108_v51 = vunpack.c.l.s8.bf16 %v668_v30  ;;  %v2110_v33 = vunpack.c.l.s8.bf16 %v670_v31  ;;  %v2124_v39 = vunpack.c.h.s8.bf16 %v668_v30  ;;  %v2126_v40 = vunpack.c.h.s8.bf16 %v670_v31 }
 0x11f   : > { %3493 = vmatpush1.bf16.msra.mxu0 %v1964_v34  ;;  %3821 = vmatpush1.bf16.msra.mxu1 %v1966_v35  ;;  %v2125_v34 = vunpack.c.h.s8.bf16 %v669_v22  ;;  %v2127_v35 = vunpack.c.h.s8.bf16 %v671_v23 }
 0x120   : > { %3494 = vmatprep.subr.bf16.mxu0 %v1981_v36  ;;  %3822 = vmatprep.subr.bf16.mxu1 %v1983_v37  ;;  %v685_v36 = vld [vmem:[%s7088_s22 + $0xd88] sm:$0xff]  ;;  %v687_v37 = vld [vmem:[%s7088_s22 + $0xd98] sm:$0xff] }
 0x123   : > { %3495 = vmatpush1.bf16.msra.mxu0 %v1980_v41  ;;  %3823 = vmatpush1.bf16.msra.mxu1 %v1982_v42  ;;  %v2141_v41 = vunpack.c.l.s8.bf16 %v685_v36  ;;  %v2143_v42 = vunpack.c.l.s8.bf16 %v687_v37 }
 0x124   : > { %3496 = vmatprep.subr.bf16.mxu0 %v1997_v44  ;;  %3824 = vmatprep.subr.bf16.mxu1 %v1999_v45  ;;  %v684_v44 = vld [vmem:[%s7088_s22 + $0xd80] sm:$0xff]  ;;  %v686_v45 = vld [vmem:[%s7088_s22 + $0xd90] sm:$0xff] }
 0x125   : > { %v2140_v46 = vunpack.c.l.s8.bf16 %v684_v44  ;;  %v2142_v47 = vunpack.c.l.s8.bf16 %v686_v45  ;;  %v2156_v54 = vunpack.c.h.s8.bf16 %v684_v44  ;;  %v2158_v55 = vunpack.c.h.s8.bf16 %v686_v45 }
 0x127   : > { %3497 = vmatpush1.bf16.msra.mxu0 %v1996_v48  ;;  %3825 = vmatpush1.bf16.msra.mxu1 %v1998_v49  ;;  %v2157_v48 = vunpack.c.h.s8.bf16 %v685_v36  ;;  %v2159_v49 = vunpack.c.h.s8.bf16 %v687_v37 }
 0x128   : > { %3498 = vmatprep.subr.bf16.mxu0 %v2013_v52  ;;  %3826 = vmatprep.subr.bf16.mxu1 %v2015_v53  ;;  %v701_v52 = vld [vmem:[%s7088_s22 + $0xe08] sm:$0xff]  ;;  %v703_v53 = vld [vmem:[%s7088_s22 + $0xe18] sm:$0xff] }
 0x12b   : > { %3499 = vmatpush1.bf16.msra.mxu0 %v2012_v56  ;;  %3827 = vmatpush1.bf16.msra.mxu1 %v2014_v57  ;;  %v2173_v56 = vunpack.c.l.s8.bf16 %v701_v52  ;;  %v2175_v57 = vunpack.c.l.s8.bf16 %v703_v53 }
 0x12c   : > { %3500 = vmatprep.subr.bf16.mxu0 %v2029_v38  ;;  %3828 = vmatprep.subr.bf16.mxu1 %v2031_v59  ;;  %v700_v38 = vld [vmem:[%s7088_s22 + $0xe00] sm:$0xff]  ;;  %v702_v59 = vld [vmem:[%s7088_s22 + $0xe10] sm:$0xff] }
 0x12d   : > { %v2172_v60 = vunpack.c.l.s8.bf16 %v700_v38  ;;  %v2174_v61 = vunpack.c.l.s8.bf16 %v702_v59  ;;  %v2188_v2 = vunpack.c.h.s8.bf16 %v700_v38  ;;  %v2190_v3 = vunpack.c.h.s8.bf16 %v702_v59  ;;  %v781_v38 = vld [vmem:[%s7088_s22 + $0x1088] sm:$0xff]  ;;  %v783_v59 = vld [vmem:[%s7088_s22 + $0x1098] sm:$0xff] }
 0x12f   : > { %3501 = vmatpush1.bf16.msra.mxu0 %v2028_v62  ;;  %3829 = vmatpush1.bf16.msra.mxu1 %v2030_v63  ;;  %v2189_v62 = vunpack.c.h.s8.bf16 %v701_v52  ;;  %v2191_v63 = vunpack.c.h.s8.bf16 %v703_v53  ;;  %v7308_v52 = vcombine.low %v7264_v5, %v7264_v5  ;;  %v7310_v53 = vld [vmem:[#allocation2 + $0x20] sm:$0xff] }
 0x130   : > { %3511 = vmatprep.subr.bf16.mxu0 %v2045_v0  ;;  %3839 = vmatprep.subr.bf16.mxu1 %v2047_v1  ;;  %v717_v0 = vld [vmem:[%s7088_s22 + $0xe88] sm:$0xff]  ;;  %v719_v1 = vld [vmem:[%s7088_s22 + $0xe98] sm:$0xff] }
 0x132   : > { %3503 = vmatmul.mubr.bf16.vlgmr.msra.gmra.mrb[0].mxu0 %v7262_v4  ;;  %3831 = vmatmul.mubr.bf16.vlgmr.msra.gmra.mrb[0].mxu1 %v7262_v4 }
 0x133   : > { %3512 = vmatpush1.bf16.msra.mxu0 %v2044_v6  ;;  %3840 = vmatpush1.bf16.msra.mxu1 %v2046_v7  ;;  %v2205_v6 = vunpack.c.l.s8.bf16 %v717_v0  ;;  %v2207_v7 = vunpack.c.l.s8.bf16 %v719_v1 }
 0x134   : > { %3513 = vmatprep.subr.bf16.mxu0 %v2061_v8  ;;  %3841 = vmatprep.subr.bf16.mxu1 %v2063_v9  ;;  %v716_v8 = vld [vmem:[%s7088_s22 + $0xe80] sm:$0xff]  ;;  %v718_v9 = vld [vmem:[%s7088_s22 + $0xe90] sm:$0xff] }
 0x135   : > { %3543 = vmatprep.mubr.bf16.mxu0 %v7270_v12  ;;  %3871 = vmatprep.mubr.bf16.mxu1 %v7270_v12  ;;  %v2204_v10 = vunpack.c.l.s8.bf16 %v716_v8  ;;  %v2206_v11 = vunpack.c.l.s8.bf16 %v718_v9  ;;  %v2220_v16 = vunpack.c.h.s8.bf16 %v716_v8  ;;  %v2222_v17 = vunpack.c.h.s8.bf16 %v718_v9  ;;  %v797_v8 = vld [vmem:[%s7088_s22 + $0x1108] sm:$0xff]  ;;  %v799_v9 = vld [vmem:[%s7088_s22 + $0x1118] sm:$0xff] }
 0x137   : > { %3514 = vmatpush1.bf16.msra.mxu0 %v2060_v25  ;;  %3842 = vmatpush1.bf16.msra.mxu1 %v2062_v13  ;;  %v2221_v25 = vunpack.c.h.s8.bf16 %v717_v0  ;;  %v2223_v13 = vunpack.c.h.s8.bf16 %v719_v1  ;;  %v780_v0 = vld [vmem:[%s7088_s22 + $0x1080] sm:$0xff]  ;;  %v782_v1 = vld [vmem:[%s7088_s22 + $0x1090] sm:$0xff] }
 0x138   : > { %3515 = vmatprep.subr.bf16.mxu0 %v2077_v14  ;;  %3843 = vmatprep.subr.bf16.mxu1 %v2079_v15  ;;  %v733_v14 = vld [vmem:[%s7088_s22 + $0xf08] sm:$0xff]  ;;  %v735_v15 = vld [vmem:[%s7088_s22 + $0xf18] sm:$0xff] }
 0x13b   : > { %3516 = vmatpush1.bf16.msra.mxu0 %v2076_v18  ;;  %3844 = vmatpush1.bf16.msra.mxu1 %v2078_v19  ;;  %v2237_v18 = vunpack.c.l.s8.bf16 %v733_v14  ;;  %v2239_v19 = vunpack.c.l.s8.bf16 %v735_v15 }
 0x13c   : > { %3517 = vmatprep.subr.bf16.mxu0 %v2093_v20  ;;  %3845 = vmatprep.subr.bf16.mxu1 %v2095_v21  ;;  %v732_v20 = vld [vmem:[%s7088_s22 + $0xf00] sm:$0xff]  ;;  %v734_v21 = vld [vmem:[%s7088_s22 + $0xf10] sm:$0xff] }
 0x13d   : > { %v2236_v22 = vunpack.c.l.s8.bf16 %v732_v20  ;;  %v2238_v23 = vunpack.c.l.s8.bf16 %v734_v21  ;;  %v2252_v30 = vunpack.c.h.s8.bf16 %v732_v20  ;;  %v2254_v31 = vunpack.c.h.s8.bf16 %v734_v21  ;;  %v813_v20 = vld [vmem:[%s7088_s22 + $0x1188] sm:$0xff]  ;;  %v815_v21 = vld [vmem:[%s7088_s22 + $0x1198] sm:$0xff] }
 0x13f   : > { %3518 = vmatpush1.bf16.msra.mxu0 %v2092_v26  ;;  %3846 = vmatpush1.bf16.msra.mxu1 %v2094_v27  ;;  %v2253_v26 = vunpack.c.h.s8.bf16 %v733_v14  ;;  %v2255_v27 = vunpack.c.h.s8.bf16 %v735_v15  ;;  %v796_v14 = vld [vmem:[%s7088_s22 + $0x1100] sm:$0xff]  ;;  %v798_v15 = vld [vmem:[%s7088_s22 + $0x1110] sm:$0xff] }
 0x140   : > { %3519 = vmatprep.subr.bf16.mxu0 %v2109_v28  ;;  %3847 = vmatprep.subr.bf16.mxu1 %v2111_v29  ;;  %v749_v28 = vld [vmem:[%s7088_s22 + $0xf88] sm:$0xff]  ;;  %v751_v29 = vld [vmem:[%s7088_s22 + $0xf98] sm:$0xff] }
 0x143   : > { %3520 = vmatpush1.bf16.msra.mxu0 %v2108_v51  ;;  %3848 = vmatpush1.bf16.msra.mxu1 %v2110_v33  ;;  %v2269_v51 = vunpack.c.l.s8.bf16 %v749_v28  ;;  %v2271_v33 = vunpack.c.l.s8.bf16 %v751_v29 }
 0x144   : > { %3521 = vmatprep.subr.bf16.mxu0 %v2125_v34  ;;  %3849 = vmatprep.subr.bf16.mxu1 %v2127_v35  ;;  %v748_v34 = vld [vmem:[%s7088_s22 + $0xf80] sm:$0xff]  ;;  %v750_v35 = vld [vmem:[%s7088_s22 + $0xf90] sm:$0xff] }
 0x145   : > { %v2268_v36 = vunpack.c.l.s8.bf16 %v748_v34  ;;  %v2270_v37 = vunpack.c.l.s8.bf16 %v750_v35  ;;  %v2284_v44 = vunpack.c.h.s8.bf16 %v748_v34  ;;  %v2286_v45 = vunpack.c.h.s8.bf16 %v750_v35  ;;  %v829_v34 = vld [vmem:[%s7088_s22 + $0x1208] sm:$0xff]  ;;  %v831_v35 = vld [vmem:[%s7088_s22 + $0x1218] sm:$0xff] }
 0x147   : > { %3522 = vmatpush1.bf16.msra.mxu0 %v2124_v39  ;;  %3850 = vmatpush1.bf16.msra.mxu1 %v2126_v40  ;;  %v2285_v39 = vunpack.c.h.s8.bf16 %v749_v28  ;;  %v2287_v40 = vunpack.c.h.s8.bf16 %v751_v29  ;;  %v812_v28 = vld [vmem:[%s7088_s22 + $0x1180] sm:$0xff]  ;;  %v814_v29 = vld [vmem:[%s7088_s22 + $0x1190] sm:$0xff] }
 0x148   : > { %3523 = vmatprep.subr.bf16.mxu0 %v2141_v41  ;;  %3851 = vmatprep.subr.bf16.mxu1 %v2143_v42  ;;  %v765_v41 = vld [vmem:[%s7088_s22 + $0x1008] sm:$0xff]  ;;  %v767_v42 = vld [vmem:[%s7088_s22 + $0x1018] sm:$0xff] }
 0x14b   : > { %3524 = vmatpush1.bf16.msra.mxu0 %v2140_v46  ;;  %3852 = vmatpush1.bf16.msra.mxu1 %v2142_v47  ;;  %v2301_v46 = vunpack.c.l.s8.bf16 %v765_v41  ;;  %v2303_v47 = vunpack.c.l.s8.bf16 %v767_v42 }
 0x14c   : > { %3525 = vmatprep.subr.bf16.mxu0 %v2157_v48  ;;  %3853 = vmatprep.subr.bf16.mxu1 %v2159_v49  ;;  %v764_v48 = vld [vmem:[%s7088_s22 + $0x1000] sm:$0xff]  ;;  %v766_v49 = vld [vmem:[%s7088_s22 + $0x1010] sm:$0xff] }
 0x14d   : > { %v2316_v5 = vunpack.c.h.s8.bf16 %v764_v48 }
 0x14f   : > { %3526 = vmatpush1.bf16.msra.mxu0 %v2156_v54  ;;  %3854 = vmatpush1.bf16.msra.mxu1 %v2158_v55  ;;  %v2300_v54 = vunpack.c.l.s8.bf16 %v764_v48  ;;  %v2302_v55 = vunpack.c.l.s8.bf16 %v766_v49  ;;  %v845_v48 = vld [vmem:[%s7088_s22 + $0x1288] sm:$0xff] }
 0x150   : > { %3527 = vmatprep.subr.bf16.mxu0 %v2173_v56  ;;  %3855 = vmatprep.subr.bf16.mxu1 %v2175_v57  ;;  %v2317_v56 = vunpack.c.h.s8.bf16 %v765_v41  ;;  %v2319_v57 = vunpack.c.h.s8.bf16 %v767_v42  ;;  %v828_v41 = vld [vmem:[%s7088_s22 + $0x1200] sm:$0xff]  ;;  %v830_v42 = vld [vmem:[%s7088_s22 + $0x1210] sm:$0xff] }
 0x153   : > { %3528 = vmatpush1.bf16.msra.mxu0 %v2172_v60  ;;  %3856 = vmatpush1.bf16.msra.mxu1 %v2174_v61  ;;  %v7316_v60 = vcombine.high %v7310_v53, %v7310_v53  ;;  %v2318_v61 = vunpack.c.h.s8.bf16 %v766_v49  ;;  %v847_v49 = vld [vmem:[%s7088_s22 + $0x1298] sm:$0xff] }
 0x154   : > { %3529 = vmatprep.subr.bf16.mxu0 %v2189_v62  ;;  %3857 = vmatprep.subr.bf16.mxu1 %v2191_v63  ;;  %v2333_v62 = vunpack.c.l.s8.bf16 %v781_v38  ;;  %v2335_v63 = vunpack.c.l.s8.bf16 %v783_v59 }
 0x157   : > { %3530 = vmatpush1.bf16.msra.mxu0 %v2188_v2  ;;  %3858 = vmatpush1.bf16.msra.mxu1 %v2190_v3  ;;  %v2332_v2 = vunpack.c.l.s8.bf16 %v780_v0  ;;  %v2334_v3 = vunpack.c.l.s8.bf16 %v782_v1 }
 0x158   : > { %3531 = vmatprep.subr.bf16.mxu0 %v2205_v6  ;;  %3859 = vmatprep.subr.bf16.mxu1 %v2207_v7  ;;  %v2349_v6 = vunpack.c.h.s8.bf16 %v781_v38  ;;  %v2351_v7 = vunpack.c.h.s8.bf16 %v783_v59  ;;  %v844_v38 = vld [vmem:[%s7088_s22 + $0x1280] sm:$0xff]  ;;  %v846_v59 = vld [vmem:[%s7088_s22 + $0x1290] sm:$0xff] }
 0x15b   : > { %3532 = vmatpush1.bf16.msra.mxu0 %v2204_v10  ;;  %3860 = vmatpush1.bf16.msra.mxu1 %v2206_v11  ;;  %v2348_v10 = vunpack.c.h.s8.bf16 %v780_v0  ;;  %v2350_v11 = vunpack.c.h.s8.bf16 %v782_v1  ;;  %v861_v0 = vld [vmem:[%s7088_s22 + $0x1308] sm:$0xff]  ;;  %v863_v1 = vld [vmem:[%s7088_s22 + $0x1318] sm:$0xff] }
 0x15c   : > { %3533 = vmatprep.subr.bf16.mxu0 %v2221_v25  ;;  %3861 = vmatprep.subr.bf16.mxu1 %v2223_v13  ;;  %v2365_v25 = vunpack.c.l.s8.bf16 %v797_v8  ;;  %v2367_v13 = vunpack.c.l.s8.bf16 %v799_v9 }
 0x15f   : > { %3534 = vmatpush1.bf16.msra.mxu0 %v2220_v16  ;;  %3862 = vmatpush1.bf16.msra.mxu1 %v2222_v17  ;;  %v2364_v16 = vunpack.c.l.s8.bf16 %v796_v14  ;;  %v2366_v17 = vunpack.c.l.s8.bf16 %v798_v15 }
 0x160   : > { %3535 = vmatprep.subr.bf16.mxu0 %v2237_v18  ;;  %3863 = vmatprep.subr.bf16.mxu1 %v2239_v19  ;;  %v2381_v18 = vunpack.c.h.s8.bf16 %v797_v8  ;;  %v2383_v19 = vunpack.c.h.s8.bf16 %v799_v9  ;;  %v860_v8 = vld [vmem:[%s7088_s22 + $0x1300] sm:$0xff]  ;;  %v862_v9 = vld [vmem:[%s7088_s22 + $0x1310] sm:$0xff] }
 0x163   : > { %3536 = vmatpush1.bf16.msra.mxu0 %v2236_v22  ;;  %3864 = vmatpush1.bf16.msra.mxu1 %v2238_v23  ;;  %v2380_v22 = vunpack.c.h.s8.bf16 %v796_v14  ;;  %v2382_v23 = vunpack.c.h.s8.bf16 %v798_v15  ;;  %v877_v14 = vld [vmem:[%s7088_s22 + $0x1388] sm:$0xff]  ;;  %v879_v15 = vld [vmem:[%s7088_s22 + $0x1398] sm:$0xff] }
 0x164   : > { %3537 = vmatprep.subr.bf16.mxu0 %v2253_v26  ;;  %3865 = vmatprep.subr.bf16.mxu1 %v2255_v27  ;;  %v2397_v26 = vunpack.c.l.s8.bf16 %v813_v20  ;;  %v2399_v27 = vunpack.c.l.s8.bf16 %v815_v21 }
 0x167   : > { %3538 = vmatpush1.bf16.msra.mxu0 %v2252_v30  ;;  %3866 = vmatpush1.bf16.msra.mxu1 %v2254_v31  ;;  %v2396_v30 = vunpack.c.l.s8.bf16 %v812_v28  ;;  %v2398_v31 = vunpack.c.l.s8.bf16 %v814_v29 }
 0x168   : > { %3539 = vmatprep.subr.bf16.mxu0 %v2269_v51  ;;  %3867 = vmatprep.subr.bf16.mxu1 %v2271_v33  ;;  %v2413_v51 = vunpack.c.h.s8.bf16 %v813_v20  ;;  %v2415_v33 = vunpack.c.h.s8.bf16 %v815_v21  ;;  %v876_v20 = vld [vmem:[%s7088_s22 + $0x1380] sm:$0xff]  ;;  %v878_v21 = vld [vmem:[%s7088_s22 + $0x1390] sm:$0xff] }
 0x16b   : > { %3540 = vmatpush1.bf16.msra.mxu0 %v2268_v36  ;;  %3868 = vmatpush1.bf16.msra.mxu1 %v2270_v37  ;;  %v2412_v36 = vunpack.c.h.s8.bf16 %v812_v28  ;;  %v2414_v37 = vunpack.c.h.s8.bf16 %v814_v29  ;;  %v893_v28 = vld [vmem:[%s7088_s22 + $0x1408] sm:$0xff]  ;;  %v895_v29 = vld [vmem:[%s7088_s22 + $0x1418] sm:$0xff] }
 0x16c   : > { %3541 = vmatprep.subr.bf16.mxu0 %v2285_v39  ;;  %3869 = vmatprep.subr.bf16.mxu1 %v2287_v40  ;;  %v2429_v39 = vunpack.c.l.s8.bf16 %v829_v34  ;;  %v2431_v40 = vunpack.c.l.s8.bf16 %v831_v35 }
 0x16f   : > { %3542 = vmatpush1.bf16.msra.mxu0 %v2284_v44  ;;  %3870 = vmatpush1.bf16.msra.mxu1 %v2286_v45  ;;  %v2428_v44 = vunpack.c.l.s8.bf16 %v828_v41  ;;  %v2430_v45 = vunpack.c.l.s8.bf16 %v830_v42 }
 0x170   : > { %3552 = vmatprep.subr.bf16.mxu0 %v2301_v46  ;;  %3880 = vmatprep.subr.bf16.mxu1 %v2303_v47  ;;  %v2445_v46 = vunpack.c.h.s8.bf16 %v829_v34  ;;  %v2447_v47 = vunpack.c.h.s8.bf16 %v831_v35  ;;  %v892_v34 = vld [vmem:[%s7088_s22 + $0x1400] sm:$0xff]  ;;  %v894_v35 = vld [vmem:[%s7088_s22 + $0x1410] sm:$0xff] }
 0x172   : > { %3544 = vmatmul.mubr.bf16.vlgmr.msra.gmra.mrb[0].mxu0 %v7308_v52  ;;  %3872 = vmatmul.mubr.bf16.vlgmr.msra.gmra.mrb[0].mxu1 %v7308_v52 }
 0x173   : > { %3553 = vmatpush1.bf16.msra.mxu0 %v2300_v54  ;;  %3881 = vmatpush1.bf16.msra.mxu1 %v2302_v55  ;;  %v2444_v54 = vunpack.c.h.s8.bf16 %v828_v41  ;;  %v2446_v55 = vunpack.c.h.s8.bf16 %v830_v42  ;;  %v2573_v41 = vunpack.c.h.s8.bf16 %v893_v28  ;;  %v2575_v42 = vunpack.c.h.s8.bf16 %v895_v29 }
 0x174   : > { %3554 = vmatprep.subr.bf16.mxu0 %v2317_v56  ;;  %3882 = vmatprep.subr.bf16.mxu1 %v2319_v57  ;;  %v2461_v56 = vunpack.c.l.s8.bf16 %v845_v48  ;;  %v2463_v57 = vunpack.c.l.s8.bf16 %v847_v49 }
 0x175   : > { %3584 = vmatprep.mubr.bf16.mxu0 %v7316_v60  ;;  %3912 = vmatprep.mubr.bf16.mxu1 %v7316_v60 }
 0x177   : > { %3555 = vmatpush1.bf16.msra.mxu0 %v2316_v5  ;;  %3883 = vmatpush1.bf16.msra.mxu1 %v2318_v61  ;;  %v2460_v5 = vunpack.c.l.s8.bf16 %v844_v38  ;;  %v2462_v61 = vunpack.c.l.s8.bf16 %v846_v59 }
 0x178   : > { %3556 = vmatprep.subr.bf16.mxu0 %v2333_v62  ;;  %3884 = vmatprep.subr.bf16.mxu1 %v2335_v63  ;;  %v2477_v62 = vunpack.c.h.s8.bf16 %v845_v48  ;;  %v2479_v63 = vunpack.c.h.s8.bf16 %v847_v49 }
 0x17b   : > { %3557 = vmatpush1.bf16.msra.mxu0 %v2332_v2  ;;  %3885 = vmatpush1.bf16.msra.mxu1 %v2334_v3  ;;  %v2476_v2 = vunpack.c.h.s8.bf16 %v844_v38  ;;  %v2478_v3 = vunpack.c.h.s8.bf16 %v846_v59 }
 0x17c   : > { %3558 = vmatprep.subr.bf16.mxu0 %v2349_v6  ;;  %3886 = vmatprep.subr.bf16.mxu1 %v2351_v7  ;;  %v2493_v6 = vunpack.c.l.s8.bf16 %v861_v0  ;;  %v2495_v7 = vunpack.c.l.s8.bf16 %v863_v1 }
 0x17f   : > { %3559 = vmatpush1.bf16.msra.mxu0 %v2348_v10  ;;  %3887 = vmatpush1.bf16.msra.mxu1 %v2350_v11  ;;  %v2492_v10 = vunpack.c.l.s8.bf16 %v860_v8  ;;  %v2494_v11 = vunpack.c.l.s8.bf16 %v862_v9 }
 0x180   : > { %3560 = vmatprep.subr.bf16.mxu0 %v2365_v25  ;;  %3888 = vmatprep.subr.bf16.mxu1 %v2367_v13  ;;  %v2509_v25 = vunpack.c.h.s8.bf16 %v861_v0  ;;  %v2511_v13 = vunpack.c.h.s8.bf16 %v863_v1 }
 0x183   : > { %3561 = vmatpush1.bf16.msra.mxu0 %v2364_v16  ;;  %3889 = vmatpush1.bf16.msra.mxu1 %v2366_v17  ;;  %v2508_v16 = vunpack.c.h.s8.bf16 %v860_v8  ;;  %v2510_v17 = vunpack.c.h.s8.bf16 %v862_v9 }
 0x184   : > { %3562 = vmatprep.subr.bf16.mxu0 %v2381_v18  ;;  %3890 = vmatprep.subr.bf16.mxu1 %v2383_v19  ;;  %v2525_v18 = vunpack.c.l.s8.bf16 %v877_v14  ;;  %v2527_v19 = vunpack.c.l.s8.bf16 %v879_v15 }
 0x187   : > { %3563 = vmatpush1.bf16.msra.mxu0 %v2380_v22  ;;  %3891 = vmatpush1.bf16.msra.mxu1 %v2382_v23  ;;  %v2524_v22 = vunpack.c.l.s8.bf16 %v876_v20  ;;  %v2526_v23 = vunpack.c.l.s8.bf16 %v878_v21 }
 0x188   : > { %3564 = vmatprep.subr.bf16.mxu0 %v2397_v26  ;;  %3892 = vmatprep.subr.bf16.mxu1 %v2399_v27  ;;  %v2541_v26 = vunpack.c.h.s8.bf16 %v877_v14  ;;  %v2543_v27 = vunpack.c.h.s8.bf16 %v879_v15 }
 0x18b   : > { %3565 = vmatpush1.bf16.msra.mxu0 %v2396_v30  ;;  %3893 = vmatpush1.bf16.msra.mxu1 %v2398_v31  ;;  %v2540_v30 = vunpack.c.h.s8.bf16 %v876_v20  ;;  %v2542_v31 = vunpack.c.h.s8.bf16 %v878_v21 }
 0x18c   : > { %3566 = vmatprep.subr.bf16.mxu0 %v2413_v51  ;;  %3894 = vmatprep.subr.bf16.mxu1 %v2415_v33  ;;  %v2557_v51 = vunpack.c.l.s8.bf16 %v893_v28  ;;  %v2559_v33 = vunpack.c.l.s8.bf16 %v895_v29 }
 0x18f   : > { %3567 = vmatpush1.bf16.msra.mxu0 %v2412_v36  ;;  %3895 = vmatpush1.bf16.msra.mxu1 %v2414_v37  ;;  %v7354_v36 = vcombine.low %v7310_v53, %v7310_v53  ;;  %v7356_v37 = vld [vmem:[#allocation2 + $0x28] sm:$0xff]  ;;  %v2572_v53 = vunpack.c.h.s8.bf16 %v892_v34 }
 0x190   : > { %3568 = vmatprep.subr.bf16.mxu0 %v2429_v39  ;;  %3896 = vmatprep.subr.bf16.mxu1 %v2431_v40  ;;  %v2556_v39 = vunpack.c.l.s8.bf16 %v892_v34  ;;  %v2558_v40 = vunpack.c.l.s8.bf16 %v894_v35 }
 0x193   : > { %3569 = vmatpush1.bf16.msra.mxu0 %v2428_v44  ;;  %3897 = vmatpush1.bf16.msra.mxu1 %v2430_v45  ;;  %v909_v44 = vld [vmem:[%s7088_s22 + $0x1488] sm:$0xff]  ;;  %v911_v45 = vld [vmem:[%s7088_s22 + $0x1498] sm:$0xff] }
 0x194   : > { %3570 = vmatprep.subr.bf16.mxu0 %v2445_v46  ;;  %3898 = vmatprep.subr.bf16.mxu1 %v2447_v47  ;;  %v7362_v46 = vcombine.high %v7356_v37, %v7356_v37  ;;  %v2574_v47 = vunpack.c.h.s8.bf16 %v894_v35  ;;  %v2589_v48 = vunpack.c.l.s8.bf16 %v909_v44  ;;  %v2591_v49 = vunpack.c.l.s8.bf16 %v911_v45 }
 0x195   : > { %v2605_v38 = vunpack.c.h.s8.bf16 %v909_v44  ;;  %v2607_v59 = vunpack.c.h.s8.bf16 %v911_v45 }
 0x197   : > { %3571 = vmatpush1.bf16.msra.mxu0 %v2444_v54  ;;  %3899 = vmatpush1.bf16.msra.mxu1 %v2446_v55  ;;  %v908_v54 = vld [vmem:[%s7088_s22 + $0x1480] sm:$0xff]  ;;  %v910_v55 = vld [vmem:[%s7088_s22 + $0x1490] sm:$0xff] }
 0x198   : > { %3572 = vmatprep.subr.bf16.mxu0 %v2461_v56  ;;  %3900 = vmatprep.subr.bf16.mxu1 %v2463_v57  ;;  %v2588_v56 = vunpack.c.l.s8.bf16 %v908_v54  ;;  %v2590_v57 = vunpack.c.l.s8.bf16 %v910_v55 }
 0x19b   : > { %3573 = vmatpush1.bf16.msra.mxu0 %v2460_v5  ;;  %3901 = vmatpush1.bf16.msra.mxu1 %v2462_v61  ;;  %v925_v5 = vld [vmem:[%s7088_s22 + $0x1508] sm:$0xff]  ;;  %v927_v61 = vld [vmem:[%s7088_s22 + $0x1518] sm:$0xff] }
 0x19c   : > { %3574 = vmatprep.subr.bf16.mxu0 %v2477_v62  ;;  %3902 = vmatprep.subr.bf16.mxu1 %v2479_v63  ;;  %v2604_v62 = vunpack.c.h.s8.bf16 %v908_v54  ;;  %v2606_v63 = vunpack.c.h.s8.bf16 %v910_v55  ;;  %v2621_v0 = vunpack.c.l.s8.bf16 %v925_v5  ;;  %v2623_v1 = vunpack.c.l.s8.bf16 %v927_v61 }
 0x19d   : > { %v2637_v8 = vunpack.c.h.s8.bf16 %v925_v5  ;;  %v2639_v9 = vunpack.c.h.s8.bf16 %v927_v61 }
 0x19f   : > { %3575 = vmatpush1.bf16.msra.mxu0 %v2476_v2  ;;  %3903 = vmatpush1.bf16.msra.mxu1 %v2478_v3  ;;  %v924_v2 = vld [vmem:[%s7088_s22 + $0x1500] sm:$0xff]  ;;  %v926_v3 = vld [vmem:[%s7088_s22 + $0x1510] sm:$0xff] }
 0x1a0   : > { %3576 = vmatprep.subr.bf16.mxu0 %v2493_v6  ;;  %3904 = vmatprep.subr.bf16.mxu1 %v2495_v7  ;;  %v2620_v6 = vunpack.c.l.s8.bf16 %v924_v2  ;;  %v2622_v7 = vunpack.c.l.s8.bf16 %v926_v3 }
 0x1a3   : > { %3577 = vmatpush1.bf16.msra.mxu0 %v2492_v10  ;;  %3905 = vmatpush1.bf16.msra.mxu1 %v2494_v11  ;;  %v941_v10 = vld [vmem:[%s7088_s22 + $0x1588] sm:$0xff]  ;;  %v943_v11 = vld [vmem:[%s7088_s22 + $0x1598] sm:$0xff] }
 0x1a4   : > { %3578 = vmatprep.subr.bf16.mxu0 %v2509_v25  ;;  %3906 = vmatprep.subr.bf16.mxu1 %v2511_v13  ;;  %v2636_v25 = vunpack.c.h.s8.bf16 %v924_v2  ;;  %v2638_v13 = vunpack.c.h.s8.bf16 %v926_v3  ;;  %v2653_v14 = vunpack.c.l.s8.bf16 %v941_v10  ;;  %v2655_v15 = vunpack.c.l.s8.bf16 %v943_v11 }
 0x1a5   : > { %v2669_v20 = vunpack.c.h.s8.bf16 %v941_v10  ;;  %v2671_v21 = vunpack.c.h.s8.bf16 %v943_v11 }
 0x1a7   : > { %3579 = vmatpush1.bf16.msra.mxu0 %v2508_v16  ;;  %3907 = vmatpush1.bf16.msra.mxu1 %v2510_v17  ;;  %v940_v16 = vld [vmem:[%s7088_s22 + $0x1580] sm:$0xff]  ;;  %v942_v17 = vld [vmem:[%s7088_s22 + $0x1590] sm:$0xff] }
 0x1a8   : > { %3580 = vmatprep.subr.bf16.mxu0 %v2525_v18  ;;  %3908 = vmatprep.subr.bf16.mxu1 %v2527_v19  ;;  %v2652_v18 = vunpack.c.l.s8.bf16 %v940_v16  ;;  %v2654_v19 = vunpack.c.l.s8.bf16 %v942_v17 }
 0x1ab   : > { %3581 = vmatpush1.bf16.msra.mxu0 %v2524_v22  ;;  %3909 = vmatpush1.bf16.msra.mxu1 %v2526_v23  ;;  %v957_v22 = vld [vmem:[%s7088_s22 + $0x1608] sm:$0xff]  ;;  %v959_v23 = vld [vmem:[%s7088_s22 + $0x1618] sm:$0xff] }
 0x1ac   : > { %3582 = vmatprep.subr.bf16.mxu0 %v2541_v26  ;;  %3910 = vmatprep.subr.bf16.mxu1 %v2543_v27  ;;  %v2668_v26 = vunpack.c.h.s8.bf16 %v940_v16  ;;  %v2670_v27 = vunpack.c.h.s8.bf16 %v942_v17  ;;  %v2685_v28 = vunpack.c.l.s8.bf16 %v957_v22  ;;  %v2687_v29 = vunpack.c.l.s8.bf16 %v959_v23 }
 0x1ad   : > { %v2701_v34 = vunpack.c.h.s8.bf16 %v957_v22  ;;  %v2703_v35 = vunpack.c.h.s8.bf16 %v959_v23 }
 0x1af   : > { %3583 = vmatpush1.bf16.msra.mxu0 %v2540_v30  ;;  %3911 = vmatpush1.bf16.msra.mxu1 %v2542_v31  ;;  %v956_v30 = vld [vmem:[%s7088_s22 + $0x1600] sm:$0xff]  ;;  %v958_v31 = vld [vmem:[%s7088_s22 + $0x1610] sm:$0xff] }
 0x1b0   : > { %3593 = vmatprep.subr.bf16.mxu0 %v2557_v51  ;;  %3921 = vmatprep.subr.bf16.mxu1 %v2559_v33  ;;  %v2684_v51 = vunpack.c.l.s8.bf16 %v956_v30  ;;  %v2686_v33 = vunpack.c.l.s8.bf16 %v958_v31 }
 0x1b2   : > { %3585 = vmatmul.mubr.bf16.vlgmr.msra.gmra.mrb[0].mxu0 %v7354_v36  ;;  %3913 = vmatmul.mubr.bf16.vlgmr.msra.gmra.mrb[0].mxu1 %v7354_v36 }
 0x1b3   : > { %3594 = vmatpush1.bf16.msra.mxu0 %v2556_v39  ;;  %3922 = vmatpush1.bf16.msra.mxu1 %v2558_v40  ;;  %v973_v39 = vld [vmem:[%s7088_s22 + $0x1688] sm:$0xff]  ;;  %v975_v40 = vld [vmem:[%s7088_s22 + $0x1698] sm:$0xff] }
 0x1b4   : > { %3595 = vmatprep.subr.bf16.mxu0 %v2573_v41  ;;  %3923 = vmatprep.subr.bf16.mxu1 %v2575_v42  ;;  %v2700_v41 = vunpack.c.h.s8.bf16 %v956_v30  ;;  %v2702_v42 = vunpack.c.h.s8.bf16 %v958_v31  ;;  %v2717_v44 = vunpack.c.l.s8.bf16 %v973_v39  ;;  %v2719_v45 = vunpack.c.l.s8.bf16 %v975_v40 }
 0x1b5   : > { %3625 = vmatprep.mubr.bf16.mxu0 %v7362_v46  ;;  %3953 = vmatprep.mubr.bf16.mxu1 %v7362_v46  ;;  %v2733_v54 = vunpack.c.h.s8.bf16 %v973_v39  ;;  %v2735_v55 = vunpack.c.h.s8.bf16 %v975_v40 }
 0x1b7   : > { %3596 = vmatpush1.bf16.msra.mxu0 %v2572_v53  ;;  %3924 = vmatpush1.bf16.msra.mxu1 %v2574_v47  ;;  %v972_v53 = vld [vmem:[%s7088_s22 + $0x1680] sm:$0xff]  ;;  %v974_v47 = vld [vmem:[%s7088_s22 + $0x1690] sm:$0xff] }
 0x1b8   : > { %3597 = vmatprep.subr.bf16.mxu0 %v2589_v48  ;;  %3925 = vmatprep.subr.bf16.mxu1 %v2591_v49  ;;  %v2716_v48 = vunpack.c.l.s8.bf16 %v972_v53  ;;  %v2718_v49 = vunpack.c.l.s8.bf16 %v974_v47 }
 0x1bb   : > { %3598 = vmatpush1.bf16.msra.mxu0 %v2588_v56  ;;  %3926 = vmatpush1.bf16.msra.mxu1 %v2590_v57  ;;  %v989_v56 = vld [vmem:[%s7088_s22 + $0x1708] sm:$0xff]  ;;  %v991_v57 = vld [vmem:[%s7088_s22 + $0x1718] sm:$0xff] }
 0x1bc   : > { %3599 = vmatprep.subr.bf16.mxu0 %v2605_v38  ;;  %3927 = vmatprep.subr.bf16.mxu1 %v2607_v59  ;;  %v2732_v38 = vunpack.c.h.s8.bf16 %v972_v53  ;;  %v2734_v59 = vunpack.c.h.s8.bf16 %v974_v47  ;;  %v2749_v5 = vunpack.c.l.s8.bf16 %v989_v56  ;;  %v2751_v61 = vunpack.c.l.s8.bf16 %v991_v57 }
 0x1bd   : > { %v2765_v2 = vunpack.c.h.s8.bf16 %v989_v56  ;;  %v2767_v3 = vunpack.c.h.s8.bf16 %v991_v57 }
 0x1bf   : > { %3600 = vmatpush1.bf16.msra.mxu0 %v2604_v62  ;;  %3928 = vmatpush1.bf16.msra.mxu1 %v2606_v63  ;;  %v988_v62 = vld [vmem:[%s7088_s22 + $0x1700] sm:$0xff]  ;;  %v990_v63 = vld [vmem:[%s7088_s22 + $0x1710] sm:$0xff] }
 0x1c0   : > { %3601 = vmatprep.subr.bf16.mxu0 %v2621_v0  ;;  %3929 = vmatprep.subr.bf16.mxu1 %v2623_v1  ;;  %v2748_v0 = vunpack.c.l.s8.bf16 %v988_v62  ;;  %v2750_v1 = vunpack.c.l.s8.bf16 %v990_v63 }
 0x1c3   : > { %3602 = vmatpush1.bf16.msra.mxu0 %v2620_v6  ;;  %3930 = vmatpush1.bf16.msra.mxu1 %v2622_v7  ;;  %v1005_v6 = vld [vmem:[%s7088_s22 + $0x1788] sm:$0xff]  ;;  %v1007_v7 = vld [vmem:[%s7088_s22 + $0x1798] sm:$0xff] }
 0x1c4   : > { %3603 = vmatprep.subr.bf16.mxu0 %v2637_v8  ;;  %3931 = vmatprep.subr.bf16.mxu1 %v2639_v9  ;;  %v2764_v8 = vunpack.c.h.s8.bf16 %v988_v62  ;;  %v2766_v9 = vunpack.c.h.s8.bf16 %v990_v63  ;;  %v2781_v10 = vunpack.c.l.s8.bf16 %v1005_v6  ;;  %v2783_v11 = vunpack.c.l.s8.bf16 %v1007_v7 }
 0x1c5   : > { %v2797_v16 = vunpack.c.h.s8.bf16 %v1005_v6  ;;  %v2799_v17 = vunpack.c.h.s8.bf16 %v1007_v7 }
 0x1c7   : > { %3604 = vmatpush1.bf16.msra.mxu0 %v2636_v25  ;;  %3932 = vmatpush1.bf16.msra.mxu1 %v2638_v13  ;;  %v1004_v25 = vld [vmem:[%s7088_s22 + $0x1780] sm:$0xff]  ;;  %v1006_v13 = vld [vmem:[%s7088_s22 + $0x1790] sm:$0xff] }
 0x1c8   : > { %3605 = vmatprep.subr.bf16.mxu0 %v2653_v14  ;;  %3933 = vmatprep.subr.bf16.mxu1 %v2655_v15  ;;  %v2780_v14 = vunpack.c.l.s8.bf16 %v1004_v25  ;;  %v2782_v15 = vunpack.c.l.s8.bf16 %v1006_v13 }
 0x1cb   : > { %3606 = vmatpush1.bf16.msra.mxu0 %v2652_v18  ;;  %3934 = vmatpush1.bf16.msra.mxu1 %v2654_v19  ;;  %v1021_v18 = vld [vmem:[%s7088_s22 + $0x1808] sm:$0xff]  ;;  %v1023_v19 = vld [vmem:[%s7088_s22 + $0x1818] sm:$0xff] }
 0x1cc   : > { %3607 = vmatprep.subr.bf16.mxu0 %v2669_v20  ;;  %3935 = vmatprep.subr.bf16.mxu1 %v2671_v21  ;;  %v2796_v20 = vunpack.c.h.s8.bf16 %v1004_v25  ;;  %v2798_v21 = vunpack.c.h.s8.bf16 %v1006_v13  ;;  %v2813_v22 = vunpack.c.l.s8.bf16 %v1021_v18  ;;  %v2815_v23 = vunpack.c.l.s8.bf16 %v1023_v19 }
 0x1cf   : > { %3608 = vmatpush1.bf16.msra.mxu0 %v2668_v26  ;;  %3936 = vmatpush1.bf16.msra.mxu1 %v2670_v27  ;;  %v1020_v26 = vld [vmem:[%s7088_s22 + $0x1800] sm:$0xff]  ;;  %v1022_v27 = vld [vmem:[%s7088_s22 + $0x1810] sm:$0xff] }
 0x1d0   : > { %3609 = vmatprep.subr.bf16.mxu0 %v2685_v28  ;;  %3937 = vmatprep.subr.bf16.mxu1 %v2687_v29  ;;  %v7400_v28 = vcombine.low %v7356_v37, %v7356_v37  ;;  %v7402_v29 = vld [vmem:[#allocation2 + $0x30] sm:$0xff]  ;;  %v2812_v30 = vunpack.c.l.s8.bf16 %v1020_v26  ;;  %v2814_v31 = vunpack.c.l.s8.bf16 %v1022_v27  ;;  %v2828_v37 = vunpack.c.h.s8.bf16 %v1020_v26 }
 0x1d1   : > { %v7408_v39 = vcombine.high %v7402_v29, %v7402_v29  ;;  %v2830_v40 = vunpack.c.h.s8.bf16 %v1022_v27 }
 0x1d3   : > { %3610 = vmatpush1.bf16.msra.mxu0 %v2684_v51  ;;  %3938 = vmatpush1.bf16.msra.mxu1 %v2686_v33  ;;  %v2829_v51 = vunpack.c.h.s8.bf16 %v1021_v18  ;;  %v2831_v33 = vunpack.c.h.s8.bf16 %v1023_v19 }
 0x1d4   : > { %3611 = vmatprep.subr.bf16.mxu0 %v2701_v34  ;;  %3939 = vmatprep.subr.bf16.mxu1 %v2703_v35  ;;  %v1037_v34 = vld [vmem:[%s7088_s22 + $0x1888] sm:$0xff]  ;;  %v1039_v35 = vld [vmem:[%s7088_s22 + $0x1898] sm:$0xff] }
 0x1d7   : > { %3612 = vmatpush1.bf16.msra.mxu0 %v2700_v41  ;;  %3940 = vmatpush1.bf16.msra.mxu1 %v2702_v42  ;;  %v2845_v41 = vunpack.c.l.s8.bf16 %v1037_v34  ;;  %v2847_v42 = vunpack.c.l.s8.bf16 %v1039_v35 }
 0x1d8   : > { %3613 = vmatprep.subr.bf16.mxu0 %v2717_v44  ;;  %3941 = vmatprep.subr.bf16.mxu1 %v2719_v45  ;;  %v1036_v44 = vld [vmem:[%s7088_s22 + $0x1880] sm:$0xff]  ;;  %v1038_v45 = vld [vmem:[%s7088_s22 + $0x1890] sm:$0xff] }
 0x1d9   : > { %v2844_v53 = vunpack.c.l.s8.bf16 %v1036_v44  ;;  %v2846_v47 = vunpack.c.l.s8.bf16 %v1038_v45  ;;  %v2860_v56 = vunpack.c.h.s8.bf16 %v1036_v44  ;;  %v2862_v57 = vunpack.c.h.s8.bf16 %v1038_v45 }
 0x1db   : > { %3614 = vmatpush1.bf16.msra.mxu0 %v2716_v48  ;;  %3942 = vmatpush1.bf16.msra.mxu1 %v2718_v49  ;;  %v2861_v48 = vunpack.c.h.s8.bf16 %v1037_v34  ;;  %v2863_v49 = vunpack.c.h.s8.bf16 %v1039_v35 }
 0x1dc   : > { %3615 = vmatprep.subr.bf16.mxu0 %v2733_v54  ;;  %3943 = vmatprep.subr.bf16.mxu1 %v2735_v55  ;;  %v1053_v54 = vld [vmem:[%s7088_s22 + $0x1908] sm:$0xff]  ;;  %v1055_v55 = vld [vmem:[%s7088_s22 + $0x1918] sm:$0xff] }
 0x1df   : > { %3616 = vmatpush1.bf16.msra.mxu0 %v2732_v38  ;;  %3944 = vmatpush1.bf16.msra.mxu1 %v2734_v59  ;;  %v2877_v38 = vunpack.c.l.s8.bf16 %v1053_v54  ;;  %v2879_v59 = vunpack.c.l.s8.bf16 %v1055_v55 }
 0x1e0   : > { %3617 = vmatprep.subr.bf16.mxu0 %v2749_v5  ;;  %3945 = vmatprep.subr.bf16.mxu1 %v2751_v61  ;;  %v1052_v5 = vld [vmem:[%s7088_s22 + $0x1900] sm:$0xff]  ;;  %v1054_v61 = vld [vmem:[%s7088_s22 + $0x1910] sm:$0xff] }
 0x1e1   : > { %v2876_v62 = vunpack.c.l.s8.bf16 %v1052_v5  ;;  %v2878_v63 = vunpack.c.l.s8.bf16 %v1054_v61  ;;  %v2892_v6 = vunpack.c.h.s8.bf16 %v1052_v5  ;;  %v2894_v7 = vunpack.c.h.s8.bf16 %v1054_v61 }
 0x1e3   : > { %3618 = vmatpush1.bf16.msra.mxu0 %v2748_v0  ;;  %3946 = vmatpush1.bf16.msra.mxu1 %v2750_v1  ;;  %v2893_v0 = vunpack.c.h.s8.bf16 %v1053_v54  ;;  %v2895_v1 = vunpack.c.h.s8.bf16 %v1055_v55 }
 0x1e4   : > { %3619 = vmatprep.subr.bf16.mxu0 %v2765_v2  ;;  %3947 = vmatprep.subr.bf16.mxu1 %v2767_v3  ;;  %v1069_v2 = vld [vmem:[%s7088_s22 + $0x1988] sm:$0xff]  ;;  %v1071_v3 = vld [vmem:[%s7088_s22 + $0x1998] sm:$0xff] }
 0x1e7   : > { %3620 = vmatpush1.bf16.msra.mxu0 %v2764_v8  ;;  %3948 = vmatpush1.bf16.msra.mxu1 %v2766_v9  ;;  %v2909_v8 = vunpack.c.l.s8.bf16 %v1069_v2  ;;  %v2911_v9 = vunpack.c.l.s8.bf16 %v1071_v3 }
 0x1e8   : > { %3621 = vmatprep.subr.bf16.mxu0 %v2781_v10  ;;  %3949 = vmatprep.subr.bf16.mxu1 %v2783_v11  ;;  %v1068_v10 = vld [vmem:[%s7088_s22 + $0x1980] sm:$0xff]  ;;  %v1070_v11 = vld [vmem:[%s7088_s22 + $0x1990] sm:$0xff] }
 0x1e9   : > { %v2908_v25 = vunpack.c.l.s8.bf16 %v1068_v10  ;;  %v2910_v13 = vunpack.c.l.s8.bf16 %v1070_v11  ;;  %v2924_v18 = vunpack.c.h.s8.bf16 %v1068_v10  ;;  %v2926_v19 = vunpack.c.h.s8.bf16 %v1070_v11 }
 0x1eb   : > { %3622 = vmatpush1.bf16.msra.mxu0 %v2780_v14  ;;  %3950 = vmatpush1.bf16.msra.mxu1 %v2782_v15  ;;  %v2925_v14 = vunpack.c.h.s8.bf16 %v1069_v2  ;;  %v2927_v15 = vunpack.c.h.s8.bf16 %v1071_v3 }
 0x1ec   : > { %3623 = vmatprep.subr.bf16.mxu0 %v2797_v16  ;;  %3951 = vmatprep.subr.bf16.mxu1 %v2799_v17  ;;  %v1085_v16 = vld [vmem:[%s7088_s22 + $0x1a08] sm:$0xff]  ;;  %v1087_v17 = vld [vmem:[%s7088_s22 + $0x1a18] sm:$0xff] }
 0x1ef   : > { %3624 = vmatpush1.bf16.msra.mxu0 %v2796_v20  ;;  %3952 = vmatpush1.bf16.msra.mxu1 %v2798_v21  ;;  %v2941_v20 = vunpack.c.l.s8.bf16 %v1085_v16  ;;  %v2943_v21 = vunpack.c.l.s8.bf16 %v1087_v17 }
 0x1f0   : > { %3634 = vmatprep.subr.bf16.mxu0 %v2813_v22  ;;  %3962 = vmatprep.subr.bf16.mxu1 %v2815_v23  ;;  %v1084_v22 = vld [vmem:[%s7088_s22 + $0x1a00] sm:$0xff]  ;;  %v1086_v23 = vld [vmem:[%s7088_s22 + $0x1a10] sm:$0xff] }
 0x1f1   : > { %v2940_v26 = vunpack.c.l.s8.bf16 %v1084_v22  ;;  %v2942_v27 = vunpack.c.l.s8.bf16 %v1086_v23  ;;  %v2956_v34 = vunpack.c.h.s8.bf16 %v1084_v22  ;;  %v2958_v35 = vunpack.c.h.s8.bf16 %v1086_v23  ;;  %v7448_v23 = vld [vmem:[#allocation2 + $0x38] sm:$0xff] }
 0x1f2   : > { %3626 = vmatmul.mubr.bf16.vlgmr.msra.gmra.mrb[0].mxu0 %v7400_v28  ;;  %3954 = vmatmul.mubr.bf16.vlgmr.msra.gmra.mrb[0].mxu1 %v7400_v28  ;;  %v7446_v22 = vcombine.low %v7402_v29, %v7402_v29 }
 0x1f3   : > { %3635 = vmatpush1.bf16.msra.mxu0 %v2812_v30  ;;  %3963 = vmatpush1.bf16.msra.mxu1 %v2814_v31  ;;  %v2957_v30 = vunpack.c.h.s8.bf16 %v1085_v16  ;;  %v2959_v31 = vunpack.c.h.s8.bf16 %v1087_v17 }
 0x1f4   : > { %3636 = vmatprep.subr.bf16.mxu0 %v2829_v51  ;;  %3964 = vmatprep.subr.bf16.mxu1 %v2831_v33  ;;  %v1101_v51 = vld [vmem:[%s7088_s22 + $0x1a88] sm:$0xff]  ;;  %v1103_v33 = vld [vmem:[%s7088_s22 + $0x1a98] sm:$0xff] }
 0x1f5   : > { %3666 = vmatprep.mubr.bf16.mxu0 %v7408_v39  ;;  %3994 = vmatprep.mubr.bf16.mxu1 %v7408_v39 }
 0x1f7   : > { %3637 = vmatpush1.bf16.msra.mxu0 %v2828_v37  ;;  %3965 = vmatpush1.bf16.msra.mxu1 %v2830_v40  ;;  %v2973_v37 = vunpack.c.l.s8.bf16 %v1101_v51  ;;  %v2975_v40 = vunpack.c.l.s8.bf16 %v1103_v33 }
 0x1f8   : > { %3638 = vmatprep.subr.bf16.mxu0 %v2845_v41  ;;  %3966 = vmatprep.subr.bf16.mxu1 %v2847_v42  ;;  %v1100_v41 = vld [vmem:[%s7088_s22 + $0x1a80] sm:$0xff]  ;;  %v1102_v42 = vld [vmem:[%s7088_s22 + $0x1a90] sm:$0xff] }
 0x1f9   : > { %v2972_v44 = vunpack.c.l.s8.bf16 %v1100_v41  ;;  %v2974_v45 = vunpack.c.l.s8.bf16 %v1102_v42  ;;  %v2988_v54 = vunpack.c.h.s8.bf16 %v1100_v41  ;;  %v2990_v55 = vunpack.c.h.s8.bf16 %v1102_v42  ;;  %v1164_v41 = vld [vmem:[%s7088_s22 + $0x1c80] sm:$0xff]  ;;  %v1166_v42 = vld [vmem:[%s7088_s22 + $0x1c90] sm:$0xff] }
 0x1fb   : > { %3639 = vmatpush1.bf16.msra.mxu0 %v2844_v53  ;;  %3967 = vmatpush1.bf16.msra.mxu1 %v2846_v47  ;;  %v2989_v53 = vunpack.c.h.s8.bf16 %v1101_v51  ;;  %v2991_v47 = vunpack.c.h.s8.bf16 %v1103_v33  ;;  %v1165_v51 = vld [vmem:[%s7088_s22 + $0x1c88] sm:$0xff]  ;;  %v1167_v33 = vld [vmem:[%s7088_s22 + $0x1c98] sm:$0xff] }
 0x1fc   : > { %3640 = vmatprep.subr.bf16.mxu0 %v2861_v48  ;;  %3968 = vmatprep.subr.bf16.mxu1 %v2863_v49  ;;  %v1117_v48 = vld [vmem:[%s7088_s22 + $0x1b08] sm:$0xff]  ;;  %v1119_v49 = vld [vmem:[%s7088_s22 + $0x1b18] sm:$0xff] }
 0x1ff   : > { %3641 = vmatpush1.bf16.msra.mxu0 %v2860_v56  ;;  %3969 = vmatpush1.bf16.msra.mxu1 %v2862_v57  ;;  %v3005_v56 = vunpack.c.l.s8.bf16 %v1117_v48  ;;  %v3007_v57 = vunpack.c.l.s8.bf16 %v1119_v49 }
 0x200   : > { %3642 = vmatprep.subr.bf16.mxu0 %v2877_v38  ;;  %3970 = vmatprep.subr.bf16.mxu1 %v2879_v59  ;;  %v1116_v38 = vld [vmem:[%s7088_s22 + $0x1b00] sm:$0xff]  ;;  %v1118_v59 = vld [vmem:[%s7088_s22 + $0x1b10] sm:$0xff] }
 0x201   : > { %v3004_v5 = vunpack.c.l.s8.bf16 %v1116_v38  ;;  %v3006_v61 = vunpack.c.l.s8.bf16 %v1118_v59  ;;  %v3020_v2 = vunpack.c.h.s8.bf16 %v1116_v38  ;;  %v3022_v3 = vunpack.c.h.s8.bf16 %v1118_v59  ;;  %v1180_v38 = vld [vmem:[%s7088_s22 + $0x1d00] sm:$0xff]  ;;  %v1182_v59 = vld [vmem:[%s7088_s22 + $0x1d10] sm:$0xff] }
 0x203   : > { %3643 = vmatpush1.bf16.msra.mxu0 %v2876_v62  ;;  %3971 = vmatpush1.bf16.msra.mxu1 %v2878_v63  ;;  %v3021_v62 = vunpack.c.h.s8.bf16 %v1117_v48  ;;  %v3023_v63 = vunpack.c.h.s8.bf16 %v1119_v49  ;;  %v1181_v48 = vld [vmem:[%s7088_s22 + $0x1d08] sm:$0xff]  ;;  %v1183_v49 = vld [vmem:[%s7088_s22 + $0x1d18] sm:$0xff] }
 0x204   : > { %3644 = vmatprep.subr.bf16.mxu0 %v2893_v0  ;;  %3972 = vmatprep.subr.bf16.mxu1 %v2895_v1  ;;  %v1133_v0 = vld [vmem:[%s7088_s22 + $0x1b88] sm:$0xff]  ;;  %v1135_v1 = vld [vmem:[%s7088_s22 + $0x1b98] sm:$0xff] }
 0x207   : > { %3645 = vmatpush1.bf16.msra.mxu0 %v2892_v6  ;;  %3973 = vmatpush1.bf16.msra.mxu1 %v2894_v7  ;;  %v3037_v6 = vunpack.c.l.s8.bf16 %v1133_v0  ;;  %v3039_v7 = vunpack.c.l.s8.bf16 %v1135_v1 }
 0x208   : > { %3646 = vmatprep.subr.bf16.mxu0 %v2909_v8  ;;  %3974 = vmatprep.subr.bf16.mxu1 %v2911_v9  ;;  %v1132_v8 = vld [vmem:[%s7088_s22 + $0x1b80] sm:$0xff]  ;;  %v1134_v9 = vld [vmem:[%s7088_s22 + $0x1b90] sm:$0xff] }
 0x209   : > { %v3036_v10 = vunpack.c.l.s8.bf16 %v1132_v8  ;;  %v3038_v11 = vunpack.c.l.s8.bf16 %v1134_v9  ;;  %v3052_v16 = vunpack.c.h.s8.bf16 %v1132_v8  ;;  %v3054_v17 = vunpack.c.h.s8.bf16 %v1134_v9  ;;  %v1196_v8 = vld [vmem:[%s7088_s22 + $0x1d80] sm:$0xff]  ;;  %v1198_v9 = vld [vmem:[%s7088_s22 + $0x1d90] sm:$0xff] }
 0x20b   : > { %3647 = vmatpush1.bf16.msra.mxu0 %v2908_v25  ;;  %3975 = vmatpush1.bf16.msra.mxu1 %v2910_v13  ;;  %v3053_v25 = vunpack.c.h.s8.bf16 %v1133_v0  ;;  %v3055_v13 = vunpack.c.h.s8.bf16 %v1135_v1  ;;  %v1197_v0 = vld [vmem:[%s7088_s22 + $0x1d88] sm:$0xff]  ;;  %v1199_v1 = vld [vmem:[%s7088_s22 + $0x1d98] sm:$0xff] }
 0x20c   : > { %3648 = vmatprep.subr.bf16.mxu0 %v2925_v14  ;;  %3976 = vmatprep.subr.bf16.mxu1 %v2927_v15  ;;  %v1149_v14 = vld [vmem:[%s7088_s22 + $0x1c08] sm:$0xff]  ;;  %v1151_v15 = vld [vmem:[%s7088_s22 + $0x1c18] sm:$0xff] }
 0x20f   : > { %3649 = vmatpush1.bf16.msra.mxu0 %v2924_v18  ;;  %3977 = vmatpush1.bf16.msra.mxu1 %v2926_v19  ;;  %v3069_v18 = vunpack.c.l.s8.bf16 %v1149_v14  ;;  %v3071_v19 = vunpack.c.l.s8.bf16 %v1151_v15 }
 0x210   : > { %3650 = vmatprep.subr.bf16.mxu0 %v2941_v20  ;;  %3978 = vmatprep.subr.bf16.mxu1 %v2943_v21  ;;  %v1148_v20 = vld [vmem:[%s7088_s22 + $0x1c00] sm:$0xff]  ;;  %v1150_v21 = vld [vmem:[%s7088_s22 + $0x1c10] sm:$0xff] }
 0x211   : > { %v3084_v29 = vunpack.c.h.s8.bf16 %v1148_v20 }
 0x213   : > { %3651 = vmatpush1.bf16.msra.mxu0 %v2940_v26  ;;  %3979 = vmatpush1.bf16.msra.mxu1 %v2942_v27  ;;  %v3068_v26 = vunpack.c.l.s8.bf16 %v1148_v20  ;;  %v3070_v27 = vunpack.c.l.s8.bf16 %v1150_v21  ;;  %v1212_v20 = vld [vmem:[%s7088_s22 + $0x1e00] sm:$0xff] }
 0x214   : > { %3652 = vmatprep.subr.bf16.mxu0 %v2957_v30  ;;  %3980 = vmatprep.subr.bf16.mxu1 %v2959_v31  ;;  %v3085_v30 = vunpack.c.h.s8.bf16 %v1149_v14  ;;  %v3087_v31 = vunpack.c.h.s8.bf16 %v1151_v15  ;;  %v1213_v14 = vld [vmem:[%s7088_s22 + $0x1e08] sm:$0xff]  ;;  %v1215_v15 = vld [vmem:[%s7088_s22 + $0x1e18] sm:$0xff] }
 0x217   : > { %3653 = vmatpush1.bf16.msra.mxu0 %v2956_v34  ;;  %3981 = vmatpush1.bf16.msra.mxu1 %v2958_v35  ;;  %v7454_v34 = vcombine.high %v7448_v23, %v7448_v23  ;;  %v3086_v35 = vunpack.c.h.s8.bf16 %v1150_v21  ;;  %v1214_v21 = vld [vmem:[%s7088_s22 + $0x1e10] sm:$0xff] }
 0x218   : > { %3654 = vmatprep.subr.bf16.mxu0 %v2973_v37  ;;  %3982 = vmatprep.subr.bf16.mxu1 %v2975_v40  ;;  %v3101_v37 = vunpack.c.l.s8.bf16 %v1165_v51  ;;  %v3103_v40 = vunpack.c.l.s8.bf16 %v1167_v33 }
 0x21b   : > { %3655 = vmatpush1.bf16.msra.mxu0 %v2972_v44  ;;  %3983 = vmatpush1.bf16.msra.mxu1 %v2974_v45  ;;  %v3100_v44 = vunpack.c.l.s8.bf16 %v1164_v41  ;;  %v3102_v45 = vunpack.c.l.s8.bf16 %v1166_v42 }
 0x21c   : > { %3656 = vmatprep.subr.bf16.mxu0 %v2989_v53  ;;  %3984 = vmatprep.subr.bf16.mxu1 %v2991_v47  ;;  %v3117_v53 = vunpack.c.h.s8.bf16 %v1165_v51  ;;  %v3119_v47 = vunpack.c.h.s8.bf16 %v1167_v33  ;;  %v1229_v51 = vld [vmem:[%s7088_s22 + $0x1e88] sm:$0xff]  ;;  %v1231_v33 = vld [vmem:[%s7088_s22 + $0x1e98] sm:$0xff] }
 0x21f   : > { %3657 = vmatpush1.bf16.msra.mxu0 %v2988_v54  ;;  %3985 = vmatpush1.bf16.msra.mxu1 %v2990_v55  ;;  %v3116_v54 = vunpack.c.h.s8.bf16 %v1164_v41  ;;  %v3118_v55 = vunpack.c.h.s8.bf16 %v1166_v42  ;;  %v1228_v41 = vld [vmem:[%s7088_s22 + $0x1e80] sm:$0xff]  ;;  %v1230_v42 = vld [vmem:[%s7088_s22 + $0x1e90] sm:$0xff] }
 0x220   : > { %3658 = vmatprep.subr.bf16.mxu0 %v3005_v56  ;;  %3986 = vmatprep.subr.bf16.mxu1 %v3007_v57  ;;  %v3133_v56 = vunpack.c.l.s8.bf16 %v1181_v48  ;;  %v3135_v57 = vunpack.c.l.s8.bf16 %v1183_v49 }
 0x223   : > { %3659 = vmatpush1.bf16.msra.mxu0 %v3004_v5  ;;  %3987 = vmatpush1.bf16.msra.mxu1 %v3006_v61  ;;  %v3132_v5 = vunpack.c.l.s8.bf16 %v1180_v38  ;;  %v3134_v61 = vunpack.c.l.s8.bf16 %v1182_v59 }
 0x224   : > { %3660 = vmatprep.subr.bf16.mxu0 %v3021_v62  ;;  %3988 = vmatprep.subr.bf16.mxu1 %v3023_v63  ;;  %v3149_v62 = vunpack.c.h.s8.bf16 %v1181_v48  ;;  %v3151_v63 = vunpack.c.h.s8.bf16 %v1183_v49  ;;  %v1245_v48 = vld [vmem:[%s7088_s22 + $0x1f08] sm:$0xff]  ;;  %v1247_v49 = vld [vmem:[%s7088_s22 + $0x1f18] sm:$0xff] }
 0x227   : > { %3661 = vmatpush1.bf16.msra.mxu0 %v3020_v2  ;;  %3989 = vmatpush1.bf16.msra.mxu1 %v3022_v3  ;;  %v3148_v2 = vunpack.c.h.s8.bf16 %v1180_v38  ;;  %v3150_v3 = vunpack.c.h.s8.bf16 %v1182_v59  ;;  %v1244_v38 = vld [vmem:[%s7088_s22 + $0x1f00] sm:$0xff]  ;;  %v1246_v59 = vld [vmem:[%s7088_s22 + $0x1f10] sm:$0xff] }
 0x228   : > { %3662 = vmatprep.subr.bf16.mxu0 %v3037_v6  ;;  %3990 = vmatprep.subr.bf16.mxu1 %v3039_v7  ;;  %v3165_v6 = vunpack.c.l.s8.bf16 %v1197_v0  ;;  %v3167_v7 = vunpack.c.l.s8.bf16 %v1199_v1 }
 0x22b   : > { %3663 = vmatpush1.bf16.msra.mxu0 %v3036_v10  ;;  %3991 = vmatpush1.bf16.msra.mxu1 %v3038_v11  ;;  %v3164_v10 = vunpack.c.l.s8.bf16 %v1196_v8  ;;  %v3166_v11 = vunpack.c.l.s8.bf16 %v1198_v9 }
 0x22c   : > { %3664 = vmatprep.subr.bf16.mxu0 %v3053_v25  ;;  %3992 = vmatprep.subr.bf16.mxu1 %v3055_v13  ;;  %v3181_v25 = vunpack.c.h.s8.bf16 %v1197_v0  ;;  %v3183_v13 = vunpack.c.h.s8.bf16 %v1199_v1  ;;  %v1261_v0 = vld [vmem:[%s7088_s22 + $0x1f88] sm:$0xff]  ;;  %v1263_v1 = vld [vmem:[%s7088_s22 + $0x1f98] sm:$0xff] }
 0x22f   : > { %3665 = vmatpush1.bf16.msra.mxu0 %v3052_v16  ;;  %3993 = vmatpush1.bf16.msra.mxu1 %v3054_v17  ;;  %v3180_v16 = vunpack.c.h.s8.bf16 %v1196_v8  ;;  %v3182_v17 = vunpack.c.h.s8.bf16 %v1198_v9  ;;  %v1260_v8 = vld [vmem:[%s7088_s22 + $0x1f80] sm:$0xff]  ;;  %v1262_v9 = vld [vmem:[%s7088_s22 + $0x1f90] sm:$0xff] }
 0x230   : > { %3675 = vmatprep.subr.bf16.mxu0 %v3069_v18  ;;  %4003 = vmatprep.subr.bf16.mxu1 %v3071_v19  ;;  %v3197_v18 = vunpack.c.l.s8.bf16 %v1213_v14  ;;  %v3199_v19 = vunpack.c.l.s8.bf16 %v1215_v15 }
 0x232   : > { %3667 = vmatmul.mubr.bf16.vlgmr.msra.gmra.mrb[0].mxu0 %v7446_v22  ;;  %3995 = vmatmul.mubr.bf16.vlgmr.msra.gmra.mrb[0].mxu1 %v7446_v22 }
 0x233   : > { %3676 = vmatpush1.bf16.msra.mxu0 %v3068_v26  ;;  %4004 = vmatpush1.bf16.msra.mxu1 %v3070_v27  ;;  %v3196_v26 = vunpack.c.l.s8.bf16 %v1212_v20  ;;  %v3198_v27 = vunpack.c.l.s8.bf16 %v1214_v21 }
 0x234   : > { %3677 = vmatprep.subr.bf16.mxu0 %v3085_v30  ;;  %4005 = vmatprep.subr.bf16.mxu1 %v3087_v31  ;;  %v3213_v30 = vunpack.c.h.s8.bf16 %v1213_v14  ;;  %v3215_v31 = vunpack.c.h.s8.bf16 %v1215_v15  ;;  %v257_v14 = vld [vmem:[%s7088_s22 + $0x28] sm:$0xff]  ;;  %v259_v15 = vld [vmem:[%s7088_s22 + $0x38] sm:$0xff] }
 0x235   : > { %3707 = vmatprep.mubr.bf16.mxu0 %v7454_v34  ;;  %4035 = vmatprep.mubr.bf16.mxu1 %v7454_v34 }
 0x237   : > { %3678 = vmatpush1.bf16.msra.mxu0 %v3084_v29  ;;  %4006 = vmatpush1.bf16.msra.mxu1 %v3086_v35  ;;  %v3212_v29 = vunpack.c.h.s8.bf16 %v1212_v20  ;;  %v3214_v35 = vunpack.c.h.s8.bf16 %v1214_v21  ;;  %v256_v20 = vld [vmem:[%s7088_s22 + $0x20] sm:$0xff]  ;;  %v258_v21 = vld [vmem:[%s7088_s22 + $0x30] sm:$0xff] }
 0x238   : > { %3679 = vmatprep.subr.bf16.mxu0 %v3101_v37  ;;  %4007 = vmatprep.subr.bf16.mxu1 %v3103_v40  ;;  %v3229_v37 = vunpack.c.l.s8.bf16 %v1229_v51  ;;  %v3231_v40 = vunpack.c.l.s8.bf16 %v1231_v33 }
 0x23b   : > { %3680 = vmatpush1.bf16.msra.mxu0 %v3100_v44  ;;  %4008 = vmatpush1.bf16.msra.mxu1 %v3102_v45  ;;  %v3228_v44 = vunpack.c.l.s8.bf16 %v1228_v41  ;;  %v3230_v45 = vunpack.c.l.s8.bf16 %v1230_v42 }
 0x23c   : > { %3681 = vmatprep.subr.bf16.mxu0 %v3117_v53  ;;  %4009 = vmatprep.subr.bf16.mxu1 %v3119_v47  ;;  %v3245_v53 = vunpack.c.h.s8.bf16 %v1229_v51  ;;  %v3247_v47 = vunpack.c.h.s8.bf16 %v1231_v33  ;;  %v1299_v51 = vunpack.c.h.s8.bf16 %v259_v15  ;;  %v273_v33 = vld [vmem:[%s7088_s22 + $0xa8] sm:$0xff] }
 0x23f   : > { %3682 = vmatpush1.bf16.msra.mxu0 %v3116_v54  ;;  %4010 = vmatpush1.bf16.msra.mxu1 %v3118_v55  ;;  %v3244_v54 = vunpack.c.h.s8.bf16 %v1228_v41  ;;  %v3246_v55 = vunpack.c.h.s8.bf16 %v1230_v42  ;;  %v272_v41 = vld [vmem:[%s7088_s22 + $0xa0] sm:$0xff]  ;;  %v274_v42 = vld [vmem:[%s7088_s22 + $0xb0] sm:$0xff] }
 0x240   : > { %3683 = vmatprep.subr.bf16.mxu0 %v3133_v56  ;;  %4011 = vmatprep.subr.bf16.mxu1 %v3135_v57  ;;  %v3261_v56 = vunpack.c.l.s8.bf16 %v1245_v48  ;;  %v3263_v57 = vunpack.c.l.s8.bf16 %v1247_v49 }
 0x243   : > { %3684 = vmatpush1.bf16.msra.mxu0 %v3132_v5  ;;  %4012 = vmatpush1.bf16.msra.mxu1 %v3134_v61  ;;  %v3260_v5 = vunpack.c.l.s8.bf16 %v1244_v38  ;;  %v3262_v61 = vunpack.c.l.s8.bf16 %v1246_v59 }
 0x244   : > { %3685 = vmatprep.subr.bf16.mxu0 %v3149_v62  ;;  %4013 = vmatprep.subr.bf16.mxu1 %v3151_v63  ;;  %v3277_v62 = vunpack.c.h.s8.bf16 %v1245_v48  ;;  %v3279_v63 = vunpack.c.h.s8.bf16 %v1247_v49  ;;  %v289_v48 = vld [vmem:[%s7088_s22 + $0x128] sm:$0xff]  ;;  %v291_v49 = vld [vmem:[%s7088_s22 + $0x138] sm:$0xff] }
 0x247   : > { %3686 = vmatpush1.bf16.msra.mxu0 %v3148_v2  ;;  %4014 = vmatpush1.bf16.msra.mxu1 %v3150_v3  ;;  %v3276_v2 = vunpack.c.h.s8.bf16 %v1244_v38  ;;  %v3278_v3 = vunpack.c.h.s8.bf16 %v1246_v59  ;;  %v288_v38 = vld [vmem:[%s7088_s22 + $0x120] sm:$0xff]  ;;  %v290_v59 = vld [vmem:[%s7088_s22 + $0x130] sm:$0xff] }
 0x248   : > { %3687 = vmatprep.subr.bf16.mxu0 %v3165_v6  ;;  %4015 = vmatprep.subr.bf16.mxu1 %v3167_v7  ;;  %v3293_v6 = vunpack.c.l.s8.bf16 %v1261_v0  ;;  %v3295_v7 = vunpack.c.l.s8.bf16 %v1263_v1 }
 0x24b   : > { %3688 = vmatpush1.bf16.msra.mxu0 %v3164_v10  ;;  %4016 = vmatpush1.bf16.msra.mxu1 %v3166_v11  ;;  %v3292_v10 = vunpack.c.l.s8.bf16 %v1260_v8  ;;  %v3294_v11 = vunpack.c.l.s8.bf16 %v1262_v9 }
 0x24c   : > { %3689 = vmatprep.subr.bf16.mxu0 %v3181_v25  ;;  %4017 = vmatprep.subr.bf16.mxu1 %v3183_v13  ;;  %v3309_v25 = vunpack.c.h.s8.bf16 %v1261_v0  ;;  %v3311_v13 = vunpack.c.h.s8.bf16 %v1263_v1  ;;  %v305_v0 = vld [vmem:[%s7088_s22 + $0x1a8] sm:$0xff]  ;;  %v307_v1 = vld [vmem:[%s7088_s22 + $0x1b8] sm:$0xff] }
 0x24f   : > { %3690 = vmatpush1.bf16.msra.mxu0 %v3180_v16  ;;  %4018 = vmatpush1.bf16.msra.mxu1 %v3182_v17  ;;  %v3308_v16 = vunpack.c.h.s8.bf16 %v1260_v8  ;;  %v3310_v17 = vunpack.c.h.s8.bf16 %v1262_v9  ;;  %v304_v8 = vld [vmem:[%s7088_s22 + $0x1a0] sm:$0xff]  ;;  %v306_v9 = vld [vmem:[%s7088_s22 + $0x1b0] sm:$0xff] }
 0x250   : > { %3691 = vmatprep.subr.bf16.mxu0 %v3197_v18  ;;  %4019 = vmatprep.subr.bf16.mxu1 %v3199_v19  ;;  %v1281_v18 = vunpack.c.l.s8.bf16 %v257_v14  ;;  %v1283_v19 = vunpack.c.l.s8.bf16 %v259_v15  ;;  %v323_v15 = vld [vmem:[%s7088_s22 + $0x238] sm:$0xff] }
 0x253   : > { %3692 = vmatpush1.bf16.msra.mxu0 %v3196_v26  ;;  %4020 = vmatpush1.bf16.msra.mxu1 %v3198_v27  ;;  %v7492_v26 = vcombine.low %v7448_v23, %v7448_v23  ;;  %v1280_v27 = vunpack.c.l.s8.bf16 %v256_v20  ;;  %v1296_v23 = vunpack.c.h.s8.bf16 %v256_v20  ;;  %v320_v20 = vld [vmem:[%s7088_s22 + $0x220] sm:$0xff] }
 0x254   : > { %3693 = vmatprep.subr.bf16.mxu0 %v3213_v30  ;;  %4021 = vmatprep.subr.bf16.mxu1 %v3215_v31  ;;  %v1282_v30 = vunpack.c.l.s8.bf16 %v258_v21  ;;  %v1297_v31 = vunpack.c.h.s8.bf16 %v257_v14  ;;  %v321_v14 = vld [vmem:[%s7088_s22 + $0x228] sm:$0xff] }
 0x257   : > { %3694 = vmatpush1.bf16.msra.mxu0 %v3212_v29  ;;  %4022 = vmatpush1.bf16.msra.mxu1 %v3214_v35  ;;  %v275_v29 = vld [vmem:[%s7088_s22 + $0xb8] sm:$0xff]  ;;  %v1298_v35 = vunpack.c.h.s8.bf16 %v258_v21  ;;  %v322_v21 = vld [vmem:[%s7088_s22 + $0x230] sm:$0xff] }
 0x258   : > { %3695 = vmatprep.subr.bf16.mxu0 %v3229_v37  ;;  %4023 = vmatprep.subr.bf16.mxu1 %v3231_v40  ;;  %v1313_v37 = vunpack.c.l.s8.bf16 %v273_v33  ;;  %v1315_v40 = vunpack.c.l.s8.bf16 %v275_v29 }
 0x25b   : > { %3696 = vmatpush1.bf16.msra.mxu0 %v3228_v44  ;;  %4024 = vmatpush1.bf16.msra.mxu1 %v3230_v45  ;;  %v1312_v44 = vunpack.c.l.s8.bf16 %v272_v41  ;;  %v1314_v45 = vunpack.c.l.s8.bf16 %v274_v42 }
 0x25c   : > { %3697 = vmatprep.subr.bf16.mxu0 %v3245_v53  ;;  %4025 = vmatprep.subr.bf16.mxu1 %v3247_v47  ;;  %v1329_v53 = vunpack.c.h.s8.bf16 %v273_v33  ;;  %v1331_v47 = vunpack.c.h.s8.bf16 %v275_v29  ;;  %v337_v33 = vld [vmem:[%s7088_s22 + $0x2a8] sm:$0xff]  ;;  %v339_v29 = vld [vmem:[%s7088_s22 + $0x2b8] sm:$0xff] }
 0x25f   : > { %3698 = vmatpush1.bf16.msra.mxu0 %v3244_v54  ;;  %4026 = vmatpush1.bf16.msra.mxu1 %v3246_v55  ;;  %v1328_v54 = vunpack.c.h.s8.bf16 %v272_v41  ;;  %v1330_v55 = vunpack.c.h.s8.bf16 %v274_v42  ;;  %v336_v41 = vld [vmem:[%s7088_s22 + $0x2a0] sm:$0xff]  ;;  %v338_v42 = vld [vmem:[%s7088_s22 + $0x2b0] sm:$0xff] }
 0x260   : > { %3699 = vmatprep.subr.bf16.mxu0 %v3261_v56  ;;  %4027 = vmatprep.subr.bf16.mxu1 %v3263_v57  ;;  %v1345_v56 = vunpack.c.l.s8.bf16 %v289_v48  ;;  %v1347_v57 = vunpack.c.l.s8.bf16 %v291_v49 }
 0x263   : > { %3700 = vmatpush1.bf16.msra.mxu0 %v3260_v5  ;;  %4028 = vmatpush1.bf16.msra.mxu1 %v3262_v61  ;;  %v1344_v5 = vunpack.c.l.s8.bf16 %v288_v38  ;;  %v1346_v61 = vunpack.c.l.s8.bf16 %v290_v59 }
 0x264   : > { %3701 = vmatprep.subr.bf16.mxu0 %v3277_v62  ;;  %4029 = vmatprep.subr.bf16.mxu1 %v3279_v63  ;;  %v1361_v62 = vunpack.c.h.s8.bf16 %v289_v48  ;;  %v1363_v63 = vunpack.c.h.s8.bf16 %v291_v49  ;;  %v353_v48 = vld [vmem:[%s7088_s22 + $0x328] sm:$0xff]  ;;  %v355_v49 = vld [vmem:[%s7088_s22 + $0x338] sm:$0xff] }
 0x267   : > { %3702 = vmatpush1.bf16.msra.mxu0 %v3276_v2  ;;  %4030 = vmatpush1.bf16.msra.mxu1 %v3278_v3  ;;  %v1360_v2 = vunpack.c.h.s8.bf16 %v288_v38  ;;  %v1362_v3 = vunpack.c.h.s8.bf16 %v290_v59  ;;  %v352_v38 = vld [vmem:[%s7088_s22 + $0x320] sm:$0xff]  ;;  %v354_v59 = vld [vmem:[%s7088_s22 + $0x330] sm:$0xff] }
 0x268   : > { %3703 = vmatprep.subr.bf16.mxu0 %v3293_v6  ;;  %4031 = vmatprep.subr.bf16.mxu1 %v3295_v7  ;;  %v1377_v6 = vunpack.c.l.s8.bf16 %v305_v0  ;;  %v1379_v7 = vunpack.c.l.s8.bf16 %v307_v1 }
 0x26b   : > { %3704 = vmatpush1.bf16.msra.mxu0 %v3292_v10  ;;  %4032 = vmatpush1.bf16.msra.mxu1 %v3294_v11  ;;  %v1376_v10 = vunpack.c.l.s8.bf16 %v304_v8  ;;  %v1378_v11 = vunpack.c.l.s8.bf16 %v306_v9 }
 0x26c   : > { %3705 = vmatprep.subr.bf16.mxu0 %v3309_v25  ;;  %4033 = vmatprep.subr.bf16.mxu1 %v3311_v13  ;;  %v1393_v25 = vunpack.c.h.s8.bf16 %v305_v0  ;;  %v1395_v13 = vunpack.c.h.s8.bf16 %v307_v1  ;;  %v369_v0 = vld [vmem:[%s7088_s22 + $0x3a8] sm:$0xff]  ;;  %v371_v1 = vld [vmem:[%s7088_s22 + $0x3b8] sm:$0xff] }
 0x26f   : > { %3706 = vmatpush1.bf16.msra.mxu0 %v3308_v16  ;;  %4034 = vmatpush1.bf16.msra.mxu1 %v3310_v17  ;;  %v1392_v16 = vunpack.c.h.s8.bf16 %v304_v8  ;;  %v1394_v17 = vunpack.c.h.s8.bf16 %v306_v9  ;;  %v368_v8 = vld [vmem:[%s7088_s22 + $0x3a0] sm:$0xff]  ;;  %v370_v9 = vld [vmem:[%s7088_s22 + $0x3b0] sm:$0xff] }
 0x270   : > { %4044 = vmatprep.subr.bf16.mxu0 %v1281_v18  ;;  %4372 = vmatprep.subr.bf16.mxu1 %v1283_v19  ;;  %v1409_v18 = vunpack.c.l.s8.bf16 %v321_v14  ;;  %v1411_v19 = vunpack.c.l.s8.bf16 %v323_v15 }
 0x272   : > { %3708 = vmatmul.mubr.bf16.vlgmr.msra.gmra.mrb[0].mxu0 %v7492_v26  ;;  %4036 = vmatmul.mubr.bf16.vlgmr.msra.gmra.mrb[0].mxu1 %v7492_v26 }
 0x273   : > { %4045 = vmatpush1.bf16.msra.mxu0 %v1280_v27  ;;  %4373 = vmatpush1.bf16.msra.mxu1 %v1282_v30  ;;  %v1408_v27 = vunpack.c.l.s8.bf16 %v320_v20  ;;  %v1410_v30 = vunpack.c.l.s8.bf16 %v322_v21 }
 0x274   : > { %4046 = vmatprep.subr.bf16.mxu0 %v1297_v31  ;;  %4374 = vmatprep.subr.bf16.mxu1 %v1299_v51  ;;  %v1425_v31 = vunpack.c.h.s8.bf16 %v321_v14  ;;  %v1427_v51 = vunpack.c.h.s8.bf16 %v323_v15  ;;  %v385_v14 = vld [vmem:[%s7088_s22 + $0x428] sm:$0xff]  ;;  %v387_v15 = vld [vmem:[%s7088_s22 + $0x438] sm:$0xff] }
 0x275   : > { %4076 = vmatprep.mubr.bf16.mxu0 %v7140_v43  ;;  %4404 = vmatprep.mubr.bf16.mxu1 %v7140_v43 }
 0x277   : > { %4047 = vmatpush1.bf16.msra.mxu0 %v1296_v23  ;;  %4375 = vmatpush1.bf16.msra.mxu1 %v1298_v35  ;;  %v1424_v23 = vunpack.c.h.s8.bf16 %v320_v20  ;;  %v1426_v35 = vunpack.c.h.s8.bf16 %v322_v21  ;;  %v384_v20 = vld [vmem:[%s7088_s22 + $0x420] sm:$0xff]  ;;  %v386_v21 = vld [vmem:[%s7088_s22 + $0x430] sm:$0xff] }
 0x278   : > { %4048 = vmatprep.subr.bf16.mxu0 %v1313_v37  ;;  %4376 = vmatprep.subr.bf16.mxu1 %v1315_v40  ;;  %v1441_v37 = vunpack.c.l.s8.bf16 %v337_v33  ;;  %v1443_v40 = vunpack.c.l.s8.bf16 %v339_v29 }
 0x27b   : > { %4049 = vmatpush1.bf16.msra.mxu0 %v1312_v44  ;;  %4377 = vmatpush1.bf16.msra.mxu1 %v1314_v45  ;;  %v1440_v44 = vunpack.c.l.s8.bf16 %v336_v41  ;;  %v1442_v45 = vunpack.c.l.s8.bf16 %v338_v42 }
 0x27c   : > { %4050 = vmatprep.subr.bf16.mxu0 %v1329_v53  ;;  %4378 = vmatprep.subr.bf16.mxu1 %v1331_v47  ;;  %v1457_v53 = vunpack.c.h.s8.bf16 %v337_v33  ;;  %v1459_v47 = vunpack.c.h.s8.bf16 %v339_v29  ;;  %v401_v33 = vld [vmem:[%s7088_s22 + $0x4a8] sm:$0xff]  ;;  %v403_v29 = vld [vmem:[%s7088_s22 + $0x4b8] sm:$0xff] }
 0x27f   : > { %4051 = vmatpush1.bf16.msra.mxu0 %v1328_v54  ;;  %4379 = vmatpush1.bf16.msra.mxu1 %v1330_v55  ;;  %v1456_v54 = vunpack.c.h.s8.bf16 %v336_v41  ;;  %v1458_v55 = vunpack.c.h.s8.bf16 %v338_v42  ;;  %v400_v41 = vld [vmem:[%s7088_s22 + $0x4a0] sm:$0xff]  ;;  %v402_v42 = vld [vmem:[%s7088_s22 + $0x4b0] sm:$0xff] }
 0x280   : > { %4052 = vmatprep.subr.bf16.mxu0 %v1345_v56  ;;  %4380 = vmatprep.subr.bf16.mxu1 %v1347_v57  ;;  %v1473_v56 = vunpack.c.l.s8.bf16 %v353_v48  ;;  %v1475_v57 = vunpack.c.l.s8.bf16 %v355_v49 }
 0x283   : > { %4053 = vmatpush1.bf16.msra.mxu0 %v1344_v5  ;;  %4381 = vmatpush1.bf16.msra.mxu1 %v1346_v61  ;;  %v1472_v5 = vunpack.c.l.s8.bf16 %v352_v38  ;;  %v1474_v61 = vunpack.c.l.s8.bf16 %v354_v59 }
 0x284   : > { %4054 = vmatprep.subr.bf16.mxu0 %v1361_v62  ;;  %4382 = vmatprep.subr.bf16.mxu1 %v1363_v63  ;;  %v1489_v62 = vunpack.c.h.s8.bf16 %v353_v48  ;;  %v1491_v63 = vunpack.c.h.s8.bf16 %v355_v49  ;;  %v417_v48 = vld [vmem:[%s7088_s22 + $0x528] sm:$0xff]  ;;  %v419_v49 = vld [vmem:[%s7088_s22 + $0x538] sm:$0xff] }
 0x287   : > { %4055 = vmatpush1.bf16.msra.mxu0 %v1360_v2  ;;  %4383 = vmatpush1.bf16.msra.mxu1 %v1362_v3  ;;  %v1488_v2 = vunpack.c.h.s8.bf16 %v352_v38  ;;  %v1490_v3 = vunpack.c.h.s8.bf16 %v354_v59  ;;  %v416_v38 = vld [vmem:[%s7088_s22 + $0x520] sm:$0xff]  ;;  %v418_v59 = vld [vmem:[%s7088_s22 + $0x530] sm:$0xff] }
 0x288   : > { %4056 = vmatprep.subr.bf16.mxu0 %v1377_v6  ;;  %4384 = vmatprep.subr.bf16.mxu1 %v1379_v7  ;;  %v1505_v6 = vunpack.c.l.s8.bf16 %v369_v0  ;;  %v1507_v7 = vunpack.c.l.s8.bf16 %v371_v1 }
 0x28b   : > { %4057 = vmatpush1.bf16.msra.mxu0 %v1376_v10  ;;  %4385 = vmatpush1.bf16.msra.mxu1 %v1378_v11  ;;  %v1504_v10 = vunpack.c.l.s8.bf16 %v368_v8  ;;  %v1506_v11 = vunpack.c.l.s8.bf16 %v370_v9 }
 0x28c   : > { %4058 = vmatprep.subr.bf16.mxu0 %v1393_v25  ;;  %4386 = vmatprep.subr.bf16.mxu1 %v1395_v13  ;;  %v1521_v25 = vunpack.c.h.s8.bf16 %v369_v0  ;;  %v1523_v13 = vunpack.c.h.s8.bf16 %v371_v1  ;;  %v433_v0 = vld [vmem:[%s7088_s22 + $0x5a8] sm:$0xff]  ;;  %v435_v1 = vld [vmem:[%s7088_s22 + $0x5b8] sm:$0xff] }
 0x28f   : > { %4059 = vmatpush1.bf16.msra.mxu0 %v1392_v16  ;;  %4387 = vmatpush1.bf16.msra.mxu1 %v1394_v17  ;;  %v1520_v16 = vunpack.c.h.s8.bf16 %v368_v8  ;;  %v1522_v17 = vunpack.c.h.s8.bf16 %v370_v9  ;;  %v432_v8 = vld [vmem:[%s7088_s22 + $0x5a0] sm:$0xff]  ;;  %v434_v9 = vld [vmem:[%s7088_s22 + $0x5b0] sm:$0xff] }
 0x290   : > { %4060 = vmatprep.subr.bf16.mxu0 %v1409_v18  ;;  %4388 = vmatprep.subr.bf16.mxu1 %v1411_v19  ;;  %v1537_v18 = vunpack.c.l.s8.bf16 %v385_v14  ;;  %v1539_v19 = vunpack.c.l.s8.bf16 %v387_v15 }
 0x293   : > { %4061 = vmatpush1.bf16.msra.mxu0 %v1408_v27  ;;  %4389 = vmatpush1.bf16.msra.mxu1 %v1410_v30  ;;  %v1536_v27 = vunpack.c.l.s8.bf16 %v384_v20  ;;  %v1538_v30 = vunpack.c.l.s8.bf16 %v386_v21 }
 0x294   : > { %4062 = vmatprep.subr.bf16.mxu0 %v1425_v31  ;;  %4390 = vmatprep.subr.bf16.mxu1 %v1427_v51  ;;  %v1553_v31 = vunpack.c.h.s8.bf16 %v385_v14  ;;  %v1555_v51 = vunpack.c.h.s8.bf16 %v387_v15  ;;  %v449_v14 = vld [vmem:[%s7088_s22 + $0x628] sm:$0xff]  ;;  %v451_v15 = vld [vmem:[%s7088_s22 + $0x638] sm:$0xff] }
 0x297   : > { %4063 = vmatpush1.bf16.msra.mxu0 %v1424_v23  ;;  %4391 = vmatpush1.bf16.msra.mxu1 %v1426_v35  ;;  %v1552_v23 = vunpack.c.h.s8.bf16 %v384_v20  ;;  %v1554_v35 = vunpack.c.h.s8.bf16 %v386_v21  ;;  %v448_v20 = vld [vmem:[%s7088_s22 + $0x620] sm:$0xff]  ;;  %v450_v21 = vld [vmem:[%s7088_s22 + $0x630] sm:$0xff] }
 0x298   : > { %4064 = vmatprep.subr.bf16.mxu0 %v1441_v37  ;;  %4392 = vmatprep.subr.bf16.mxu1 %v1443_v40  ;;  %v1569_v37 = vunpack.c.l.s8.bf16 %v401_v33  ;;  %v1571_v40 = vunpack.c.l.s8.bf16 %v403_v29 }
 0x29b   : > { %4065 = vmatpush1.bf16.msra.mxu0 %v1440_v44  ;;  %4393 = vmatpush1.bf16.msra.mxu1 %v1442_v45  ;;  %v1568_v44 = vunpack.c.l.s8.bf16 %v400_v41  ;;  %v1570_v45 = vunpack.c.l.s8.bf16 %v402_v42 }
 0x29c   : > { %4066 = vmatprep.subr.bf16.mxu0 %v1457_v53  ;;  %4394 = vmatprep.subr.bf16.mxu1 %v1459_v47  ;;  %v1585_v53 = vunpack.c.h.s8.bf16 %v401_v33  ;;  %v1587_v47 = vunpack.c.h.s8.bf16 %v403_v29  ;;  %v465_v33 = vld [vmem:[%s7088_s22 + $0x6a8] sm:$0xff]  ;;  %v467_v29 = vld [vmem:[%s7088_s22 + $0x6b8] sm:$0xff] }
 0x29f   : > { %4067 = vmatpush1.bf16.msra.mxu0 %v1456_v54  ;;  %4395 = vmatpush1.bf16.msra.mxu1 %v1458_v55  ;;  %v1584_v54 = vunpack.c.h.s8.bf16 %v400_v41  ;;  %v1586_v55 = vunpack.c.h.s8.bf16 %v402_v42  ;;  %v464_v41 = vld [vmem:[%s7088_s22 + $0x6a0] sm:$0xff]  ;;  %v466_v42 = vld [vmem:[%s7088_s22 + $0x6b0] sm:$0xff] }
 0x2a0   : > { %4068 = vmatprep.subr.bf16.mxu0 %v1473_v56  ;;  %4396 = vmatprep.subr.bf16.mxu1 %v1475_v57  ;;  %v1601_v56 = vunpack.c.l.s8.bf16 %v417_v48  ;;  %v1603_v57 = vunpack.c.l.s8.bf16 %v419_v49 }
 0x2a3   : > { %4069 = vmatpush1.bf16.msra.mxu0 %v1472_v5  ;;  %4397 = vmatpush1.bf16.msra.mxu1 %v1474_v61  ;;  %v1600_v5 = vunpack.c.l.s8.bf16 %v416_v38  ;;  %v1602_v61 = vunpack.c.l.s8.bf16 %v418_v59 }
 0x2a4   : > { %4070 = vmatprep.subr.bf16.mxu0 %v1489_v62  ;;  %4398 = vmatprep.subr.bf16.mxu1 %v1491_v63  ;;  %v1617_v62 = vunpack.c.h.s8.bf16 %v417_v48  ;;  %v1619_v63 = vunpack.c.h.s8.bf16 %v419_v49  ;;  %v481_v48 = vld [vmem:[%s7088_s22 + $0x728] sm:$0xff]  ;;  %v483_v49 = vld [vmem:[%s7088_s22 + $0x738] sm:$0xff] }
 0x2a7   : > { %4071 = vmatpush1.bf16.msra.mxu0 %v1488_v2  ;;  %4399 = vmatpush1.bf16.msra.mxu1 %v1490_v3  ;;  %v1616_v2 = vunpack.c.h.s8.bf16 %v416_v38  ;;  %v1618_v3 = vunpack.c.h.s8.bf16 %v418_v59  ;;  %v480_v38 = vld [vmem:[%s7088_s22 + $0x720] sm:$0xff]  ;;  %v482_v59 = vld [vmem:[%s7088_s22 + $0x730] sm:$0xff] }
 0x2a8   : > { %4072 = vmatprep.subr.bf16.mxu0 %v1505_v6  ;;  %4400 = vmatprep.subr.bf16.mxu1 %v1507_v7  ;;  %v1633_v6 = vunpack.c.l.s8.bf16 %v433_v0  ;;  %v1635_v7 = vunpack.c.l.s8.bf16 %v435_v1 }
 0x2ab   : > { %4073 = vmatpush1.bf16.msra.mxu0 %v1504_v10  ;;  %4401 = vmatpush1.bf16.msra.mxu1 %v1506_v11  ;;  %v1632_v10 = vunpack.c.l.s8.bf16 %v432_v8  ;;  %v1634_v11 = vunpack.c.l.s8.bf16 %v434_v9 }
 0x2ac   : > { %4074 = vmatprep.subr.bf16.mxu0 %v1521_v25  ;;  %4402 = vmatprep.subr.bf16.mxu1 %v1523_v13  ;;  %v1649_v25 = vunpack.c.h.s8.bf16 %v433_v0  ;;  %v1651_v13 = vunpack.c.h.s8.bf16 %v435_v1  ;;  %v497_v0 = vld [vmem:[%s7088_s22 + $0x7a8] sm:$0xff]  ;;  %v499_v1 = vld [vmem:[%s7088_s22 + $0x7b8] sm:$0xff] }
 0x2af   : > { %4075 = vmatpush1.bf16.msra.mxu0 %v1520_v16  ;;  %4403 = vmatpush1.bf16.msra.mxu1 %v1522_v17  ;;  %v1648_v16 = vunpack.c.h.s8.bf16 %v432_v8  ;;  %v1650_v17 = vunpack.c.h.s8.bf16 %v434_v9  ;;  %v496_v8 = vld [vmem:[%s7088_s22 + $0x7a0] sm:$0xff]  ;;  %v498_v9 = vld [vmem:[%s7088_s22 + $0x7b0] sm:$0xff] }
 0x2b0   : > { %4085 = vmatprep.subr.bf16.mxu0 %v1537_v18  ;;  %4413 = vmatprep.subr.bf16.mxu1 %v1539_v19  ;;  %v1665_v18 = vunpack.c.l.s8.bf16 %v449_v14  ;;  %v1667_v19 = vunpack.c.l.s8.bf16 %v451_v15 }
 0x2b2   : > { %4077 = vmatmul.mubr.bf16.vlgmr.msra.gmra.mrb[4].mxu0 %v7170_v50  ;;  %4405 = vmatmul.mubr.bf16.vlgmr.msra.gmra.mrb[4].mxu1 %v7170_v50 }
 0x2b3   : > { %4086 = vmatpush1.bf16.msra.mxu0 %v1536_v27  ;;  %4414 = vmatpush1.bf16.msra.mxu1 %v1538_v30  ;;  %v1664_v27 = vunpack.c.l.s8.bf16 %v448_v20  ;;  %v1666_v30 = vunpack.c.l.s8.bf16 %v450_v21 }
 0x2b4   : > { %4087 = vmatprep.subr.bf16.mxu0 %v1553_v31  ;;  %4415 = vmatprep.subr.bf16.mxu1 %v1555_v51  ;;  %v1681_v31 = vunpack.c.h.s8.bf16 %v449_v14  ;;  %v1683_v51 = vunpack.c.h.s8.bf16 %v451_v15  ;;  %v513_v14 = vld [vmem:[%s7088_s22 + $0x828] sm:$0xff]  ;;  %v515_v15 = vld [vmem:[%s7088_s22 + $0x838] sm:$0xff] }
 0x2b5   : > { %4117 = vmatprep.mubr.bf16.mxu0 %v7178_v58  ;;  %4445 = vmatprep.mubr.bf16.mxu1 %v7178_v58 }
 0x2b7   : > { %4088 = vmatpush1.bf16.msra.mxu0 %v1552_v23  ;;  %4416 = vmatpush1.bf16.msra.mxu1 %v1554_v35  ;;  %v1680_v23 = vunpack.c.h.s8.bf16 %v448_v20  ;;  %v1682_v35 = vunpack.c.h.s8.bf16 %v450_v21  ;;  %v512_v20 = vld [vmem:[%s7088_s22 + $0x820] sm:$0xff]  ;;  %v514_v21 = vld [vmem:[%s7088_s22 + $0x830] sm:$0xff] }
 0x2b8   : > { %4089 = vmatprep.subr.bf16.mxu0 %v1569_v37  ;;  %4417 = vmatprep.subr.bf16.mxu1 %v1571_v40  ;;  %v1697_v37 = vunpack.c.l.s8.bf16 %v465_v33  ;;  %v1699_v40 = vunpack.c.l.s8.bf16 %v467_v29 }
 0x2bb   : > { %4090 = vmatpush1.bf16.msra.mxu0 %v1568_v44  ;;  %4418 = vmatpush1.bf16.msra.mxu1 %v1570_v45  ;;  %v1696_v44 = vunpack.c.l.s8.bf16 %v464_v41  ;;  %v1698_v45 = vunpack.c.l.s8.bf16 %v466_v42 }
 0x2bc   : > { %4091 = vmatprep.subr.bf16.mxu0 %v1585_v53  ;;  %4419 = vmatprep.subr.bf16.mxu1 %v1587_v47  ;;  %v1713_v53 = vunpack.c.h.s8.bf16 %v465_v33  ;;  %v1715_v47 = vunpack.c.h.s8.bf16 %v467_v29  ;;  %v529_v33 = vld [vmem:[%s7088_s22 + $0x8a8] sm:$0xff]  ;;  %v531_v29 = vld [vmem:[%s7088_s22 + $0x8b8] sm:$0xff] }
 0x2bf   : > { %4092 = vmatpush1.bf16.msra.mxu0 %v1584_v54  ;;  %4420 = vmatpush1.bf16.msra.mxu1 %v1586_v55  ;;  %v1712_v54 = vunpack.c.h.s8.bf16 %v464_v41  ;;  %v1714_v55 = vunpack.c.h.s8.bf16 %v466_v42  ;;  %v528_v41 = vld [vmem:[%s7088_s22 + $0x8a0] sm:$0xff]  ;;  %v530_v42 = vld [vmem:[%s7088_s22 + $0x8b0] sm:$0xff] }
 0x2c0   : > { %4093 = vmatprep.subr.bf16.mxu0 %v1601_v56  ;;  %4421 = vmatprep.subr.bf16.mxu1 %v1603_v57  ;;  %v1729_v56 = vunpack.c.l.s8.bf16 %v481_v48  ;;  %v1731_v57 = vunpack.c.l.s8.bf16 %v483_v49 }
 0x2c3   : > { %4094 = vmatpush1.bf16.msra.mxu0 %v1600_v5  ;;  %4422 = vmatpush1.bf16.msra.mxu1 %v1602_v61  ;;  %v1728_v5 = vunpack.c.l.s8.bf16 %v480_v38  ;;  %v1730_v61 = vunpack.c.l.s8.bf16 %v482_v59 }
 0x2c4   : > { %4095 = vmatprep.subr.bf16.mxu0 %v1617_v62  ;;  %4423 = vmatprep.subr.bf16.mxu1 %v1619_v63  ;;  %v1745_v62 = vunpack.c.h.s8.bf16 %v481_v48  ;;  %v1747_v63 = vunpack.c.h.s8.bf16 %v483_v49  ;;  %v545_v48 = vld [vmem:[%s7088_s22 + $0x928] sm:$0xff]  ;;  %v547_v49 = vld [vmem:[%s7088_s22 + $0x938] sm:$0xff] }
 0x2c7   : > { %4096 = vmatpush1.bf16.msra.mxu0 %v1616_v2  ;;  %4424 = vmatpush1.bf16.msra.mxu1 %v1618_v3  ;;  %v1744_v2 = vunpack.c.h.s8.bf16 %v480_v38  ;;  %v1746_v3 = vunpack.c.h.s8.bf16 %v482_v59  ;;  %v544_v38 = vld [vmem:[%s7088_s22 + $0x920] sm:$0xff]  ;;  %v546_v59 = vld [vmem:[%s7088_s22 + $0x930] sm:$0xff] }
 0x2c8   : > { %4097 = vmatprep.subr.bf16.mxu0 %v1633_v6  ;;  %4425 = vmatprep.subr.bf16.mxu1 %v1635_v7  ;;  %v1761_v6 = vunpack.c.l.s8.bf16 %v497_v0  ;;  %v1763_v7 = vunpack.c.l.s8.bf16 %v499_v1 }
 0x2cb   : > { %4098 = vmatpush1.bf16.msra.mxu0 %v1632_v10  ;;  %4426 = vmatpush1.bf16.msra.mxu1 %v1634_v11  ;;  %v1760_v10 = vunpack.c.l.s8.bf16 %v496_v8  ;;  %v1762_v11 = vunpack.c.l.s8.bf16 %v498_v9 }
 0x2cc   : > { %4099 = vmatprep.subr.bf16.mxu0 %v1649_v25  ;;  %4427 = vmatprep.subr.bf16.mxu1 %v1651_v13  ;;  %v1777_v25 = vunpack.c.h.s8.bf16 %v497_v0  ;;  %v1779_v13 = vunpack.c.h.s8.bf16 %v499_v1  ;;  %v561_v0 = vld [vmem:[%s7088_s22 + $0x9a8] sm:$0xff]  ;;  %v563_v1 = vld [vmem:[%s7088_s22 + $0x9b8] sm:$0xff] }
 0x2cf   : > { %4100 = vmatpush1.bf16.msra.mxu0 %v1648_v16  ;;  %4428 = vmatpush1.bf16.msra.mxu1 %v1650_v17  ;;  %v1776_v16 = vunpack.c.h.s8.bf16 %v496_v8  ;;  %v1778_v17 = vunpack.c.h.s8.bf16 %v498_v9  ;;  %v560_v8 = vld [vmem:[%s7088_s22 + $0x9a0] sm:$0xff]  ;;  %v562_v9 = vld [vmem:[%s7088_s22 + $0x9b0] sm:$0xff] }
 0x2d0   : > { %4101 = vmatprep.subr.bf16.mxu0 %v1665_v18  ;;  %4429 = vmatprep.subr.bf16.mxu1 %v1667_v19  ;;  %v1793_v18 = vunpack.c.l.s8.bf16 %v513_v14  ;;  %v1795_v19 = vunpack.c.l.s8.bf16 %v515_v15 }
 0x2d3   : > { %4102 = vmatpush1.bf16.msra.mxu0 %v1664_v27  ;;  %4430 = vmatpush1.bf16.msra.mxu1 %v1666_v30  ;;  %v1792_v27 = vunpack.c.l.s8.bf16 %v512_v20  ;;  %v1794_v30 = vunpack.c.l.s8.bf16 %v514_v21 }
 0x2d4   : > { %4103 = vmatprep.subr.bf16.mxu0 %v1681_v31  ;;  %4431 = vmatprep.subr.bf16.mxu1 %v1683_v51  ;;  %v1809_v31 = vunpack.c.h.s8.bf16 %v513_v14  ;;  %v1811_v51 = vunpack.c.h.s8.bf16 %v515_v15  ;;  %v577_v14 = vld [vmem:[%s7088_s22 + $0xa28] sm:$0xff]  ;;  %v579_v15 = vld [vmem:[%s7088_s22 + $0xa38] sm:$0xff] }
 0x2d7   : > { %4104 = vmatpush1.bf16.msra.mxu0 %v1680_v23  ;;  %4432 = vmatpush1.bf16.msra.mxu1 %v1682_v35  ;;  %v1808_v23 = vunpack.c.h.s8.bf16 %v512_v20  ;;  %v1810_v35 = vunpack.c.h.s8.bf16 %v514_v21  ;;  %v576_v20 = vld [vmem:[%s7088_s22 + $0xa20] sm:$0xff]  ;;  %v578_v21 = vld [vmem:[%s7088_s22 + $0xa30] sm:$0xff] }
 0x2d8   : > { %4105 = vmatprep.subr.bf16.mxu0 %v1697_v37  ;;  %4433 = vmatprep.subr.bf16.mxu1 %v1699_v40  ;;  %v1825_v37 = vunpack.c.l.s8.bf16 %v529_v33  ;;  %v1827_v40 = vunpack.c.l.s8.bf16 %v531_v29 }
 0x2db   : > { %4106 = vmatpush1.bf16.msra.mxu0 %v1696_v44  ;;  %4434 = vmatpush1.bf16.msra.mxu1 %v1698_v45  ;;  %v1824_v44 = vunpack.c.l.s8.bf16 %v528_v41  ;;  %v1826_v45 = vunpack.c.l.s8.bf16 %v530_v42 }
 0x2dc   : > { %4107 = vmatprep.subr.bf16.mxu0 %v1713_v53  ;;  %4435 = vmatprep.subr.bf16.mxu1 %v1715_v47  ;;  %v1841_v53 = vunpack.c.h.s8.bf16 %v529_v33  ;;  %v1843_v47 = vunpack.c.h.s8.bf16 %v531_v29  ;;  %v593_v33 = vld [vmem:[%s7088_s22 + $0xaa8] sm:$0xff]  ;;  %v595_v29 = vld [vmem:[%s7088_s22 + $0xab8] sm:$0xff] }
 0x2df   : > { %4108 = vmatpush1.bf16.msra.mxu0 %v1712_v54  ;;  %4436 = vmatpush1.bf16.msra.mxu1 %v1714_v55  ;;  %v1840_v54 = vunpack.c.h.s8.bf16 %v528_v41  ;;  %v1842_v55 = vunpack.c.h.s8.bf16 %v530_v42  ;;  %v592_v41 = vld [vmem:[%s7088_s22 + $0xaa0] sm:$0xff]  ;;  %v594_v42 = vld [vmem:[%s7088_s22 + $0xab0] sm:$0xff] }
 0x2e0   : > { %4109 = vmatprep.subr.bf16.mxu0 %v1729_v56  ;;  %4437 = vmatprep.subr.bf16.mxu1 %v1731_v57  ;;  %v1857_v56 = vunpack.c.l.s8.bf16 %v545_v48  ;;  %v1859_v57 = vunpack.c.l.s8.bf16 %v547_v49 }
 0x2e3   : > { %4110 = vmatpush1.bf16.msra.mxu0 %v1728_v5  ;;  %4438 = vmatpush1.bf16.msra.mxu1 %v1730_v61  ;;  %v1856_v5 = vunpack.c.l.s8.bf16 %v544_v38  ;;  %v1858_v61 = vunpack.c.l.s8.bf16 %v546_v59 }
 0x2e4   : > { %4111 = vmatprep.subr.bf16.mxu0 %v1745_v62  ;;  %4439 = vmatprep.subr.bf16.mxu1 %v1747_v63  ;;  %v1873_v62 = vunpack.c.h.s8.bf16 %v545_v48  ;;  %v1875_v63 = vunpack.c.h.s8.bf16 %v547_v49  ;;  %v609_v48 = vld [vmem:[%s7088_s22 + $0xb28] sm:$0xff]  ;;  %v611_v49 = vld [vmem:[%s7088_s22 + $0xb38] sm:$0xff] }
 0x2e7   : > { %4112 = vmatpush1.bf16.msra.mxu0 %v1744_v2  ;;  %4440 = vmatpush1.bf16.msra.mxu1 %v1746_v3  ;;  %v1872_v2 = vunpack.c.h.s8.bf16 %v544_v38  ;;  %v1874_v3 = vunpack.c.h.s8.bf16 %v546_v59  ;;  %v608_v38 = vld [vmem:[%s7088_s22 + $0xb20] sm:$0xff]  ;;  %v610_v59 = vld [vmem:[%s7088_s22 + $0xb30] sm:$0xff] }
 0x2e8   : > { %4113 = vmatprep.subr.bf16.mxu0 %v1761_v6  ;;  %4441 = vmatprep.subr.bf16.mxu1 %v1763_v7  ;;  %v1889_v6 = vunpack.c.l.s8.bf16 %v561_v0  ;;  %v1891_v7 = vunpack.c.l.s8.bf16 %v563_v1 }
 0x2eb   : > { %4114 = vmatpush1.bf16.msra.mxu0 %v1760_v10  ;;  %4442 = vmatpush1.bf16.msra.mxu1 %v1762_v11  ;;  %v1888_v10 = vunpack.c.l.s8.bf16 %v560_v8  ;;  %v1890_v11 = vunpack.c.l.s8.bf16 %v562_v9 }
 0x2ec   : > { %4115 = vmatprep.subr.bf16.mxu0 %v1777_v25  ;;  %4443 = vmatprep.subr.bf16.mxu1 %v1779_v13  ;;  %v1905_v25 = vunpack.c.h.s8.bf16 %v561_v0  ;;  %v1907_v13 = vunpack.c.h.s8.bf16 %v563_v1  ;;  %v625_v0 = vld [vmem:[%s7088_s22 + $0xba8] sm:$0xff]  ;;  %v627_v1 = vld [vmem:[%s7088_s22 + $0xbb8] sm:$0xff] }
 0x2ef   : > { %4116 = vmatpush1.bf16.msra.mxu0 %v1776_v16  ;;  %4444 = vmatpush1.bf16.msra.mxu1 %v1778_v17  ;;  %v1904_v16 = vunpack.c.h.s8.bf16 %v560_v8  ;;  %v1906_v17 = vunpack.c.h.s8.bf16 %v562_v9  ;;  %v624_v8 = vld [vmem:[%s7088_s22 + $0xba0] sm:$0xff]  ;;  %v626_v9 = vld [vmem:[%s7088_s22 + $0xbb0] sm:$0xff] }
 0x2f0   : > { %4126 = vmatprep.subr.bf16.mxu0 %v1793_v18  ;;  %4454 = vmatprep.subr.bf16.mxu1 %v1795_v19  ;;  %v1921_v18 = vunpack.c.l.s8.bf16 %v577_v14  ;;  %v1923_v19 = vunpack.c.l.s8.bf16 %v579_v15 }
 0x2f2   : > { %4118 = vmatmul.mubr.bf16.vlgmr.msra.gmra.mrb[4].mxu0 %v7216_v24  ;;  %4446 = vmatmul.mubr.bf16.vlgmr.msra.gmra.mrb[4].mxu1 %v7216_v24 }
 0x2f3   : > { %4127 = vmatpush1.bf16.msra.mxu0 %v1792_v27  ;;  %4455 = vmatpush1.bf16.msra.mxu1 %v1794_v30  ;;  %v1920_v27 = vunpack.c.l.s8.bf16 %v576_v20  ;;  %v1922_v30 = vunpack.c.l.s8.bf16 %v578_v21 }
 0x2f4   : > { %4128 = vmatprep.subr.bf16.mxu0 %v1809_v31  ;;  %4456 = vmatprep.subr.bf16.mxu1 %v1811_v51  ;;  %v1937_v31 = vunpack.c.h.s8.bf16 %v577_v14  ;;  %v1939_v51 = vunpack.c.h.s8.bf16 %v579_v15  ;;  %v641_v14 = vld [vmem:[%s7088_s22 + $0xc28] sm:$0xff]  ;;  %v643_v15 = vld [vmem:[%s7088_s22 + $0xc38] sm:$0xff] }
 0x2f5   : > { %4158 = vmatprep.mubr.bf16.mxu0 %v7224_v32  ;;  %4486 = vmatprep.mubr.bf16.mxu1 %v7224_v32 }
 0x2f7   : > { %4129 = vmatpush1.bf16.msra.mxu0 %v1808_v23  ;;  %4457 = vmatpush1.bf16.msra.mxu1 %v1810_v35  ;;  %v1936_v23 = vunpack.c.h.s8.bf16 %v576_v20  ;;  %v1938_v35 = vunpack.c.h.s8.bf16 %v578_v21  ;;  %v640_v20 = vld [vmem:[%s7088_s22 + $0xc20] sm:$0xff]  ;;  %v642_v21 = vld [vmem:[%s7088_s22 + $0xc30] sm:$0xff] }
 0x2f8   : > { %4130 = vmatprep.subr.bf16.mxu0 %v1825_v37  ;;  %4458 = vmatprep.subr.bf16.mxu1 %v1827_v40  ;;  %v1953_v37 = vunpack.c.l.s8.bf16 %v593_v33  ;;  %v1955_v40 = vunpack.c.l.s8.bf16 %v595_v29 }
 0x2fb   : > { %4131 = vmatpush1.bf16.msra.mxu0 %v1824_v44  ;;  %4459 = vmatpush1.bf16.msra.mxu1 %v1826_v45  ;;  %v1952_v44 = vunpack.c.l.s8.bf16 %v592_v41  ;;  %v1954_v45 = vunpack.c.l.s8.bf16 %v594_v42 }
 0x2fc   : > { %4132 = vmatprep.subr.bf16.mxu0 %v1841_v53  ;;  %4460 = vmatprep.subr.bf16.mxu1 %v1843_v47  ;;  %v1969_v53 = vunpack.c.h.s8.bf16 %v593_v33  ;;  %v1971_v47 = vunpack.c.h.s8.bf16 %v595_v29  ;;  %v657_v33 = vld [vmem:[%s7088_s22 + $0xca8] sm:$0xff]  ;;  %v659_v29 = vld [vmem:[%s7088_s22 + $0xcb8] sm:$0xff] }
 0x2ff   : > { %4133 = vmatpush1.bf16.msra.mxu0 %v1840_v54  ;;  %4461 = vmatpush1.bf16.msra.mxu1 %v1842_v55  ;;  %v1968_v54 = vunpack.c.h.s8.bf16 %v592_v41  ;;  %v1970_v55 = vunpack.c.h.s8.bf16 %v594_v42  ;;  %v656_v41 = vld [vmem:[%s7088_s22 + $0xca0] sm:$0xff]  ;;  %v658_v42 = vld [vmem:[%s7088_s22 + $0xcb0] sm:$0xff] }
 0x300   : > { %4134 = vmatprep.subr.bf16.mxu0 %v1857_v56  ;;  %4462 = vmatprep.subr.bf16.mxu1 %v1859_v57  ;;  %v1985_v56 = vunpack.c.l.s8.bf16 %v609_v48  ;;  %v1987_v57 = vunpack.c.l.s8.bf16 %v611_v49 }
 0x303   : > { %4135 = vmatpush1.bf16.msra.mxu0 %v1856_v5  ;;  %4463 = vmatpush1.bf16.msra.mxu1 %v1858_v61  ;;  %v1984_v5 = vunpack.c.l.s8.bf16 %v608_v38  ;;  %v1986_v61 = vunpack.c.l.s8.bf16 %v610_v59 }
 0x304   : > { %4136 = vmatprep.subr.bf16.mxu0 %v1873_v62  ;;  %4464 = vmatprep.subr.bf16.mxu1 %v1875_v63  ;;  %v2001_v62 = vunpack.c.h.s8.bf16 %v609_v48  ;;  %v2003_v63 = vunpack.c.h.s8.bf16 %v611_v49  ;;  %v2099_v48 = vunpack.c.h.s8.bf16 %v659_v29  ;;  %v673_v49 = vld [vmem:[%s7088_s22 + $0xd28] sm:$0xff] }
 0x307   : > { %4137 = vmatpush1.bf16.msra.mxu0 %v1872_v2  ;;  %4465 = vmatpush1.bf16.msra.mxu1 %v1874_v3  ;;  %v2000_v2 = vunpack.c.h.s8.bf16 %v608_v38  ;;  %v2002_v3 = vunpack.c.h.s8.bf16 %v610_v59  ;;  %v2113_v38 = vunpack.c.l.s8.bf16 %v673_v49 }
 0x308   : > { %4138 = vmatprep.subr.bf16.mxu0 %v1889_v6  ;;  %4466 = vmatprep.subr.bf16.mxu1 %v1891_v7  ;;  %v2017_v6 = vunpack.c.l.s8.bf16 %v625_v0  ;;  %v2019_v7 = vunpack.c.l.s8.bf16 %v627_v1 }
 0x30b   : > { %4139 = vmatpush1.bf16.msra.mxu0 %v1888_v10  ;;  %4467 = vmatpush1.bf16.msra.mxu1 %v1890_v11  ;;  %v2016_v10 = vunpack.c.l.s8.bf16 %v624_v8  ;;  %v2018_v11 = vunpack.c.l.s8.bf16 %v626_v9 }
 0x30c   : > { %4140 = vmatprep.subr.bf16.mxu0 %v1905_v25  ;;  %4468 = vmatprep.subr.bf16.mxu1 %v1907_v13  ;;  %v2033_v25 = vunpack.c.h.s8.bf16 %v625_v0  ;;  %v2035_v13 = vunpack.c.h.s8.bf16 %v627_v1 }
 0x30f   : > { %4141 = vmatpush1.bf16.msra.mxu0 %v1904_v16  ;;  %4469 = vmatpush1.bf16.msra.mxu1 %v1906_v17  ;;  %v2032_v16 = vunpack.c.h.s8.bf16 %v624_v8  ;;  %v2034_v17 = vunpack.c.h.s8.bf16 %v626_v9  ;;  %v6115_v9 = vld [vmem:[%s7632_s14] sm:$0xff] }
 0x310   : > { %4142 = vmatprep.subr.bf16.mxu0 %v1921_v18  ;;  %4470 = vmatprep.subr.bf16.mxu1 %v1923_v19  ;;  %v2049_v18 = vunpack.c.l.s8.bf16 %v641_v14  ;;  %v2051_v19 = vunpack.c.l.s8.bf16 %v643_v15 }
 0x313   : > { %4143 = vmatpush1.bf16.msra.mxu0 %v1920_v27  ;;  %4471 = vmatpush1.bf16.msra.mxu1 %v1922_v30  ;;  %v2048_v27 = vunpack.c.l.s8.bf16 %v640_v20  ;;  %v2050_v30 = vunpack.c.l.s8.bf16 %v642_v21 }
 0x314   : > { %4144 = vmatprep.subr.bf16.mxu0 %v1937_v31  ;;  %4472 = vmatprep.subr.bf16.mxu1 %v1939_v51  ;;  %v2065_v31 = vunpack.c.h.s8.bf16 %v641_v14  ;;  %v2067_v51 = vunpack.c.h.s8.bf16 %v643_v15 }
 0x317   : > { %4145 = vmatpush1.bf16.msra.mxu0 %v1936_v23  ;;  %4473 = vmatpush1.bf16.msra.mxu1 %v1938_v35  ;;  %v2064_v23 = vunpack.c.h.s8.bf16 %v640_v20  ;;  %v2066_v35 = vunpack.c.h.s8.bf16 %v642_v21 }
 0x318   : > { %4146 = vmatprep.subr.bf16.mxu0 %v1953_v37  ;;  %4474 = vmatprep.subr.bf16.mxu1 %v1955_v40  ;;  %v2081_v37 = vunpack.c.l.s8.bf16 %v657_v33  ;;  %v2083_v40 = vunpack.c.l.s8.bf16 %v659_v29 }
 0x31b   : > { %4147 = vmatpush1.bf16.msra.mxu0 %v1952_v44  ;;  %4475 = vmatpush1.bf16.msra.mxu1 %v1954_v45  ;;  %v6018_v44 = vlaneseq  ;;  %v2080_v45 = vunpack.c.l.s8.bf16 %v656_v41 }
 0x31c   : > { %4148 = vmatprep.subr.bf16.mxu0 %v1969_v53  ;;  %4476 = vmatprep.subr.bf16.mxu1 %v1971_v47  ;;  %v2082_v53 = vunpack.c.l.s8.bf16 %v658_v42  ;;  %v2097_v47 = vunpack.c.h.s8.bf16 %v657_v33 }
 0x31f   : > { %4149 = vmatpush1.bf16.msra.mxu0 %v1968_v54  ;;  %4477 = vmatpush1.bf16.msra.mxu1 %v1970_v55  ;;  %v675_v54 = vld [vmem:[%s7088_s22 + $0xd38] sm:$0xff]  ;;  %v7613_v55 = vshrl.u32 %v6018_v44, 7 }
 0x320   : > { %4150 = vmatprep.subr.bf16.mxu0 %v1985_v56  ;;  %4478 = vmatprep.subr.bf16.mxu1 %v1987_v57  ;;  %v2096_v56 = vunpack.c.h.s8.bf16 %v656_v41  ;;  %v2098_v57 = vunpack.c.h.s8.bf16 %v658_v42  ;;  %v2115_v59 = vunpack.c.l.s8.bf16 %v675_v54  ;;  %v2131_v8 = vunpack.c.h.s8.bf16 %v675_v54 }
 0x323   : > { %4151 = vmatpush1.bf16.msra.mxu0 %v1984_v5  ;;  %4479 = vmatpush1.bf16.msra.mxu1 %v1986_v61  ;;  %v672_v5 = vld [vmem:[%s7088_s22 + $0xd20] sm:$0xff]  ;;  %v674_v61 = vld [vmem:[%s7088_s22 + $0xd30] sm:$0xff] }
 0x324   : > { %4152 = vmatprep.subr.bf16.mxu0 %v2001_v62  ;;  %4480 = vmatprep.subr.bf16.mxu1 %v2003_v63  ;;  %v7618_v62 = vsub.s32 0, %v7613_v55  ;;  %v7621_v63 = vsub.s32 2, %v7613_v55  ;;  %v2112_v0 = vunpack.c.l.s8.bf16 %v672_v5  ;;  %v2114_v1 = vunpack.c.l.s8.bf16 %v674_v61 }
 0x327   : > { %4153 = vmatpush1.bf16.msra.mxu0 %v2000_v2  ;;  %4481 = vmatpush1.bf16.msra.mxu1 %v2002_v3  ;;  %v6014_v2 = vld [vmem:[%s7623_s13] sm:$0xff]  ;;  %v7627_v3 = vsub.s32 1, %v7613_v55 }
 0x328   : > { %4154 = vmatprep.subr.bf16.mxu0 %v2017_v6  ;;  %4482 = vmatprep.subr.bf16.mxu1 %v2019_v7  ;;  %v7630_v6 = vsub.s32 3, %v7613_v55  ;;  %v2129_v7 = vunpack.c.h.s8.bf16 %v673_v49 }
 0x329   : > { %v6025_v14 = vrot.slane %v6014_v2, %v7627_v3  ;;  %v6126_v33 = vrot.slane %v6115_v9, %v7627_v3 }
 0x32a   : > { %v6033_v15 = vrot.slane %v6014_v2, %v7630_v6  ;;  %v6134_v29 = vrot.slane %v6115_v9, %v7630_v6 }
 0x32b   : > { %4155 = vmatpush1.bf16.msra.mxu0 %v2016_v10  ;;  %4483 = vmatpush1.bf16.msra.mxu1 %v2018_v11  ;;  %v689_v10 = vld [vmem:[%s7088_s22 + $0xda8] sm:$0xff]  ;;  %v691_v11 = vld [vmem:[%s7088_s22 + $0xdb8] sm:$0xff] }
 0x32c   : > { %4156 = vmatprep.subr.bf16.mxu0 %v2033_v25  ;;  %4484 = vmatprep.subr.bf16.mxu1 %v2035_v13  ;;  %v6021_v25 = vrot.slane %v6014_v2, %v7618_v62  ;;  %v6029_v13 = vrot.slane %v6014_v2, %v7621_v63  ;;  %v2145_v20 = vunpack.c.l.s8.bf16 %v689_v10  ;;  %v2147_v21 = vunpack.c.l.s8.bf16 %v691_v11 }
 0x32f   : > { %4157 = vmatpush1.bf16.msra.mxu0 %v2032_v16  ;;  %4485 = vmatpush1.bf16.msra.mxu1 %v2034_v17  ;;  %v2128_v16 = vunpack.c.h.s8.bf16 %v672_v5  ;;  %v2130_v17 = vunpack.c.h.s8.bf16 %v674_v61  ;;  %v705_v61 = vld [vmem:[%s7088_s22 + $0xe28] sm:$0xff] }
 0x330   : > { %4167 = vmatprep.subr.bf16.mxu0 %v2049_v18  ;;  %4495 = vmatprep.subr.bf16.mxu1 %v2051_v19  ;;  %v6122_v18 = vrot.slane %v6115_v9, %v7618_v62  ;;  %v6130_v19 = vrot.slane %v6115_v9, %v7621_v63  ;;  %v704_v9 = vld [vmem:[%s7088_s22 + $0xe20] sm:$0xff] }
 0x332   : > { %4159 = vmatmul.mubr.bf16.vlgmr.msra.gmra.mrb[4].mxu0 %v7262_v4  ;;  %4487 = vmatmul.mubr.bf16.vlgmr.msra.gmra.mrb[4].mxu1 %v7262_v4 }
 0x333   : > { %4168 = vmatpush1.bf16.msra.mxu0 %v2048_v27  ;;  %4496 = vmatpush1.bf16.msra.mxu1 %v2050_v30  ;;  %v688_v27 = vld [vmem:[%s7088_s22 + $0xda0] sm:$0xff]  ;;  %v690_v30 = vld [vmem:[%s7088_s22 + $0xdb0] sm:$0xff] }
 0x334   : > { %4169 = vmatprep.subr.bf16.mxu0 %v2065_v31  ;;  %4497 = vmatprep.subr.bf16.mxu1 %v2067_v51  ;;  %v2162_v2 = vunpack.c.h.s8.bf16 %v690_v30 }
 0x335   : > { %4199 = vmatprep.mubr.bf16.mxu0 %v7270_v12  ;;  %4527 = vmatprep.mubr.bf16.mxu1 %v7270_v12 }
 0x337   : > { %4170 = vmatpush1.bf16.msra.mxu0 %v2064_v23  ;;  %4498 = vmatpush1.bf16.msra.mxu1 %v2066_v35 }
 0x338   : > { %4171 = vmatprep.subr.bf16.mxu0 %v2081_v37  ;;  %4499 = vmatprep.subr.bf16.mxu1 %v2083_v40 }
 0x33b   : > { %4172 = vmatpush1.bf16.msra.mxu0 %v2080_v45  ;;  %4500 = vmatpush1.bf16.msra.mxu1 %v2082_v53  ;;  %v2144_v53 = vunpack.c.l.s8.bf16 %v688_v27 }
 0x33c   : > { %4173 = vmatprep.subr.bf16.mxu0 %v2097_v47  ;;  %4501 = vmatprep.subr.bf16.mxu1 %v2099_v48  ;;  %v2146_v47 = vunpack.c.l.s8.bf16 %v690_v30 }
 0x33f   : > { %4174 = vmatpush1.bf16.msra.mxu0 %v2096_v56  ;;  %4502 = vmatpush1.bf16.msra.mxu1 %v2098_v57  ;;  %v2161_v57 = vunpack.c.h.s8.bf16 %v689_v10  ;;  %v2176_v10 = vunpack.c.l.s8.bf16 %v704_v9 }
 0x340   : > { %4175 = vmatprep.subr.bf16.mxu0 %v2113_v38  ;;  %4503 = vmatprep.subr.bf16.mxu1 %v2115_v59  ;;  %v2163_v38 = vunpack.c.h.s8.bf16 %v691_v11 }
 0x343   : > { %4176 = vmatpush1.bf16.msra.mxu0 %v2112_v0  ;;  %4504 = vmatpush1.bf16.msra.mxu1 %v2114_v1  ;;  %v707_v0 = vld [vmem:[%s7088_s22 + $0xe38] sm:$0xff]  ;;  %v2160_v1 = vunpack.c.h.s8.bf16 %v688_v27  ;;  %v722_v27 = vld [vmem:[%s7088_s22 + $0xeb0] sm:$0xff] }
 0x344   : > { %4177 = vmatprep.subr.bf16.mxu0 %v2129_v7  ;;  %4505 = vmatprep.subr.bf16.mxu1 %v2131_v8  ;;  %v2177_v7 = vunpack.c.l.s8.bf16 %v705_v61  ;;  %v2179_v8 = vunpack.c.l.s8.bf16 %v707_v0 }
 0x345   : > { %v3709_v31 = vpop.f32.mrb[0].mxu0  ;;  %v4037_v51 = vpop.f32.mrb[0].mxu1 }
 0x346   : > { %v6098_v23 = vmul.f32 %v6021_v25, %v3709_v31  ;;  %v6100_v35 = vmul.f32 %v6029_v13, %v4037_v51  ;;  %v3711_v37 = vpop.f32.mrb[1].mxu0  ;;  %v4039_v40 = vpop.f32.mrb[1].mxu1  ;;  %v706_v25 = vld [vmem:[%s7088_s22 + $0xe30] sm:$0xff]  ;;  %v2193_v13 = vunpack.c.h.s8.bf16 %v705_v61  ;;  %v2210_v31 = vunpack.c.l.s8.bf16 %v722_v27 }
 0x347   : > { %v6099_v41 = vmul.f32 %v6025_v14, %v3711_v37  ;;  %v6101_v42 = vmul.f32 %v6033_v15, %v4039_v40  ;;  %v3713_v44 = vpop.f32.mrb[2].mxu0  ;;  %v4041_v45 = vpop.f32.mrb[2].mxu1  ;;  %4178 = vmatpush1.bf16.msra.mxu0 %v2128_v16  ;;  %4506 = vmatpush1.bf16.msra.mxu1 %v2130_v17  ;;  %v2178_v11 = vunpack.c.l.s8.bf16 %v706_v25  ;;  %v2195_v14 = vunpack.c.h.s8.bf16 %v707_v0  ;;  %v721_v15 = vld [vmem:[%s7088_s22 + $0xea8] sm:$0xff]  ;;  %v723_v16 = vld [vmem:[%s7088_s22 + $0xeb8] sm:$0xff] }
 0x348   : > { %v7647_v48 = vadd.f32 %v6122_v18, %v6098_v23  ;;  %v7649_v49 = vadd.f32 %v6130_v19, %v6100_v35  ;;  %v3714_v54 = vpop.f32.mrb[3].mxu0  ;;  %v4042_v56 = vpop.f32.mrb[3].mxu1  ;;  %4179 = vmatprep.subr.bf16.mxu0 %v2145_v20  ;;  %4507 = vmatprep.subr.bf16.mxu1 %v2147_v21  ;;  %v2192_v17 = vunpack.c.h.s8.bf16 %v704_v9  ;;  %v2194_v18 = vunpack.c.h.s8.bf16 %v706_v25  ;;  %v720_v21 = vld [vmem:[%s7088_s22 + $0xea0] sm:$0xff]  ;;  %v739_v23 = vld [vmem:[%s7088_s22 + $0xf38] sm:$0xff]  ;;  %v738_v44 = vld [vmem:[%s7088_s22 + $0xf30] sm:$0xff] }
 0x349   : > { %v7651_v59 = vadd.f32 %v6126_v33, %v6099_v41  ;;  %v7653_v5 = vadd.f32 %v6134_v29, %v6101_v42  ;;  %v2209_v19 = vunpack.c.l.s8.bf16 %v721_v15  ;;  %v2211_v20 = vunpack.c.l.s8.bf16 %v723_v16  ;;  %v737_v29 = vld [vmem:[%s7088_s22 + $0xf28] sm:$0xff]  ;;  %v736_v42 = vld [vmem:[%s7088_s22 + $0xf20] sm:$0xff] }
 0x34a   : > { %v2208_v30 = vunpack.c.l.s8.bf16 %v720_v21  ;;  %v2225_v51 = vunpack.c.h.s8.bf16 %v721_v15  ;;  %v2227_v33 = vunpack.c.h.s8.bf16 %v723_v16  ;;  %v2224_v35 = vunpack.c.h.s8.bf16 %v720_v21  ;;  %v753_v56 = vld [vmem:[%s7088_s22 + $0xfa8] sm:$0xff] }
 0x34b   : > { %4180 = vmatpush1.bf16.msra.mxu0 %v2144_v53  ;;  %4508 = vmatpush1.bf16.msra.mxu1 %v2146_v47  ;;  %v2226_v37 = vunpack.c.h.s8.bf16 %v722_v27  ;;  %v2241_v40 = vunpack.c.l.s8.bf16 %v737_v29  ;;  %v2243_v41 = vunpack.c.l.s8.bf16 %v739_v23  ;;  %v2240_v45 = vunpack.c.l.s8.bf16 %v736_v42 }
 0x34c   : > { %4181 = vmatprep.subr.bf16.mxu0 %v2161_v57  ;;  %4509 = vmatprep.subr.bf16.mxu1 %v2163_v38  ;;  %v2242_v53 = vunpack.c.l.s8.bf16 %v738_v44  ;;  %v2257_v47 = vunpack.c.h.s8.bf16 %v737_v29  ;;  %v2259_v54 = vunpack.c.h.s8.bf16 %v739_v23  ;;  %v755_v57 = vld [vmem:[%s7088_s22 + $0xfb8] sm:$0xff]  ;;  %v2256_v38 = vunpack.c.h.s8.bf16 %v736_v42 }
 0x34d   : > { %v2258_v61 = vunpack.c.h.s8.bf16 %v738_v44  ;;  %v2273_v0 = vunpack.c.l.s8.bf16 %v753_v56  ;;  %v2289_v25 = vunpack.c.h.s8.bf16 %v753_v56  ;;  %6748 = vtanh.f32 (!%p6419_p10), %v7647_v48 }
 0x34e   : > { %6750 = vtanh.f32 (!%p6419_p10), %v7651_v59 }
 0x34f   : > { %4182 = vmatpush1.bf16.msra.mxu0 %v2160_v1  ;;  %4510 = vmatpush1.bf16.msra.mxu1 %v2162_v2  ;;  %v2275_v1 = vunpack.c.l.s8.bf16 %v755_v57  ;;  %v752_v2 = vld [vmem:[%s7088_s22 + $0xfa0] sm:$0xff]  ;;  %6752 = vtanh.f32 (!%p6419_p10), %v7649_v49 }
 0x350   : > { %4183 = vmatprep.subr.bf16.mxu0 %v2177_v7  ;;  %4511 = vmatprep.subr.bf16.mxu1 %v2179_v8  ;;  %v754_v7 = vld [vmem:[%s7088_s22 + $0xfb0] sm:$0xff]  ;;  %v2272_v8 = vunpack.c.l.s8.bf16 %v752_v2  ;;  %6754 = vtanh.f32 (!%p6419_p10), %v7653_v5 }
 0x351   : > { %v2274_v9 = vunpack.c.l.s8.bf16 %v754_v7  ;;  %v2290_v15 = vunpack.c.h.s8.bf16 %v754_v7 }
 0x353   : > { %4184 = vmatpush1.bf16.msra.mxu0 %v2176_v10  ;;  %4512 = vmatpush1.bf16.msra.mxu1 %v2178_v11  ;;  %v2291_v10 = vunpack.c.h.s8.bf16 %v755_v57  ;;  %v769_v11 = vld [vmem:[%s7088_s22 + $0x1028] sm:$0xff] }
 0x354   : > { %4185 = vmatprep.subr.bf16.mxu0 %v2193_v13  ;;  %4513 = vmatprep.subr.bf16.mxu1 %v2195_v14  ;;  %v771_v13 = vld [vmem:[%s7088_s22 + $0x1038] sm:$0xff]  ;;  %v2288_v14 = vunpack.c.h.s8.bf16 %v752_v2  ;;  %v2305_v16 = vunpack.c.l.s8.bf16 %v769_v11  ;;  %v2321_v27 = vunpack.c.h.s8.bf16 %v769_v11 }
 0x357   : > { %4186 = vmatpush1.bf16.msra.mxu0 %v2192_v17  ;;  %4514 = vmatpush1.bf16.msra.mxu1 %v2194_v18  ;;  %v2307_v17 = vunpack.c.l.s8.bf16 %v771_v13  ;;  %v768_v18 = vld [vmem:[%s7088_s22 + $0x1020] sm:$0xff] }
 0x358   : > { %4187 = vmatprep.subr.bf16.mxu0 %v2209_v19  ;;  %4515 = vmatprep.subr.bf16.mxu1 %v2211_v20  ;;  %v770_v19 = vld [vmem:[%s7088_s22 + $0x1030] sm:$0xff]  ;;  %v2304_v20 = vunpack.c.l.s8.bf16 %v768_v18 }
 0x359   : > { %v2306_v21 = vunpack.c.l.s8.bf16 %v770_v19  ;;  %v2322_v29 = vunpack.c.h.s8.bf16 %v770_v19 }
 0x35b   : > { %4188 = vmatpush1.bf16.msra.mxu0 %v2208_v30  ;;  %4516 = vmatpush1.bf16.msra.mxu1 %v2210_v31  ;;  %v2323_v30 = vunpack.c.h.s8.bf16 %v771_v13  ;;  %v785_v31 = vld [vmem:[%s7088_s22 + $0x10a8] sm:$0xff] }
 0x35c   : > { %4189 = vmatprep.subr.bf16.mxu0 %v2225_v51  ;;  %4517 = vmatprep.subr.bf16.mxu1 %v2227_v33  ;;  %v787_v51 = vld [vmem:[%s7088_s22 + $0x10b8] sm:$0xff]  ;;  %v2320_v33 = vunpack.c.h.s8.bf16 %v768_v18  ;;  %v2337_v23 = vunpack.c.l.s8.bf16 %v785_v31  ;;  %v2353_v44 = vunpack.c.h.s8.bf16 %v785_v31 }
 0x35f   : > { %4190 = vmatpush1.bf16.msra.mxu0 %v2224_v35  ;;  %4518 = vmatpush1.bf16.msra.mxu1 %v2226_v37  ;;  %v2339_v35 = vunpack.c.l.s8.bf16 %v787_v51  ;;  %v784_v37 = vld [vmem:[%s7088_s22 + $0x10a0] sm:$0xff] }
 0x360   : > { %4191 = vmatprep.subr.bf16.mxu0 %v2241_v40  ;;  %4519 = vmatprep.subr.bf16.mxu1 %v2243_v41  ;;  %v786_v40 = vld [vmem:[%s7088_s22 + $0x10b0] sm:$0xff]  ;;  %v2336_v41 = vunpack.c.l.s8.bf16 %v784_v37 }
 0x361   : > { %v2338_v42 = vunpack.c.l.s8.bf16 %v786_v40  ;;  %v2354_v56 = vunpack.c.h.s8.bf16 %v786_v40 }
 0x363   : > { %4192 = vmatpush1.bf16.msra.mxu0 %v2240_v45  ;;  %4520 = vmatpush1.bf16.msra.mxu1 %v2242_v53  ;;  %v2355_v45 = vunpack.c.h.s8.bf16 %v787_v51  ;;  %v801_v53 = vld [vmem:[%s7088_s22 + $0x1128] sm:$0xff] }
 0x364   : > { %4193 = vmatprep.subr.bf16.mxu0 %v2257_v47  ;;  %4521 = vmatprep.subr.bf16.mxu1 %v2259_v54  ;;  %v803_v47 = vld [vmem:[%s7088_s22 + $0x1138] sm:$0xff]  ;;  %v2352_v54 = vunpack.c.h.s8.bf16 %v784_v37  ;;  %v2369_v57 = vunpack.c.l.s8.bf16 %v801_v53  ;;  %v2385_v7 = vunpack.c.h.s8.bf16 %v801_v53 }
 0x367   : > { %4194 = vmatpush1.bf16.msra.mxu0 %v2256_v38  ;;  %4522 = vmatpush1.bf16.msra.mxu1 %v2258_v61  ;;  %v2371_v38 = vunpack.c.l.s8.bf16 %v803_v47  ;;  %v800_v61 = vld [vmem:[%s7088_s22 + $0x1120] sm:$0xff] }
 0x368   : > { %4195 = vmatprep.subr.bf16.mxu0 %v2273_v0  ;;  %4523 = vmatprep.subr.bf16.mxu1 %v2275_v1  ;;  %v802_v0 = vld [vmem:[%s7088_s22 + $0x1130] sm:$0xff]  ;;  %v2368_v1 = vunpack.c.l.s8.bf16 %v800_v61 }
 0x369   : > { %v2370_v2 = vunpack.c.l.s8.bf16 %v802_v0  ;;  %v2386_v11 = vunpack.c.h.s8.bf16 %v802_v0 }
 0x36b   : > { %4196 = vmatpush1.bf16.msra.mxu0 %v2272_v8  ;;  %4524 = vmatpush1.bf16.msra.mxu1 %v2274_v9  ;;  %v2387_v8 = vunpack.c.h.s8.bf16 %v803_v47  ;;  %v817_v9 = vld [vmem:[%s7088_s22 + $0x11a8] sm:$0xff] }
 0x36c   : > { %4197 = vmatprep.subr.bf16.mxu0 %v2289_v25  ;;  %4525 = vmatprep.subr.bf16.mxu1 %v2291_v10  ;;  %v819_v25 = vld [vmem:[%s7088_s22 + $0x11b8] sm:$0xff]  ;;  %v2384_v10 = vunpack.c.h.s8.bf16 %v800_v61  ;;  %v2401_v13 = vunpack.c.l.s8.bf16 %v817_v9  ;;  %v2417_v19 = vunpack.c.h.s8.bf16 %v817_v9 }
 0x36f   : > { %4198 = vmatpush1.bf16.msra.mxu0 %v2288_v14  ;;  %4526 = vmatpush1.bf16.msra.mxu1 %v2290_v15  ;;  %v2403_v14 = vunpack.c.l.s8.bf16 %v819_v25  ;;  %v816_v15 = vld [vmem:[%s7088_s22 + $0x11a0] sm:$0xff] }
 0x370   : > { %4208 = vmatprep.subr.bf16.mxu0 %v2305_v16  ;;  %4536 = vmatprep.subr.bf16.mxu1 %v2307_v17  ;;  %v818_v16 = vld [vmem:[%s7088_s22 + $0x11b0] sm:$0xff]  ;;  %v2400_v17 = vunpack.c.l.s8.bf16 %v816_v15 }
 0x371   : > { %v2402_v18 = vunpack.c.l.s8.bf16 %v818_v16  ;;  %v2418_v31 = vunpack.c.h.s8.bf16 %v818_v16 }
 0x372   : > { %4200 = vmatmul.mubr.bf16.vlgmr.msra.gmra.mrb[4].mxu0 %v7308_v52  ;;  %4528 = vmatmul.mubr.bf16.vlgmr.msra.gmra.mrb[4].mxu1 %v7308_v52 }
 0x373   : > { %4209 = vmatpush1.bf16.msra.mxu0 %v2304_v20  ;;  %4537 = vmatpush1.bf16.msra.mxu1 %v2306_v21  ;;  %v2419_v20 = vunpack.c.h.s8.bf16 %v819_v25  ;;  %v833_v21 = vld [vmem:[%s7088_s22 + $0x1228] sm:$0xff] }
 0x374   : > { %4210 = vmatprep.subr.bf16.mxu0 %v2321_v27  ;;  %4538 = vmatprep.subr.bf16.mxu1 %v2323_v30  ;;  %v835_v27 = vld [vmem:[%s7088_s22 + $0x1238] sm:$0xff]  ;;  %v2416_v30 = vunpack.c.h.s8.bf16 %v816_v15  ;;  %v2433_v51 = vunpack.c.l.s8.bf16 %v833_v21  ;;  %v2449_v40 = vunpack.c.h.s8.bf16 %v833_v21 }
 0x375   : > { %4240 = vmatprep.mubr.bf16.mxu0 %v7316_v60  ;;  %4568 = vmatprep.mubr.bf16.mxu1 %v7316_v60 }
 0x377   : > { %4211 = vmatpush1.bf16.msra.mxu0 %v2320_v33  ;;  %4539 = vmatpush1.bf16.msra.mxu1 %v2322_v29  ;;  %v2435_v33 = vunpack.c.l.s8.bf16 %v835_v27  ;;  %v832_v29 = vld [vmem:[%s7088_s22 + $0x1220] sm:$0xff] }
 0x378   : > { %4212 = vmatprep.subr.bf16.mxu0 %v2337_v23  ;;  %4540 = vmatprep.subr.bf16.mxu1 %v2339_v35  ;;  %v834_v23 = vld [vmem:[%s7088_s22 + $0x1230] sm:$0xff]  ;;  %v2432_v35 = vunpack.c.l.s8.bf16 %v832_v29 }
 0x379   : > { %v2434_v37 = vunpack.c.l.s8.bf16 %v834_v23  ;;  %v2450_v53 = vunpack.c.h.s8.bf16 %v834_v23 }
 0x37b   : > { %4213 = vmatpush1.bf16.msra.mxu0 %v2336_v41  ;;  %4541 = vmatpush1.bf16.msra.mxu1 %v2338_v42  ;;  %v2451_v41 = vunpack.c.h.s8.bf16 %v835_v27  ;;  %v849_v42 = vld [vmem:[%s7088_s22 + $0x12a8] sm:$0xff] }
 0x37c   : > { %4214 = vmatprep.subr.bf16.mxu0 %v2353_v44  ;;  %4542 = vmatprep.subr.bf16.mxu1 %v2355_v45  ;;  %v851_v44 = vld [vmem:[%s7088_s22 + $0x12b8] sm:$0xff]  ;;  %v2448_v45 = vunpack.c.h.s8.bf16 %v832_v29  ;;  %v2465_v47 = vunpack.c.l.s8.bf16 %v849_v42  ;;  %v2481_v0 = vunpack.c.h.s8.bf16 %v849_v42 }
 0x37f   : > { %4215 = vmatpush1.bf16.msra.mxu0 %v2352_v54  ;;  %4543 = vmatpush1.bf16.msra.mxu1 %v2354_v56  ;;  %v2467_v54 = vunpack.c.l.s8.bf16 %v851_v44  ;;  %v848_v56 = vld [vmem:[%s7088_s22 + $0x12a0] sm:$0xff] }
 0x380   : > { %4216 = vmatprep.subr.bf16.mxu0 %v2369_v57  ;;  %4544 = vmatprep.subr.bf16.mxu1 %v2371_v38  ;;  %v850_v57 = vld [vmem:[%s7088_s22 + $0x12b0] sm:$0xff]  ;;  %v2464_v38 = vunpack.c.l.s8.bf16 %v848_v56 }
 0x381   : > { %v2466_v61 = vunpack.c.l.s8.bf16 %v850_v57  ;;  %v2482_v9 = vunpack.c.h.s8.bf16 %v850_v57 }
 0x383   : > { %4217 = vmatpush1.bf16.msra.mxu0 %v2368_v1  ;;  %4545 = vmatpush1.bf16.msra.mxu1 %v2370_v2  ;;  %v2483_v1 = vunpack.c.h.s8.bf16 %v851_v44  ;;  %v865_v2 = vld [vmem:[%s7088_s22 + $0x1328] sm:$0xff] }
 0x384   : > { %4218 = vmatprep.subr.bf16.mxu0 %v2385_v7  ;;  %4546 = vmatprep.subr.bf16.mxu1 %v2387_v8  ;;  %v867_v7 = vld [vmem:[%s7088_s22 + $0x1338] sm:$0xff]  ;;  %v2480_v8 = vunpack.c.h.s8.bf16 %v848_v56  ;;  %v2497_v25 = vunpack.c.l.s8.bf16 %v865_v2  ;;  %v2513_v16 = vunpack.c.h.s8.bf16 %v865_v2 }
 0x387   : > { %4219 = vmatpush1.bf16.msra.mxu0 %v2384_v10  ;;  %4547 = vmatpush1.bf16.msra.mxu1 %v2386_v11  ;;  %v2499_v10 = vunpack.c.l.s8.bf16 %v867_v7  ;;  %v864_v11 = vld [vmem:[%s7088_s22 + $0x1320] sm:$0xff] }
 0x388   : > { %4220 = vmatprep.subr.bf16.mxu0 %v2401_v13  ;;  %4548 = vmatprep.subr.bf16.mxu1 %v2403_v14  ;;  %v866_v13 = vld [vmem:[%s7088_s22 + $0x1330] sm:$0xff]  ;;  %v2496_v14 = vunpack.c.l.s8.bf16 %v864_v11 }
 0x389   : > { %v2498_v15 = vunpack.c.l.s8.bf16 %v866_v13  ;;  %v2514_v21 = vunpack.c.h.s8.bf16 %v866_v13 }
 0x38b   : > { %4221 = vmatpush1.bf16.msra.mxu0 %v2400_v17  ;;  %4549 = vmatpush1.bf16.msra.mxu1 %v2402_v18  ;;  %v2515_v17 = vunpack.c.h.s8.bf16 %v867_v7  ;;  %v881_v18 = vld [vmem:[%s7088_s22 + $0x13a8] sm:$0xff] }
 0x38c   : > { %4222 = vmatprep.subr.bf16.mxu0 %v2417_v19  ;;  %4550 = vmatprep.subr.bf16.mxu1 %v2419_v20  ;;  %v883_v19 = vld [vmem:[%s7088_s22 + $0x13b8] sm:$0xff]  ;;  %v2512_v20 = vunpack.c.h.s8.bf16 %v864_v11  ;;  %v2529_v27 = vunpack.c.l.s8.bf16 %v881_v18  ;;  %v2545_v23 = vunpack.c.h.s8.bf16 %v881_v18 }
 0x38f   : > { %4223 = vmatpush1.bf16.msra.mxu0 %v2416_v30  ;;  %4551 = vmatpush1.bf16.msra.mxu1 %v2418_v31  ;;  %v2531_v30 = vunpack.c.l.s8.bf16 %v883_v19  ;;  %v880_v31 = vld [vmem:[%s7088_s22 + $0x13a0] sm:$0xff] }
 0x390   : > { %4224 = vmatprep.subr.bf16.mxu0 %v2433_v51  ;;  %4552 = vmatprep.subr.bf16.mxu1 %v2435_v33  ;;  %v882_v51 = vld [vmem:[%s7088_s22 + $0x13b0] sm:$0xff]  ;;  %v2528_v33 = vunpack.c.l.s8.bf16 %v880_v31 }
 0x391   : > { %v2530_v29 = vunpack.c.l.s8.bf16 %v882_v51  ;;  %v2546_v42 = vunpack.c.h.s8.bf16 %v882_v51 }
 0x393   : > { %4225 = vmatpush1.bf16.msra.mxu0 %v2432_v35  ;;  %4553 = vmatpush1.bf16.msra.mxu1 %v2434_v37  ;;  %v2547_v35 = vunpack.c.h.s8.bf16 %v883_v19  ;;  %v897_v37 = vld [vmem:[%s7088_s22 + $0x1428] sm:$0xff] }
 0x394   : > { %4226 = vmatprep.subr.bf16.mxu0 %v2449_v40  ;;  %4554 = vmatprep.subr.bf16.mxu1 %v2451_v41  ;;  %v899_v40 = vld [vmem:[%s7088_s22 + $0x1438] sm:$0xff]  ;;  %v2544_v41 = vunpack.c.h.s8.bf16 %v880_v31  ;;  %v2561_v44 = vunpack.c.l.s8.bf16 %v897_v37  ;;  %v2577_v57 = vunpack.c.h.s8.bf16 %v897_v37 }
 0x397   : > { %4227 = vmatpush1.bf16.msra.mxu0 %v2448_v45  ;;  %4555 = vmatpush1.bf16.msra.mxu1 %v2450_v53  ;;  %v2563_v45 = vunpack.c.l.s8.bf16 %v899_v40  ;;  %v896_v53 = vld [vmem:[%s7088_s22 + $0x1420] sm:$0xff] }
 0x398   : > { %4228 = vmatprep.subr.bf16.mxu0 %v2465_v47  ;;  %4556 = vmatprep.subr.bf16.mxu1 %v2467_v54  ;;  %v898_v47 = vld [vmem:[%s7088_s22 + $0x1430] sm:$0xff]  ;;  %v2560_v54 = vunpack.c.l.s8.bf16 %v896_v53 }
 0x399   : > { %v2562_v56 = vunpack.c.l.s8.bf16 %v898_v47  ;;  %v2578_v2 = vunpack.c.h.s8.bf16 %v898_v47 }
 0x39b   : > { %4229 = vmatpush1.bf16.msra.mxu0 %v2464_v38  ;;  %4557 = vmatpush1.bf16.msra.mxu1 %v2466_v61  ;;  %v2579_v38 = vunpack.c.h.s8.bf16 %v899_v40  ;;  %v913_v61 = vld [vmem:[%s7088_s22 + $0x14a8] sm:$0xff] }
 0x39c   : > { %4230 = vmatprep.subr.bf16.mxu0 %v2481_v0  ;;  %4558 = vmatprep.subr.bf16.mxu1 %v2483_v1  ;;  %v915_v0 = vld [vmem:[%s7088_s22 + $0x14b8] sm:$0xff]  ;;  %v2576_v1 = vunpack.c.h.s8.bf16 %v896_v53  ;;  %v2593_v7 = vunpack.c.l.s8.bf16 %v913_v61  ;;  %v2609_v13 = vunpack.c.h.s8.bf16 %v913_v61 }
 0x39f   : > { %4231 = vmatpush1.bf16.msra.mxu0 %v2480_v8  ;;  %4559 = vmatpush1.bf16.msra.mxu1 %v2482_v9  ;;  %v2595_v8 = vunpack.c.l.s8.bf16 %v915_v0  ;;  %v912_v9 = vld [vmem:[%s7088_s22 + $0x14a0] sm:$0xff] }
 0x3a0   : > { %4232 = vmatprep.subr.bf16.mxu0 %v2497_v25  ;;  %4560 = vmatprep.subr.bf16.mxu1 %v2499_v10  ;;  %v914_v25 = vld [vmem:[%s7088_s22 + $0x14b0] sm:$0xff]  ;;  %v2592_v10 = vunpack.c.l.s8.bf16 %v912_v9 }
 0x3a1   : > { %v2594_v11 = vunpack.c.l.s8.bf16 %v914_v25  ;;  %v2610_v18 = vunpack.c.h.s8.bf16 %v914_v25 }
 0x3a3   : > { %4233 = vmatpush1.bf16.msra.mxu0 %v2496_v14  ;;  %4561 = vmatpush1.bf16.msra.mxu1 %v2498_v15  ;;  %v2611_v14 = vunpack.c.h.s8.bf16 %v915_v0  ;;  %v929_v15 = vld [vmem:[%s7088_s22 + $0x1528] sm:$0xff] }
 0x3a4   : > { %4234 = vmatprep.subr.bf16.mxu0 %v2513_v16  ;;  %4562 = vmatprep.subr.bf16.mxu1 %v2515_v17  ;;  %v931_v16 = vld [vmem:[%s7088_s22 + $0x1538] sm:$0xff]  ;;  %v2608_v17 = vunpack.c.h.s8.bf16 %v912_v9  ;;  %v2625_v19 = vunpack.c.l.s8.bf16 %v929_v15  ;;  %v2641_v51 = vunpack.c.h.s8.bf16 %v929_v15 }
 0x3a7   : > { %4235 = vmatpush1.bf16.msra.mxu0 %v2512_v20  ;;  %4563 = vmatpush1.bf16.msra.mxu1 %v2514_v21  ;;  %v2627_v20 = vunpack.c.l.s8.bf16 %v931_v16  ;;  %v928_v21 = vld [vmem:[%s7088_s22 + $0x1520] sm:$0xff] }
 0x3a8   : > { %4236 = vmatprep.subr.bf16.mxu0 %v2529_v27  ;;  %4564 = vmatprep.subr.bf16.mxu1 %v2531_v30  ;;  %v930_v27 = vld [vmem:[%s7088_s22 + $0x1530] sm:$0xff]  ;;  %v2624_v30 = vunpack.c.l.s8.bf16 %v928_v21 }
 0x3a9   : > { %v2626_v31 = vunpack.c.l.s8.bf16 %v930_v27  ;;  %v2642_v37 = vunpack.c.h.s8.bf16 %v930_v27 }
 0x3ab   : > { %4237 = vmatpush1.bf16.msra.mxu0 %v2528_v33  ;;  %4565 = vmatpush1.bf16.msra.mxu1 %v2530_v29  ;;  %v2643_v33 = vunpack.c.h.s8.bf16 %v931_v16  ;;  %v945_v29 = vld [vmem:[%s7088_s22 + $0x15a8] sm:$0xff] }
 0x3ac   : > { %4238 = vmatprep.subr.bf16.mxu0 %v2545_v23  ;;  %4566 = vmatprep.subr.bf16.mxu1 %v2547_v35  ;;  %v947_v23 = vld [vmem:[%s7088_s22 + $0x15b8] sm:$0xff]  ;;  %v2640_v35 = vunpack.c.h.s8.bf16 %v928_v21  ;;  %v2657_v40 = vunpack.c.l.s8.bf16 %v945_v29  ;;  %v2673_v47 = vunpack.c.h.s8.bf16 %v945_v29 }
 0x3af   : > { %4239 = vmatpush1.bf16.msra.mxu0 %v2544_v41  ;;  %4567 = vmatpush1.bf16.msra.mxu1 %v2546_v42  ;;  %v2659_v41 = vunpack.c.l.s8.bf16 %v947_v23  ;;  %v944_v42 = vld [vmem:[%s7088_s22 + $0x15a0] sm:$0xff] }
 0x3b0   : > { %4249 = vmatprep.subr.bf16.mxu0 %v2561_v44  ;;  %4577 = vmatprep.subr.bf16.mxu1 %v2563_v45  ;;  %v946_v44 = vld [vmem:[%s7088_s22 + $0x15b0] sm:$0xff]  ;;  %v2656_v45 = vunpack.c.l.s8.bf16 %v944_v42 }
 0x3b1   : > { %v2658_v53 = vunpack.c.l.s8.bf16 %v946_v44  ;;  %v2674_v61 = vunpack.c.h.s8.bf16 %v946_v44 }
 0x3b2   : > { %4241 = vmatmul.mubr.bf16.vlgmr.msra.gmra.mrb[4].mxu0 %v7354_v36  ;;  %4569 = vmatmul.mubr.bf16.vlgmr.msra.gmra.mrb[4].mxu1 %v7354_v36 }
 0x3b3   : > { %4250 = vmatpush1.bf16.msra.mxu0 %v2560_v54  ;;  %4578 = vmatpush1.bf16.msra.mxu1 %v2562_v56  ;;  %v2675_v54 = vunpack.c.h.s8.bf16 %v947_v23  ;;  %v961_v56 = vld [vmem:[%s7088_s22 + $0x1628] sm:$0xff] }
 0x3b4   : > { %4251 = vmatprep.subr.bf16.mxu0 %v2577_v57  ;;  %4579 = vmatprep.subr.bf16.mxu1 %v2579_v38  ;;  %v963_v57 = vld [vmem:[%s7088_s22 + $0x1638] sm:$0xff]  ;;  %v2672_v38 = vunpack.c.h.s8.bf16 %v944_v42  ;;  %v2689_v0 = vunpack.c.l.s8.bf16 %v961_v56  ;;  %v2705_v25 = vunpack.c.h.s8.bf16 %v961_v56 }
 0x3b5   : > { %4281 = vmatprep.mubr.bf16.mxu0 %v7362_v46  ;;  %4609 = vmatprep.mubr.bf16.mxu1 %v7362_v46 }
 0x3b7   : > { %4252 = vmatpush1.bf16.msra.mxu0 %v2576_v1  ;;  %4580 = vmatpush1.bf16.msra.mxu1 %v2578_v2  ;;  %v2691_v1 = vunpack.c.l.s8.bf16 %v963_v57  ;;  %v960_v2 = vld [vmem:[%s7088_s22 + $0x1620] sm:$0xff] }
 0x3b8   : > { %4253 = vmatprep.subr.bf16.mxu0 %v2593_v7  ;;  %4581 = vmatprep.subr.bf16.mxu1 %v2595_v8  ;;  %v962_v7 = vld [vmem:[%s7088_s22 + $0x1630] sm:$0xff]  ;;  %v2688_v8 = vunpack.c.l.s8.bf16 %v960_v2 }
 0x3b9   : > { %v2690_v9 = vunpack.c.l.s8.bf16 %v962_v7  ;;  %v2706_v15 = vunpack.c.h.s8.bf16 %v962_v7 }
 0x3bb   : > { %4254 = vmatpush1.bf16.msra.mxu0 %v2592_v10  ;;  %4582 = vmatpush1.bf16.msra.mxu1 %v2594_v11  ;;  %v2707_v10 = vunpack.c.h.s8.bf16 %v963_v57  ;;  %v977_v11 = vld [vmem:[%s7088_s22 + $0x16a8] sm:$0xff] }
 0x3bc   : > { %4255 = vmatprep.subr.bf16.mxu0 %v2609_v13  ;;  %4583 = vmatprep.subr.bf16.mxu1 %v2611_v14  ;;  %v979_v13 = vld [vmem:[%s7088_s22 + $0x16b8] sm:$0xff]  ;;  %v2704_v14 = vunpack.c.h.s8.bf16 %v960_v2  ;;  %v2721_v16 = vunpack.c.l.s8.bf16 %v977_v11  ;;  %v2737_v27 = vunpack.c.h.s8.bf16 %v977_v11 }
 0x3bf   : > { %4256 = vmatpush1.bf16.msra.mxu0 %v2608_v17  ;;  %4584 = vmatpush1.bf16.msra.mxu1 %v2610_v18  ;;  %v2723_v17 = vunpack.c.l.s8.bf16 %v979_v13  ;;  %v976_v18 = vld [vmem:[%s7088_s22 + $0x16a0] sm:$0xff] }
 0x3c0   : > { %4257 = vmatprep.subr.bf16.mxu0 %v2625_v19  ;;  %4585 = vmatprep.subr.bf16.mxu1 %v2627_v20  ;;  %v978_v19 = vld [vmem:[%s7088_s22 + $0x16b0] sm:$0xff]  ;;  %v2720_v20 = vunpack.c.l.s8.bf16 %v976_v18 }
 0x3c1   : > { %v2722_v21 = vunpack.c.l.s8.bf16 %v978_v19  ;;  %v2738_v29 = vunpack.c.h.s8.bf16 %v978_v19 }
 0x3c3   : > { %4258 = vmatpush1.bf16.msra.mxu0 %v2624_v30  ;;  %4586 = vmatpush1.bf16.msra.mxu1 %v2626_v31  ;;  %v2739_v30 = vunpack.c.h.s8.bf16 %v979_v13  ;;  %v993_v31 = vld [vmem:[%s7088_s22 + $0x1728] sm:$0xff] }
 0x3c4   : > { %4259 = vmatprep.subr.bf16.mxu0 %v2641_v51  ;;  %4587 = vmatprep.subr.bf16.mxu1 %v2643_v33  ;;  %v995_v51 = vld [vmem:[%s7088_s22 + $0x1738] sm:$0xff]  ;;  %v2736_v33 = vunpack.c.h.s8.bf16 %v976_v18  ;;  %v2753_v23 = vunpack.c.l.s8.bf16 %v993_v31  ;;  %v2769_v44 = vunpack.c.h.s8.bf16 %v993_v31 }
 0x3c7   : > { %4260 = vmatpush1.bf16.msra.mxu0 %v2640_v35  ;;  %4588 = vmatpush1.bf16.msra.mxu1 %v2642_v37  ;;  %v2755_v35 = vunpack.c.l.s8.bf16 %v995_v51  ;;  %v992_v37 = vld [vmem:[%s7088_s22 + $0x1720] sm:$0xff] }
 0x3c8   : > { %4261 = vmatprep.subr.bf16.mxu0 %v2657_v40  ;;  %4589 = vmatprep.subr.bf16.mxu1 %v2659_v41  ;;  %v994_v40 = vld [vmem:[%s7088_s22 + $0x1730] sm:$0xff]  ;;  %v2752_v41 = vunpack.c.l.s8.bf16 %v992_v37 }
 0x3c9   : > { %v2754_v42 = vunpack.c.l.s8.bf16 %v994_v40  ;;  %v2770_v56 = vunpack.c.h.s8.bf16 %v994_v40 }
 0x3cb   : > { %4262 = vmatpush1.bf16.msra.mxu0 %v2656_v45  ;;  %4590 = vmatpush1.bf16.msra.mxu1 %v2658_v53  ;;  %v2771_v45 = vunpack.c.h.s8.bf16 %v995_v51  ;;  %v1009_v53 = vld [vmem:[%s7088_s22 + $0x17a8] sm:$0xff] }
 0x3cc   : > { %4263 = vmatprep.subr.bf16.mxu0 %v2673_v47  ;;  %4591 = vmatprep.subr.bf16.mxu1 %v2675_v54  ;;  %v1011_v47 = vld [vmem:[%s7088_s22 + $0x17b8] sm:$0xff]  ;;  %v2768_v54 = vunpack.c.h.s8.bf16 %v992_v37  ;;  %v2785_v57 = vunpack.c.l.s8.bf16 %v1009_v53  ;;  %v2801_v7 = vunpack.c.h.s8.bf16 %v1009_v53 }
 0x3cf   : > { %4264 = vmatpush1.bf16.msra.mxu0 %v2672_v38  ;;  %4592 = vmatpush1.bf16.msra.mxu1 %v2674_v61  ;;  %v2787_v38 = vunpack.c.l.s8.bf16 %v1011_v47  ;;  %v1008_v61 = vld [vmem:[%s7088_s22 + $0x17a0] sm:$0xff] }
 0x3d0   : > { %4265 = vmatprep.subr.bf16.mxu0 %v2689_v0  ;;  %4593 = vmatprep.subr.bf16.mxu1 %v2691_v1  ;;  %v1010_v0 = vld [vmem:[%s7088_s22 + $0x17b0] sm:$0xff]  ;;  %v2784_v1 = vunpack.c.l.s8.bf16 %v1008_v61 }
 0x3d1   : > { %v2786_v2 = vunpack.c.l.s8.bf16 %v1010_v0  ;;  %v2802_v11 = vunpack.c.h.s8.bf16 %v1010_v0 }
 0x3d3   : > { %4266 = vmatpush1.bf16.msra.mxu0 %v2688_v8  ;;  %4594 = vmatpush1.bf16.msra.mxu1 %v2690_v9  ;;  %v2803_v8 = vunpack.c.h.s8.bf16 %v1011_v47  ;;  %v1025_v9 = vld [vmem:[%s7088_s22 + $0x1828] sm:$0xff] }
 0x3d4   : > { %4267 = vmatprep.subr.bf16.mxu0 %v2705_v25  ;;  %4595 = vmatprep.subr.bf16.mxu1 %v2707_v10  ;;  %v1027_v25 = vld [vmem:[%s7088_s22 + $0x1838] sm:$0xff]  ;;  %v2800_v10 = vunpack.c.h.s8.bf16 %v1008_v61  ;;  %v2817_v13 = vunpack.c.l.s8.bf16 %v1025_v9  ;;  %v2833_v19 = vunpack.c.h.s8.bf16 %v1025_v9 }
 0x3d7   : > { %4268 = vmatpush1.bf16.msra.mxu0 %v2704_v14  ;;  %4596 = vmatpush1.bf16.msra.mxu1 %v2706_v15  ;;  %v2819_v14 = vunpack.c.l.s8.bf16 %v1027_v25  ;;  %v1024_v15 = vld [vmem:[%s7088_s22 + $0x1820] sm:$0xff] }
 0x3d8   : > { %4269 = vmatprep.subr.bf16.mxu0 %v2721_v16  ;;  %4597 = vmatprep.subr.bf16.mxu1 %v2723_v17  ;;  %v1026_v16 = vld [vmem:[%s7088_s22 + $0x1830] sm:$0xff]  ;;  %v2816_v17 = vunpack.c.l.s8.bf16 %v1024_v15 }
 0x3d9   : > { %v2818_v18 = vunpack.c.l.s8.bf16 %v1026_v16  ;;  %v2834_v31 = vunpack.c.h.s8.bf16 %v1026_v16 }
 0x3db   : > { %4270 = vmatpush1.bf16.msra.mxu0 %v2720_v20  ;;  %4598 = vmatpush1.bf16.msra.mxu1 %v2722_v21  ;;  %v2835_v20 = vunpack.c.h.s8.bf16 %v1027_v25  ;;  %v1041_v21 = vld [vmem:[%s7088_s22 + $0x18a8] sm:$0xff] }
 0x3dc   : > { %4271 = vmatprep.subr.bf16.mxu0 %v2737_v27  ;;  %4599 = vmatprep.subr.bf16.mxu1 %v2739_v30  ;;  %v1043_v27 = vld [vmem:[%s7088_s22 + $0x18b8] sm:$0xff]  ;;  %v2832_v30 = vunpack.c.h.s8.bf16 %v1024_v15  ;;  %v2849_v51 = vunpack.c.l.s8.bf16 %v1041_v21  ;;  %v2865_v40 = vunpack.c.h.s8.bf16 %v1041_v21 }
 0x3df   : > { %4272 = vmatpush1.bf16.msra.mxu0 %v2736_v33  ;;  %4600 = vmatpush1.bf16.msra.mxu1 %v2738_v29  ;;  %v2851_v33 = vunpack.c.l.s8.bf16 %v1043_v27  ;;  %v1040_v29 = vld [vmem:[%s7088_s22 + $0x18a0] sm:$0xff] }
 0x3e0   : > { %4273 = vmatprep.subr.bf16.mxu0 %v2753_v23  ;;  %4601 = vmatprep.subr.bf16.mxu1 %v2755_v35  ;;  %v1042_v23 = vld [vmem:[%s7088_s22 + $0x18b0] sm:$0xff]  ;;  %v2848_v35 = vunpack.c.l.s8.bf16 %v1040_v29 }
 0x3e1   : > { %v2850_v37 = vunpack.c.l.s8.bf16 %v1042_v23  ;;  %v2866_v53 = vunpack.c.h.s8.bf16 %v1042_v23 }
 0x3e3   : > { %4274 = vmatpush1.bf16.msra.mxu0 %v2752_v41  ;;  %4602 = vmatpush1.bf16.msra.mxu1 %v2754_v42  ;;  %v2867_v41 = vunpack.c.h.s8.bf16 %v1043_v27  ;;  %v1057_v42 = vld [vmem:[%s7088_s22 + $0x1928] sm:$0xff] }
 0x3e4   : > { %4275 = vmatprep.subr.bf16.mxu0 %v2769_v44  ;;  %4603 = vmatprep.subr.bf16.mxu1 %v2771_v45  ;;  %v1059_v44 = vld [vmem:[%s7088_s22 + $0x1938] sm:$0xff]  ;;  %v2864_v45 = vunpack.c.h.s8.bf16 %v1040_v29  ;;  %v2881_v47 = vunpack.c.l.s8.bf16 %v1057_v42  ;;  %v2897_v0 = vunpack.c.h.s8.bf16 %v1057_v42 }
 0x3e7   : > { %4276 = vmatpush1.bf16.msra.mxu0 %v2768_v54  ;;  %4604 = vmatpush1.bf16.msra.mxu1 %v2770_v56  ;;  %v2883_v54 = vunpack.c.l.s8.bf16 %v1059_v44  ;;  %v1056_v56 = vld [vmem:[%s7088_s22 + $0x1920] sm:$0xff] }
 0x3e8   : > { %4277 = vmatprep.subr.bf16.mxu0 %v2785_v57  ;;  %4605 = vmatprep.subr.bf16.mxu1 %v2787_v38  ;;  %v1058_v57 = vld [vmem:[%s7088_s22 + $0x1930] sm:$0xff]  ;;  %v2880_v38 = vunpack.c.l.s8.bf16 %v1056_v56 }
 0x3e9   : > { %v2882_v61 = vunpack.c.l.s8.bf16 %v1058_v57  ;;  %v2898_v9 = vunpack.c.h.s8.bf16 %v1058_v57 }
 0x3eb   : > { %4278 = vmatpush1.bf16.msra.mxu0 %v2784_v1  ;;  %4606 = vmatpush1.bf16.msra.mxu1 %v2786_v2  ;;  %v2899_v1 = vunpack.c.h.s8.bf16 %v1059_v44  ;;  %v1073_v2 = vld [vmem:[%s7088_s22 + $0x19a8] sm:$0xff] }
 0x3ec   : > { %4279 = vmatprep.subr.bf16.mxu0 %v2801_v7  ;;  %4607 = vmatprep.subr.bf16.mxu1 %v2803_v8  ;;  %v1075_v7 = vld [vmem:[%s7088_s22 + $0x19b8] sm:$0xff]  ;;  %v2896_v8 = vunpack.c.h.s8.bf16 %v1056_v56  ;;  %v2913_v25 = vunpack.c.l.s8.bf16 %v1073_v2  ;;  %v2929_v16 = vunpack.c.h.s8.bf16 %v1073_v2 }
 0x3ef   : > { %4280 = vmatpush1.bf16.msra.mxu0 %v2800_v10  ;;  %4608 = vmatpush1.bf16.msra.mxu1 %v2802_v11  ;;  %v2915_v10 = vunpack.c.l.s8.bf16 %v1075_v7  ;;  %v1072_v11 = vld [vmem:[%s7088_s22 + $0x19a0] sm:$0xff] }
 0x3f0   : > { %4290 = vmatprep.subr.bf16.mxu0 %v2817_v13  ;;  %4618 = vmatprep.subr.bf16.mxu1 %v2819_v14  ;;  %v1074_v13 = vld [vmem:[%s7088_s22 + $0x19b0] sm:$0xff]  ;;  %v2912_v14 = vunpack.c.l.s8.bf16 %v1072_v11 }
 0x3f1   : > { %v2914_v15 = vunpack.c.l.s8.bf16 %v1074_v13  ;;  %v2930_v21 = vunpack.c.h.s8.bf16 %v1074_v13 }
 0x3f2   : > { %4282 = vmatmul.mubr.bf16.vlgmr.msra.gmra.mrb[4].mxu0 %v7400_v28  ;;  %4610 = vmatmul.mubr.bf16.vlgmr.msra.gmra.mrb[4].mxu1 %v7400_v28 }
 0x3f3   : > { %4291 = vmatpush1.bf16.msra.mxu0 %v2816_v17  ;;  %4619 = vmatpush1.bf16.msra.mxu1 %v2818_v18  ;;  %v2931_v17 = vunpack.c.h.s8.bf16 %v1075_v7  ;;  %v1089_v18 = vld [vmem:[%s7088_s22 + $0x1a28] sm:$0xff] }
 0x3f4   : > { %4292 = vmatprep.subr.bf16.mxu0 %v2833_v19  ;;  %4620 = vmatprep.subr.bf16.mxu1 %v2835_v20  ;;  %v1091_v19 = vld [vmem:[%s7088_s22 + $0x1a38] sm:$0xff]  ;;  %v2928_v20 = vunpack.c.h.s8.bf16 %v1072_v11  ;;  %v2945_v27 = vunpack.c.l.s8.bf16 %v1089_v18  ;;  %v2961_v23 = vunpack.c.h.s8.bf16 %v1089_v18 }
 0x3f5   : > { %4322 = vmatprep.mubr.bf16.mxu0 %v7408_v39  ;;  %4650 = vmatprep.mubr.bf16.mxu1 %v7408_v39 }
 0x3f7   : > { %4293 = vmatpush1.bf16.msra.mxu0 %v2832_v30  ;;  %4621 = vmatpush1.bf16.msra.mxu1 %v2834_v31  ;;  %v2947_v30 = vunpack.c.l.s8.bf16 %v1091_v19  ;;  %v1088_v31 = vld [vmem:[%s7088_s22 + $0x1a20] sm:$0xff] }
 0x3f8   : > { %4294 = vmatprep.subr.bf16.mxu0 %v2849_v51  ;;  %4622 = vmatprep.subr.bf16.mxu1 %v2851_v33  ;;  %v1090_v51 = vld [vmem:[%s7088_s22 + $0x1a30] sm:$0xff]  ;;  %v2944_v33 = vunpack.c.l.s8.bf16 %v1088_v31 }
 0x3f9   : > { %v2946_v29 = vunpack.c.l.s8.bf16 %v1090_v51  ;;  %v2962_v42 = vunpack.c.h.s8.bf16 %v1090_v51 }
 0x3fb   : > { %4295 = vmatpush1.bf16.msra.mxu0 %v2848_v35  ;;  %4623 = vmatpush1.bf16.msra.mxu1 %v2850_v37  ;;  %v2963_v35 = vunpack.c.h.s8.bf16 %v1091_v19  ;;  %v1105_v37 = vld [vmem:[%s7088_s22 + $0x1aa8] sm:$0xff] }
 0x3fc   : > { %4296 = vmatprep.subr.bf16.mxu0 %v2865_v40  ;;  %4624 = vmatprep.subr.bf16.mxu1 %v2867_v41  ;;  %v1107_v40 = vld [vmem:[%s7088_s22 + $0x1ab8] sm:$0xff]  ;;  %v2960_v41 = vunpack.c.h.s8.bf16 %v1088_v31  ;;  %v2977_v44 = vunpack.c.l.s8.bf16 %v1105_v37  ;;  %v2993_v57 = vunpack.c.h.s8.bf16 %v1105_v37 }
 0x3ff   : > { %4297 = vmatpush1.bf16.msra.mxu0 %v2864_v45  ;;  %4625 = vmatpush1.bf16.msra.mxu1 %v2866_v53  ;;  %v2979_v45 = vunpack.c.l.s8.bf16 %v1107_v40  ;;  %v1104_v53 = vld [vmem:[%s7088_s22 + $0x1aa0] sm:$0xff] }
 0x400   : > { %4298 = vmatprep.subr.bf16.mxu0 %v2881_v47  ;;  %4626 = vmatprep.subr.bf16.mxu1 %v2883_v54  ;;  %v1106_v47 = vld [vmem:[%s7088_s22 + $0x1ab0] sm:$0xff]  ;;  %v2976_v54 = vunpack.c.l.s8.bf16 %v1104_v53 }
 0x401   : > { %v2978_v56 = vunpack.c.l.s8.bf16 %v1106_v47  ;;  %v2994_v2 = vunpack.c.h.s8.bf16 %v1106_v47 }
 0x403   : > { %4299 = vmatpush1.bf16.msra.mxu0 %v2880_v38  ;;  %4627 = vmatpush1.bf16.msra.mxu1 %v2882_v61  ;;  %v2995_v38 = vunpack.c.h.s8.bf16 %v1107_v40  ;;  %v1121_v61 = vld [vmem:[%s7088_s22 + $0x1b28] sm:$0xff] }
 0x404   : > { %4300 = vmatprep.subr.bf16.mxu0 %v2897_v0  ;;  %4628 = vmatprep.subr.bf16.mxu1 %v2899_v1  ;;  %v1123_v0 = vld [vmem:[%s7088_s22 + $0x1b38] sm:$0xff]  ;;  %v2992_v1 = vunpack.c.h.s8.bf16 %v1104_v53  ;;  %v3009_v7 = vunpack.c.l.s8.bf16 %v1121_v61  ;;  %v3025_v13 = vunpack.c.h.s8.bf16 %v1121_v61 }
 0x407   : > { %4301 = vmatpush1.bf16.msra.mxu0 %v2896_v8  ;;  %4629 = vmatpush1.bf16.msra.mxu1 %v2898_v9  ;;  %v3011_v8 = vunpack.c.l.s8.bf16 %v1123_v0  ;;  %v1120_v9 = vld [vmem:[%s7088_s22 + $0x1b20] sm:$0xff] }
 0x408   : > { %4302 = vmatprep.subr.bf16.mxu0 %v2913_v25  ;;  %4630 = vmatprep.subr.bf16.mxu1 %v2915_v10  ;;  %v1122_v25 = vld [vmem:[%s7088_s22 + $0x1b30] sm:$0xff]  ;;  %v3008_v10 = vunpack.c.l.s8.bf16 %v1120_v9 }
 0x409   : > { %v3010_v11 = vunpack.c.l.s8.bf16 %v1122_v25  ;;  %v3026_v18 = vunpack.c.h.s8.bf16 %v1122_v25 }
 0x40b   : > { %4303 = vmatpush1.bf16.msra.mxu0 %v2912_v14  ;;  %4631 = vmatpush1.bf16.msra.mxu1 %v2914_v15  ;;  %v3027_v14 = vunpack.c.h.s8.bf16 %v1123_v0  ;;  %v1137_v15 = vld [vmem:[%s7088_s22 + $0x1ba8] sm:$0xff] }
 0x40c   : > { %4304 = vmatprep.subr.bf16.mxu0 %v2929_v16  ;;  %4632 = vmatprep.subr.bf16.mxu1 %v2931_v17  ;;  %v1139_v16 = vld [vmem:[%s7088_s22 + $0x1bb8] sm:$0xff]  ;;  %v3024_v17 = vunpack.c.h.s8.bf16 %v1120_v9  ;;  %v3041_v19 = vunpack.c.l.s8.bf16 %v1137_v15  ;;  %v3057_v51 = vunpack.c.h.s8.bf16 %v1137_v15 }
 0x40f   : > { %4305 = vmatpush1.bf16.msra.mxu0 %v2928_v20  ;;  %4633 = vmatpush1.bf16.msra.mxu1 %v2930_v21  ;;  %v3043_v20 = vunpack.c.l.s8.bf16 %v1139_v16  ;;  %v1136_v21 = vld [vmem:[%s7088_s22 + $0x1ba0] sm:$0xff] }
 0x410   : > { %4306 = vmatprep.subr.bf16.mxu0 %v2945_v27  ;;  %4634 = vmatprep.subr.bf16.mxu1 %v2947_v30  ;;  %v1138_v27 = vld [vmem:[%s7088_s22 + $0x1bb0] sm:$0xff]  ;;  %v3040_v30 = vunpack.c.l.s8.bf16 %v1136_v21 }
 0x411   : > { %v3042_v31 = vunpack.c.l.s8.bf16 %v1138_v27  ;;  %v3058_v37 = vunpack.c.h.s8.bf16 %v1138_v27 }
 0x413   : > { %4307 = vmatpush1.bf16.msra.mxu0 %v2944_v33  ;;  %4635 = vmatpush1.bf16.msra.mxu1 %v2946_v29  ;;  %v3059_v33 = vunpack.c.h.s8.bf16 %v1139_v16  ;;  %v1153_v29 = vld [vmem:[%s7088_s22 + $0x1c28] sm:$0xff] }
 0x414   : > { %4308 = vmatprep.subr.bf16.mxu0 %v2961_v23  ;;  %4636 = vmatprep.subr.bf16.mxu1 %v2963_v35  ;;  %v1155_v23 = vld [vmem:[%s7088_s22 + $0x1c38] sm:$0xff]  ;;  %v3056_v35 = vunpack.c.h.s8.bf16 %v1136_v21  ;;  %v3073_v40 = vunpack.c.l.s8.bf16 %v1153_v29  ;;  %v3089_v47 = vunpack.c.h.s8.bf16 %v1153_v29 }
 0x417   : > { %4309 = vmatpush1.bf16.msra.mxu0 %v2960_v41  ;;  %4637 = vmatpush1.bf16.msra.mxu1 %v2962_v42  ;;  %v3075_v41 = vunpack.c.l.s8.bf16 %v1155_v23  ;;  %v1152_v42 = vld [vmem:[%s7088_s22 + $0x1c20] sm:$0xff] }
 0x418   : > { %4310 = vmatprep.subr.bf16.mxu0 %v2977_v44  ;;  %4638 = vmatprep.subr.bf16.mxu1 %v2979_v45  ;;  %v1154_v44 = vld [vmem:[%s7088_s22 + $0x1c30] sm:$0xff]  ;;  %v3072_v45 = vunpack.c.l.s8.bf16 %v1152_v42 }
 0x419   : > { %v3074_v53 = vunpack.c.l.s8.bf16 %v1154_v44  ;;  %v3090_v61 = vunpack.c.h.s8.bf16 %v1154_v44 }
 0x41b   : > { %4311 = vmatpush1.bf16.msra.mxu0 %v2976_v54  ;;  %4639 = vmatpush1.bf16.msra.mxu1 %v2978_v56  ;;  %v3091_v54 = vunpack.c.h.s8.bf16 %v1155_v23  ;;  %v1169_v56 = vld [vmem:[%s7088_s22 + $0x1ca8] sm:$0xff] }
 0x41c   : > { %4312 = vmatprep.subr.bf16.mxu0 %v2993_v57  ;;  %4640 = vmatprep.subr.bf16.mxu1 %v2995_v38  ;;  %v1171_v57 = vld [vmem:[%s7088_s22 + $0x1cb8] sm:$0xff]  ;;  %v3088_v38 = vunpack.c.h.s8.bf16 %v1152_v42  ;;  %v3105_v0 = vunpack.c.l.s8.bf16 %v1169_v56  ;;  %v3121_v25 = vunpack.c.h.s8.bf16 %v1169_v56 }
 0x41f   : > { %4313 = vmatpush1.bf16.msra.mxu0 %v2992_v1  ;;  %4641 = vmatpush1.bf16.msra.mxu1 %v2994_v2  ;;  %v3107_v1 = vunpack.c.l.s8.bf16 %v1171_v57  ;;  %v1168_v2 = vld [vmem:[%s7088_s22 + $0x1ca0] sm:$0xff] }
 0x420   : > { %4314 = vmatprep.subr.bf16.mxu0 %v3009_v7  ;;  %4642 = vmatprep.subr.bf16.mxu1 %v3011_v8  ;;  %v1170_v7 = vld [vmem:[%s7088_s22 + $0x1cb0] sm:$0xff]  ;;  %v3104_v8 = vunpack.c.l.s8.bf16 %v1168_v2 }
 0x421   : > { %v3106_v9 = vunpack.c.l.s8.bf16 %v1170_v7  ;;  %v3122_v15 = vunpack.c.h.s8.bf16 %v1170_v7 }
 0x423   : > { %4315 = vmatpush1.bf16.msra.mxu0 %v3008_v10  ;;  %4643 = vmatpush1.bf16.msra.mxu1 %v3010_v11  ;;  %v3123_v10 = vunpack.c.h.s8.bf16 %v1171_v57  ;;  %v1185_v11 = vld [vmem:[%s7088_s22 + $0x1d28] sm:$0xff] }
 0x424   : > { %4316 = vmatprep.subr.bf16.mxu0 %v3025_v13  ;;  %4644 = vmatprep.subr.bf16.mxu1 %v3027_v14  ;;  %v1187_v13 = vld [vmem:[%s7088_s22 + $0x1d38] sm:$0xff]  ;;  %v3120_v14 = vunpack.c.h.s8.bf16 %v1168_v2  ;;  %v3137_v16 = vunpack.c.l.s8.bf16 %v1185_v11  ;;  %v3153_v27 = vunpack.c.h.s8.bf16 %v1185_v11 }
 0x427   : > { %4317 = vmatpush1.bf16.msra.mxu0 %v3024_v17  ;;  %4645 = vmatpush1.bf16.msra.mxu1 %v3026_v18  ;;  %v3139_v17 = vunpack.c.l.s8.bf16 %v1187_v13  ;;  %v1184_v18 = vld [vmem:[%s7088_s22 + $0x1d20] sm:$0xff] }
 0x428   : > { %4318 = vmatprep.subr.bf16.mxu0 %v3041_v19  ;;  %4646 = vmatprep.subr.bf16.mxu1 %v3043_v20  ;;  %v1186_v19 = vld [vmem:[%s7088_s22 + $0x1d30] sm:$0xff]  ;;  %v3136_v20 = vunpack.c.l.s8.bf16 %v1184_v18 }
 0x429   : > { %v3138_v21 = vunpack.c.l.s8.bf16 %v1186_v19  ;;  %v3154_v29 = vunpack.c.h.s8.bf16 %v1186_v19 }
 0x42b   : > { %4319 = vmatpush1.bf16.msra.mxu0 %v3040_v30  ;;  %4647 = vmatpush1.bf16.msra.mxu1 %v3042_v31  ;;  %v3155_v30 = vunpack.c.h.s8.bf16 %v1187_v13  ;;  %v1201_v31 = vld [vmem:[%s7088_s22 + $0x1da8] sm:$0xff] }
 0x42c   : > { %4320 = vmatprep.subr.bf16.mxu0 %v3057_v51  ;;  %4648 = vmatprep.subr.bf16.mxu1 %v3059_v33  ;;  %v1203_v51 = vld [vmem:[%s7088_s22 + $0x1db8] sm:$0xff]  ;;  %v3152_v33 = vunpack.c.h.s8.bf16 %v1184_v18  ;;  %v3169_v23 = vunpack.c.l.s8.bf16 %v1201_v31  ;;  %v3185_v44 = vunpack.c.h.s8.bf16 %v1201_v31 }
 0x42f   : > { %4321 = vmatpush1.bf16.msra.mxu0 %v3056_v35  ;;  %4649 = vmatpush1.bf16.msra.mxu1 %v3058_v37  ;;  %v3171_v35 = vunpack.c.l.s8.bf16 %v1203_v51  ;;  %v1200_v37 = vld [vmem:[%s7088_s22 + $0x1da0] sm:$0xff] }
 0x430   : > { %4331 = vmatprep.subr.bf16.mxu0 %v3073_v40  ;;  %4659 = vmatprep.subr.bf16.mxu1 %v3075_v41  ;;  %v1202_v40 = vld [vmem:[%s7088_s22 + $0x1db0] sm:$0xff]  ;;  %v3168_v41 = vunpack.c.l.s8.bf16 %v1200_v37 }
 0x431   : > { %v3170_v42 = vunpack.c.l.s8.bf16 %v1202_v40  ;;  %v3186_v56 = vunpack.c.h.s8.bf16 %v1202_v40 }
 0x432   : > { %4323 = vmatmul.mubr.bf16.vlgmr.msra.gmra.mrb[4].mxu0 %v7446_v22  ;;  %4651 = vmatmul.mubr.bf16.vlgmr.msra.gmra.mrb[4].mxu1 %v7446_v22 }
 0x433   : > { %4332 = vmatpush1.bf16.msra.mxu0 %v3072_v45  ;;  %4660 = vmatpush1.bf16.msra.mxu1 %v3074_v53  ;;  %v3187_v45 = vunpack.c.h.s8.bf16 %v1203_v51  ;;  %v1217_v53 = vld [vmem:[%s7088_s22 + $0x1e28] sm:$0xff] }
 0x434   : > { %4333 = vmatprep.subr.bf16.mxu0 %v3089_v47  ;;  %4661 = vmatprep.subr.bf16.mxu1 %v3091_v54  ;;  %v1219_v47 = vld [vmem:[%s7088_s22 + $0x1e38] sm:$0xff]  ;;  %v3184_v54 = vunpack.c.h.s8.bf16 %v1200_v37  ;;  %v3201_v57 = vunpack.c.l.s8.bf16 %v1217_v53  ;;  %v3217_v7 = vunpack.c.h.s8.bf16 %v1217_v53 }
 0x435   : > { %4363 = vmatprep.mubr.bf16.mxu0 %v7454_v34  ;;  %4691 = vmatprep.mubr.bf16.mxu1 %v7454_v34 }
 0x437   : > { %4334 = vmatpush1.bf16.msra.mxu0 %v3088_v38  ;;  %4662 = vmatpush1.bf16.msra.mxu1 %v3090_v61  ;;  %v3203_v38 = vunpack.c.l.s8.bf16 %v1219_v47  ;;  %v1216_v61 = vld [vmem:[%s7088_s22 + $0x1e20] sm:$0xff] }
 0x438   : > { %4335 = vmatprep.subr.bf16.mxu0 %v3105_v0  ;;  %4663 = vmatprep.subr.bf16.mxu1 %v3107_v1  ;;  %v1218_v0 = vld [vmem:[%s7088_s22 + $0x1e30] sm:$0xff]  ;;  %v3200_v1 = vunpack.c.l.s8.bf16 %v1216_v61 }
 0x439   : > { %v3202_v2 = vunpack.c.l.s8.bf16 %v1218_v0  ;;  %v3218_v11 = vunpack.c.h.s8.bf16 %v1218_v0 }
 0x43b   : > { %4336 = vmatpush1.bf16.msra.mxu0 %v3104_v8  ;;  %4664 = vmatpush1.bf16.msra.mxu1 %v3106_v9  ;;  %v3219_v8 = vunpack.c.h.s8.bf16 %v1219_v47  ;;  %v1233_v9 = vld [vmem:[%s7088_s22 + $0x1ea8] sm:$0xff] }
 0x43c   : > { %4337 = vmatprep.subr.bf16.mxu0 %v3121_v25  ;;  %4665 = vmatprep.subr.bf16.mxu1 %v3123_v10  ;;  %v1235_v25 = vld [vmem:[%s7088_s22 + $0x1eb8] sm:$0xff]  ;;  %v3216_v10 = vunpack.c.h.s8.bf16 %v1216_v61  ;;  %v3233_v13 = vunpack.c.l.s8.bf16 %v1233_v9  ;;  %v3249_v19 = vunpack.c.h.s8.bf16 %v1233_v9 }
 0x43f   : > { %4338 = vmatpush1.bf16.msra.mxu0 %v3120_v14  ;;  %4666 = vmatpush1.bf16.msra.mxu1 %v3122_v15  ;;  %v3235_v14 = vunpack.c.l.s8.bf16 %v1235_v25  ;;  %v1232_v15 = vld [vmem:[%s7088_s22 + $0x1ea0] sm:$0xff] }
 0x440   : > { %4339 = vmatprep.subr.bf16.mxu0 %v3137_v16  ;;  %4667 = vmatprep.subr.bf16.mxu1 %v3139_v17  ;;  %v1234_v16 = vld [vmem:[%s7088_s22 + $0x1eb0] sm:$0xff]  ;;  %v3232_v17 = vunpack.c.l.s8.bf16 %v1232_v15 }
 0x441   : > { %v3234_v18 = vunpack.c.l.s8.bf16 %v1234_v16  ;;  %v3250_v31 = vunpack.c.h.s8.bf16 %v1234_v16 }
 0x443   : > { %4340 = vmatpush1.bf16.msra.mxu0 %v3136_v20  ;;  %4668 = vmatpush1.bf16.msra.mxu1 %v3138_v21  ;;  %v3251_v20 = vunpack.c.h.s8.bf16 %v1235_v25  ;;  %v1249_v21 = vld [vmem:[%s7088_s22 + $0x1f28] sm:$0xff] }
 0x444   : > { %4341 = vmatprep.subr.bf16.mxu0 %v3153_v27  ;;  %4669 = vmatprep.subr.bf16.mxu1 %v3155_v30  ;;  %v1251_v27 = vld [vmem:[%s7088_s22 + $0x1f38] sm:$0xff]  ;;  %v3248_v30 = vunpack.c.h.s8.bf16 %v1232_v15  ;;  %v3265_v51 = vunpack.c.l.s8.bf16 %v1249_v21  ;;  %v3281_v40 = vunpack.c.h.s8.bf16 %v1249_v21 }
 0x447   : > { %4342 = vmatpush1.bf16.msra.mxu0 %v3152_v33  ;;  %4670 = vmatpush1.bf16.msra.mxu1 %v3154_v29  ;;  %v3267_v33 = vunpack.c.l.s8.bf16 %v1251_v27  ;;  %v1248_v29 = vld [vmem:[%s7088_s22 + $0x1f20] sm:$0xff] }
 0x448   : > { %4343 = vmatprep.subr.bf16.mxu0 %v3169_v23  ;;  %4671 = vmatprep.subr.bf16.mxu1 %v3171_v35  ;;  %v1250_v23 = vld [vmem:[%s7088_s22 + $0x1f30] sm:$0xff]  ;;  %v3264_v35 = vunpack.c.l.s8.bf16 %v1248_v29 }
 0x449   : > { %v3266_v37 = vunpack.c.l.s8.bf16 %v1250_v23  ;;  %v3282_v53 = vunpack.c.h.s8.bf16 %v1250_v23 }
 0x44b   : > { %4344 = vmatpush1.bf16.msra.mxu0 %v3168_v41  ;;  %4672 = vmatpush1.bf16.msra.mxu1 %v3170_v42  ;;  %v3283_v41 = vunpack.c.h.s8.bf16 %v1251_v27  ;;  %v1265_v42 = vld [vmem:[%s7088_s22 + $0x1fa8] sm:$0xff] }
 0x44c   : > { %4345 = vmatprep.subr.bf16.mxu0 %v3185_v44  ;;  %4673 = vmatprep.subr.bf16.mxu1 %v3187_v45  ;;  %v1267_v44 = vld [vmem:[%s7088_s22 + $0x1fb8] sm:$0xff]  ;;  %v3280_v45 = vunpack.c.h.s8.bf16 %v1248_v29  ;;  %v3297_v47 = vunpack.c.l.s8.bf16 %v1265_v42  ;;  %v3313_v0 = vunpack.c.h.s8.bf16 %v1265_v42 }
 0x44f   : > { %4346 = vmatpush1.bf16.msra.mxu0 %v3184_v54  ;;  %4674 = vmatpush1.bf16.msra.mxu1 %v3186_v56  ;;  %v3299_v54 = vunpack.c.l.s8.bf16 %v1267_v44  ;;  %v1264_v56 = vld [vmem:[%s7088_s22 + $0x1fa0] sm:$0xff] }
 0x450   : > { %4347 = vmatprep.subr.bf16.mxu0 %v3201_v57  ;;  %4675 = vmatprep.subr.bf16.mxu1 %v3203_v38  ;;  %v1266_v57 = vld [vmem:[%s7088_s22 + $0x1fb0] sm:$0xff]  ;;  %v3296_v38 = vunpack.c.l.s8.bf16 %v1264_v56 }
 0x451   : > { %v3298_v61 = vunpack.c.l.s8.bf16 %v1266_v57  ;;  %v3314_v9 = vunpack.c.h.s8.bf16 %v1266_v57 }
 0x453   : > { %4348 = vmatpush1.bf16.msra.mxu0 %v3200_v1  ;;  %4676 = vmatpush1.bf16.msra.mxu1 %v3202_v2  ;;  %v3315_v1 = vunpack.c.h.s8.bf16 %v1267_v44  ;;  %v261_v2 = vld [vmem:[%s7088_s22 + $0x48] sm:$0xff] }
 0x454   : > { %4349 = vmatprep.subr.bf16.mxu0 %v3217_v7  ;;  %4677 = vmatprep.subr.bf16.mxu1 %v3219_v8  ;;  %v263_v7 = vld [vmem:[%s7088_s22 + $0x58] sm:$0xff]  ;;  %v3312_v8 = vunpack.c.h.s8.bf16 %v1264_v56  ;;  %v1285_v25 = vunpack.c.l.s8.bf16 %v261_v2  ;;  %v1301_v16 = vunpack.c.h.s8.bf16 %v261_v2 }
 0x457   : > { %4350 = vmatpush1.bf16.msra.mxu0 %v3216_v10  ;;  %4678 = vmatpush1.bf16.msra.mxu1 %v3218_v11  ;;  %v1287_v10 = vunpack.c.l.s8.bf16 %v263_v7  ;;  %v260_v11 = vld [vmem:[%s7088_s22 + $0x40] sm:$0xff] }
 0x458   : > { %4351 = vmatprep.subr.bf16.mxu0 %v3233_v13  ;;  %4679 = vmatprep.subr.bf16.mxu1 %v3235_v14  ;;  %v262_v13 = vld [vmem:[%s7088_s22 + $0x50] sm:$0xff]  ;;  %v1284_v14 = vunpack.c.l.s8.bf16 %v260_v11 }
 0x459   : > { %v1286_v15 = vunpack.c.l.s8.bf16 %v262_v13  ;;  %v1302_v21 = vunpack.c.h.s8.bf16 %v262_v13 }
 0x45b   : > { %4352 = vmatpush1.bf16.msra.mxu0 %v3232_v17  ;;  %4680 = vmatpush1.bf16.msra.mxu1 %v3234_v18  ;;  %v1303_v17 = vunpack.c.h.s8.bf16 %v263_v7  ;;  %v277_v18 = vld [vmem:[%s7088_s22 + $0xc8] sm:$0xff] }
 0x45c   : > { %4353 = vmatprep.subr.bf16.mxu0 %v3249_v19  ;;  %4681 = vmatprep.subr.bf16.mxu1 %v3251_v20  ;;  %v279_v19 = vld [vmem:[%s7088_s22 + $0xd8] sm:$0xff]  ;;  %v1300_v20 = vunpack.c.h.s8.bf16 %v260_v11  ;;  %v1317_v27 = vunpack.c.l.s8.bf16 %v277_v18  ;;  %v1333_v23 = vunpack.c.h.s8.bf16 %v277_v18 }
 0x45f   : > { %4354 = vmatpush1.bf16.msra.mxu0 %v3248_v30  ;;  %4682 = vmatpush1.bf16.msra.mxu1 %v3250_v31  ;;  %v1319_v30 = vunpack.c.l.s8.bf16 %v279_v19  ;;  %v276_v31 = vld [vmem:[%s7088_s22 + $0xc0] sm:$0xff] }
 0x460   : > { %4355 = vmatprep.subr.bf16.mxu0 %v3265_v51  ;;  %4683 = vmatprep.subr.bf16.mxu1 %v3267_v33  ;;  %v278_v51 = vld [vmem:[%s7088_s22 + $0xd0] sm:$0xff]  ;;  %v1316_v33 = vunpack.c.l.s8.bf16 %v276_v31 }
 0x461   : > { %v1318_v29 = vunpack.c.l.s8.bf16 %v278_v51  ;;  %v1334_v42 = vunpack.c.h.s8.bf16 %v278_v51 }
 0x463   : > { %4356 = vmatpush1.bf16.msra.mxu0 %v3264_v35  ;;  %4684 = vmatpush1.bf16.msra.mxu1 %v3266_v37  ;;  %v1335_v35 = vunpack.c.h.s8.bf16 %v279_v19  ;;  %v293_v37 = vld [vmem:[%s7088_s22 + $0x148] sm:$0xff] }
 0x464   : > { %4357 = vmatprep.subr.bf16.mxu0 %v3281_v40  ;;  %4685 = vmatprep.subr.bf16.mxu1 %v3283_v41  ;;  %v295_v40 = vld [vmem:[%s7088_s22 + $0x158] sm:$0xff]  ;;  %v1332_v41 = vunpack.c.h.s8.bf16 %v276_v31  ;;  %v1349_v44 = vunpack.c.l.s8.bf16 %v293_v37  ;;  %v1365_v57 = vunpack.c.h.s8.bf16 %v293_v37 }
 0x467   : > { %4358 = vmatpush1.bf16.msra.mxu0 %v3280_v45  ;;  %4686 = vmatpush1.bf16.msra.mxu1 %v3282_v53  ;;  %v1351_v45 = vunpack.c.l.s8.bf16 %v295_v40  ;;  %v292_v53 = vld [vmem:[%s7088_s22 + $0x140] sm:$0xff] }
 0x468   : > { %4359 = vmatprep.subr.bf16.mxu0 %v3297_v47  ;;  %4687 = vmatprep.subr.bf16.mxu1 %v3299_v54  ;;  %v294_v47 = vld [vmem:[%s7088_s22 + $0x150] sm:$0xff]  ;;  %v1348_v54 = vunpack.c.l.s8.bf16 %v292_v53 }
 0x469   : > { %v1350_v56 = vunpack.c.l.s8.bf16 %v294_v47  ;;  %v1366_v2 = vunpack.c.h.s8.bf16 %v294_v47 }
 0x46b   : > { %4360 = vmatpush1.bf16.msra.mxu0 %v3296_v38  ;;  %4688 = vmatpush1.bf16.msra.mxu1 %v3298_v61  ;;  %v1367_v38 = vunpack.c.h.s8.bf16 %v295_v40  ;;  %v309_v61 = vld [vmem:[%s7088_s22 + $0x1c8] sm:$0xff] }
 0x46c   : > { %4361 = vmatprep.subr.bf16.mxu0 %v3313_v0  ;;  %4689 = vmatprep.subr.bf16.mxu1 %v3315_v1  ;;  %v311_v0 = vld [vmem:[%s7088_s22 + $0x1d8] sm:$0xff]  ;;  %v1364_v1 = vunpack.c.h.s8.bf16 %v292_v53  ;;  %v1381_v7 = vunpack.c.l.s8.bf16 %v309_v61  ;;  %v1397_v13 = vunpack.c.h.s8.bf16 %v309_v61 }
 0x46f   : > { %4362 = vmatpush1.bf16.msra.mxu0 %v3312_v8  ;;  %4690 = vmatpush1.bf16.msra.mxu1 %v3314_v9  ;;  %v1383_v8 = vunpack.c.l.s8.bf16 %v311_v0  ;;  %v308_v9 = vld [vmem:[%s7088_s22 + $0x1c0] sm:$0xff] }
 0x470   : > { %4700 = vmatprep.subr.bf16.mxu0 %v1285_v25  ;;  %5028 = vmatprep.subr.bf16.mxu1 %v1287_v10  ;;  %v310_v25 = vld [vmem:[%s7088_s22 + $0x1d0] sm:$0xff]  ;;  %v1380_v10 = vunpack.c.l.s8.bf16 %v308_v9 }
 0x471   : > { %v1382_v11 = vunpack.c.l.s8.bf16 %v310_v25  ;;  %v1398_v18 = vunpack.c.h.s8.bf16 %v310_v25 }
 0x472   : > { %4364 = vmatmul.mubr.bf16.vlgmr.msra.gmra.mrb[4].mxu0 %v7492_v26  ;;  %4692 = vmatmul.mubr.bf16.vlgmr.msra.gmra.mrb[4].mxu1 %v7492_v26 }
 0x473   : > { %4701 = vmatpush1.bf16.msra.mxu0 %v1284_v14  ;;  %5029 = vmatpush1.bf16.msra.mxu1 %v1286_v15  ;;  %v1399_v14 = vunpack.c.h.s8.bf16 %v311_v0  ;;  %v325_v15 = vld [vmem:[%s7088_s22 + $0x248] sm:$0xff] }
 0x474   : > { %4702 = vmatprep.subr.bf16.mxu0 %v1301_v16  ;;  %5030 = vmatprep.subr.bf16.mxu1 %v1303_v17  ;;  %v327_v16 = vld [vmem:[%s7088_s22 + $0x258] sm:$0xff]  ;;  %v1396_v17 = vunpack.c.h.s8.bf16 %v308_v9  ;;  %v1413_v19 = vunpack.c.l.s8.bf16 %v325_v15  ;;  %v1429_v51 = vunpack.c.h.s8.bf16 %v325_v15 }
 0x475   : > { %4732 = vmatprep.mubr.bf16.mxu0 %v7140_v43  ;;  %5060 = vmatprep.mubr.bf16.mxu1 %v7140_v43 }
 0x477   : > { %4703 = vmatpush1.bf16.msra.mxu0 %v1300_v20  ;;  %5031 = vmatpush1.bf16.msra.mxu1 %v1302_v21  ;;  %v1415_v20 = vunpack.c.l.s8.bf16 %v327_v16  ;;  %v324_v21 = vld [vmem:[%s7088_s22 + $0x240] sm:$0xff] }
 0x478   : > { %4704 = vmatprep.subr.bf16.mxu0 %v1317_v27  ;;  %5032 = vmatprep.subr.bf16.mxu1 %v1319_v30  ;;  %v326_v27 = vld [vmem:[%s7088_s22 + $0x250] sm:$0xff]  ;;  %v1412_v30 = vunpack.c.l.s8.bf16 %v324_v21 }
 0x479   : > { %v1414_v31 = vunpack.c.l.s8.bf16 %v326_v27  ;;  %v1430_v37 = vunpack.c.h.s8.bf16 %v326_v27 }
 0x47b   : > { %4705 = vmatpush1.bf16.msra.mxu0 %v1316_v33  ;;  %5033 = vmatpush1.bf16.msra.mxu1 %v1318_v29  ;;  %v1431_v33 = vunpack.c.h.s8.bf16 %v327_v16  ;;  %v341_v29 = vld [vmem:[%s7088_s22 + $0x2c8] sm:$0xff] }
 0x47c   : > { %4706 = vmatprep.subr.bf16.mxu0 %v1333_v23  ;;  %5034 = vmatprep.subr.bf16.mxu1 %v1335_v35  ;;  %v343_v23 = vld [vmem:[%s7088_s22 + $0x2d8] sm:$0xff]  ;;  %v1428_v35 = vunpack.c.h.s8.bf16 %v324_v21  ;;  %v1445_v40 = vunpack.c.l.s8.bf16 %v341_v29  ;;  %v1461_v47 = vunpack.c.h.s8.bf16 %v341_v29 }
 0x47f   : > { %4707 = vmatpush1.bf16.msra.mxu0 %v1332_v41  ;;  %5035 = vmatpush1.bf16.msra.mxu1 %v1334_v42  ;;  %v1447_v41 = vunpack.c.l.s8.bf16 %v343_v23  ;;  %v340_v42 = vld [vmem:[%s7088_s22 + $0x2c0] sm:$0xff] }
 0x480   : > { %4708 = vmatprep.subr.bf16.mxu0 %v1349_v44  ;;  %5036 = vmatprep.subr.bf16.mxu1 %v1351_v45  ;;  %v342_v44 = vld [vmem:[%s7088_s22 + $0x2d0] sm:$0xff]  ;;  %v1444_v45 = vunpack.c.l.s8.bf16 %v340_v42 }
 0x481   : > { %v1446_v53 = vunpack.c.l.s8.bf16 %v342_v44  ;;  %v1462_v61 = vunpack.c.h.s8.bf16 %v342_v44 }
 0x483   : > { %4709 = vmatpush1.bf16.msra.mxu0 %v1348_v54  ;;  %5037 = vmatpush1.bf16.msra.mxu1 %v1350_v56  ;;  %v1463_v54 = vunpack.c.h.s8.bf16 %v343_v23  ;;  %v357_v56 = vld [vmem:[%s7088_s22 + $0x348] sm:$0xff] }
 0x484   : > { %4710 = vmatprep.subr.bf16.mxu0 %v1365_v57  ;;  %5038 = vmatprep.subr.bf16.mxu1 %v1367_v38  ;;  %v359_v57 = vld [vmem:[%s7088_s22 + $0x358] sm:$0xff]  ;;  %v1460_v38 = vunpack.c.h.s8.bf16 %v340_v42  ;;  %v1477_v0 = vunpack.c.l.s8.bf16 %v357_v56  ;;  %v1493_v25 = vunpack.c.h.s8.bf16 %v357_v56 }
 0x487   : > { %4711 = vmatpush1.bf16.msra.mxu0 %v1364_v1  ;;  %5039 = vmatpush1.bf16.msra.mxu1 %v1366_v2  ;;  %v1479_v1 = vunpack.c.l.s8.bf16 %v359_v57  ;;  %v356_v2 = vld [vmem:[%s7088_s22 + $0x340] sm:$0xff] }
 0x488   : > { %4712 = vmatprep.subr.bf16.mxu0 %v1381_v7  ;;  %5040 = vmatprep.subr.bf16.mxu1 %v1383_v8  ;;  %v358_v7 = vld [vmem:[%s7088_s22 + $0x350] sm:$0xff]  ;;  %v1476_v8 = vunpack.c.l.s8.bf16 %v356_v2 }
 0x489   : > { %v1478_v9 = vunpack.c.l.s8.bf16 %v358_v7  ;;  %v1494_v15 = vunpack.c.h.s8.bf16 %v358_v7 }
 0x48b   : > { %4713 = vmatpush1.bf16.msra.mxu0 %v1380_v10  ;;  %5041 = vmatpush1.bf16.msra.mxu1 %v1382_v11  ;;  %v1495_v10 = vunpack.c.h.s8.bf16 %v359_v57  ;;  %v373_v11 = vld [vmem:[%s7088_s22 + $0x3c8] sm:$0xff] }
 0x48c   : > { %4714 = vmatprep.subr.bf16.mxu0 %v1397_v13  ;;  %5042 = vmatprep.subr.bf16.mxu1 %v1399_v14  ;;  %v375_v13 = vld [vmem:[%s7088_s22 + $0x3d8] sm:$0xff]  ;;  %v1492_v14 = vunpack.c.h.s8.bf16 %v356_v2  ;;  %v1509_v16 = vunpack.c.l.s8.bf16 %v373_v11  ;;  %v1525_v27 = vunpack.c.h.s8.bf16 %v373_v11 }
 0x48f   : > { %4715 = vmatpush1.bf16.msra.mxu0 %v1396_v17  ;;  %5043 = vmatpush1.bf16.msra.mxu1 %v1398_v18  ;;  %v1511_v17 = vunpack.c.l.s8.bf16 %v375_v13  ;;  %v372_v18 = vld [vmem:[%s7088_s22 + $0x3c0] sm:$0xff] }
 0x490   : > { %4716 = vmatprep.subr.bf16.mxu0 %v1413_v19  ;;  %5044 = vmatprep.subr.bf16.mxu1 %v1415_v20  ;;  %v374_v19 = vld [vmem:[%s7088_s22 + $0x3d0] sm:$0xff]  ;;  %v1508_v20 = vunpack.c.l.s8.bf16 %v372_v18 }
 0x491   : > { %v1510_v21 = vunpack.c.l.s8.bf16 %v374_v19  ;;  %v1526_v29 = vunpack.c.h.s8.bf16 %v374_v19 }
 0x493   : > { %4717 = vmatpush1.bf16.msra.mxu0 %v1412_v30  ;;  %5045 = vmatpush1.bf16.msra.mxu1 %v1414_v31  ;;  %v1527_v30 = vunpack.c.h.s8.bf16 %v375_v13  ;;  %v389_v31 = vld [vmem:[%s7088_s22 + $0x448] sm:$0xff] }
 0x494   : > { %4718 = vmatprep.subr.bf16.mxu0 %v1429_v51  ;;  %5046 = vmatprep.subr.bf16.mxu1 %v1431_v33  ;;  %v391_v51 = vld [vmem:[%s7088_s22 + $0x458] sm:$0xff]  ;;  %v1524_v33 = vunpack.c.h.s8.bf16 %v372_v18  ;;  %v1541_v23 = vunpack.c.l.s8.bf16 %v389_v31  ;;  %v1557_v44 = vunpack.c.h.s8.bf16 %v389_v31 }
 0x497   : > { %4719 = vmatpush1.bf16.msra.mxu0 %v1428_v35  ;;  %5047 = vmatpush1.bf16.msra.mxu1 %v1430_v37  ;;  %v1543_v35 = vunpack.c.l.s8.bf16 %v391_v51  ;;  %v388_v37 = vld [vmem:[%s7088_s22 + $0x440] sm:$0xff] }
 0x498   : > { %4720 = vmatprep.subr.bf16.mxu0 %v1445_v40  ;;  %5048 = vmatprep.subr.bf16.mxu1 %v1447_v41  ;;  %v390_v40 = vld [vmem:[%s7088_s22 + $0x450] sm:$0xff]  ;;  %v1540_v41 = vunpack.c.l.s8.bf16 %v388_v37 }
 0x499   : > { %v1542_v42 = vunpack.c.l.s8.bf16 %v390_v40  ;;  %v1558_v56 = vunpack.c.h.s8.bf16 %v390_v40 }
 0x49b   : > { %4721 = vmatpush1.bf16.msra.mxu0 %v1444_v45  ;;  %5049 = vmatpush1.bf16.msra.mxu1 %v1446_v53  ;;  %v1559_v45 = vunpack.c.h.s8.bf16 %v391_v51  ;;  %v405_v53 = vld [vmem:[%s7088_s22 + $0x4c8] sm:$0xff] }
 0x49c   : > { %4722 = vmatprep.subr.bf16.mxu0 %v1461_v47  ;;  %5050 = vmatprep.subr.bf16.mxu1 %v1463_v54  ;;  %v407_v47 = vld [vmem:[%s7088_s22 + $0x4d8] sm:$0xff]  ;;  %v1556_v54 = vunpack.c.h.s8.bf16 %v388_v37  ;;  %v1573_v57 = vunpack.c.l.s8.bf16 %v405_v53  ;;  %v1589_v7 = vunpack.c.h.s8.bf16 %v405_v53 }
 0x49f   : > { %4723 = vmatpush1.bf16.msra.mxu0 %v1460_v38  ;;  %5051 = vmatpush1.bf16.msra.mxu1 %v1462_v61  ;;  %v1575_v38 = vunpack.c.l.s8.bf16 %v407_v47  ;;  %v404_v61 = vld [vmem:[%s7088_s22 + $0x4c0] sm:$0xff] }
 0x4a0   : > { %4724 = vmatprep.subr.bf16.mxu0 %v1477_v0  ;;  %5052 = vmatprep.subr.bf16.mxu1 %v1479_v1  ;;  %v406_v0 = vld [vmem:[%s7088_s22 + $0x4d0] sm:$0xff]  ;;  %v1572_v1 = vunpack.c.l.s8.bf16 %v404_v61 }
 0x4a1   : > { %v1574_v2 = vunpack.c.l.s8.bf16 %v406_v0  ;;  %v1590_v11 = vunpack.c.h.s8.bf16 %v406_v0 }
 0x4a3   : > { %4725 = vmatpush1.bf16.msra.mxu0 %v1476_v8  ;;  %5053 = vmatpush1.bf16.msra.mxu1 %v1478_v9  ;;  %v1591_v8 = vunpack.c.h.s8.bf16 %v407_v47  ;;  %v421_v9 = vld [vmem:[%s7088_s22 + $0x548] sm:$0xff] }
 0x4a4   : > { %4726 = vmatprep.subr.bf16.mxu0 %v1493_v25  ;;  %5054 = vmatprep.subr.bf16.mxu1 %v1495_v10  ;;  %v423_v25 = vld [vmem:[%s7088_s22 + $0x558] sm:$0xff]  ;;  %v1588_v10 = vunpack.c.h.s8.bf16 %v404_v61  ;;  %v1605_v13 = vunpack.c.l.s8.bf16 %v421_v9  ;;  %v1621_v19 = vunpack.c.h.s8.bf16 %v421_v9 }
 0x4a7   : > { %4727 = vmatpush1.bf16.msra.mxu0 %v1492_v14  ;;  %5055 = vmatpush1.bf16.msra.mxu1 %v1494_v15  ;;  %v1607_v14 = vunpack.c.l.s8.bf16 %v423_v25  ;;  %v420_v15 = vld [vmem:[%s7088_s22 + $0x540] sm:$0xff] }
 0x4a8   : > { %4728 = vmatprep.subr.bf16.mxu0 %v1509_v16  ;;  %5056 = vmatprep.subr.bf16.mxu1 %v1511_v17  ;;  %v422_v16 = vld [vmem:[%s7088_s22 + $0x550] sm:$0xff]  ;;  %v1604_v17 = vunpack.c.l.s8.bf16 %v420_v15 }
 0x4a9   : > { %v1606_v18 = vunpack.c.l.s8.bf16 %v422_v16  ;;  %v1622_v31 = vunpack.c.h.s8.bf16 %v422_v16 }
 0x4ab   : > { %4729 = vmatpush1.bf16.msra.mxu0 %v1508_v20  ;;  %5057 = vmatpush1.bf16.msra.mxu1 %v1510_v21  ;;  %v1623_v20 = vunpack.c.h.s8.bf16 %v423_v25  ;;  %v437_v21 = vld [vmem:[%s7088_s22 + $0x5c8] sm:$0xff] }
 0x4ac   : > { %4730 = vmatprep.subr.bf16.mxu0 %v1525_v27  ;;  %5058 = vmatprep.subr.bf16.mxu1 %v1527_v30  ;;  %v439_v27 = vld [vmem:[%s7088_s22 + $0x5d8] sm:$0xff]  ;;  %v1620_v30 = vunpack.c.h.s8.bf16 %v420_v15  ;;  %v1637_v51 = vunpack.c.l.s8.bf16 %v437_v21  ;;  %v1653_v40 = vunpack.c.h.s8.bf16 %v437_v21 }
 0x4af   : > { %4731 = vmatpush1.bf16.msra.mxu0 %v1524_v33  ;;  %5059 = vmatpush1.bf16.msra.mxu1 %v1526_v29  ;;  %v1639_v33 = vunpack.c.l.s8.bf16 %v439_v27  ;;  %v436_v29 = vld [vmem:[%s7088_s22 + $0x5c0] sm:$0xff] }
 0x4b0   : > { %4741 = vmatprep.subr.bf16.mxu0 %v1541_v23  ;;  %5069 = vmatprep.subr.bf16.mxu1 %v1543_v35  ;;  %v438_v23 = vld [vmem:[%s7088_s22 + $0x5d0] sm:$0xff]  ;;  %v1636_v35 = vunpack.c.l.s8.bf16 %v436_v29 }
 0x4b1   : > { %v1638_v37 = vunpack.c.l.s8.bf16 %v438_v23  ;;  %v1654_v53 = vunpack.c.h.s8.bf16 %v438_v23 }
 0x4b2   : > { %4733 = vmatmul.mubr.bf16.vlgmr.msra.gmra.mrb[8].mxu0 %v7170_v50  ;;  %5061 = vmatmul.mubr.bf16.vlgmr.msra.gmra.mrb[8].mxu1 %v7170_v50 }
 0x4b3   : > { %4742 = vmatpush1.bf16.msra.mxu0 %v1540_v41  ;;  %5070 = vmatpush1.bf16.msra.mxu1 %v1542_v42  ;;  %v1655_v41 = vunpack.c.h.s8.bf16 %v439_v27  ;;  %v453_v42 = vld [vmem:[%s7088_s22 + $0x648] sm:$0xff] }
 0x4b4   : > { %4743 = vmatprep.subr.bf16.mxu0 %v1557_v44  ;;  %5071 = vmatprep.subr.bf16.mxu1 %v1559_v45  ;;  %v455_v44 = vld [vmem:[%s7088_s22 + $0x658] sm:$0xff]  ;;  %v1652_v45 = vunpack.c.h.s8.bf16 %v436_v29  ;;  %v1669_v47 = vunpack.c.l.s8.bf16 %v453_v42  ;;  %v1685_v0 = vunpack.c.h.s8.bf16 %v453_v42 }
 0x4b5   : > { %4773 = vmatprep.mubr.bf16.mxu0 %v7178_v58  ;;  %5101 = vmatprep.mubr.bf16.mxu1 %v7178_v58 }
 0x4b7   : > { %4744 = vmatpush1.bf16.msra.mxu0 %v1556_v54  ;;  %5072 = vmatpush1.bf16.msra.mxu1 %v1558_v56  ;;  %v1671_v54 = vunpack.c.l.s8.bf16 %v455_v44  ;;  %v452_v56 = vld [vmem:[%s7088_s22 + $0x640] sm:$0xff] }
 0x4b8   : > { %4745 = vmatprep.subr.bf16.mxu0 %v1573_v57  ;;  %5073 = vmatprep.subr.bf16.mxu1 %v1575_v38  ;;  %v454_v57 = vld [vmem:[%s7088_s22 + $0x650] sm:$0xff]  ;;  %v1668_v38 = vunpack.c.l.s8.bf16 %v452_v56 }
 0x4b9   : > { %v1670_v61 = vunpack.c.l.s8.bf16 %v454_v57  ;;  %v1686_v9 = vunpack.c.h.s8.bf16 %v454_v57 }
 0x4bb   : > { %4746 = vmatpush1.bf16.msra.mxu0 %v1572_v1  ;;  %5074 = vmatpush1.bf16.msra.mxu1 %v1574_v2  ;;  %v1687_v1 = vunpack.c.h.s8.bf16 %v455_v44  ;;  %v469_v2 = vld [vmem:[%s7088_s22 + $0x6c8] sm:$0xff] }
 0x4bc   : > { %4747 = vmatprep.subr.bf16.mxu0 %v1589_v7  ;;  %5075 = vmatprep.subr.bf16.mxu1 %v1591_v8  ;;  %v471_v7 = vld [vmem:[%s7088_s22 + $0x6d8] sm:$0xff]  ;;  %v1684_v8 = vunpack.c.h.s8.bf16 %v452_v56  ;;  %v1701_v25 = vunpack.c.l.s8.bf16 %v469_v2  ;;  %v1717_v16 = vunpack.c.h.s8.bf16 %v469_v2 }
 0x4bf   : > { %4748 = vmatpush1.bf16.msra.mxu0 %v1588_v10  ;;  %5076 = vmatpush1.bf16.msra.mxu1 %v1590_v11  ;;  %v1703_v10 = vunpack.c.l.s8.bf16 %v471_v7  ;;  %v468_v11 = vld [vmem:[%s7088_s22 + $0x6c0] sm:$0xff] }
 0x4c0   : > { %4749 = vmatprep.subr.bf16.mxu0 %v1605_v13  ;;  %5077 = vmatprep.subr.bf16.mxu1 %v1607_v14  ;;  %v470_v13 = vld [vmem:[%s7088_s22 + $0x6d0] sm:$0xff]  ;;  %v1700_v14 = vunpack.c.l.s8.bf16 %v468_v11 }
 0x4c1   : > { %v1702_v15 = vunpack.c.l.s8.bf16 %v470_v13  ;;  %v1718_v21 = vunpack.c.h.s8.bf16 %v470_v13 }
 0x4c3   : > { %4750 = vmatpush1.bf16.msra.mxu0 %v1604_v17  ;;  %5078 = vmatpush1.bf16.msra.mxu1 %v1606_v18  ;;  %v1719_v17 = vunpack.c.h.s8.bf16 %v471_v7  ;;  %v485_v18 = vld [vmem:[%s7088_s22 + $0x748] sm:$0xff] }
 0x4c4   : > { %4751 = vmatprep.subr.bf16.mxu0 %v1621_v19  ;;  %5079 = vmatprep.subr.bf16.mxu1 %v1623_v20  ;;  %v487_v19 = vld [vmem:[%s7088_s22 + $0x758] sm:$0xff]  ;;  %v1716_v20 = vunpack.c.h.s8.bf16 %v468_v11  ;;  %v1733_v27 = vunpack.c.l.s8.bf16 %v485_v18  ;;  %v1749_v23 = vunpack.c.h.s8.bf16 %v485_v18 }
 0x4c7   : > { %4752 = vmatpush1.bf16.msra.mxu0 %v1620_v30  ;;  %5080 = vmatpush1.bf16.msra.mxu1 %v1622_v31  ;;  %v1735_v30 = vunpack.c.l.s8.bf16 %v487_v19  ;;  %v484_v31 = vld [vmem:[%s7088_s22 + $0x740] sm:$0xff] }
 0x4c8   : > { %4753 = vmatprep.subr.bf16.mxu0 %v1637_v51  ;;  %5081 = vmatprep.subr.bf16.mxu1 %v1639_v33  ;;  %v486_v51 = vld [vmem:[%s7088_s22 + $0x750] sm:$0xff]  ;;  %v1732_v33 = vunpack.c.l.s8.bf16 %v484_v31 }
 0x4c9   : > { %v1734_v29 = vunpack.c.l.s8.bf16 %v486_v51  ;;  %v1750_v42 = vunpack.c.h.s8.bf16 %v486_v51 }
 0x4cb   : > { %4754 = vmatpush1.bf16.msra.mxu0 %v1636_v35  ;;  %5082 = vmatpush1.bf16.msra.mxu1 %v1638_v37  ;;  %v1751_v35 = vunpack.c.h.s8.bf16 %v487_v19  ;;  %v501_v37 = vld [vmem:[%s7088_s22 + $0x7c8] sm:$0xff] }
 0x4cc   : > { %4755 = vmatprep.subr.bf16.mxu0 %v1653_v40  ;;  %5083 = vmatprep.subr.bf16.mxu1 %v1655_v41  ;;  %v503_v40 = vld [vmem:[%s7088_s22 + $0x7d8] sm:$0xff]  ;;  %v1748_v41 = vunpack.c.h.s8.bf16 %v484_v31  ;;  %v1765_v44 = vunpack.c.l.s8.bf16 %v501_v37  ;;  %v1781_v57 = vunpack.c.h.s8.bf16 %v501_v37 }
 0x4cf   : > { %4756 = vmatpush1.bf16.msra.mxu0 %v1652_v45  ;;  %5084 = vmatpush1.bf16.msra.mxu1 %v1654_v53  ;;  %v1767_v45 = vunpack.c.l.s8.bf16 %v503_v40  ;;  %v500_v53 = vld [vmem:[%s7088_s22 + $0x7c0] sm:$0xff] }
 0x4d0   : > { %4757 = vmatprep.subr.bf16.mxu0 %v1669_v47  ;;  %5085 = vmatprep.subr.bf16.mxu1 %v1671_v54  ;;  %v502_v47 = vld [vmem:[%s7088_s22 + $0x7d0] sm:$0xff]  ;;  %v1764_v54 = vunpack.c.l.s8.bf16 %v500_v53 }
 0x4d1   : > { %v1766_v56 = vunpack.c.l.s8.bf16 %v502_v47  ;;  %v1782_v2 = vunpack.c.h.s8.bf16 %v502_v47 }
 0x4d3   : > { %4758 = vmatpush1.bf16.msra.mxu0 %v1668_v38  ;;  %5086 = vmatpush1.bf16.msra.mxu1 %v1670_v61  ;;  %v1783_v38 = vunpack.c.h.s8.bf16 %v503_v40  ;;  %v517_v61 = vld [vmem:[%s7088_s22 + $0x848] sm:$0xff] }
 0x4d4   : > { %4759 = vmatprep.subr.bf16.mxu0 %v1685_v0  ;;  %5087 = vmatprep.subr.bf16.mxu1 %v1687_v1  ;;  %v519_v0 = vld [vmem:[%s7088_s22 + $0x858] sm:$0xff]  ;;  %v1780_v1 = vunpack.c.h.s8.bf16 %v500_v53  ;;  %v1797_v7 = vunpack.c.l.s8.bf16 %v517_v61  ;;  %v1813_v13 = vunpack.c.h.s8.bf16 %v517_v61 }
 0x4d7   : > { %4760 = vmatpush1.bf16.msra.mxu0 %v1684_v8  ;;  %5088 = vmatpush1.bf16.msra.mxu1 %v1686_v9  ;;  %v1799_v8 = vunpack.c.l.s8.bf16 %v519_v0  ;;  %v516_v9 = vld [vmem:[%s7088_s22 + $0x840] sm:$0xff] }
 0x4d8   : > { %4761 = vmatprep.subr.bf16.mxu0 %v1701_v25  ;;  %5089 = vmatprep.subr.bf16.mxu1 %v1703_v10  ;;  %v518_v25 = vld [vmem:[%s7088_s22 + $0x850] sm:$0xff]  ;;  %v1796_v10 = vunpack.c.l.s8.bf16 %v516_v9 }
 0x4d9   : > { %v1798_v11 = vunpack.c.l.s8.bf16 %v518_v25  ;;  %v1814_v18 = vunpack.c.h.s8.bf16 %v518_v25 }
 0x4db   : > { %4762 = vmatpush1.bf16.msra.mxu0 %v1700_v14  ;;  %5090 = vmatpush1.bf16.msra.mxu1 %v1702_v15  ;;  %v1815_v14 = vunpack.c.h.s8.bf16 %v519_v0  ;;  %v533_v15 = vld [vmem:[%s7088_s22 + $0x8c8] sm:$0xff] }
 0x4dc   : > { %4763 = vmatprep.subr.bf16.mxu0 %v1717_v16  ;;  %5091 = vmatprep.subr.bf16.mxu1 %v1719_v17  ;;  %v535_v16 = vld [vmem:[%s7088_s22 + $0x8d8] sm:$0xff]  ;;  %v1812_v17 = vunpack.c.h.s8.bf16 %v516_v9  ;;  %v1829_v19 = vunpack.c.l.s8.bf16 %v533_v15  ;;  %v1845_v51 = vunpack.c.h.s8.bf16 %v533_v15 }
 0x4df   : > { %4764 = vmatpush1.bf16.msra.mxu0 %v1716_v20  ;;  %5092 = vmatpush1.bf16.msra.mxu1 %v1718_v21  ;;  %v1831_v20 = vunpack.c.l.s8.bf16 %v535_v16  ;;  %v532_v21 = vld [vmem:[%s7088_s22 + $0x8c0] sm:$0xff] }
 0x4e0   : > { %4765 = vmatprep.subr.bf16.mxu0 %v1733_v27  ;;  %5093 = vmatprep.subr.bf16.mxu1 %v1735_v30  ;;  %v534_v27 = vld [vmem:[%s7088_s22 + $0x8d0] sm:$0xff]  ;;  %v1828_v30 = vunpack.c.l.s8.bf16 %v532_v21 }
 0x4e1   : > { %v1830_v31 = vunpack.c.l.s8.bf16 %v534_v27  ;;  %v1846_v37 = vunpack.c.h.s8.bf16 %v534_v27 }
 0x4e3   : > { %4766 = vmatpush1.bf16.msra.mxu0 %v1732_v33  ;;  %5094 = vmatpush1.bf16.msra.mxu1 %v1734_v29  ;;  %v1847_v33 = vunpack.c.h.s8.bf16 %v535_v16  ;;  %v549_v29 = vld [vmem:[%s7088_s22 + $0x948] sm:$0xff] }
 0x4e4   : > { %4767 = vmatprep.subr.bf16.mxu0 %v1749_v23  ;;  %5095 = vmatprep.subr.bf16.mxu1 %v1751_v35  ;;  %v551_v23 = vld [vmem:[%s7088_s22 + $0x958] sm:$0xff]  ;;  %v1844_v35 = vunpack.c.h.s8.bf16 %v532_v21  ;;  %v1861_v40 = vunpack.c.l.s8.bf16 %v549_v29  ;;  %v1877_v47 = vunpack.c.h.s8.bf16 %v549_v29 }
 0x4e7   : > { %4768 = vmatpush1.bf16.msra.mxu0 %v1748_v41  ;;  %5096 = vmatpush1.bf16.msra.mxu1 %v1750_v42  ;;  %v1863_v41 = vunpack.c.l.s8.bf16 %v551_v23  ;;  %v548_v42 = vld [vmem:[%s7088_s22 + $0x940] sm:$0xff] }
 0x4e8   : > { %4769 = vmatprep.subr.bf16.mxu0 %v1765_v44  ;;  %5097 = vmatprep.subr.bf16.mxu1 %v1767_v45  ;;  %v550_v44 = vld [vmem:[%s7088_s22 + $0x950] sm:$0xff]  ;;  %v1860_v45 = vunpack.c.l.s8.bf16 %v548_v42 }
 0x4e9   : > { %v1862_v53 = vunpack.c.l.s8.bf16 %v550_v44  ;;  %v1878_v61 = vunpack.c.h.s8.bf16 %v550_v44 }
 0x4eb   : > { %4770 = vmatpush1.bf16.msra.mxu0 %v1764_v54  ;;  %5098 = vmatpush1.bf16.msra.mxu1 %v1766_v56  ;;  %v1879_v54 = vunpack.c.h.s8.bf16 %v551_v23  ;;  %v565_v56 = vld [vmem:[%s7088_s22 + $0x9c8] sm:$0xff] }
 0x4ec   : > { %4771 = vmatprep.subr.bf16.mxu0 %v1781_v57  ;;  %5099 = vmatprep.subr.bf16.mxu1 %v1783_v38  ;;  %v567_v57 = vld [vmem:[%s7088_s22 + $0x9d8] sm:$0xff]  ;;  %v1876_v38 = vunpack.c.h.s8.bf16 %v548_v42  ;;  %v1893_v0 = vunpack.c.l.s8.bf16 %v565_v56  ;;  %v1909_v25 = vunpack.c.h.s8.bf16 %v565_v56 }
 0x4ef   : > { %4772 = vmatpush1.bf16.msra.mxu0 %v1780_v1  ;;  %5100 = vmatpush1.bf16.msra.mxu1 %v1782_v2  ;;  %v1895_v1 = vunpack.c.l.s8.bf16 %v567_v57  ;;  %v564_v2 = vld [vmem:[%s7088_s22 + $0x9c0] sm:$0xff] }
 0x4f0   : > { %4782 = vmatprep.subr.bf16.mxu0 %v1797_v7  ;;  %5110 = vmatprep.subr.bf16.mxu1 %v1799_v8  ;;  %v566_v7 = vld [vmem:[%s7088_s22 + $0x9d0] sm:$0xff]  ;;  %v1892_v8 = vunpack.c.l.s8.bf16 %v564_v2 }
 0x4f1   : > { %v1894_v9 = vunpack.c.l.s8.bf16 %v566_v7  ;;  %v1910_v15 = vunpack.c.h.s8.bf16 %v566_v7 }
 0x4f2   : > { %4774 = vmatmul.mubr.bf16.vlgmr.msra.gmra.mrb[8].mxu0 %v7216_v24  ;;  %5102 = vmatmul.mubr.bf16.vlgmr.msra.gmra.mrb[8].mxu1 %v7216_v24 }
 0x4f3   : > { %4783 = vmatpush1.bf16.msra.mxu0 %v1796_v10  ;;  %5111 = vmatpush1.bf16.msra.mxu1 %v1798_v11  ;;  %v1911_v10 = vunpack.c.h.s8.bf16 %v567_v57  ;;  %v581_v11 = vld [vmem:[%s7088_s22 + $0xa48] sm:$0xff] }
 0x4f4   : > { %4784 = vmatprep.subr.bf16.mxu0 %v1813_v13  ;;  %5112 = vmatprep.subr.bf16.mxu1 %v1815_v14  ;;  %v583_v13 = vld [vmem:[%s7088_s22 + $0xa58] sm:$0xff]  ;;  %v1908_v14 = vunpack.c.h.s8.bf16 %v564_v2  ;;  %v1925_v16 = vunpack.c.l.s8.bf16 %v581_v11  ;;  %v1941_v27 = vunpack.c.h.s8.bf16 %v581_v11 }
 0x4f5   : > { %4814 = vmatprep.mubr.bf16.mxu0 %v7224_v32  ;;  %5142 = vmatprep.mubr.bf16.mxu1 %v7224_v32 }
 0x4f7   : > { %4785 = vmatpush1.bf16.msra.mxu0 %v1812_v17  ;;  %5113 = vmatpush1.bf16.msra.mxu1 %v1814_v18  ;;  %v1927_v17 = vunpack.c.l.s8.bf16 %v583_v13  ;;  %v580_v18 = vld [vmem:[%s7088_s22 + $0xa40] sm:$0xff] }
 0x4f8   : > { %4786 = vmatprep.subr.bf16.mxu0 %v1829_v19  ;;  %5114 = vmatprep.subr.bf16.mxu1 %v1831_v20  ;;  %v582_v19 = vld [vmem:[%s7088_s22 + $0xa50] sm:$0xff]  ;;  %v1924_v20 = vunpack.c.l.s8.bf16 %v580_v18 }
 0x4f9   : > { %v1926_v21 = vunpack.c.l.s8.bf16 %v582_v19  ;;  %v1942_v29 = vunpack.c.h.s8.bf16 %v582_v19 }
 0x4fb   : > { %4787 = vmatpush1.bf16.msra.mxu0 %v1828_v30  ;;  %5115 = vmatpush1.bf16.msra.mxu1 %v1830_v31  ;;  %v1943_v30 = vunpack.c.h.s8.bf16 %v583_v13  ;;  %v597_v31 = vld [vmem:[%s7088_s22 + $0xac8] sm:$0xff] }
 0x4fc   : > { %4788 = vmatprep.subr.bf16.mxu0 %v1845_v51  ;;  %5116 = vmatprep.subr.bf16.mxu1 %v1847_v33  ;;  %v599_v51 = vld [vmem:[%s7088_s22 + $0xad8] sm:$0xff]  ;;  %v1940_v33 = vunpack.c.h.s8.bf16 %v580_v18  ;;  %v1957_v23 = vunpack.c.l.s8.bf16 %v597_v31  ;;  %v1973_v44 = vunpack.c.h.s8.bf16 %v597_v31 }
 0x4ff   : > { %4789 = vmatpush1.bf16.msra.mxu0 %v1844_v35  ;;  %5117 = vmatpush1.bf16.msra.mxu1 %v1846_v37  ;;  %v1959_v35 = vunpack.c.l.s8.bf16 %v599_v51  ;;  %v596_v37 = vld [vmem:[%s7088_s22 + $0xac0] sm:$0xff] }
 0x500   : > { %4790 = vmatprep.subr.bf16.mxu0 %v1861_v40  ;;  %5118 = vmatprep.subr.bf16.mxu1 %v1863_v41  ;;  %v598_v40 = vld [vmem:[%s7088_s22 + $0xad0] sm:$0xff]  ;;  %v1956_v41 = vunpack.c.l.s8.bf16 %v596_v37 }
 0x501   : > { %v1958_v42 = vunpack.c.l.s8.bf16 %v598_v40  ;;  %v1974_v56 = vunpack.c.h.s8.bf16 %v598_v40 }
 0x503   : > { %4791 = vmatpush1.bf16.msra.mxu0 %v1860_v45  ;;  %5119 = vmatpush1.bf16.msra.mxu1 %v1862_v53  ;;  %v1975_v45 = vunpack.c.h.s8.bf16 %v599_v51  ;;  %v613_v53 = vld [vmem:[%s7088_s22 + $0xb48] sm:$0xff] }
 0x504   : > { %4792 = vmatprep.subr.bf16.mxu0 %v1877_v47  ;;  %5120 = vmatprep.subr.bf16.mxu1 %v1879_v54  ;;  %v615_v47 = vld [vmem:[%s7088_s22 + $0xb58] sm:$0xff]  ;;  %v1972_v54 = vunpack.c.h.s8.bf16 %v596_v37  ;;  %v1989_v57 = vunpack.c.l.s8.bf16 %v613_v53  ;;  %v2005_v7 = vunpack.c.h.s8.bf16 %v613_v53 }
 0x507   : > { %4793 = vmatpush1.bf16.msra.mxu0 %v1876_v38  ;;  %5121 = vmatpush1.bf16.msra.mxu1 %v1878_v61  ;;  %v1991_v38 = vunpack.c.l.s8.bf16 %v615_v47  ;;  %v612_v61 = vld [vmem:[%s7088_s22 + $0xb40] sm:$0xff] }
 0x508   : > { %4794 = vmatprep.subr.bf16.mxu0 %v1893_v0  ;;  %5122 = vmatprep.subr.bf16.mxu1 %v1895_v1  ;;  %v614_v0 = vld [vmem:[%s7088_s22 + $0xb50] sm:$0xff]  ;;  %v1988_v1 = vunpack.c.l.s8.bf16 %v612_v61 }
 0x509   : > { %v1990_v2 = vunpack.c.l.s8.bf16 %v614_v0  ;;  %v2006_v11 = vunpack.c.h.s8.bf16 %v614_v0 }
 0x50b   : > { %4795 = vmatpush1.bf16.msra.mxu0 %v1892_v8  ;;  %5123 = vmatpush1.bf16.msra.mxu1 %v1894_v9  ;;  %v2007_v8 = vunpack.c.h.s8.bf16 %v615_v47  ;;  %v629_v9 = vld [vmem:[%s7088_s22 + $0xbc8] sm:$0xff] }
 0x50c   : > { %4796 = vmatprep.subr.bf16.mxu0 %v1909_v25  ;;  %5124 = vmatprep.subr.bf16.mxu1 %v1911_v10  ;;  %v631_v25 = vld [vmem:[%s7088_s22 + $0xbd8] sm:$0xff]  ;;  %v2004_v10 = vunpack.c.h.s8.bf16 %v612_v61  ;;  %v2021_v13 = vunpack.c.l.s8.bf16 %v629_v9  ;;  %v2037_v19 = vunpack.c.h.s8.bf16 %v629_v9 }
 0x50f   : > { %4797 = vmatpush1.bf16.msra.mxu0 %v1908_v14  ;;  %5125 = vmatpush1.bf16.msra.mxu1 %v1910_v15  ;;  %v2023_v14 = vunpack.c.l.s8.bf16 %v631_v25  ;;  %v628_v15 = vld [vmem:[%s7088_s22 + $0xbc0] sm:$0xff] }
 0x510   : > { %4798 = vmatprep.subr.bf16.mxu0 %v1925_v16  ;;  %5126 = vmatprep.subr.bf16.mxu1 %v1927_v17  ;;  %v630_v16 = vld [vmem:[%s7088_s22 + $0xbd0] sm:$0xff]  ;;  %v2020_v17 = vunpack.c.l.s8.bf16 %v628_v15 }
 0x511   : > { %v2022_v18 = vunpack.c.l.s8.bf16 %v630_v16  ;;  %v2038_v31 = vunpack.c.h.s8.bf16 %v630_v16 }
 0x513   : > { %4799 = vmatpush1.bf16.msra.mxu0 %v1924_v20  ;;  %5127 = vmatpush1.bf16.msra.mxu1 %v1926_v21  ;;  %v2039_v20 = vunpack.c.h.s8.bf16 %v631_v25  ;;  %v645_v21 = vld [vmem:[%s7088_s22 + $0xc48] sm:$0xff] }
 0x514   : > { %4800 = vmatprep.subr.bf16.mxu0 %v1941_v27  ;;  %5128 = vmatprep.subr.bf16.mxu1 %v1943_v30  ;;  %v647_v27 = vld [vmem:[%s7088_s22 + $0xc58] sm:$0xff]  ;;  %v2036_v30 = vunpack.c.h.s8.bf16 %v628_v15  ;;  %v2053_v51 = vunpack.c.l.s8.bf16 %v645_v21  ;;  %v2069_v40 = vunpack.c.h.s8.bf16 %v645_v21  ;;  %v7943_v15 = vsub.s32 6, %v7613_v55 }
 0x517   : > { %4801 = vmatpush1.bf16.msra.mxu0 %v1940_v33  ;;  %5129 = vmatpush1.bf16.msra.mxu1 %v1942_v29  ;;  %v2055_v33 = vunpack.c.l.s8.bf16 %v647_v27  ;;  %v644_v29 = vld [vmem:[%s7088_s22 + $0xc40] sm:$0xff] }
 0x518   : > { %4802 = vmatprep.subr.bf16.mxu0 %v1957_v23  ;;  %5130 = vmatprep.subr.bf16.mxu1 %v1959_v35  ;;  %v646_v23 = vld [vmem:[%s7088_s22 + $0xc50] sm:$0xff]  ;;  %v2052_v35 = vunpack.c.l.s8.bf16 %v644_v29 }
 0x519   : > { %v2054_v37 = vunpack.c.l.s8.bf16 %v646_v23  ;;  %v2070_v53 = vunpack.c.h.s8.bf16 %v646_v23 }
 0x51b   : > { %4803 = vmatpush1.bf16.msra.mxu0 %v1956_v41  ;;  %5131 = vmatpush1.bf16.msra.mxu1 %v1958_v42  ;;  %v2071_v41 = vunpack.c.h.s8.bf16 %v647_v27  ;;  %v661_v42 = vld [vmem:[%s7088_s22 + $0xcc8] sm:$0xff] }
 0x51c   : > { %4804 = vmatprep.subr.bf16.mxu0 %v1973_v44  ;;  %5132 = vmatprep.subr.bf16.mxu1 %v1975_v45  ;;  %v663_v44 = vld [vmem:[%s7088_s22 + $0xcd8] sm:$0xff]  ;;  %v2068_v45 = vunpack.c.h.s8.bf16 %v644_v29  ;;  %v2085_v47 = vunpack.c.l.s8.bf16 %v661_v42  ;;  %v2101_v0 = vunpack.c.h.s8.bf16 %v661_v42  ;;  %v693_v27 = vld [vmem:[%s7088_s22 + $0xdc8] sm:$0xff] }
 0x51d   : > { %v2149_v42 = vunpack.c.l.s8.bf16 %v693_v27 }
 0x51f   : > { %4805 = vmatpush1.bf16.msra.mxu0 %v1972_v54  ;;  %5133 = vmatpush1.bf16.msra.mxu1 %v1974_v56  ;;  %v2087_v54 = vunpack.c.l.s8.bf16 %v663_v44  ;;  %v660_v56 = vld [vmem:[%s7088_s22 + $0xcc0] sm:$0xff] }
 0x520   : > { %4806 = vmatprep.subr.bf16.mxu0 %v1989_v57  ;;  %5134 = vmatprep.subr.bf16.mxu1 %v1991_v38  ;;  %v662_v57 = vld [vmem:[%s7088_s22 + $0xcd0] sm:$0xff]  ;;  %v2084_v38 = vunpack.c.l.s8.bf16 %v660_v56 }
 0x521   : > { %v2086_v61 = vunpack.c.l.s8.bf16 %v662_v57  ;;  %v2102_v9 = vunpack.c.h.s8.bf16 %v662_v57 }
 0x523   : > { %4807 = vmatpush1.bf16.msra.mxu0 %v1988_v1  ;;  %5135 = vmatpush1.bf16.msra.mxu1 %v1990_v2  ;;  %v2103_v1 = vunpack.c.h.s8.bf16 %v663_v44  ;;  %v677_v2 = vld [vmem:[%s7088_s22 + $0xd48] sm:$0xff] }
 0x524   : > { %4808 = vmatprep.subr.bf16.mxu0 %v2005_v7  ;;  %5136 = vmatprep.subr.bf16.mxu1 %v2007_v8  ;;  %v679_v7 = vld [vmem:[%s7088_s22 + $0xd58] sm:$0xff]  ;;  %v2100_v8 = vunpack.c.h.s8.bf16 %v660_v56  ;;  %v2117_v25 = vunpack.c.l.s8.bf16 %v677_v2 }
 0x525   : > { %v2135_v21 = vunpack.c.h.s8.bf16 %v679_v7 }
 0x527   : > { %4809 = vmatpush1.bf16.msra.mxu0 %v2004_v10  ;;  %5137 = vmatpush1.bf16.msra.mxu1 %v2006_v11  ;;  %v2119_v10 = vunpack.c.l.s8.bf16 %v679_v7  ;;  %v676_v11 = vld [vmem:[%s7088_s22 + $0xd40] sm:$0xff] }
 0x528   : > { %4810 = vmatprep.subr.bf16.mxu0 %v2021_v13  ;;  %5138 = vmatprep.subr.bf16.mxu1 %v2023_v14  ;;  %v678_v13 = vld [vmem:[%s7088_s22 + $0xd50] sm:$0xff]  ;;  %v7940_v14 = vsub.s32 4, %v7613_v55  ;;  %v2116_v16 = vunpack.c.l.s8.bf16 %v676_v11  ;;  %v2132_v23 = vunpack.c.h.s8.bf16 %v676_v11 }
 0x52b   : > { %4811 = vmatpush1.bf16.msra.mxu0 %v2020_v17  ;;  %5139 = vmatpush1.bf16.msra.mxu1 %v2022_v18  ;;  %v2118_v17 = vunpack.c.l.s8.bf16 %v678_v13  ;;  %v7946_v18 = vsub.s32 5, %v7613_v55 }
 0x52c   : > { %4812 = vmatprep.subr.bf16.mxu0 %v2037_v19  ;;  %5140 = vmatprep.subr.bf16.mxu1 %v2039_v20  ;;  %v7949_v19 = vsub.s32 7, %v7613_v55  ;;  %v2133_v20 = vunpack.c.h.s8.bf16 %v677_v2 }
 0x52f   : > { %4813 = vmatpush1.bf16.msra.mxu0 %v2036_v30  ;;  %5141 = vmatpush1.bf16.msra.mxu1 %v2038_v31  ;;  %v695_v30 = vld [vmem:[%s7088_s22 + $0xdd8] sm:$0xff]  ;;  %v6744_v31 = vld [vmem:[%s7623_s13] sm:$0xff] }
 0x530   : > { %4823 = vmatprep.subr.bf16.mxu0 %v2053_v51  ;;  %5151 = vmatprep.subr.bf16.mxu1 %v2055_v33  ;;  %v6037_v51 = vrot.slane %v6744_v31, %v7940_v14  ;;  %v6045_v33 = vrot.slane %v6744_v31, %v7943_v15  ;;  %v6041_v29 = vrot.slane %v6744_v31, %v7946_v18  ;;  %v2151_v44 = vunpack.c.l.s8.bf16 %v695_v30 }
 0x531   : > { %v6049_v55 = vrot.slane %v6744_v31, %v7949_v19 }
 0x532   : > { %4815 = vmatmul.mubr.bf16.vlgmr.msra.gmra.mrb[8].mxu0 %v7262_v4  ;;  %5143 = vmatmul.mubr.bf16.vlgmr.msra.gmra.mrb[8].mxu1 %v7262_v4 }
 0x533   : > { %4824 = vmatpush1.bf16.msra.mxu0 %v2052_v35  ;;  %5152 = vmatpush1.bf16.msra.mxu1 %v2054_v37  ;;  %v2134_v35 = vunpack.c.h.s8.bf16 %v678_v13  ;;  %v6745_v37 = vld [vmem:[%s7632_s14] sm:$0xff] }
 0x534   : > { %4825 = vmatprep.subr.bf16.mxu0 %v2069_v40  ;;  %5153 = vmatprep.subr.bf16.mxu1 %v2071_v41  ;;  %v6138_v40 = vrot.slane %v6745_v37, %v7940_v14  ;;  %v6146_v41 = vrot.slane %v6745_v37, %v7943_v15  ;;  %v6142_v56 = vrot.slane %v6745_v37, %v7946_v18 }
 0x535   : > { %4855 = vmatprep.mubr.bf16.mxu0 %v7270_v12  ;;  %5183 = vmatprep.mubr.bf16.mxu1 %v7270_v12  ;;  %v6150_v57 = vrot.slane %v6745_v37, %v7949_v19 }
 0x537   : > { %4826 = vmatpush1.bf16.msra.mxu0 %v2068_v45  ;;  %5154 = vmatpush1.bf16.msra.mxu1 %v2070_v53  ;;  %v692_v45 = vld [vmem:[%s7088_s22 + $0xdc0] sm:$0xff]  ;;  %v694_v53 = vld [vmem:[%s7088_s22 + $0xdd0] sm:$0xff] }
 0x538   : > { %4827 = vmatprep.subr.bf16.mxu0 %v2085_v47  ;;  %5155 = vmatprep.subr.bf16.mxu1 %v2087_v54 }
 0x53b   : > { %4828 = vmatpush1.bf16.msra.mxu0 %v2084_v38  ;;  %5156 = vmatpush1.bf16.msra.mxu1 %v2086_v61 }
 0x53c   : > { %4829 = vmatprep.subr.bf16.mxu0 %v2101_v0  ;;  %5157 = vmatprep.subr.bf16.mxu1 %v2103_v1 }
 0x53f   : > { %4830 = vmatpush1.bf16.msra.mxu0 %v2100_v8  ;;  %5158 = vmatpush1.bf16.msra.mxu1 %v2102_v9 }
 0x540   : > { %4831 = vmatprep.subr.bf16.mxu0 %v2117_v25  ;;  %5159 = vmatprep.subr.bf16.mxu1 %v2119_v10  ;;  %v2148_v25 = vunpack.c.l.s8.bf16 %v692_v45  ;;  %v2150_v10 = vunpack.c.l.s8.bf16 %v694_v53 }
 0x543   : > { %4832 = vmatpush1.bf16.msra.mxu0 %v2116_v16  ;;  %5160 = vmatpush1.bf16.msra.mxu1 %v2118_v17 }
 0x544   : > { %4833 = vmatprep.subr.bf16.mxu0 %v2133_v20  ;;  %5161 = vmatprep.subr.bf16.mxu1 %v2135_v21  ;;  %v2165_v20 = vunpack.c.h.s8.bf16 %v693_v27  ;;  %v2167_v21 = vunpack.c.h.s8.bf16 %v695_v30 }
 0x545   : > { %v4365_v47 = vpop.f32.mrb[4].mxu0  ;;  %v4693_v54 = vpop.f32.mrb[4].mxu1 }
 0x546   : > { %v6102_v38 = vmul.f32 %v6037_v51, %v4365_v47  ;;  %v6104_v61 = vmul.f32 %v6045_v33, %v4693_v54  ;;  %v4367_v0 = vpop.f32.mrb[5].mxu0  ;;  %v4695_v1 = vpop.f32.mrb[5].mxu1  ;;  %v709_v33 = vld [vmem:[%s7088_s22 + $0xe48] sm:$0xff]  ;;  %v727_v47 = vld [vmem:[%s7088_s22 + $0xed8] sm:$0xff] }
 0x547   : > { %v6103_v2 = vmul.f32 %v6041_v29, %v4367_v0  ;;  %v6105_v7 = vmul.f32 %v6049_v55, %v4695_v1  ;;  %v4369_v8 = vpop.f32.mrb[6].mxu0  ;;  %v4697_v9 = vpop.f32.mrb[6].mxu1  ;;  %4834 = vmatpush1.bf16.msra.mxu0 %v2132_v23  ;;  %5162 = vmatpush1.bf16.msra.mxu1 %v2134_v35  ;;  %v711_v29 = vld [vmem:[%s7088_s22 + $0xe58] sm:$0xff]  ;;  %v2164_v55 = vunpack.c.h.s8.bf16 %v692_v45  ;;  %v2166_v23 = vunpack.c.h.s8.bf16 %v694_v53  ;;  %v725_v45 = vld [vmem:[%s7088_s22 + $0xec8] sm:$0xff] }
 0x548   : > { %v7965_v11 = vadd.f32 %v6138_v40, %v6102_v38  ;;  %v7967_v13 = vadd.f32 %v6146_v41, %v6104_v61  ;;  %v4370_v16 = vpop.f32.mrb[7].mxu0  ;;  %v4698_v17 = vpop.f32.mrb[7].mxu1  ;;  %4835 = vmatprep.subr.bf16.mxu0 %v2149_v42  ;;  %5163 = vmatprep.subr.bf16.mxu1 %v2151_v44  ;;  %v2181_v35 = vunpack.c.l.s8.bf16 %v709_v33  ;;  %v2183_v37 = vunpack.c.l.s8.bf16 %v711_v29  ;;  %v708_v40 = vld [vmem:[%s7088_s22 + $0xe40] sm:$0xff]  ;;  %v710_v41 = vld [vmem:[%s7088_s22 + $0xe50] sm:$0xff]  ;;  %v741_v8 = vld [vmem:[%s7088_s22 + $0xf48] sm:$0xff] }
 0x549   : > { %v7969_v31 = vadd.f32 %v6142_v56, %v6103_v2  ;;  %v7971_v51 = vadd.f32 %v6150_v57, %v6105_v7  ;;  %v2180_v27 = vunpack.c.l.s8.bf16 %v708_v40  ;;  %v2182_v30 = vunpack.c.l.s8.bf16 %v710_v41  ;;  %v724_v38 = vld [vmem:[%s7088_s22 + $0xec0] sm:$0xff]  ;;  %v726_v61 = vld [vmem:[%s7088_s22 + $0xed0] sm:$0xff]  ;;  %v743_v9 = vld [vmem:[%s7088_s22 + $0xf58] sm:$0xff] }
 0x54a   : > { %v2197_v42 = vunpack.c.h.s8.bf16 %v709_v33  ;;  %v2199_v44 = vunpack.c.h.s8.bf16 %v711_v29  ;;  %v2196_v53 = vunpack.c.h.s8.bf16 %v708_v40  ;;  %v2198_v54 = vunpack.c.h.s8.bf16 %v710_v41 }
 0x54b   : > { %4836 = vmatpush1.bf16.msra.mxu0 %v2148_v25  ;;  %5164 = vmatpush1.bf16.msra.mxu1 %v2150_v10  ;;  %v2213_v56 = vunpack.c.l.s8.bf16 %v725_v45  ;;  %v2215_v57 = vunpack.c.l.s8.bf16 %v727_v47  ;;  %v2212_v0 = vunpack.c.l.s8.bf16 %v724_v38  ;;  %v2214_v1 = vunpack.c.l.s8.bf16 %v726_v61 }
 0x54c   : > { %4837 = vmatprep.subr.bf16.mxu0 %v2165_v20  ;;  %5165 = vmatprep.subr.bf16.mxu1 %v2167_v21  ;;  %v2229_v2 = vunpack.c.h.s8.bf16 %v725_v45  ;;  %v2231_v7 = vunpack.c.h.s8.bf16 %v727_v47  ;;  %v2228_v25 = vunpack.c.h.s8.bf16 %v724_v38  ;;  %v2230_v10 = vunpack.c.h.s8.bf16 %v726_v61  ;;  %v740_v20 = vld [vmem:[%s7088_s22 + $0xf40] sm:$0xff]  ;;  %v742_v21 = vld [vmem:[%s7088_s22 + $0xf50] sm:$0xff] }
 0x54d   : > { %v2245_v16 = vunpack.c.l.s8.bf16 %v741_v8  ;;  %v2247_v17 = vunpack.c.l.s8.bf16 %v743_v9  ;;  %v2244_v33 = vunpack.c.l.s8.bf16 %v740_v20  ;;  %v2246_v29 = vunpack.c.l.s8.bf16 %v742_v21 }
 0x54e   : > { %v2260_v40 = vunpack.c.h.s8.bf16 %v740_v20  ;;  %v2262_v41 = vunpack.c.h.s8.bf16 %v742_v21  ;;  %6756 = vtanh.f32 (!%p6419_p10), %v7965_v11 }
 0x54f   : > { %4838 = vmatpush1.bf16.msra.mxu0 %v2164_v55  ;;  %5166 = vmatpush1.bf16.msra.mxu1 %v2166_v23  ;;  %v2261_v55 = vunpack.c.h.s8.bf16 %v741_v8  ;;  %v2263_v23 = vunpack.c.h.s8.bf16 %v743_v9  ;;  %6758 = vtanh.f32 (!%p6419_p10), %v7969_v31 }
 0x550   : > { %4839 = vmatprep.subr.bf16.mxu0 %v2181_v35  ;;  %5167 = vmatprep.subr.bf16.mxu1 %v2183_v37  ;;  %v757_v35 = vld [vmem:[%s7088_s22 + $0xfc8] sm:$0xff]  ;;  %v759_v37 = vld [vmem:[%s7088_s22 + $0xfd8] sm:$0xff]  ;;  %6760 = vtanh.f32 (!%p6419_p10), %v7967_v13 }
 0x551   : > { %6762 = vtanh.f32 (!%p6419_p10), %v7971_v51 }
 0x553   : > { %4840 = vmatpush1.bf16.msra.mxu0 %v2180_v27  ;;  %5168 = vmatpush1.bf16.msra.mxu1 %v2182_v30  ;;  %v2277_v27 = vunpack.c.l.s8.bf16 %v757_v35  ;;  %v2279_v30 = vunpack.c.l.s8.bf16 %v759_v37 }
 0x554   : > { %4841 = vmatprep.subr.bf16.mxu0 %v2197_v42  ;;  %5169 = vmatprep.subr.bf16.mxu1 %v2199_v44  ;;  %v756_v42 = vld [vmem:[%s7088_s22 + $0xfc0] sm:$0xff]  ;;  %v758_v44 = vld [vmem:[%s7088_s22 + $0xfd0] sm:$0xff] }
 0x555   : > { %v2276_v45 = vunpack.c.l.s8.bf16 %v756_v42  ;;  %v2278_v47 = vunpack.c.l.s8.bf16 %v758_v44  ;;  %v2292_v38 = vunpack.c.h.s8.bf16 %v756_v42  ;;  %v2294_v61 = vunpack.c.h.s8.bf16 %v758_v44 }
 0x557   : > { %4842 = vmatpush1.bf16.msra.mxu0 %v2196_v53  ;;  %5170 = vmatpush1.bf16.msra.mxu1 %v2198_v54  ;;  %v2293_v53 = vunpack.c.h.s8.bf16 %v757_v35  ;;  %v2295_v54 = vunpack.c.h.s8.bf16 %v759_v37 }
 0x558   : > { %4843 = vmatprep.subr.bf16.mxu0 %v2213_v56  ;;  %5171 = vmatprep.subr.bf16.mxu1 %v2215_v57  ;;  %v773_v56 = vld [vmem:[%s7088_s22 + $0x1048] sm:$0xff]  ;;  %v775_v57 = vld [vmem:[%s7088_s22 + $0x1058] sm:$0xff] }
 0x55b   : > { %4844 = vmatpush1.bf16.msra.mxu0 %v2212_v0  ;;  %5172 = vmatpush1.bf16.msra.mxu1 %v2214_v1  ;;  %v2309_v0 = vunpack.c.l.s8.bf16 %v773_v56  ;;  %v2311_v1 = vunpack.c.l.s8.bf16 %v775_v57 }
 0x55c   : > { %4845 = vmatprep.subr.bf16.mxu0 %v2229_v2  ;;  %5173 = vmatprep.subr.bf16.mxu1 %v2231_v7  ;;  %v772_v2 = vld [vmem:[%s7088_s22 + $0x1040] sm:$0xff]  ;;  %v774_v7 = vld [vmem:[%s7088_s22 + $0x1050] sm:$0xff] }
 0x55d   : > { %v2308_v8 = vunpack.c.l.s8.bf16 %v772_v2  ;;  %v2310_v9 = vunpack.c.l.s8.bf16 %v774_v7  ;;  %v2324_v20 = vunpack.c.h.s8.bf16 %v772_v2  ;;  %v2326_v21 = vunpack.c.h.s8.bf16 %v774_v7 }
 0x55f   : > { %4846 = vmatpush1.bf16.msra.mxu0 %v2228_v25  ;;  %5174 = vmatpush1.bf16.msra.mxu1 %v2230_v10  ;;  %v2325_v25 = vunpack.c.h.s8.bf16 %v773_v56  ;;  %v2327_v10 = vunpack.c.h.s8.bf16 %v775_v57 }
 0x560   : > { %4847 = vmatprep.subr.bf16.mxu0 %v2245_v16  ;;  %5175 = vmatprep.subr.bf16.mxu1 %v2247_v17  ;;  %v789_v16 = vld [vmem:[%s7088_s22 + $0x10c8] sm:$0xff]  ;;  %v791_v17 = vld [vmem:[%s7088_s22 + $0x10d8] sm:$0xff] }
 0x563   : > { %4848 = vmatpush1.bf16.msra.mxu0 %v2244_v33  ;;  %5176 = vmatpush1.bf16.msra.mxu1 %v2246_v29  ;;  %v2341_v33 = vunpack.c.l.s8.bf16 %v789_v16  ;;  %v2343_v29 = vunpack.c.l.s8.bf16 %v791_v17 }
 0x564   : > { %4849 = vmatprep.subr.bf16.mxu0 %v2261_v55  ;;  %5177 = vmatprep.subr.bf16.mxu1 %v2263_v23  ;;  %v788_v55 = vld [vmem:[%s7088_s22 + $0x10c0] sm:$0xff]  ;;  %v790_v23 = vld [vmem:[%s7088_s22 + $0x10d0] sm:$0xff] }
 0x565   : > { %v2340_v35 = vunpack.c.l.s8.bf16 %v788_v55  ;;  %v2342_v37 = vunpack.c.l.s8.bf16 %v790_v23  ;;  %v2356_v42 = vunpack.c.h.s8.bf16 %v788_v55  ;;  %v2358_v44 = vunpack.c.h.s8.bf16 %v790_v23 }
 0x567   : > { %4850 = vmatpush1.bf16.msra.mxu0 %v2260_v40  ;;  %5178 = vmatpush1.bf16.msra.mxu1 %v2262_v41  ;;  %v2357_v40 = vunpack.c.h.s8.bf16 %v789_v16  ;;  %v2359_v41 = vunpack.c.h.s8.bf16 %v791_v17 }
 0x568   : > { %4851 = vmatprep.subr.bf16.mxu0 %v2277_v27  ;;  %5179 = vmatprep.subr.bf16.mxu1 %v2279_v30  ;;  %v805_v27 = vld [vmem:[%s7088_s22 + $0x1148] sm:$0xff]  ;;  %v807_v30 = vld [vmem:[%s7088_s22 + $0x1158] sm:$0xff] }
 0x56b   : > { %4852 = vmatpush1.bf16.msra.mxu0 %v2276_v45  ;;  %5180 = vmatpush1.bf16.msra.mxu1 %v2278_v47  ;;  %v2373_v45 = vunpack.c.l.s8.bf16 %v805_v27  ;;  %v2375_v47 = vunpack.c.l.s8.bf16 %v807_v30 }
 0x56c   : > { %4853 = vmatprep.subr.bf16.mxu0 %v2293_v53  ;;  %5181 = vmatprep.subr.bf16.mxu1 %v2295_v54  ;;  %v804_v53 = vld [vmem:[%s7088_s22 + $0x1140] sm:$0xff]  ;;  %v806_v54 = vld [vmem:[%s7088_s22 + $0x1150] sm:$0xff] }
 0x56d   : > { %v2372_v56 = vunpack.c.l.s8.bf16 %v804_v53  ;;  %v2374_v57 = vunpack.c.l.s8.bf16 %v806_v54  ;;  %v2388_v2 = vunpack.c.h.s8.bf16 %v804_v53  ;;  %v2390_v7 = vunpack.c.h.s8.bf16 %v806_v54 }
 0x56f   : > { %4854 = vmatpush1.bf16.msra.mxu0 %v2292_v38  ;;  %5182 = vmatpush1.bf16.msra.mxu1 %v2294_v61  ;;  %v2389_v38 = vunpack.c.h.s8.bf16 %v805_v27  ;;  %v2391_v61 = vunpack.c.h.s8.bf16 %v807_v30 }
 0x570   : > { %4864 = vmatprep.subr.bf16.mxu0 %v2309_v0  ;;  %5192 = vmatprep.subr.bf16.mxu1 %v2311_v1  ;;  %v821_v0 = vld [vmem:[%s7088_s22 + $0x11c8] sm:$0xff]  ;;  %v823_v1 = vld [vmem:[%s7088_s22 + $0x11d8] sm:$0xff] }
 0x572   : > { %4856 = vmatmul.mubr.bf16.vlgmr.msra.gmra.mrb[8].mxu0 %v7308_v52  ;;  %5184 = vmatmul.mubr.bf16.vlgmr.msra.gmra.mrb[8].mxu1 %v7308_v52 }
 0x573   : > { %4865 = vmatpush1.bf16.msra.mxu0 %v2308_v8  ;;  %5193 = vmatpush1.bf16.msra.mxu1 %v2310_v9  ;;  %v2405_v8 = vunpack.c.l.s8.bf16 %v821_v0  ;;  %v2407_v9 = vunpack.c.l.s8.bf16 %v823_v1 }
 0x574   : > { %4866 = vmatprep.subr.bf16.mxu0 %v2325_v25  ;;  %5194 = vmatprep.subr.bf16.mxu1 %v2327_v10  ;;  %v820_v25 = vld [vmem:[%s7088_s22 + $0x11c0] sm:$0xff]  ;;  %v822_v10 = vld [vmem:[%s7088_s22 + $0x11d0] sm:$0xff] }
 0x575   : > { %4896 = vmatprep.mubr.bf16.mxu0 %v7316_v60  ;;  %5224 = vmatprep.mubr.bf16.mxu1 %v7316_v60  ;;  %v2404_v16 = vunpack.c.l.s8.bf16 %v820_v25  ;;  %v2406_v17 = vunpack.c.l.s8.bf16 %v822_v10  ;;  %v2420_v55 = vunpack.c.h.s8.bf16 %v820_v25  ;;  %v2422_v23 = vunpack.c.h.s8.bf16 %v822_v10 }
 0x577   : > { %4867 = vmatpush1.bf16.msra.mxu0 %v2324_v20  ;;  %5195 = vmatpush1.bf16.msra.mxu1 %v2326_v21  ;;  %v2421_v20 = vunpack.c.h.s8.bf16 %v821_v0  ;;  %v2423_v21 = vunpack.c.h.s8.bf16 %v823_v1 }
 0x578   : > { %4868 = vmatprep.subr.bf16.mxu0 %v2341_v33  ;;  %5196 = vmatprep.subr.bf16.mxu1 %v2343_v29  ;;  %v837_v33 = vld [vmem:[%s7088_s22 + $0x1248] sm:$0xff]  ;;  %v839_v29 = vld [vmem:[%s7088_s22 + $0x1258] sm:$0xff] }
 0x57b   : > { %4869 = vmatpush1.bf16.msra.mxu0 %v2340_v35  ;;  %5197 = vmatpush1.bf16.msra.mxu1 %v2342_v37  ;;  %v2437_v35 = vunpack.c.l.s8.bf16 %v837_v33  ;;  %v2439_v37 = vunpack.c.l.s8.bf16 %v839_v29 }
 0x57c   : > { %4870 = vmatprep.subr.bf16.mxu0 %v2357_v40  ;;  %5198 = vmatprep.subr.bf16.mxu1 %v2359_v41  ;;  %v836_v40 = vld [vmem:[%s7088_s22 + $0x1240] sm:$0xff]  ;;  %v838_v41 = vld [vmem:[%s7088_s22 + $0x1250] sm:$0xff] }
 0x57d   : > { %v2436_v27 = vunpack.c.l.s8.bf16 %v836_v40  ;;  %v2438_v30 = vunpack.c.l.s8.bf16 %v838_v41  ;;  %v2452_v53 = vunpack.c.h.s8.bf16 %v836_v40  ;;  %v2454_v54 = vunpack.c.h.s8.bf16 %v838_v41 }
 0x57f   : > { %4871 = vmatpush1.bf16.msra.mxu0 %v2356_v42  ;;  %5199 = vmatpush1.bf16.msra.mxu1 %v2358_v44  ;;  %v2453_v42 = vunpack.c.h.s8.bf16 %v837_v33  ;;  %v2455_v44 = vunpack.c.h.s8.bf16 %v839_v29 }
 0x580   : > { %4872 = vmatprep.subr.bf16.mxu0 %v2373_v45  ;;  %5200 = vmatprep.subr.bf16.mxu1 %v2375_v47  ;;  %v853_v45 = vld [vmem:[%s7088_s22 + $0x12c8] sm:$0xff]  ;;  %v855_v47 = vld [vmem:[%s7088_s22 + $0x12d8] sm:$0xff] }
 0x583   : > { %4873 = vmatpush1.bf16.msra.mxu0 %v2372_v56  ;;  %5201 = vmatpush1.bf16.msra.mxu1 %v2374_v57  ;;  %v2469_v56 = vunpack.c.l.s8.bf16 %v853_v45  ;;  %v2471_v57 = vunpack.c.l.s8.bf16 %v855_v47 }
 0x584   : > { %4874 = vmatprep.subr.bf16.mxu0 %v2389_v38  ;;  %5202 = vmatprep.subr.bf16.mxu1 %v2391_v61  ;;  %v852_v38 = vld [vmem:[%s7088_s22 + $0x12c0] sm:$0xff]  ;;  %v854_v61 = vld [vmem:[%s7088_s22 + $0x12d0] sm:$0xff] }
 0x585   : > { %v2468_v0 = vunpack.c.l.s8.bf16 %v852_v38  ;;  %v2470_v1 = vunpack.c.l.s8.bf16 %v854_v61  ;;  %v2484_v25 = vunpack.c.h.s8.bf16 %v852_v38  ;;  %v2486_v10 = vunpack.c.h.s8.bf16 %v854_v61 }
 0x587   : > { %4875 = vmatpush1.bf16.msra.mxu0 %v2388_v2  ;;  %5203 = vmatpush1.bf16.msra.mxu1 %v2390_v7  ;;  %v2485_v2 = vunpack.c.h.s8.bf16 %v853_v45  ;;  %v2487_v7 = vunpack.c.h.s8.bf16 %v855_v47 }
 0x588   : > { %4876 = vmatprep.subr.bf16.mxu0 %v2405_v8  ;;  %5204 = vmatprep.subr.bf16.mxu1 %v2407_v9  ;;  %v869_v8 = vld [vmem:[%s7088_s22 + $0x1348] sm:$0xff]  ;;  %v871_v9 = vld [vmem:[%s7088_s22 + $0x1358] sm:$0xff] }
 0x58b   : > { %4877 = vmatpush1.bf16.msra.mxu0 %v2404_v16  ;;  %5205 = vmatpush1.bf16.msra.mxu1 %v2406_v17  ;;  %v2501_v16 = vunpack.c.l.s8.bf16 %v869_v8  ;;  %v2503_v17 = vunpack.c.l.s8.bf16 %v871_v9 }
 0x58c   : > { %4878 = vmatprep.subr.bf16.mxu0 %v2421_v20  ;;  %5206 = vmatprep.subr.bf16.mxu1 %v2423_v21  ;;  %v868_v20 = vld [vmem:[%s7088_s22 + $0x1340] sm:$0xff]  ;;  %v870_v21 = vld [vmem:[%s7088_s22 + $0x1350] sm:$0xff] }
 0x58d   : > { %v2500_v33 = vunpack.c.l.s8.bf16 %v868_v20  ;;  %v2502_v29 = vunpack.c.l.s8.bf16 %v870_v21  ;;  %v2516_v40 = vunpack.c.h.s8.bf16 %v868_v20  ;;  %v2518_v41 = vunpack.c.h.s8.bf16 %v870_v21 }
 0x58f   : > { %4879 = vmatpush1.bf16.msra.mxu0 %v2420_v55  ;;  %5207 = vmatpush1.bf16.msra.mxu1 %v2422_v23  ;;  %v2517_v55 = vunpack.c.h.s8.bf16 %v869_v8  ;;  %v2519_v23 = vunpack.c.h.s8.bf16 %v871_v9 }
 0x590   : > { %4880 = vmatprep.subr.bf16.mxu0 %v2437_v35  ;;  %5208 = vmatprep.subr.bf16.mxu1 %v2439_v37  ;;  %v885_v35 = vld [vmem:[%s7088_s22 + $0x13c8] sm:$0xff]  ;;  %v887_v37 = vld [vmem:[%s7088_s22 + $0x13d8] sm:$0xff] }
 0x593   : > { %4881 = vmatpush1.bf16.msra.mxu0 %v2436_v27  ;;  %5209 = vmatpush1.bf16.msra.mxu1 %v2438_v30  ;;  %v2533_v27 = vunpack.c.l.s8.bf16 %v885_v35  ;;  %v2535_v30 = vunpack.c.l.s8.bf16 %v887_v37 }
 0x594   : > { %4882 = vmatprep.subr.bf16.mxu0 %v2453_v42  ;;  %5210 = vmatprep.subr.bf16.mxu1 %v2455_v44  ;;  %v884_v42 = vld [vmem:[%s7088_s22 + $0x13c0] sm:$0xff]  ;;  %v886_v44 = vld [vmem:[%s7088_s22 + $0x13d0] sm:$0xff] }
 0x595   : > { %v2532_v45 = vunpack.c.l.s8.bf16 %v884_v42  ;;  %v2534_v47 = vunpack.c.l.s8.bf16 %v886_v44  ;;  %v2548_v38 = vunpack.c.h.s8.bf16 %v884_v42  ;;  %v2550_v61 = vunpack.c.h.s8.bf16 %v886_v44 }
 0x597   : > { %4883 = vmatpush1.bf16.msra.mxu0 %v2452_v53  ;;  %5211 = vmatpush1.bf16.msra.mxu1 %v2454_v54  ;;  %v2549_v53 = vunpack.c.h.s8.bf16 %v885_v35  ;;  %v2551_v54 = vunpack.c.h.s8.bf16 %v887_v37 }
 0x598   : > { %4884 = vmatprep.subr.bf16.mxu0 %v2469_v56  ;;  %5212 = vmatprep.subr.bf16.mxu1 %v2471_v57  ;;  %v901_v56 = vld [vmem:[%s7088_s22 + $0x1448] sm:$0xff]  ;;  %v903_v57 = vld [vmem:[%s7088_s22 + $0x1458] sm:$0xff] }
 0x59b   : > { %4885 = vmatpush1.bf16.msra.mxu0 %v2468_v0  ;;  %5213 = vmatpush1.bf16.msra.mxu1 %v2470_v1  ;;  %v2565_v0 = vunpack.c.l.s8.bf16 %v901_v56  ;;  %v2567_v1 = vunpack.c.l.s8.bf16 %v903_v57 }
 0x59c   : > { %4886 = vmatprep.subr.bf16.mxu0 %v2485_v2  ;;  %5214 = vmatprep.subr.bf16.mxu1 %v2487_v7  ;;  %v900_v2 = vld [vmem:[%s7088_s22 + $0x1440] sm:$0xff]  ;;  %v902_v7 = vld [vmem:[%s7088_s22 + $0x1450] sm:$0xff] }
 0x59d   : > { %v2564_v8 = vunpack.c.l.s8.bf16 %v900_v2  ;;  %v2566_v9 = vunpack.c.l.s8.bf16 %v902_v7  ;;  %v2580_v20 = vunpack.c.h.s8.bf16 %v900_v2  ;;  %v2582_v21 = vunpack.c.h.s8.bf16 %v902_v7 }
 0x59f   : > { %4887 = vmatpush1.bf16.msra.mxu0 %v2484_v25  ;;  %5215 = vmatpush1.bf16.msra.mxu1 %v2486_v10  ;;  %v2581_v25 = vunpack.c.h.s8.bf16 %v901_v56  ;;  %v2583_v10 = vunpack.c.h.s8.bf16 %v903_v57 }
 0x5a0   : > { %4888 = vmatprep.subr.bf16.mxu0 %v2501_v16  ;;  %5216 = vmatprep.subr.bf16.mxu1 %v2503_v17  ;;  %v917_v16 = vld [vmem:[%s7088_s22 + $0x14c8] sm:$0xff]  ;;  %v919_v17 = vld [vmem:[%s7088_s22 + $0x14d8] sm:$0xff] }
 0x5a3   : > { %4889 = vmatpush1.bf16.msra.mxu0 %v2500_v33  ;;  %5217 = vmatpush1.bf16.msra.mxu1 %v2502_v29  ;;  %v2597_v33 = vunpack.c.l.s8.bf16 %v917_v16  ;;  %v2599_v29 = vunpack.c.l.s8.bf16 %v919_v17 }
 0x5a4   : > { %4890 = vmatprep.subr.bf16.mxu0 %v2517_v55  ;;  %5218 = vmatprep.subr.bf16.mxu1 %v2519_v23  ;;  %v916_v55 = vld [vmem:[%s7088_s22 + $0x14c0] sm:$0xff]  ;;  %v918_v23 = vld [vmem:[%s7088_s22 + $0x14d0] sm:$0xff] }
 0x5a5   : > { %v2596_v35 = vunpack.c.l.s8.bf16 %v916_v55  ;;  %v2598_v37 = vunpack.c.l.s8.bf16 %v918_v23  ;;  %v2612_v42 = vunpack.c.h.s8.bf16 %v916_v55  ;;  %v2614_v44 = vunpack.c.h.s8.bf16 %v918_v23 }
 0x5a7   : > { %4891 = vmatpush1.bf16.msra.mxu0 %v2516_v40  ;;  %5219 = vmatpush1.bf16.msra.mxu1 %v2518_v41  ;;  %v2613_v40 = vunpack.c.h.s8.bf16 %v917_v16  ;;  %v2615_v41 = vunpack.c.h.s8.bf16 %v919_v17 }
 0x5a8   : > { %4892 = vmatprep.subr.bf16.mxu0 %v2533_v27  ;;  %5220 = vmatprep.subr.bf16.mxu1 %v2535_v30  ;;  %v933_v27 = vld [vmem:[%s7088_s22 + $0x1548] sm:$0xff]  ;;  %v935_v30 = vld [vmem:[%s7088_s22 + $0x1558] sm:$0xff] }
 0x5ab   : > { %4893 = vmatpush1.bf16.msra.mxu0 %v2532_v45  ;;  %5221 = vmatpush1.bf16.msra.mxu1 %v2534_v47  ;;  %v2629_v45 = vunpack.c.l.s8.bf16 %v933_v27  ;;  %v2631_v47 = vunpack.c.l.s8.bf16 %v935_v30 }
 0x5ac   : > { %4894 = vmatprep.subr.bf16.mxu0 %v2549_v53  ;;  %5222 = vmatprep.subr.bf16.mxu1 %v2551_v54  ;;  %v932_v53 = vld [vmem:[%s7088_s22 + $0x1540] sm:$0xff]  ;;  %v934_v54 = vld [vmem:[%s7088_s22 + $0x1550] sm:$0xff] }
 0x5ad   : > { %v2628_v56 = vunpack.c.l.s8.bf16 %v932_v53  ;;  %v2630_v57 = vunpack.c.l.s8.bf16 %v934_v54  ;;  %v2644_v2 = vunpack.c.h.s8.bf16 %v932_v53  ;;  %v2646_v7 = vunpack.c.h.s8.bf16 %v934_v54 }
 0x5af   : > { %4895 = vmatpush1.bf16.msra.mxu0 %v2548_v38  ;;  %5223 = vmatpush1.bf16.msra.mxu1 %v2550_v61  ;;  %v2645_v38 = vunpack.c.h.s8.bf16 %v933_v27  ;;  %v2647_v61 = vunpack.c.h.s8.bf16 %v935_v30 }
 0x5b0   : > { %4905 = vmatprep.subr.bf16.mxu0 %v2565_v0  ;;  %5233 = vmatprep.subr.bf16.mxu1 %v2567_v1  ;;  %v949_v0 = vld [vmem:[%s7088_s22 + $0x15c8] sm:$0xff]  ;;  %v951_v1 = vld [vmem:[%s7088_s22 + $0x15d8] sm:$0xff] }
 0x5b2   : > { %4897 = vmatmul.mubr.bf16.vlgmr.msra.gmra.mrb[8].mxu0 %v7354_v36  ;;  %5225 = vmatmul.mubr.bf16.vlgmr.msra.gmra.mrb[8].mxu1 %v7354_v36 }
 0x5b3   : > { %4906 = vmatpush1.bf16.msra.mxu0 %v2564_v8  ;;  %5234 = vmatpush1.bf16.msra.mxu1 %v2566_v9  ;;  %v2661_v8 = vunpack.c.l.s8.bf16 %v949_v0  ;;  %v2663_v9 = vunpack.c.l.s8.bf16 %v951_v1 }
 0x5b4   : > { %4907 = vmatprep.subr.bf16.mxu0 %v2581_v25  ;;  %5235 = vmatprep.subr.bf16.mxu1 %v2583_v10  ;;  %v948_v25 = vld [vmem:[%s7088_s22 + $0x15c0] sm:$0xff]  ;;  %v950_v10 = vld [vmem:[%s7088_s22 + $0x15d0] sm:$0xff] }
 0x5b5   : > { %4937 = vmatprep.mubr.bf16.mxu0 %v7362_v46  ;;  %5265 = vmatprep.mubr.bf16.mxu1 %v7362_v46  ;;  %v2660_v16 = vunpack.c.l.s8.bf16 %v948_v25  ;;  %v2662_v17 = vunpack.c.l.s8.bf16 %v950_v10  ;;  %v2676_v55 = vunpack.c.h.s8.bf16 %v948_v25  ;;  %v2678_v23 = vunpack.c.h.s8.bf16 %v950_v10 }
 0x5b7   : > { %4908 = vmatpush1.bf16.msra.mxu0 %v2580_v20  ;;  %5236 = vmatpush1.bf16.msra.mxu1 %v2582_v21  ;;  %v2677_v20 = vunpack.c.h.s8.bf16 %v949_v0  ;;  %v2679_v21 = vunpack.c.h.s8.bf16 %v951_v1 }
 0x5b8   : > { %4909 = vmatprep.subr.bf16.mxu0 %v2597_v33  ;;  %5237 = vmatprep.subr.bf16.mxu1 %v2599_v29  ;;  %v965_v33 = vld [vmem:[%s7088_s22 + $0x1648] sm:$0xff]  ;;  %v967_v29 = vld [vmem:[%s7088_s22 + $0x1658] sm:$0xff] }
 0x5bb   : > { %4910 = vmatpush1.bf16.msra.mxu0 %v2596_v35  ;;  %5238 = vmatpush1.bf16.msra.mxu1 %v2598_v37  ;;  %v2693_v35 = vunpack.c.l.s8.bf16 %v965_v33  ;;  %v2695_v37 = vunpack.c.l.s8.bf16 %v967_v29 }
 0x5bc   : > { %4911 = vmatprep.subr.bf16.mxu0 %v2613_v40  ;;  %5239 = vmatprep.subr.bf16.mxu1 %v2615_v41  ;;  %v964_v40 = vld [vmem:[%s7088_s22 + $0x1640] sm:$0xff]  ;;  %v966_v41 = vld [vmem:[%s7088_s22 + $0x1650] sm:$0xff] }
 0x5bd   : > { %v2692_v27 = vunpack.c.l.s8.bf16 %v964_v40  ;;  %v2694_v30 = vunpack.c.l.s8.bf16 %v966_v41  ;;  %v2708_v53 = vunpack.c.h.s8.bf16 %v964_v40  ;;  %v2710_v54 = vunpack.c.h.s8.bf16 %v966_v41 }
 0x5bf   : > { %4912 = vmatpush1.bf16.msra.mxu0 %v2612_v42  ;;  %5240 = vmatpush1.bf16.msra.mxu1 %v2614_v44  ;;  %v2709_v42 = vunpack.c.h.s8.bf16 %v965_v33  ;;  %v2711_v44 = vunpack.c.h.s8.bf16 %v967_v29 }
 0x5c0   : > { %4913 = vmatprep.subr.bf16.mxu0 %v2629_v45  ;;  %5241 = vmatprep.subr.bf16.mxu1 %v2631_v47  ;;  %v981_v45 = vld [vmem:[%s7088_s22 + $0x16c8] sm:$0xff]  ;;  %v983_v47 = vld [vmem:[%s7088_s22 + $0x16d8] sm:$0xff] }
 0x5c3   : > { %4914 = vmatpush1.bf16.msra.mxu0 %v2628_v56  ;;  %5242 = vmatpush1.bf16.msra.mxu1 %v2630_v57  ;;  %v2725_v56 = vunpack.c.l.s8.bf16 %v981_v45  ;;  %v2727_v57 = vunpack.c.l.s8.bf16 %v983_v47 }
 0x5c4   : > { %4915 = vmatprep.subr.bf16.mxu0 %v2645_v38  ;;  %5243 = vmatprep.subr.bf16.mxu1 %v2647_v61  ;;  %v980_v38 = vld [vmem:[%s7088_s22 + $0x16c0] sm:$0xff]  ;;  %v982_v61 = vld [vmem:[%s7088_s22 + $0x16d0] sm:$0xff] }
 0x5c5   : > { %v2724_v0 = vunpack.c.l.s8.bf16 %v980_v38  ;;  %v2726_v1 = vunpack.c.l.s8.bf16 %v982_v61  ;;  %v2740_v25 = vunpack.c.h.s8.bf16 %v980_v38  ;;  %v2742_v10 = vunpack.c.h.s8.bf16 %v982_v61 }
 0x5c7   : > { %4916 = vmatpush1.bf16.msra.mxu0 %v2644_v2  ;;  %5244 = vmatpush1.bf16.msra.mxu1 %v2646_v7  ;;  %v2741_v2 = vunpack.c.h.s8.bf16 %v981_v45  ;;  %v2743_v7 = vunpack.c.h.s8.bf16 %v983_v47 }
 0x5c8   : > { %4917 = vmatprep.subr.bf16.mxu0 %v2661_v8  ;;  %5245 = vmatprep.subr.bf16.mxu1 %v2663_v9  ;;  %v997_v8 = vld [vmem:[%s7088_s22 + $0x1748] sm:$0xff]  ;;  %v999_v9 = vld [vmem:[%s7088_s22 + $0x1758] sm:$0xff] }
 0x5cb   : > { %4918 = vmatpush1.bf16.msra.mxu0 %v2660_v16  ;;  %5246 = vmatpush1.bf16.msra.mxu1 %v2662_v17  ;;  %v2757_v16 = vunpack.c.l.s8.bf16 %v997_v8  ;;  %v2759_v17 = vunpack.c.l.s8.bf16 %v999_v9 }
 0x5cc   : > { %4919 = vmatprep.subr.bf16.mxu0 %v2677_v20  ;;  %5247 = vmatprep.subr.bf16.mxu1 %v2679_v21  ;;  %v996_v20 = vld [vmem:[%s7088_s22 + $0x1740] sm:$0xff]  ;;  %v998_v21 = vld [vmem:[%s7088_s22 + $0x1750] sm:$0xff] }
 0x5cd   : > { %v2756_v33 = vunpack.c.l.s8.bf16 %v996_v20  ;;  %v2758_v29 = vunpack.c.l.s8.bf16 %v998_v21  ;;  %v2772_v40 = vunpack.c.h.s8.bf16 %v996_v20  ;;  %v2774_v41 = vunpack.c.h.s8.bf16 %v998_v21 }
 0x5cf   : > { %4920 = vmatpush1.bf16.msra.mxu0 %v2676_v55  ;;  %5248 = vmatpush1.bf16.msra.mxu1 %v2678_v23  ;;  %v2773_v55 = vunpack.c.h.s8.bf16 %v997_v8  ;;  %v2775_v23 = vunpack.c.h.s8.bf16 %v999_v9 }
 0x5d0   : > { %4921 = vmatprep.subr.bf16.mxu0 %v2693_v35  ;;  %5249 = vmatprep.subr.bf16.mxu1 %v2695_v37  ;;  %v1013_v35 = vld [vmem:[%s7088_s22 + $0x17c8] sm:$0xff]  ;;  %v1015_v37 = vld [vmem:[%s7088_s22 + $0x17d8] sm:$0xff] }
 0x5d3   : > { %4922 = vmatpush1.bf16.msra.mxu0 %v2692_v27  ;;  %5250 = vmatpush1.bf16.msra.mxu1 %v2694_v30  ;;  %v2789_v27 = vunpack.c.l.s8.bf16 %v1013_v35  ;;  %v2791_v30 = vunpack.c.l.s8.bf16 %v1015_v37 }
 0x5d4   : > { %4923 = vmatprep.subr.bf16.mxu0 %v2709_v42  ;;  %5251 = vmatprep.subr.bf16.mxu1 %v2711_v44  ;;  %v1012_v42 = vld [vmem:[%s7088_s22 + $0x17c0] sm:$0xff]  ;;  %v1014_v44 = vld [vmem:[%s7088_s22 + $0x17d0] sm:$0xff] }
 0x5d5   : > { %v2788_v45 = vunpack.c.l.s8.bf16 %v1012_v42  ;;  %v2790_v47 = vunpack.c.l.s8.bf16 %v1014_v44  ;;  %v2804_v38 = vunpack.c.h.s8.bf16 %v1012_v42  ;;  %v2806_v61 = vunpack.c.h.s8.bf16 %v1014_v44 }
 0x5d7   : > { %4924 = vmatpush1.bf16.msra.mxu0 %v2708_v53  ;;  %5252 = vmatpush1.bf16.msra.mxu1 %v2710_v54  ;;  %v2805_v53 = vunpack.c.h.s8.bf16 %v1013_v35  ;;  %v2807_v54 = vunpack.c.h.s8.bf16 %v1015_v37 }
 0x5d8   : > { %4925 = vmatprep.subr.bf16.mxu0 %v2725_v56  ;;  %5253 = vmatprep.subr.bf16.mxu1 %v2727_v57  ;;  %v1029_v56 = vld [vmem:[%s7088_s22 + $0x1848] sm:$0xff]  ;;  %v1031_v57 = vld [vmem:[%s7088_s22 + $0x1858] sm:$0xff] }
 0x5db   : > { %4926 = vmatpush1.bf16.msra.mxu0 %v2724_v0  ;;  %5254 = vmatpush1.bf16.msra.mxu1 %v2726_v1  ;;  %v2821_v0 = vunpack.c.l.s8.bf16 %v1029_v56  ;;  %v2823_v1 = vunpack.c.l.s8.bf16 %v1031_v57 }
 0x5dc   : > { %4927 = vmatprep.subr.bf16.mxu0 %v2741_v2  ;;  %5255 = vmatprep.subr.bf16.mxu1 %v2743_v7  ;;  %v1028_v2 = vld [vmem:[%s7088_s22 + $0x1840] sm:$0xff]  ;;  %v1030_v7 = vld [vmem:[%s7088_s22 + $0x1850] sm:$0xff] }
 0x5dd   : > { %v2820_v8 = vunpack.c.l.s8.bf16 %v1028_v2  ;;  %v2822_v9 = vunpack.c.l.s8.bf16 %v1030_v7  ;;  %v2836_v20 = vunpack.c.h.s8.bf16 %v1028_v2  ;;  %v2838_v21 = vunpack.c.h.s8.bf16 %v1030_v7 }
 0x5df   : > { %4928 = vmatpush1.bf16.msra.mxu0 %v2740_v25  ;;  %5256 = vmatpush1.bf16.msra.mxu1 %v2742_v10  ;;  %v2837_v25 = vunpack.c.h.s8.bf16 %v1029_v56  ;;  %v2839_v10 = vunpack.c.h.s8.bf16 %v1031_v57 }
 0x5e0   : > { %4929 = vmatprep.subr.bf16.mxu0 %v2757_v16  ;;  %5257 = vmatprep.subr.bf16.mxu1 %v2759_v17  ;;  %v1045_v16 = vld [vmem:[%s7088_s22 + $0x18c8] sm:$0xff]  ;;  %v1047_v17 = vld [vmem:[%s7088_s22 + $0x18d8] sm:$0xff] }
 0x5e3   : > { %4930 = vmatpush1.bf16.msra.mxu0 %v2756_v33  ;;  %5258 = vmatpush1.bf16.msra.mxu1 %v2758_v29  ;;  %v2853_v33 = vunpack.c.l.s8.bf16 %v1045_v16  ;;  %v2855_v29 = vunpack.c.l.s8.bf16 %v1047_v17 }
 0x5e4   : > { %4931 = vmatprep.subr.bf16.mxu0 %v2773_v55  ;;  %5259 = vmatprep.subr.bf16.mxu1 %v2775_v23  ;;  %v1044_v55 = vld [vmem:[%s7088_s22 + $0x18c0] sm:$0xff]  ;;  %v1046_v23 = vld [vmem:[%s7088_s22 + $0x18d0] sm:$0xff] }
 0x5e5   : > { %v2852_v35 = vunpack.c.l.s8.bf16 %v1044_v55  ;;  %v2854_v37 = vunpack.c.l.s8.bf16 %v1046_v23  ;;  %v2868_v42 = vunpack.c.h.s8.bf16 %v1044_v55  ;;  %v2870_v44 = vunpack.c.h.s8.bf16 %v1046_v23 }
 0x5e7   : > { %4932 = vmatpush1.bf16.msra.mxu0 %v2772_v40  ;;  %5260 = vmatpush1.bf16.msra.mxu1 %v2774_v41  ;;  %v2869_v40 = vunpack.c.h.s8.bf16 %v1045_v16  ;;  %v2871_v41 = vunpack.c.h.s8.bf16 %v1047_v17 }
 0x5e8   : > { %4933 = vmatprep.subr.bf16.mxu0 %v2789_v27  ;;  %5261 = vmatprep.subr.bf16.mxu1 %v2791_v30  ;;  %v1061_v27 = vld [vmem:[%s7088_s22 + $0x1948] sm:$0xff]  ;;  %v1063_v30 = vld [vmem:[%s7088_s22 + $0x1958] sm:$0xff] }
 0x5eb   : > { %4934 = vmatpush1.bf16.msra.mxu0 %v2788_v45  ;;  %5262 = vmatpush1.bf16.msra.mxu1 %v2790_v47  ;;  %v2885_v45 = vunpack.c.l.s8.bf16 %v1061_v27  ;;  %v2887_v47 = vunpack.c.l.s8.bf16 %v1063_v30 }
 0x5ec   : > { %4935 = vmatprep.subr.bf16.mxu0 %v2805_v53  ;;  %5263 = vmatprep.subr.bf16.mxu1 %v2807_v54  ;;  %v1060_v53 = vld [vmem:[%s7088_s22 + $0x1940] sm:$0xff]  ;;  %v1062_v54 = vld [vmem:[%s7088_s22 + $0x1950] sm:$0xff] }
 0x5ed   : > { %v2884_v56 = vunpack.c.l.s8.bf16 %v1060_v53  ;;  %v2886_v57 = vunpack.c.l.s8.bf16 %v1062_v54  ;;  %v2900_v2 = vunpack.c.h.s8.bf16 %v1060_v53  ;;  %v2902_v7 = vunpack.c.h.s8.bf16 %v1062_v54 }
 0x5ef   : > { %4936 = vmatpush1.bf16.msra.mxu0 %v2804_v38  ;;  %5264 = vmatpush1.bf16.msra.mxu1 %v2806_v61  ;;  %v2901_v38 = vunpack.c.h.s8.bf16 %v1061_v27  ;;  %v2903_v61 = vunpack.c.h.s8.bf16 %v1063_v30 }
 0x5f0   : > { %4946 = vmatprep.subr.bf16.mxu0 %v2821_v0  ;;  %5274 = vmatprep.subr.bf16.mxu1 %v2823_v1  ;;  %v1077_v0 = vld [vmem:[%s7088_s22 + $0x19c8] sm:$0xff]  ;;  %v1079_v1 = vld [vmem:[%s7088_s22 + $0x19d8] sm:$0xff] }
 0x5f2   : > { %4938 = vmatmul.mubr.bf16.vlgmr.msra.gmra.mrb[8].mxu0 %v7400_v28  ;;  %5266 = vmatmul.mubr.bf16.vlgmr.msra.gmra.mrb[8].mxu1 %v7400_v28 }
 0x5f3   : > { %4947 = vmatpush1.bf16.msra.mxu0 %v2820_v8  ;;  %5275 = vmatpush1.bf16.msra.mxu1 %v2822_v9  ;;  %v2917_v8 = vunpack.c.l.s8.bf16 %v1077_v0  ;;  %v2919_v9 = vunpack.c.l.s8.bf16 %v1079_v1 }
 0x5f4   : > { %4948 = vmatprep.subr.bf16.mxu0 %v2837_v25  ;;  %5276 = vmatprep.subr.bf16.mxu1 %v2839_v10  ;;  %v1076_v25 = vld [vmem:[%s7088_s22 + $0x19c0] sm:$0xff]  ;;  %v1078_v10 = vld [vmem:[%s7088_s22 + $0x19d0] sm:$0xff] }
 0x5f5   : > { %4978 = vmatprep.mubr.bf16.mxu0 %v7408_v39  ;;  %5306 = vmatprep.mubr.bf16.mxu1 %v7408_v39  ;;  %v2916_v16 = vunpack.c.l.s8.bf16 %v1076_v25  ;;  %v2918_v17 = vunpack.c.l.s8.bf16 %v1078_v10  ;;  %v2932_v55 = vunpack.c.h.s8.bf16 %v1076_v25  ;;  %v2934_v23 = vunpack.c.h.s8.bf16 %v1078_v10 }
 0x5f7   : > { %4949 = vmatpush1.bf16.msra.mxu0 %v2836_v20  ;;  %5277 = vmatpush1.bf16.msra.mxu1 %v2838_v21  ;;  %v2933_v20 = vunpack.c.h.s8.bf16 %v1077_v0  ;;  %v2935_v21 = vunpack.c.h.s8.bf16 %v1079_v1 }
 0x5f8   : > { %4950 = vmatprep.subr.bf16.mxu0 %v2853_v33  ;;  %5278 = vmatprep.subr.bf16.mxu1 %v2855_v29  ;;  %v1093_v33 = vld [vmem:[%s7088_s22 + $0x1a48] sm:$0xff]  ;;  %v1095_v29 = vld [vmem:[%s7088_s22 + $0x1a58] sm:$0xff] }
 0x5fb   : > { %4951 = vmatpush1.bf16.msra.mxu0 %v2852_v35  ;;  %5279 = vmatpush1.bf16.msra.mxu1 %v2854_v37  ;;  %v2949_v35 = vunpack.c.l.s8.bf16 %v1093_v33  ;;  %v2951_v37 = vunpack.c.l.s8.bf16 %v1095_v29 }
 0x5fc   : > { %4952 = vmatprep.subr.bf16.mxu0 %v2869_v40  ;;  %5280 = vmatprep.subr.bf16.mxu1 %v2871_v41  ;;  %v1092_v40 = vld [vmem:[%s7088_s22 + $0x1a40] sm:$0xff]  ;;  %v1094_v41 = vld [vmem:[%s7088_s22 + $0x1a50] sm:$0xff] }
 0x5fd   : > { %v2948_v27 = vunpack.c.l.s8.bf16 %v1092_v40  ;;  %v2950_v30 = vunpack.c.l.s8.bf16 %v1094_v41  ;;  %v2964_v53 = vunpack.c.h.s8.bf16 %v1092_v40  ;;  %v2966_v54 = vunpack.c.h.s8.bf16 %v1094_v41 }
 0x5ff   : > { %4953 = vmatpush1.bf16.msra.mxu0 %v2868_v42  ;;  %5281 = vmatpush1.bf16.msra.mxu1 %v2870_v44  ;;  %v2965_v42 = vunpack.c.h.s8.bf16 %v1093_v33  ;;  %v2967_v44 = vunpack.c.h.s8.bf16 %v1095_v29 }
 0x600   : > { %4954 = vmatprep.subr.bf16.mxu0 %v2885_v45  ;;  %5282 = vmatprep.subr.bf16.mxu1 %v2887_v47  ;;  %v1109_v45 = vld [vmem:[%s7088_s22 + $0x1ac8] sm:$0xff]  ;;  %v1111_v47 = vld [vmem:[%s7088_s22 + $0x1ad8] sm:$0xff] }
 0x603   : > { %4955 = vmatpush1.bf16.msra.mxu0 %v2884_v56  ;;  %5283 = vmatpush1.bf16.msra.mxu1 %v2886_v57  ;;  %v2981_v56 = vunpack.c.l.s8.bf16 %v1109_v45  ;;  %v2983_v57 = vunpack.c.l.s8.bf16 %v1111_v47 }
 0x604   : > { %4956 = vmatprep.subr.bf16.mxu0 %v2901_v38  ;;  %5284 = vmatprep.subr.bf16.mxu1 %v2903_v61  ;;  %v1108_v38 = vld [vmem:[%s7088_s22 + $0x1ac0] sm:$0xff]  ;;  %v1110_v61 = vld [vmem:[%s7088_s22 + $0x1ad0] sm:$0xff] }
 0x605   : > { %v2980_v0 = vunpack.c.l.s8.bf16 %v1108_v38  ;;  %v2982_v1 = vunpack.c.l.s8.bf16 %v1110_v61  ;;  %v2996_v25 = vunpack.c.h.s8.bf16 %v1108_v38  ;;  %v2998_v10 = vunpack.c.h.s8.bf16 %v1110_v61 }
 0x607   : > { %4957 = vmatpush1.bf16.msra.mxu0 %v2900_v2  ;;  %5285 = vmatpush1.bf16.msra.mxu1 %v2902_v7  ;;  %v2997_v2 = vunpack.c.h.s8.bf16 %v1109_v45  ;;  %v2999_v7 = vunpack.c.h.s8.bf16 %v1111_v47 }
 0x608   : > { %4958 = vmatprep.subr.bf16.mxu0 %v2917_v8  ;;  %5286 = vmatprep.subr.bf16.mxu1 %v2919_v9  ;;  %v1125_v8 = vld [vmem:[%s7088_s22 + $0x1b48] sm:$0xff]  ;;  %v1127_v9 = vld [vmem:[%s7088_s22 + $0x1b58] sm:$0xff] }
 0x60b   : > { %4959 = vmatpush1.bf16.msra.mxu0 %v2916_v16  ;;  %5287 = vmatpush1.bf16.msra.mxu1 %v2918_v17  ;;  %v3013_v16 = vunpack.c.l.s8.bf16 %v1125_v8  ;;  %v3015_v17 = vunpack.c.l.s8.bf16 %v1127_v9 }
 0x60c   : > { %4960 = vmatprep.subr.bf16.mxu0 %v2933_v20  ;;  %5288 = vmatprep.subr.bf16.mxu1 %v2935_v21  ;;  %v1124_v20 = vld [vmem:[%s7088_s22 + $0x1b40] sm:$0xff]  ;;  %v1126_v21 = vld [vmem:[%s7088_s22 + $0x1b50] sm:$0xff] }
 0x60d   : > { %v3012_v33 = vunpack.c.l.s8.bf16 %v1124_v20  ;;  %v3014_v29 = vunpack.c.l.s8.bf16 %v1126_v21  ;;  %v3028_v40 = vunpack.c.h.s8.bf16 %v1124_v20  ;;  %v3030_v41 = vunpack.c.h.s8.bf16 %v1126_v21 }
 0x60f   : > { %4961 = vmatpush1.bf16.msra.mxu0 %v2932_v55  ;;  %5289 = vmatpush1.bf16.msra.mxu1 %v2934_v23  ;;  %v3029_v55 = vunpack.c.h.s8.bf16 %v1125_v8  ;;  %v3031_v23 = vunpack.c.h.s8.bf16 %v1127_v9 }
 0x610   : > { %4962 = vmatprep.subr.bf16.mxu0 %v2949_v35  ;;  %5290 = vmatprep.subr.bf16.mxu1 %v2951_v37  ;;  %v1141_v35 = vld [vmem:[%s7088_s22 + $0x1bc8] sm:$0xff]  ;;  %v1143_v37 = vld [vmem:[%s7088_s22 + $0x1bd8] sm:$0xff] }
 0x613   : > { %4963 = vmatpush1.bf16.msra.mxu0 %v2948_v27  ;;  %5291 = vmatpush1.bf16.msra.mxu1 %v2950_v30  ;;  %v3045_v27 = vunpack.c.l.s8.bf16 %v1141_v35  ;;  %v3047_v30 = vunpack.c.l.s8.bf16 %v1143_v37 }
 0x614   : > { %4964 = vmatprep.subr.bf16.mxu0 %v2965_v42  ;;  %5292 = vmatprep.subr.bf16.mxu1 %v2967_v44  ;;  %v1140_v42 = vld [vmem:[%s7088_s22 + $0x1bc0] sm:$0xff]  ;;  %v1142_v44 = vld [vmem:[%s7088_s22 + $0x1bd0] sm:$0xff] }
 0x615   : > { %v3044_v45 = vunpack.c.l.s8.bf16 %v1140_v42  ;;  %v3046_v47 = vunpack.c.l.s8.bf16 %v1142_v44  ;;  %v3060_v38 = vunpack.c.h.s8.bf16 %v1140_v42  ;;  %v3062_v61 = vunpack.c.h.s8.bf16 %v1142_v44 }
 0x617   : > { %4965 = vmatpush1.bf16.msra.mxu0 %v2964_v53  ;;  %5293 = vmatpush1.bf16.msra.mxu1 %v2966_v54  ;;  %v3061_v53 = vunpack.c.h.s8.bf16 %v1141_v35  ;;  %v3063_v54 = vunpack.c.h.s8.bf16 %v1143_v37 }
 0x618   : > { %4966 = vmatprep.subr.bf16.mxu0 %v2981_v56  ;;  %5294 = vmatprep.subr.bf16.mxu1 %v2983_v57  ;;  %v1157_v56 = vld [vmem:[%s7088_s22 + $0x1c48] sm:$0xff]  ;;  %v1159_v57 = vld [vmem:[%s7088_s22 + $0x1c58] sm:$0xff] }
 0x61b   : > { %4967 = vmatpush1.bf16.msra.mxu0 %v2980_v0  ;;  %5295 = vmatpush1.bf16.msra.mxu1 %v2982_v1  ;;  %v3077_v0 = vunpack.c.l.s8.bf16 %v1157_v56  ;;  %v3079_v1 = vunpack.c.l.s8.bf16 %v1159_v57 }
 0x61c   : > { %4968 = vmatprep.subr.bf16.mxu0 %v2997_v2  ;;  %5296 = vmatprep.subr.bf16.mxu1 %v2999_v7  ;;  %v1156_v2 = vld [vmem:[%s7088_s22 + $0x1c40] sm:$0xff]  ;;  %v1158_v7 = vld [vmem:[%s7088_s22 + $0x1c50] sm:$0xff] }
 0x61d   : > { %v3076_v8 = vunpack.c.l.s8.bf16 %v1156_v2  ;;  %v3078_v9 = vunpack.c.l.s8.bf16 %v1158_v7  ;;  %v3092_v20 = vunpack.c.h.s8.bf16 %v1156_v2  ;;  %v3094_v21 = vunpack.c.h.s8.bf16 %v1158_v7 }
 0x61f   : > { %4969 = vmatpush1.bf16.msra.mxu0 %v2996_v25  ;;  %5297 = vmatpush1.bf16.msra.mxu1 %v2998_v10  ;;  %v3093_v25 = vunpack.c.h.s8.bf16 %v1157_v56  ;;  %v3095_v10 = vunpack.c.h.s8.bf16 %v1159_v57 }
 0x620   : > { %4970 = vmatprep.subr.bf16.mxu0 %v3013_v16  ;;  %5298 = vmatprep.subr.bf16.mxu1 %v3015_v17  ;;  %v1173_v16 = vld [vmem:[%s7088_s22 + $0x1cc8] sm:$0xff]  ;;  %v1175_v17 = vld [vmem:[%s7088_s22 + $0x1cd8] sm:$0xff] }
 0x623   : > { %4971 = vmatpush1.bf16.msra.mxu0 %v3012_v33  ;;  %5299 = vmatpush1.bf16.msra.mxu1 %v3014_v29  ;;  %v3109_v33 = vunpack.c.l.s8.bf16 %v1173_v16  ;;  %v3111_v29 = vunpack.c.l.s8.bf16 %v1175_v17 }
 0x624   : > { %4972 = vmatprep.subr.bf16.mxu0 %v3029_v55  ;;  %5300 = vmatprep.subr.bf16.mxu1 %v3031_v23  ;;  %v1172_v55 = vld [vmem:[%s7088_s22 + $0x1cc0] sm:$0xff]  ;;  %v1174_v23 = vld [vmem:[%s7088_s22 + $0x1cd0] sm:$0xff] }
 0x625   : > { %v3108_v35 = vunpack.c.l.s8.bf16 %v1172_v55  ;;  %v3110_v37 = vunpack.c.l.s8.bf16 %v1174_v23  ;;  %v3124_v42 = vunpack.c.h.s8.bf16 %v1172_v55  ;;  %v3126_v44 = vunpack.c.h.s8.bf16 %v1174_v23 }
 0x627   : > { %4973 = vmatpush1.bf16.msra.mxu0 %v3028_v40  ;;  %5301 = vmatpush1.bf16.msra.mxu1 %v3030_v41  ;;  %v3125_v40 = vunpack.c.h.s8.bf16 %v1173_v16  ;;  %v3127_v41 = vunpack.c.h.s8.bf16 %v1175_v17 }
 0x628   : > { %4974 = vmatprep.subr.bf16.mxu0 %v3045_v27  ;;  %5302 = vmatprep.subr.bf16.mxu1 %v3047_v30  ;;  %v1189_v27 = vld [vmem:[%s7088_s22 + $0x1d48] sm:$0xff]  ;;  %v1191_v30 = vld [vmem:[%s7088_s22 + $0x1d58] sm:$0xff] }
 0x62b   : > { %4975 = vmatpush1.bf16.msra.mxu0 %v3044_v45  ;;  %5303 = vmatpush1.bf16.msra.mxu1 %v3046_v47  ;;  %v3141_v45 = vunpack.c.l.s8.bf16 %v1189_v27  ;;  %v3143_v47 = vunpack.c.l.s8.bf16 %v1191_v30 }
 0x62c   : > { %4976 = vmatprep.subr.bf16.mxu0 %v3061_v53  ;;  %5304 = vmatprep.subr.bf16.mxu1 %v3063_v54  ;;  %v1188_v53 = vld [vmem:[%s7088_s22 + $0x1d40] sm:$0xff]  ;;  %v1190_v54 = vld [vmem:[%s7088_s22 + $0x1d50] sm:$0xff] }
 0x62d   : > { %v3140_v56 = vunpack.c.l.s8.bf16 %v1188_v53  ;;  %v3142_v57 = vunpack.c.l.s8.bf16 %v1190_v54  ;;  %v3156_v2 = vunpack.c.h.s8.bf16 %v1188_v53  ;;  %v3158_v7 = vunpack.c.h.s8.bf16 %v1190_v54 }
 0x62f   : > { %4977 = vmatpush1.bf16.msra.mxu0 %v3060_v38  ;;  %5305 = vmatpush1.bf16.msra.mxu1 %v3062_v61  ;;  %v3157_v38 = vunpack.c.h.s8.bf16 %v1189_v27  ;;  %v3159_v61 = vunpack.c.h.s8.bf16 %v1191_v30 }
 0x630   : > { %4987 = vmatprep.subr.bf16.mxu0 %v3077_v0  ;;  %5315 = vmatprep.subr.bf16.mxu1 %v3079_v1  ;;  %v1205_v0 = vld [vmem:[%s7088_s22 + $0x1dc8] sm:$0xff]  ;;  %v1207_v1 = vld [vmem:[%s7088_s22 + $0x1dd8] sm:$0xff] }
 0x632   : > { %4979 = vmatmul.mubr.bf16.vlgmr.msra.gmra.mrb[8].mxu0 %v7446_v22  ;;  %5307 = vmatmul.mubr.bf16.vlgmr.msra.gmra.mrb[8].mxu1 %v7446_v22 }
 0x633   : > { %4988 = vmatpush1.bf16.msra.mxu0 %v3076_v8  ;;  %5316 = vmatpush1.bf16.msra.mxu1 %v3078_v9  ;;  %v3173_v8 = vunpack.c.l.s8.bf16 %v1205_v0  ;;  %v3175_v9 = vunpack.c.l.s8.bf16 %v1207_v1 }
 0x634   : > { %4989 = vmatprep.subr.bf16.mxu0 %v3093_v25  ;;  %5317 = vmatprep.subr.bf16.mxu1 %v3095_v10  ;;  %v1204_v25 = vld [vmem:[%s7088_s22 + $0x1dc0] sm:$0xff]  ;;  %v1206_v10 = vld [vmem:[%s7088_s22 + $0x1dd0] sm:$0xff] }
 0x635   : > { %5019 = vmatprep.mubr.bf16.mxu0 %v7454_v34  ;;  %5347 = vmatprep.mubr.bf16.mxu1 %v7454_v34  ;;  %v3172_v16 = vunpack.c.l.s8.bf16 %v1204_v25  ;;  %v3174_v17 = vunpack.c.l.s8.bf16 %v1206_v10  ;;  %v3188_v55 = vunpack.c.h.s8.bf16 %v1204_v25  ;;  %v3190_v23 = vunpack.c.h.s8.bf16 %v1206_v10 }
 0x637   : > { %4990 = vmatpush1.bf16.msra.mxu0 %v3092_v20  ;;  %5318 = vmatpush1.bf16.msra.mxu1 %v3094_v21  ;;  %v3189_v20 = vunpack.c.h.s8.bf16 %v1205_v0  ;;  %v3191_v21 = vunpack.c.h.s8.bf16 %v1207_v1 }
 0x638   : > { %4991 = vmatprep.subr.bf16.mxu0 %v3109_v33  ;;  %5319 = vmatprep.subr.bf16.mxu1 %v3111_v29  ;;  %v1221_v33 = vld [vmem:[%s7088_s22 + $0x1e48] sm:$0xff]  ;;  %v1223_v29 = vld [vmem:[%s7088_s22 + $0x1e58] sm:$0xff] }
 0x63b   : > { %4992 = vmatpush1.bf16.msra.mxu0 %v3108_v35  ;;  %5320 = vmatpush1.bf16.msra.mxu1 %v3110_v37  ;;  %v3205_v35 = vunpack.c.l.s8.bf16 %v1221_v33  ;;  %v3207_v37 = vunpack.c.l.s8.bf16 %v1223_v29 }
 0x63c   : > { %4993 = vmatprep.subr.bf16.mxu0 %v3125_v40  ;;  %5321 = vmatprep.subr.bf16.mxu1 %v3127_v41  ;;  %v1220_v40 = vld [vmem:[%s7088_s22 + $0x1e40] sm:$0xff]  ;;  %v1222_v41 = vld [vmem:[%s7088_s22 + $0x1e50] sm:$0xff] }
 0x63d   : > { %v3204_v27 = vunpack.c.l.s8.bf16 %v1220_v40  ;;  %v3206_v30 = vunpack.c.l.s8.bf16 %v1222_v41  ;;  %v3220_v53 = vunpack.c.h.s8.bf16 %v1220_v40  ;;  %v3222_v54 = vunpack.c.h.s8.bf16 %v1222_v41 }
 0x63f   : > { %4994 = vmatpush1.bf16.msra.mxu0 %v3124_v42  ;;  %5322 = vmatpush1.bf16.msra.mxu1 %v3126_v44  ;;  %v3221_v42 = vunpack.c.h.s8.bf16 %v1221_v33  ;;  %v3223_v44 = vunpack.c.h.s8.bf16 %v1223_v29 }
 0x640   : > { %4995 = vmatprep.subr.bf16.mxu0 %v3141_v45  ;;  %5323 = vmatprep.subr.bf16.mxu1 %v3143_v47  ;;  %v1237_v45 = vld [vmem:[%s7088_s22 + $0x1ec8] sm:$0xff]  ;;  %v1239_v47 = vld [vmem:[%s7088_s22 + $0x1ed8] sm:$0xff] }
 0x643   : > { %4996 = vmatpush1.bf16.msra.mxu0 %v3140_v56  ;;  %5324 = vmatpush1.bf16.msra.mxu1 %v3142_v57  ;;  %v3237_v56 = vunpack.c.l.s8.bf16 %v1237_v45  ;;  %v3239_v57 = vunpack.c.l.s8.bf16 %v1239_v47 }
 0x644   : > { %4997 = vmatprep.subr.bf16.mxu0 %v3157_v38  ;;  %5325 = vmatprep.subr.bf16.mxu1 %v3159_v61  ;;  %v1236_v38 = vld [vmem:[%s7088_s22 + $0x1ec0] sm:$0xff]  ;;  %v1238_v61 = vld [vmem:[%s7088_s22 + $0x1ed0] sm:$0xff] }
 0x645   : > { %v3236_v0 = vunpack.c.l.s8.bf16 %v1236_v38  ;;  %v3238_v1 = vunpack.c.l.s8.bf16 %v1238_v61  ;;  %v3252_v25 = vunpack.c.h.s8.bf16 %v1236_v38  ;;  %v3254_v10 = vunpack.c.h.s8.bf16 %v1238_v61 }
 0x647   : > { %4998 = vmatpush1.bf16.msra.mxu0 %v3156_v2  ;;  %5326 = vmatpush1.bf16.msra.mxu1 %v3158_v7  ;;  %v3253_v2 = vunpack.c.h.s8.bf16 %v1237_v45  ;;  %v3255_v7 = vunpack.c.h.s8.bf16 %v1239_v47 }
 0x648   : > { %4999 = vmatprep.subr.bf16.mxu0 %v3173_v8  ;;  %5327 = vmatprep.subr.bf16.mxu1 %v3175_v9  ;;  %v1253_v8 = vld [vmem:[%s7088_s22 + $0x1f48] sm:$0xff]  ;;  %v1255_v9 = vld [vmem:[%s7088_s22 + $0x1f58] sm:$0xff] }
 0x64b   : > { %5000 = vmatpush1.bf16.msra.mxu0 %v3172_v16  ;;  %5328 = vmatpush1.bf16.msra.mxu1 %v3174_v17  ;;  %v3269_v16 = vunpack.c.l.s8.bf16 %v1253_v8  ;;  %v3271_v17 = vunpack.c.l.s8.bf16 %v1255_v9 }
 0x64c   : > { %5001 = vmatprep.subr.bf16.mxu0 %v3189_v20  ;;  %5329 = vmatprep.subr.bf16.mxu1 %v3191_v21  ;;  %v1252_v20 = vld [vmem:[%s7088_s22 + $0x1f40] sm:$0xff]  ;;  %v1254_v21 = vld [vmem:[%s7088_s22 + $0x1f50] sm:$0xff] }
 0x64d   : > { %v3268_v33 = vunpack.c.l.s8.bf16 %v1252_v20  ;;  %v3270_v29 = vunpack.c.l.s8.bf16 %v1254_v21  ;;  %v3284_v40 = vunpack.c.h.s8.bf16 %v1252_v20  ;;  %v3286_v41 = vunpack.c.h.s8.bf16 %v1254_v21 }
 0x64f   : > { %5002 = vmatpush1.bf16.msra.mxu0 %v3188_v55  ;;  %5330 = vmatpush1.bf16.msra.mxu1 %v3190_v23  ;;  %v3285_v55 = vunpack.c.h.s8.bf16 %v1253_v8  ;;  %v3287_v23 = vunpack.c.h.s8.bf16 %v1255_v9 }
 0x650   : > { %5003 = vmatprep.subr.bf16.mxu0 %v3205_v35  ;;  %5331 = vmatprep.subr.bf16.mxu1 %v3207_v37  ;;  %v1269_v35 = vld [vmem:[%s7088_s22 + $0x1fc8] sm:$0xff]  ;;  %v1271_v37 = vld [vmem:[%s7088_s22 + $0x1fd8] sm:$0xff] }
 0x653   : > { %5004 = vmatpush1.bf16.msra.mxu0 %v3204_v27  ;;  %5332 = vmatpush1.bf16.msra.mxu1 %v3206_v30  ;;  %v3301_v27 = vunpack.c.l.s8.bf16 %v1269_v35  ;;  %v3303_v30 = vunpack.c.l.s8.bf16 %v1271_v37 }
 0x654   : > { %5005 = vmatprep.subr.bf16.mxu0 %v3221_v42  ;;  %5333 = vmatprep.subr.bf16.mxu1 %v3223_v44  ;;  %v1268_v42 = vld [vmem:[%s7088_s22 + $0x1fc0] sm:$0xff]  ;;  %v1270_v44 = vld [vmem:[%s7088_s22 + $0x1fd0] sm:$0xff] }
 0x655   : > { %v3300_v45 = vunpack.c.l.s8.bf16 %v1268_v42  ;;  %v3302_v47 = vunpack.c.l.s8.bf16 %v1270_v44  ;;  %v3316_v38 = vunpack.c.h.s8.bf16 %v1268_v42  ;;  %v3318_v61 = vunpack.c.h.s8.bf16 %v1270_v44 }
 0x657   : > { %5006 = vmatpush1.bf16.msra.mxu0 %v3220_v53  ;;  %5334 = vmatpush1.bf16.msra.mxu1 %v3222_v54  ;;  %v3317_v53 = vunpack.c.h.s8.bf16 %v1269_v35  ;;  %v3319_v54 = vunpack.c.h.s8.bf16 %v1271_v37 }
 0x658   : > { %5007 = vmatprep.subr.bf16.mxu0 %v3237_v56  ;;  %5335 = vmatprep.subr.bf16.mxu1 %v3239_v57  ;;  %v265_v56 = vld [vmem:[%s7088_s22 + $0x68] sm:$0xff]  ;;  %v267_v57 = vld [vmem:[%s7088_s22 + $0x78] sm:$0xff] }
 0x65b   : > { %5008 = vmatpush1.bf16.msra.mxu0 %v3236_v0  ;;  %5336 = vmatpush1.bf16.msra.mxu1 %v3238_v1  ;;  %v1289_v0 = vunpack.c.l.s8.bf16 %v265_v56  ;;  %v1291_v1 = vunpack.c.l.s8.bf16 %v267_v57 }
 0x65c   : > { %5009 = vmatprep.subr.bf16.mxu0 %v3253_v2  ;;  %5337 = vmatprep.subr.bf16.mxu1 %v3255_v7  ;;  %v264_v2 = vld [vmem:[%s7088_s22 + $0x60] sm:$0xff]  ;;  %v266_v7 = vld [vmem:[%s7088_s22 + $0x70] sm:$0xff] }
 0x65d   : > { %v1288_v8 = vunpack.c.l.s8.bf16 %v264_v2  ;;  %v1290_v9 = vunpack.c.l.s8.bf16 %v266_v7  ;;  %v1304_v20 = vunpack.c.h.s8.bf16 %v264_v2  ;;  %v1306_v21 = vunpack.c.h.s8.bf16 %v266_v7 }
 0x65f   : > { %5010 = vmatpush1.bf16.msra.mxu0 %v3252_v25  ;;  %5338 = vmatpush1.bf16.msra.mxu1 %v3254_v10  ;;  %v1305_v25 = vunpack.c.h.s8.bf16 %v265_v56  ;;  %v1307_v10 = vunpack.c.h.s8.bf16 %v267_v57 }
 0x660   : > { %5011 = vmatprep.subr.bf16.mxu0 %v3269_v16  ;;  %5339 = vmatprep.subr.bf16.mxu1 %v3271_v17  ;;  %v281_v16 = vld [vmem:[%s7088_s22 + $0xe8] sm:$0xff]  ;;  %v283_v17 = vld [vmem:[%s7088_s22 + $0xf8] sm:$0xff] }
 0x663   : > { %5012 = vmatpush1.bf16.msra.mxu0 %v3268_v33  ;;  %5340 = vmatpush1.bf16.msra.mxu1 %v3270_v29  ;;  %v1321_v33 = vunpack.c.l.s8.bf16 %v281_v16  ;;  %v1323_v29 = vunpack.c.l.s8.bf16 %v283_v17 }
 0x664   : > { %5013 = vmatprep.subr.bf16.mxu0 %v3285_v55  ;;  %5341 = vmatprep.subr.bf16.mxu1 %v3287_v23  ;;  %v280_v55 = vld [vmem:[%s7088_s22 + $0xe0] sm:$0xff]  ;;  %v282_v23 = vld [vmem:[%s7088_s22 + $0xf0] sm:$0xff] }
 0x665   : > { %v1320_v35 = vunpack.c.l.s8.bf16 %v280_v55  ;;  %v1322_v37 = vunpack.c.l.s8.bf16 %v282_v23  ;;  %v1336_v42 = vunpack.c.h.s8.bf16 %v280_v55  ;;  %v1338_v44 = vunpack.c.h.s8.bf16 %v282_v23 }
 0x667   : > { %5014 = vmatpush1.bf16.msra.mxu0 %v3284_v40  ;;  %5342 = vmatpush1.bf16.msra.mxu1 %v3286_v41  ;;  %v1337_v40 = vunpack.c.h.s8.bf16 %v281_v16  ;;  %v1339_v41 = vunpack.c.h.s8.bf16 %v283_v17 }
 0x668   : > { %5015 = vmatprep.subr.bf16.mxu0 %v3301_v27  ;;  %5343 = vmatprep.subr.bf16.mxu1 %v3303_v30  ;;  %v297_v27 = vld [vmem:[%s7088_s22 + $0x168] sm:$0xff]  ;;  %v299_v30 = vld [vmem:[%s7088_s22 + $0x178] sm:$0xff] }
 0x669   : > { %v1369_v57 = vunpack.c.h.s8.bf16 %v297_v27 }
 0x66b   : > { %5016 = vmatpush1.bf16.msra.mxu0 %v3300_v45  ;;  %5344 = vmatpush1.bf16.msra.mxu1 %v3302_v47  ;;  %v1355_v45 = vunpack.c.l.s8.bf16 %v299_v30  ;;  %v296_v47 = vld [vmem:[%s7088_s22 + $0x160] sm:$0xff] }
 0x66c   : > { %5017 = vmatprep.subr.bf16.mxu0 %v3317_v53  ;;  %5345 = vmatprep.subr.bf16.mxu1 %v3319_v54  ;;  %v298_v53 = vld [vmem:[%s7088_s22 + $0x170] sm:$0xff]  ;;  %v1352_v54 = vunpack.c.l.s8.bf16 %v296_v47 }
 0x66d   : > { %v1354_v56 = vunpack.c.l.s8.bf16 %v298_v53  ;;  %v1370_v2 = vunpack.c.h.s8.bf16 %v298_v53 }
 0x66f   : > { %5018 = vmatpush1.bf16.msra.mxu0 %v3316_v38  ;;  %5346 = vmatpush1.bf16.msra.mxu1 %v3318_v61  ;;  %v1371_v38 = vunpack.c.h.s8.bf16 %v299_v30  ;;  %v313_v61 = vld [vmem:[%s7088_s22 + $0x1e8] sm:$0xff] }
 0x670   : > { %5356 = vmatprep.subr.bf16.mxu0 %v1289_v0  ;;  %5684 = vmatprep.subr.bf16.mxu1 %v1291_v1  ;;  %v315_v0 = vld [vmem:[%s7088_s22 + $0x1f8] sm:$0xff]  ;;  %v1368_v1 = vunpack.c.h.s8.bf16 %v296_v47  ;;  %v1385_v7 = vunpack.c.l.s8.bf16 %v313_v61  ;;  %v1401_v17 = vunpack.c.h.s8.bf16 %v313_v61 }
 0x672   : > { %5020 = vmatmul.mubr.bf16.vlgmr.msra.gmra.mrb[8].mxu0 %v7492_v26  ;;  %5348 = vmatmul.mubr.bf16.vlgmr.msra.gmra.mrb[8].mxu1 %v7492_v26 }
 0x673   : > { %5357 = vmatpush1.bf16.msra.mxu0 %v1288_v8  ;;  %5685 = vmatpush1.bf16.msra.mxu1 %v1290_v9  ;;  %v1387_v8 = vunpack.c.l.s8.bf16 %v315_v0  ;;  %v312_v9 = vld [vmem:[%s7088_s22 + $0x1e0] sm:$0xff] }
 0x674   : > { %5358 = vmatprep.subr.bf16.mxu0 %v1305_v25  ;;  %5686 = vmatprep.subr.bf16.mxu1 %v1307_v10  ;;  %v314_v25 = vld [vmem:[%s7088_s22 + $0x1f0] sm:$0xff]  ;;  %v1384_v10 = vunpack.c.l.s8.bf16 %v312_v9 }
 0x675   : > { %5388 = vmatprep.mubr.bf16.mxu0 %v7140_v43  ;;  %5716 = vmatprep.mubr.bf16.mxu1 %v7140_v43  ;;  %v1353_v43 = vunpack.c.l.s8.bf16 %v297_v27  ;;  %v1386_v16 = vunpack.c.l.s8.bf16 %v314_v25  ;;  %v1402_v55 = vunpack.c.h.s8.bf16 %v314_v25 }
 0x677   : > { %5359 = vmatpush1.bf16.msra.mxu0 %v1304_v20  ;;  %5687 = vmatpush1.bf16.msra.mxu1 %v1306_v21  ;;  %v1403_v20 = vunpack.c.h.s8.bf16 %v315_v0  ;;  %v329_v21 = vld [vmem:[%s7088_s22 + $0x268] sm:$0xff] }
 0x678   : > { %5360 = vmatprep.subr.bf16.mxu0 %v1321_v33  ;;  %5688 = vmatprep.subr.bf16.mxu1 %v1323_v29  ;;  %v331_v33 = vld [vmem:[%s7088_s22 + $0x278] sm:$0xff]  ;;  %v1400_v29 = vunpack.c.h.s8.bf16 %v312_v9  ;;  %v1417_v23 = vunpack.c.l.s8.bf16 %v329_v21  ;;  %v1433_v30 = vunpack.c.h.s8.bf16 %v329_v21 }
 0x67b   : > { %5361 = vmatpush1.bf16.msra.mxu0 %v1320_v35  ;;  %5689 = vmatpush1.bf16.msra.mxu1 %v1322_v37  ;;  %v1419_v35 = vunpack.c.l.s8.bf16 %v331_v33  ;;  %v328_v37 = vld [vmem:[%s7088_s22 + $0x260] sm:$0xff] }
 0x67c   : > { %5362 = vmatprep.subr.bf16.mxu0 %v1337_v40  ;;  %5690 = vmatprep.subr.bf16.mxu1 %v1339_v41  ;;  %v330_v40 = vld [vmem:[%s7088_s22 + $0x270] sm:$0xff]  ;;  %v1416_v41 = vunpack.c.l.s8.bf16 %v328_v37 }
 0x67d   : > { %v1418_v27 = vunpack.c.l.s8.bf16 %v330_v40  ;;  %v1434_v47 = vunpack.c.h.s8.bf16 %v330_v40 }
 0x67f   : > { %5363 = vmatpush1.bf16.msra.mxu0 %v1336_v42  ;;  %5691 = vmatpush1.bf16.msra.mxu1 %v1338_v44  ;;  %v1435_v42 = vunpack.c.h.s8.bf16 %v331_v33  ;;  %v345_v44 = vld [vmem:[%s7088_s22 + $0x2e8] sm:$0xff] }
 0x680   : > { %5364 = vmatprep.subr.bf16.mxu0 %v1353_v43  ;;  %5692 = vmatprep.subr.bf16.mxu1 %v1355_v45  ;;  %v347_v43 = vld [vmem:[%s7088_s22 + $0x2f8] sm:$0xff]  ;;  %v1432_v45 = vunpack.c.h.s8.bf16 %v328_v37  ;;  %v1449_v53 = vunpack.c.l.s8.bf16 %v345_v44  ;;  %v1465_v0 = vunpack.c.h.s8.bf16 %v345_v44 }
 0x683   : > { %5365 = vmatpush1.bf16.msra.mxu0 %v1352_v54  ;;  %5693 = vmatpush1.bf16.msra.mxu1 %v1354_v56  ;;  %v1451_v54 = vunpack.c.l.s8.bf16 %v347_v43  ;;  %v344_v56 = vld [vmem:[%s7088_s22 + $0x2e0] sm:$0xff] }
 0x684   : > { %5366 = vmatprep.subr.bf16.mxu0 %v1369_v57  ;;  %5694 = vmatprep.subr.bf16.mxu1 %v1371_v38  ;;  %v346_v57 = vld [vmem:[%s7088_s22 + $0x2f0] sm:$0xff]  ;;  %v1448_v38 = vunpack.c.l.s8.bf16 %v344_v56 }
 0x685   : > { %v1450_v61 = vunpack.c.l.s8.bf16 %v346_v57  ;;  %v1466_v9 = vunpack.c.h.s8.bf16 %v346_v57 }
 0x687   : > { %5367 = vmatpush1.bf16.msra.mxu0 %v1368_v1  ;;  %5695 = vmatpush1.bf16.msra.mxu1 %v1370_v2  ;;  %v1467_v1 = vunpack.c.h.s8.bf16 %v347_v43  ;;  %v361_v2 = vld [vmem:[%s7088_s22 + $0x368] sm:$0xff] }
 0x688   : > { %5368 = vmatprep.subr.bf16.mxu0 %v1385_v7  ;;  %5696 = vmatprep.subr.bf16.mxu1 %v1387_v8  ;;  %v363_v7 = vld [vmem:[%s7088_s22 + $0x378] sm:$0xff]  ;;  %v1464_v8 = vunpack.c.h.s8.bf16 %v344_v56  ;;  %v1481_v25 = vunpack.c.l.s8.bf16 %v361_v2  ;;  %v1497_v33 = vunpack.c.h.s8.bf16 %v361_v2 }
 0x68b   : > { %5369 = vmatpush1.bf16.msra.mxu0 %v1384_v10  ;;  %5697 = vmatpush1.bf16.msra.mxu1 %v1386_v16  ;;  %v1483_v10 = vunpack.c.l.s8.bf16 %v363_v7  ;;  %v360_v16 = vld [vmem:[%s7088_s22 + $0x360] sm:$0xff] }
 0x68c   : > { %5370 = vmatprep.subr.bf16.mxu0 %v1401_v17  ;;  %5698 = vmatprep.subr.bf16.mxu1 %v1403_v20  ;;  %v362_v17 = vld [vmem:[%s7088_s22 + $0x370] sm:$0xff]  ;;  %v1480_v20 = vunpack.c.l.s8.bf16 %v360_v16 }
 0x68d   : > { %v1482_v21 = vunpack.c.l.s8.bf16 %v362_v17  ;;  %v1498_v37 = vunpack.c.h.s8.bf16 %v362_v17 }
 0x68f   : > { %5371 = vmatpush1.bf16.msra.mxu0 %v1400_v29  ;;  %5699 = vmatpush1.bf16.msra.mxu1 %v1402_v55  ;;  %v1499_v29 = vunpack.c.h.s8.bf16 %v363_v7  ;;  %v377_v55 = vld [vmem:[%s7088_s22 + $0x3e8] sm:$0xff] }
 0x690   : > { %5372 = vmatprep.subr.bf16.mxu0 %v1417_v23  ;;  %5700 = vmatprep.subr.bf16.mxu1 %v1419_v35  ;;  %v379_v23 = vld [vmem:[%s7088_s22 + $0x3f8] sm:$0xff]  ;;  %v1496_v35 = vunpack.c.h.s8.bf16 %v360_v16  ;;  %v1513_v40 = vunpack.c.l.s8.bf16 %v377_v55  ;;  %v1529_v43 = vunpack.c.h.s8.bf16 %v377_v55 }
 0x693   : > { %5373 = vmatpush1.bf16.msra.mxu0 %v1416_v41  ;;  %5701 = vmatpush1.bf16.msra.mxu1 %v1418_v27  ;;  %v1515_v41 = vunpack.c.l.s8.bf16 %v379_v23  ;;  %v376_v27 = vld [vmem:[%s7088_s22 + $0x3e0] sm:$0xff] }
 0x694   : > { %5374 = vmatprep.subr.bf16.mxu0 %v1433_v30  ;;  %5702 = vmatprep.subr.bf16.mxu1 %v1435_v42  ;;  %v378_v30 = vld [vmem:[%s7088_s22 + $0x3f0] sm:$0xff]  ;;  %v1512_v42 = vunpack.c.l.s8.bf16 %v376_v27 }
 0x695   : > { %v1514_v44 = vunpack.c.l.s8.bf16 %v378_v30  ;;  %v1530_v56 = vunpack.c.h.s8.bf16 %v378_v30  ;;  %v424_v30 = vld [vmem:[%s7088_s22 + $0x560] sm:$0xff] }
 0x697   : > { %5375 = vmatpush1.bf16.msra.mxu0 %v1432_v45  ;;  %5703 = vmatpush1.bf16.msra.mxu1 %v1434_v47  ;;  %v1531_v45 = vunpack.c.h.s8.bf16 %v379_v23  ;;  %v393_v47 = vld [vmem:[%s7088_s22 + $0x468] sm:$0xff] }
 0x698   : > { %5376 = vmatprep.subr.bf16.mxu0 %v1449_v53  ;;  %5704 = vmatprep.subr.bf16.mxu1 %v1451_v54  ;;  %v395_v53 = vld [vmem:[%s7088_s22 + $0x478] sm:$0xff]  ;;  %v1528_v54 = vunpack.c.h.s8.bf16 %v376_v27  ;;  %v1545_v57 = vunpack.c.l.s8.bf16 %v393_v47  ;;  %v1561_v7 = vunpack.c.h.s8.bf16 %v393_v47 }
 0x69b   : > { %5377 = vmatpush1.bf16.msra.mxu0 %v1448_v38  ;;  %5705 = vmatpush1.bf16.msra.mxu1 %v1450_v61  ;;  %v1547_v38 = vunpack.c.l.s8.bf16 %v395_v53  ;;  %v392_v61 = vld [vmem:[%s7088_s22 + $0x460] sm:$0xff] }
 0x69c   : > { %5378 = vmatprep.subr.bf16.mxu0 %v1465_v0  ;;  %5706 = vmatprep.subr.bf16.mxu1 %v1467_v1  ;;  %v394_v0 = vld [vmem:[%s7088_s22 + $0x470] sm:$0xff]  ;;  %v1544_v1 = vunpack.c.l.s8.bf16 %v392_v61 }
 0x69d   : > { %v1546_v2 = vunpack.c.l.s8.bf16 %v394_v0  ;;  %v1562_v16 = vunpack.c.h.s8.bf16 %v394_v0  ;;  %v440_v0 = vld [vmem:[%s7088_s22 + $0x5e0] sm:$0xff] }
 0x69f   : > { %5379 = vmatpush1.bf16.msra.mxu0 %v1464_v8  ;;  %5707 = vmatpush1.bf16.msra.mxu1 %v1466_v9  ;;  %v1563_v8 = vunpack.c.h.s8.bf16 %v395_v53  ;;  %v409_v9 = vld [vmem:[%s7088_s22 + $0x4e8] sm:$0xff] }
 0x6a0   : > { %5380 = vmatprep.subr.bf16.mxu0 %v1481_v25  ;;  %5708 = vmatprep.subr.bf16.mxu1 %v1483_v10  ;;  %v411_v25 = vld [vmem:[%s7088_s22 + $0x4f8] sm:$0xff]  ;;  %v1560_v10 = vunpack.c.h.s8.bf16 %v392_v61  ;;  %v1577_v17 = vunpack.c.l.s8.bf16 %v409_v9  ;;  %v1593_v55 = vunpack.c.h.s8.bf16 %v409_v9  ;;  %v441_v53 = vld [vmem:[%s7088_s22 + $0x5e8] sm:$0xff] }
 0x6a1   : > { %v1595_v23 = vunpack.c.h.s8.bf16 %v411_v25 }
 0x6a3   : > { %5381 = vmatpush1.bf16.msra.mxu0 %v1480_v20  ;;  %5709 = vmatpush1.bf16.msra.mxu1 %v1482_v21  ;;  %v1579_v20 = vunpack.c.l.s8.bf16 %v411_v25  ;;  %v408_v21 = vld [vmem:[%s7088_s22 + $0x4e0] sm:$0xff]  ;;  %v457_v25 = vld [vmem:[%s7088_s22 + $0x668] sm:$0xff] }
 0x6a4   : > { %5382 = vmatprep.subr.bf16.mxu0 %v1497_v33  ;;  %5710 = vmatprep.subr.bf16.mxu1 %v1499_v29  ;;  %v410_v33 = vld [vmem:[%s7088_s22 + $0x4f0] sm:$0xff]  ;;  %v1576_v29 = vunpack.c.l.s8.bf16 %v408_v21 }
 0x6a7   : > { %5383 = vmatpush1.bf16.msra.mxu0 %v1496_v35  ;;  %5711 = vmatpush1.bf16.msra.mxu1 %v1498_v37  ;;  %v425_v35 = vld [vmem:[%s7088_s22 + $0x568] sm:$0xff]  ;;  %v427_v37 = vld [vmem:[%s7088_s22 + $0x578] sm:$0xff] }
 0x6a8   : > { %5384 = vmatprep.subr.bf16.mxu0 %v1513_v40  ;;  %5712 = vmatprep.subr.bf16.mxu1 %v1515_v41  ;;  %v1592_v40 = vunpack.c.h.s8.bf16 %v408_v21  ;;  %v1594_v41 = vunpack.c.h.s8.bf16 %v410_v33  ;;  %v1611_v27 = vunpack.c.l.s8.bf16 %v427_v37  ;;  %v1627_v47 = vunpack.c.h.s8.bf16 %v427_v37  ;;  %v473_v37 = vld [vmem:[%s7088_s22 + $0x6e8] sm:$0xff] }
 0x6ab   : > { %5385 = vmatpush1.bf16.msra.mxu0 %v1512_v42  ;;  %5713 = vmatpush1.bf16.msra.mxu1 %v1514_v44  ;;  %v426_v42 = vld [vmem:[%s7088_s22 + $0x570] sm:$0xff]  ;;  %v1608_v44 = vunpack.c.l.s8.bf16 %v424_v30 }
 0x6ac   : > { %5386 = vmatprep.subr.bf16.mxu0 %v1529_v43  ;;  %5714 = vmatprep.subr.bf16.mxu1 %v1531_v45  ;;  %v1610_v43 = vunpack.c.l.s8.bf16 %v426_v42  ;;  %v1625_v45 = vunpack.c.h.s8.bf16 %v425_v35 }
 0x6af   : > { %5387 = vmatpush1.bf16.msra.mxu0 %v1528_v54  ;;  %5715 = vmatpush1.bf16.msra.mxu1 %v1530_v56  ;;  %v443_v54 = vld [vmem:[%s7088_s22 + $0x5f8] sm:$0xff]  ;;  %v1624_v56 = vunpack.c.h.s8.bf16 %v424_v30 }
 0x6b0   : > { %5397 = vmatprep.subr.bf16.mxu0 %v1545_v57  ;;  %5725 = vmatprep.subr.bf16.mxu1 %v1547_v38  ;;  %v1626_v57 = vunpack.c.h.s8.bf16 %v426_v42  ;;  %v1641_v38 = vunpack.c.l.s8.bf16 %v441_v53  ;;  %v1643_v61 = vunpack.c.l.s8.bf16 %v443_v54  ;;  %v1659_v9 = vunpack.c.h.s8.bf16 %v443_v54  ;;  %v472_v42 = vld [vmem:[%s7088_s22 + $0x6e0] sm:$0xff]  ;;  %v489_v54 = vld [vmem:[%s7088_s22 + $0x768] sm:$0xff] }
 0x6b2   : > { %5389 = vmatmul.mubr.bf16.vlgmr.msra.gmra.mrb[12].mxu0 %v7170_v50  ;;  %5717 = vmatmul.mubr.bf16.vlgmr.msra.gmra.mrb[12].mxu1 %v7170_v50  ;;  %v1578_v50 = vunpack.c.l.s8.bf16 %v410_v33  ;;  %v456_v33 = vld [vmem:[%s7088_s22 + $0x660] sm:$0xff] }
 0x6b3   : > { %5398 = vmatpush1.bf16.msra.mxu0 %v1544_v1  ;;  %5726 = vmatpush1.bf16.msra.mxu1 %v1546_v2  ;;  %v442_v1 = vld [vmem:[%s7088_s22 + $0x5f0] sm:$0xff]  ;;  %v1640_v2 = vunpack.c.l.s8.bf16 %v440_v0 }
 0x6b4   : > { %5399 = vmatprep.subr.bf16.mxu0 %v1561_v7  ;;  %5727 = vmatprep.subr.bf16.mxu1 %v1563_v8  ;;  %v1642_v7 = vunpack.c.l.s8.bf16 %v442_v1  ;;  %v1657_v8 = vunpack.c.h.s8.bf16 %v441_v53 }
 0x6b5   : > { %5429 = vmatprep.mubr.bf16.mxu0 %v7178_v58  ;;  %5757 = vmatprep.mubr.bf16.mxu1 %v7178_v58  ;;  %v1609_v58 = vunpack.c.l.s8.bf16 %v425_v35 }
 0x6b7   : > { %5400 = vmatpush1.bf16.msra.mxu0 %v1560_v10  ;;  %5728 = vmatpush1.bf16.msra.mxu1 %v1562_v16  ;;  %v459_v10 = vld [vmem:[%s7088_s22 + $0x678] sm:$0xff]  ;;  %v1656_v16 = vunpack.c.h.s8.bf16 %v440_v0 }
 0x6b8   : > { %5401 = vmatprep.subr.bf16.mxu0 %v1577_v17  ;;  %5729 = vmatprep.subr.bf16.mxu1 %v1579_v20  ;;  %v1658_v17 = vunpack.c.h.s8.bf16 %v442_v1  ;;  %v1673_v20 = vunpack.c.l.s8.bf16 %v457_v25  ;;  %v1675_v21 = vunpack.c.l.s8.bf16 %v459_v10  ;;  %v1691_v35 = vunpack.c.h.s8.bf16 %v459_v10  ;;  %v488_v1 = vld [vmem:[%s7088_s22 + $0x760] sm:$0xff]  ;;  %v505_v10 = vld [vmem:[%s7088_s22 + $0x7e8] sm:$0xff] }
 0x6bb   : > { %5402 = vmatpush1.bf16.msra.mxu0 %v1576_v29  ;;  %5730 = vmatpush1.bf16.msra.mxu1 %v1578_v50  ;;  %v458_v29 = vld [vmem:[%s7088_s22 + $0x670] sm:$0xff]  ;;  %v1672_v50 = vunpack.c.l.s8.bf16 %v456_v33 }
 0x6bc   : > { %5403 = vmatprep.subr.bf16.mxu0 %v1593_v55  ;;  %5731 = vmatprep.subr.bf16.mxu1 %v1595_v23  ;;  %v1674_v55 = vunpack.c.l.s8.bf16 %v458_v29  ;;  %v1689_v23 = vunpack.c.h.s8.bf16 %v457_v25 }
 0x6bf   : > { %5404 = vmatpush1.bf16.msra.mxu0 %v1592_v40  ;;  %5732 = vmatpush1.bf16.msra.mxu1 %v1594_v41  ;;  %v475_v40 = vld [vmem:[%s7088_s22 + $0x6f8] sm:$0xff]  ;;  %v1688_v41 = vunpack.c.h.s8.bf16 %v456_v33 }
 0x6c0   : > { %5405 = vmatprep.subr.bf16.mxu0 %v1609_v58  ;;  %5733 = vmatprep.subr.bf16.mxu1 %v1611_v27  ;;  %v1690_v58 = vunpack.c.h.s8.bf16 %v458_v29  ;;  %v1705_v27 = vunpack.c.l.s8.bf16 %v473_v37  ;;  %v1707_v30 = vunpack.c.l.s8.bf16 %v475_v40  ;;  %v1723_v53 = vunpack.c.h.s8.bf16 %v475_v40  ;;  %v504_v29 = vld [vmem:[%s7088_s22 + $0x7e0] sm:$0xff]  ;;  %v521_v40 = vld [vmem:[%s7088_s22 + $0x868] sm:$0xff] }
 0x6c3   : > { %5406 = vmatpush1.bf16.msra.mxu0 %v1608_v44  ;;  %5734 = vmatpush1.bf16.msra.mxu1 %v1610_v43  ;;  %v474_v44 = vld [vmem:[%s7088_s22 + $0x6f0] sm:$0xff]  ;;  %v1704_v43 = vunpack.c.l.s8.bf16 %v472_v42 }
 0x6c4   : > { %5407 = vmatprep.subr.bf16.mxu0 %v1625_v45  ;;  %5735 = vmatprep.subr.bf16.mxu1 %v1627_v47  ;;  %v1706_v45 = vunpack.c.l.s8.bf16 %v474_v44  ;;  %v1721_v47 = vunpack.c.h.s8.bf16 %v473_v37 }
 0x6c7   : > { %5408 = vmatpush1.bf16.msra.mxu0 %v1624_v56  ;;  %5736 = vmatpush1.bf16.msra.mxu1 %v1626_v57  ;;  %v491_v56 = vld [vmem:[%s7088_s22 + $0x778] sm:$0xff]  ;;  %v1720_v57 = vunpack.c.h.s8.bf16 %v472_v42 }
 0x6c8   : > { %5409 = vmatprep.subr.bf16.mxu0 %v1641_v38  ;;  %5737 = vmatprep.subr.bf16.mxu1 %v1643_v61  ;;  %v1722_v38 = vunpack.c.h.s8.bf16 %v474_v44  ;;  %v1737_v61 = vunpack.c.l.s8.bf16 %v489_v54  ;;  %v1739_v0 = vunpack.c.l.s8.bf16 %v491_v56  ;;  %v1755_v25 = vunpack.c.h.s8.bf16 %v491_v56  ;;  %v520_v44 = vld [vmem:[%s7088_s22 + $0x860] sm:$0xff]  ;;  %v537_v56 = vld [vmem:[%s7088_s22 + $0x8e8] sm:$0xff] }
 0x6cb   : > { %5410 = vmatpush1.bf16.msra.mxu0 %v1640_v2  ;;  %5738 = vmatpush1.bf16.msra.mxu1 %v1642_v7  ;;  %v490_v2 = vld [vmem:[%s7088_s22 + $0x770] sm:$0xff]  ;;  %v1736_v7 = vunpack.c.l.s8.bf16 %v488_v1 }
 0x6cc   : > { %5411 = vmatprep.subr.bf16.mxu0 %v1657_v8  ;;  %5739 = vmatprep.subr.bf16.mxu1 %v1659_v9  ;;  %v1738_v8 = vunpack.c.l.s8.bf16 %v490_v2  ;;  %v1753_v9 = vunpack.c.h.s8.bf16 %v489_v54 }
 0x6cf   : > { %5412 = vmatpush1.bf16.msra.mxu0 %v1656_v16  ;;  %5740 = vmatpush1.bf16.msra.mxu1 %v1658_v17  ;;  %v507_v16 = vld [vmem:[%s7088_s22 + $0x7f8] sm:$0xff]  ;;  %v1752_v17 = vunpack.c.h.s8.bf16 %v488_v1 }
 0x6d0   : > { %5413 = vmatprep.subr.bf16.mxu0 %v1673_v20  ;;  %5741 = vmatprep.subr.bf16.mxu1 %v1675_v21  ;;  %v1754_v20 = vunpack.c.h.s8.bf16 %v490_v2  ;;  %v1769_v21 = vunpack.c.l.s8.bf16 %v505_v10  ;;  %v1771_v33 = vunpack.c.l.s8.bf16 %v507_v16  ;;  %v1787_v37 = vunpack.c.h.s8.bf16 %v507_v16  ;;  %v536_v2 = vld [vmem:[%s7088_s22 + $0x8e0] sm:$0xff]  ;;  %v555_v16 = vld [vmem:[%s7088_s22 + $0x978] sm:$0xff] }
 0x6d3   : > { %5414 = vmatpush1.bf16.msra.mxu0 %v1672_v50  ;;  %5742 = vmatpush1.bf16.msra.mxu1 %v1674_v55  ;;  %v506_v50 = vld [vmem:[%s7088_s22 + $0x7f0] sm:$0xff]  ;;  %v1768_v55 = vunpack.c.l.s8.bf16 %v504_v29 }
 0x6d4   : > { %5415 = vmatprep.subr.bf16.mxu0 %v1689_v23  ;;  %5743 = vmatprep.subr.bf16.mxu1 %v1691_v35  ;;  %v1770_v23 = vunpack.c.l.s8.bf16 %v506_v50  ;;  %v1785_v35 = vunpack.c.h.s8.bf16 %v505_v10  ;;  %v553_v10 = vld [vmem:[%s7088_s22 + $0x968] sm:$0xff] }
 0x6d7   : > { %5416 = vmatpush1.bf16.msra.mxu0 %v1688_v41  ;;  %5744 = vmatpush1.bf16.msra.mxu1 %v1690_v58  ;;  %v523_v41 = vld [vmem:[%s7088_s22 + $0x878] sm:$0xff]  ;;  %v1784_v58 = vunpack.c.h.s8.bf16 %v504_v29  ;;  %v554_v29 = vld [vmem:[%s7088_s22 + $0x970] sm:$0xff] }
 0x6d8   : > { %5417 = vmatprep.subr.bf16.mxu0 %v1705_v27  ;;  %5745 = vmatprep.subr.bf16.mxu1 %v1707_v30  ;;  %v1786_v27 = vunpack.c.h.s8.bf16 %v506_v50  ;;  %v1801_v30 = vunpack.c.l.s8.bf16 %v521_v40  ;;  %v1803_v42 = vunpack.c.l.s8.bf16 %v523_v41  ;;  %v1819_v54 = vunpack.c.h.s8.bf16 %v523_v41 }
 0x6db   : > { %5418 = vmatpush1.bf16.msra.mxu0 %v1704_v43  ;;  %5746 = vmatpush1.bf16.msra.mxu1 %v1706_v45  ;;  %v522_v43 = vld [vmem:[%s7088_s22 + $0x870] sm:$0xff]  ;;  %v1800_v45 = vunpack.c.l.s8.bf16 %v520_v44 }
 0x6dc   : > { %5419 = vmatprep.subr.bf16.mxu0 %v1721_v47  ;;  %5747 = vmatprep.subr.bf16.mxu1 %v1723_v53  ;;  %v1802_v47 = vunpack.c.l.s8.bf16 %v522_v43  ;;  %v1817_v53 = vunpack.c.h.s8.bf16 %v521_v40  ;;  %v571_v40 = vld [vmem:[%s7088_s22 + $0x9f8] sm:$0xff] }
 0x6df   : > { %5420 = vmatpush1.bf16.msra.mxu0 %v1720_v57  ;;  %5748 = vmatpush1.bf16.msra.mxu1 %v1722_v38  ;;  %v539_v57 = vld [vmem:[%s7088_s22 + $0x8f8] sm:$0xff]  ;;  %v1816_v38 = vunpack.c.h.s8.bf16 %v520_v44  ;;  %v570_v44 = vld [vmem:[%s7088_s22 + $0x9f0] sm:$0xff] }
 0x6e0   : > { %5421 = vmatprep.subr.bf16.mxu0 %v1737_v61  ;;  %5749 = vmatprep.subr.bf16.mxu1 %v1739_v0  ;;  %v1818_v61 = vunpack.c.h.s8.bf16 %v522_v43  ;;  %v1833_v0 = vunpack.c.l.s8.bf16 %v537_v56  ;;  %v1835_v1 = vunpack.c.l.s8.bf16 %v539_v57 }
 0x6e3   : > { %5422 = vmatpush1.bf16.msra.mxu0 %v1736_v7  ;;  %5750 = vmatpush1.bf16.msra.mxu1 %v1738_v8  ;;  %v538_v7 = vld [vmem:[%s7088_s22 + $0x8f0] sm:$0xff]  ;;  %v1832_v8 = vunpack.c.l.s8.bf16 %v536_v2 }
 0x6e4   : > { %5423 = vmatprep.subr.bf16.mxu0 %v1753_v9  ;;  %5751 = vmatprep.subr.bf16.mxu1 %v1755_v25  ;;  %v1849_v9 = vunpack.c.h.s8.bf16 %v537_v56  ;;  %v1851_v25 = vunpack.c.h.s8.bf16 %v539_v57  ;;  %v587_v56 = vld [vmem:[%s7088_s22 + $0xa78] sm:$0xff] }
 0x6e7   : > { %5424 = vmatpush1.bf16.msra.mxu0 %v1752_v17  ;;  %5752 = vmatpush1.bf16.msra.mxu1 %v1754_v20  ;;  %v1848_v17 = vunpack.c.h.s8.bf16 %v536_v2  ;;  %v1850_v20 = vunpack.c.h.s8.bf16 %v538_v7  ;;  %v586_v2 = vld [vmem:[%s7088_s22 + $0xa70] sm:$0xff] }
 0x6e8   : > { %5425 = vmatprep.subr.bf16.mxu0 %v1769_v21  ;;  %5753 = vmatprep.subr.bf16.mxu1 %v1771_v33  ;;  %v1867_v21 = vunpack.c.l.s8.bf16 %v555_v16  ;;  %v552_v33 = vld [vmem:[%s7088_s22 + $0x960] sm:$0xff] }
 0x6e9   : > { %v1864_v50 = vunpack.c.l.s8.bf16 %v552_v33  ;;  %v1880_v41 = vunpack.c.h.s8.bf16 %v552_v33  ;;  %v602_v33 = vld [vmem:[%s7088_s22 + $0xaf0] sm:$0xff] }
 0x6eb   : > { %5426 = vmatpush1.bf16.msra.mxu0 %v1768_v55  ;;  %5754 = vmatpush1.bf16.msra.mxu1 %v1770_v23  ;;  %v1866_v55 = vunpack.c.l.s8.bf16 %v554_v29  ;;  %v1881_v23 = vunpack.c.h.s8.bf16 %v553_v10 }
 0x6ec   : > { %5427 = vmatprep.subr.bf16.mxu0 %v1785_v35  ;;  %5755 = vmatprep.subr.bf16.mxu1 %v1787_v37  ;;  %v1883_v35 = vunpack.c.h.s8.bf16 %v555_v16  ;;  %v569_v37 = vld [vmem:[%s7088_s22 + $0x9e8] sm:$0xff] }
 0x6ef   : > { %5428 = vmatpush1.bf16.msra.mxu0 %v1784_v58  ;;  %5756 = vmatpush1.bf16.msra.mxu1 %v1786_v27  ;;  %v1882_v58 = vunpack.c.h.s8.bf16 %v554_v29  ;;  %v1897_v27 = vunpack.c.l.s8.bf16 %v569_v37 }
 0x6f0   : > { %5438 = vmatprep.subr.bf16.mxu0 %v1801_v30  ;;  %5766 = vmatprep.subr.bf16.mxu1 %v1803_v42  ;;  %v1899_v30 = vunpack.c.l.s8.bf16 %v571_v40  ;;  %v568_v42 = vld [vmem:[%s7088_s22 + $0x9e0] sm:$0xff] }
 0x6f1   : > { %v1896_v43 = vunpack.c.l.s8.bf16 %v568_v42  ;;  %v1912_v57 = vunpack.c.h.s8.bf16 %v568_v42  ;;  %v618_v42 = vld [vmem:[%s7088_s22 + $0xb70] sm:$0xff] }
 0x6f2   : > { %5430 = vmatmul.mubr.bf16.vlgmr.msra.gmra.mrb[12].mxu0 %v7216_v24  ;;  %5758 = vmatmul.mubr.bf16.vlgmr.msra.gmra.mrb[12].mxu1 %v7216_v24  ;;  %v1834_v24 = vunpack.c.l.s8.bf16 %v538_v7 }
 0x6f3   : > { %5439 = vmatpush1.bf16.msra.mxu0 %v1800_v45  ;;  %5767 = vmatpush1.bf16.msra.mxu1 %v1802_v47  ;;  %v1898_v45 = vunpack.c.l.s8.bf16 %v570_v44  ;;  %v1913_v47 = vunpack.c.h.s8.bf16 %v569_v37  ;;  %v619_v37 = vld [vmem:[%s7088_s22 + $0xb78] sm:$0xff] }
 0x6f4   : > { %5440 = vmatprep.subr.bf16.mxu0 %v1817_v53  ;;  %5768 = vmatprep.subr.bf16.mxu1 %v1819_v54  ;;  %v1915_v53 = vunpack.c.h.s8.bf16 %v571_v40  ;;  %v585_v54 = vld [vmem:[%s7088_s22 + $0xa68] sm:$0xff] }
 0x6f5   : > { %5470 = vmatprep.mubr.bf16.mxu0 %v7224_v32  ;;  %5798 = vmatprep.mubr.bf16.mxu1 %v7224_v32  ;;  %v1865_v32 = vunpack.c.l.s8.bf16 %v553_v10  ;;  %v603_v10 = vld [vmem:[%s7088_s22 + $0xaf8] sm:$0xff] }
 0x6f7   : > { %5441 = vmatpush1.bf16.msra.mxu0 %v1816_v38  ;;  %5769 = vmatpush1.bf16.msra.mxu1 %v1818_v61  ;;  %v1914_v38 = vunpack.c.h.s8.bf16 %v570_v44  ;;  %v1929_v61 = vunpack.c.l.s8.bf16 %v585_v54 }
 0x6f8   : > { %5442 = vmatprep.subr.bf16.mxu0 %v1833_v0  ;;  %5770 = vmatprep.subr.bf16.mxu1 %v1835_v1  ;;  %v1931_v0 = vunpack.c.l.s8.bf16 %v587_v56  ;;  %v584_v1 = vld [vmem:[%s7088_s22 + $0xa60] sm:$0xff] }
 0x6f9   : > { %v1928_v7 = vunpack.c.l.s8.bf16 %v584_v1  ;;  %v1944_v16 = vunpack.c.h.s8.bf16 %v584_v1  ;;  %v634_v1 = vld [vmem:[%s7088_s22 + $0xbf0] sm:$0xff] }
 0x6fb   : > { %5443 = vmatpush1.bf16.msra.mxu0 %v1832_v8  ;;  %5771 = vmatpush1.bf16.msra.mxu1 %v1834_v24  ;;  %v1930_v8 = vunpack.c.l.s8.bf16 %v586_v2  ;;  %v1945_v24 = vunpack.c.h.s8.bf16 %v585_v54  ;;  %v635_v54 = vld [vmem:[%s7088_s22 + $0xbf8] sm:$0xff] }
 0x6fc   : > { %5444 = vmatprep.subr.bf16.mxu0 %v1849_v9  ;;  %5772 = vmatprep.subr.bf16.mxu1 %v1851_v25  ;;  %v1947_v9 = vunpack.c.h.s8.bf16 %v587_v56  ;;  %v601_v25 = vld [vmem:[%s7088_s22 + $0xae8] sm:$0xff] }
 0x6ff   : > { %5445 = vmatpush1.bf16.msra.mxu0 %v1848_v17  ;;  %5773 = vmatpush1.bf16.msra.mxu1 %v1850_v20  ;;  %v1946_v17 = vunpack.c.h.s8.bf16 %v586_v2  ;;  %v1961_v20 = vunpack.c.l.s8.bf16 %v601_v25 }
 0x700   : > { %5446 = vmatprep.subr.bf16.mxu0 %v1865_v32  ;;  %5774 = vmatprep.subr.bf16.mxu1 %v1867_v21  ;;  %v1963_v32 = vunpack.c.l.s8.bf16 %v603_v10  ;;  %v600_v21 = vld [vmem:[%s7088_s22 + $0xae0] sm:$0xff] }
 0x701   : > { %v1960_v29 = vunpack.c.l.s8.bf16 %v600_v21  ;;  %v1976_v40 = vunpack.c.h.s8.bf16 %v600_v21  ;;  %v650_v21 = vld [vmem:[%s7088_s22 + $0xc70] sm:$0xff] }
 0x703   : > { %5447 = vmatpush1.bf16.msra.mxu0 %v1864_v50  ;;  %5775 = vmatpush1.bf16.msra.mxu1 %v1866_v55  ;;  %v1962_v50 = vunpack.c.l.s8.bf16 %v602_v33  ;;  %v1977_v55 = vunpack.c.h.s8.bf16 %v601_v25  ;;  %v651_v25 = vld [vmem:[%s7088_s22 + $0xc78] sm:$0xff] }
 0x704   : > { %5448 = vmatprep.subr.bf16.mxu0 %v1881_v23  ;;  %5776 = vmatprep.subr.bf16.mxu1 %v1883_v35  ;;  %v1979_v23 = vunpack.c.h.s8.bf16 %v603_v10  ;;  %v617_v35 = vld [vmem:[%s7088_s22 + $0xb68] sm:$0xff] }
 0x707   : > { %5449 = vmatpush1.bf16.msra.mxu0 %v1880_v41  ;;  %5777 = vmatpush1.bf16.msra.mxu1 %v1882_v58  ;;  %v1978_v41 = vunpack.c.h.s8.bf16 %v602_v33  ;;  %v1993_v58 = vunpack.c.l.s8.bf16 %v617_v35 }
 0x708   : > { %5450 = vmatprep.subr.bf16.mxu0 %v1897_v27  ;;  %5778 = vmatprep.subr.bf16.mxu1 %v1899_v30  ;;  %v1995_v27 = vunpack.c.l.s8.bf16 %v619_v37  ;;  %v616_v30 = vld [vmem:[%s7088_s22 + $0xb60] sm:$0xff] }
 0x709   : > { %v1992_v44 = vunpack.c.l.s8.bf16 %v616_v30  ;;  %v2008_v56 = vunpack.c.h.s8.bf16 %v616_v30  ;;  %v666_v30 = vld [vmem:[%s7088_s22 + $0xcf0] sm:$0xff] }
 0x70b   : > { %5451 = vmatpush1.bf16.msra.mxu0 %v1896_v43  ;;  %5779 = vmatpush1.bf16.msra.mxu1 %v1898_v45  ;;  %v1994_v43 = vunpack.c.l.s8.bf16 %v618_v42  ;;  %v2009_v45 = vunpack.c.h.s8.bf16 %v617_v35  ;;  %v667_v35 = vld [vmem:[%s7088_s22 + $0xcf8] sm:$0xff] }
 0x70c   : > { %5452 = vmatprep.subr.bf16.mxu0 %v1913_v47  ;;  %5780 = vmatprep.subr.bf16.mxu1 %v1915_v53  ;;  %v2011_v47 = vunpack.c.h.s8.bf16 %v619_v37  ;;  %v633_v53 = vld [vmem:[%s7088_s22 + $0xbe8] sm:$0xff] }
 0x70f   : > { %5453 = vmatpush1.bf16.msra.mxu0 %v1912_v57  ;;  %5781 = vmatpush1.bf16.msra.mxu1 %v1914_v38  ;;  %v2010_v57 = vunpack.c.h.s8.bf16 %v618_v42  ;;  %v2025_v38 = vunpack.c.l.s8.bf16 %v633_v53 }
 0x710   : > { %5454 = vmatprep.subr.bf16.mxu0 %v1929_v61  ;;  %5782 = vmatprep.subr.bf16.mxu1 %v1931_v0  ;;  %v2027_v61 = vunpack.c.l.s8.bf16 %v635_v54  ;;  %v632_v0 = vld [vmem:[%s7088_s22 + $0xbe0] sm:$0xff] }
 0x711   : > { %v2024_v2 = vunpack.c.l.s8.bf16 %v632_v0  ;;  %v2040_v10 = vunpack.c.h.s8.bf16 %v632_v0 }
 0x713   : > { %5455 = vmatpush1.bf16.msra.mxu0 %v1928_v7  ;;  %5783 = vmatpush1.bf16.msra.mxu1 %v1930_v8  ;;  %v2026_v7 = vunpack.c.l.s8.bf16 %v634_v1  ;;  %v2041_v8 = vunpack.c.h.s8.bf16 %v633_v53 }
 0x714   : > { %5456 = vmatprep.subr.bf16.mxu0 %v1945_v24  ;;  %5784 = vmatprep.subr.bf16.mxu1 %v1947_v9  ;;  %v2043_v24 = vunpack.c.h.s8.bf16 %v635_v54  ;;  %v649_v9 = vld [vmem:[%s7088_s22 + $0xc68] sm:$0xff]  ;;  %v2106_v54 = vunpack.c.h.s8.bf16 %v666_v30 }
 0x717   : > { %5457 = vmatpush1.bf16.msra.mxu0 %v1944_v16  ;;  %5785 = vmatpush1.bf16.msra.mxu1 %v1946_v17  ;;  %v2042_v16 = vunpack.c.h.s8.bf16 %v634_v1  ;;  %v2057_v17 = vunpack.c.l.s8.bf16 %v649_v9  ;;  %v6015_v1 = vld [vmem:[%s7623_s13 + $0x8] sm:$0xff] }
 0x718   : > { %5458 = vmatprep.subr.bf16.mxu0 %v1961_v20  ;;  %5786 = vmatprep.subr.bf16.mxu1 %v1963_v32  ;;  %v2059_v20 = vunpack.c.l.s8.bf16 %v651_v25  ;;  %v648_v32 = vld [vmem:[%s7088_s22 + $0xc60] sm:$0xff] }
 0x719   : > { %v2056_v33 = vunpack.c.l.s8.bf16 %v648_v32  ;;  %v2072_v37 = vunpack.c.h.s8.bf16 %v648_v32 }
 0x71b   : > { %5459 = vmatpush1.bf16.msra.mxu0 %v1960_v29  ;;  %5787 = vmatpush1.bf16.msra.mxu1 %v1962_v50  ;;  %v2058_v29 = vunpack.c.l.s8.bf16 %v650_v21  ;;  %v2073_v50 = vunpack.c.h.s8.bf16 %v649_v9  ;;  %v699_v9 = vld [vmem:[%s7088_s22 + $0xdf8] sm:$0xff] }
 0x71c   : > { %5460 = vmatprep.subr.bf16.mxu0 %v1977_v55  ;;  %5788 = vmatprep.subr.bf16.mxu1 %v1979_v23  ;;  %v2075_v55 = vunpack.c.h.s8.bf16 %v651_v25  ;;  %v665_v23 = vld [vmem:[%s7088_s22 + $0xce8] sm:$0xff]  ;;  %v6053_v25 = vrot.slane %v6015_v1, %v7618_v62 }
 0x71f   : > { %5461 = vmatpush1.bf16.msra.mxu0 %v1976_v40  ;;  %5789 = vmatpush1.bf16.msra.mxu1 %v1978_v41  ;;  %v2074_v40 = vunpack.c.h.s8.bf16 %v650_v21  ;;  %v2089_v41 = vunpack.c.l.s8.bf16 %v665_v23 }
 0x720   : > { %5462 = vmatprep.subr.bf16.mxu0 %v1993_v58  ;;  %5790 = vmatprep.subr.bf16.mxu1 %v1995_v27  ;;  %v2091_v58 = vunpack.c.l.s8.bf16 %v667_v35  ;;  %v664_v27 = vld [vmem:[%s7088_s22 + $0xce0] sm:$0xff] }
 0x721   : > { %v2088_v42 = vunpack.c.l.s8.bf16 %v664_v27  ;;  %v2104_v53 = vunpack.c.h.s8.bf16 %v664_v27 }
 0x723   : > { %5463 = vmatpush1.bf16.msra.mxu0 %v1992_v44  ;;  %5791 = vmatpush1.bf16.msra.mxu1 %v1994_v43  ;;  %v2105_v44 = vunpack.c.h.s8.bf16 %v665_v23  ;;  %v2107_v43 = vunpack.c.h.s8.bf16 %v667_v35  ;;  %v698_v23 = vld [vmem:[%s7088_s22 + $0xdf0] sm:$0xff] }
 0x724   : > { %5464 = vmatprep.subr.bf16.mxu0 %v2009_v45  ;;  %5792 = vmatprep.subr.bf16.mxu1 %v2011_v47  ;;  %v681_v45 = vld [vmem:[%s7088_s22 + $0xd68] sm:$0xff]  ;;  %v683_v47 = vld [vmem:[%s7088_s22 + $0xd78] sm:$0xff] }
 0x727   : > { %5465 = vmatpush1.bf16.msra.mxu0 %v2008_v56  ;;  %5793 = vmatpush1.bf16.msra.mxu1 %v2010_v57  ;;  %v2123_v56 = vunpack.c.l.s8.bf16 %v683_v47  ;;  %v680_v57 = vld [vmem:[%s7088_s22 + $0xd60] sm:$0xff] }
 0x728   : > { %5466 = vmatprep.subr.bf16.mxu0 %v2025_v38  ;;  %5794 = vmatprep.subr.bf16.mxu1 %v2027_v61  ;;  %v682_v38 = vld [vmem:[%s7088_s22 + $0xd70] sm:$0xff]  ;;  %v2120_v61 = vunpack.c.l.s8.bf16 %v680_v57 }
 0x729   : > { %v2122_v0 = vunpack.c.l.s8.bf16 %v682_v38  ;;  %v2138_v32 = vunpack.c.h.s8.bf16 %v682_v38  ;;  %v713_v38 = vld [vmem:[%s7088_s22 + $0xe68] sm:$0xff] }
 0x72b   : > { %5467 = vmatpush1.bf16.msra.mxu0 %v2024_v2  ;;  %5795 = vmatpush1.bf16.msra.mxu1 %v2026_v7  ;;  %v2137_v2 = vunpack.c.h.s8.bf16 %v681_v45  ;;  %v2139_v7 = vunpack.c.h.s8.bf16 %v683_v47 }
 0x72c   : > { %5468 = vmatprep.subr.bf16.mxu0 %v2041_v8  ;;  %5796 = vmatprep.subr.bf16.mxu1 %v2043_v24  ;;  %v6116_v8 = vld [vmem:[%s7632_s14 + $0x8] sm:$0xff] }
 0x72d   : > { %v697_v24 = vld [vmem:[%s7088_s22 + $0xde8] sm:$0xff]  ;;  %v6154_v21 = vrot.slane %v6116_v8, %v7618_v62 }
 0x72f   : > { %5469 = vmatpush1.bf16.msra.mxu0 %v2040_v10  ;;  %5797 = vmatpush1.bf16.msra.mxu1 %v2042_v16  ;;  %v6061_v10 = vrot.slane %v6015_v1, %v7621_v63  ;;  %v6057_v16 = vrot.slane %v6015_v1, %v7627_v3 }
 0x730   : > { %5479 = vmatprep.subr.bf16.mxu0 %v2057_v17  ;;  %5807 = vmatprep.subr.bf16.mxu1 %v2059_v20  ;;  %v6065_v17 = vrot.slane %v6015_v1, %v7630_v6  ;;  %v2136_v20 = vunpack.c.h.s8.bf16 %v680_v57  ;;  %v2170_v1 = vunpack.c.h.s8.bf16 %v698_v23 }
 0x732   : > { %5471 = vmatmul.mubr.bf16.vlgmr.msra.gmra.mrb[12].mxu0 %v7262_v4  ;;  %5799 = vmatmul.mubr.bf16.vlgmr.msra.gmra.mrb[12].mxu1 %v7262_v4  ;;  %v2090_v4 = vunpack.c.l.s8.bf16 %v666_v30 }
 0x733   : > { %5480 = vmatpush1.bf16.msra.mxu0 %v2056_v33  ;;  %5808 = vmatpush1.bf16.msra.mxu1 %v2058_v29  ;;  %v6162_v33 = vrot.slane %v6116_v8, %v7621_v63  ;;  %v2153_v29 = vunpack.c.l.s8.bf16 %v697_v24 }
 0x734   : > { %5481 = vmatprep.subr.bf16.mxu0 %v2073_v50  ;;  %5809 = vmatprep.subr.bf16.mxu1 %v2075_v55  ;;  %v2155_v50 = vunpack.c.l.s8.bf16 %v699_v9  ;;  %v696_v55 = vld [vmem:[%s7088_s22 + $0xde0] sm:$0xff] }
 0x735   : > { %5511 = vmatprep.mubr.bf16.mxu0 %v7270_v12  ;;  %5839 = vmatprep.mubr.bf16.mxu1 %v7270_v12  ;;  %v2121_v12 = vunpack.c.l.s8.bf16 %v681_v45  ;;  %v2154_v45 = vunpack.c.l.s8.bf16 %v698_v23 }
 0x737   : > { %5482 = vmatpush1.bf16.msra.mxu0 %v2072_v37  ;;  %5810 = vmatpush1.bf16.msra.mxu1 %v2074_v40  ;;  %v6158_v40 = vrot.slane %v6116_v8, %v7627_v3 }
 0x738   : > { %5483 = vmatprep.subr.bf16.mxu0 %v2089_v41  ;;  %5811 = vmatprep.subr.bf16.mxu1 %v2091_v58  ;;  %v6166_v41 = vrot.slane %v6116_v8, %v7630_v6  ;;  %v712_v8 = vld [vmem:[%s7088_s22 + $0xe60] sm:$0xff] }
 0x73b   : > { %5484 = vmatpush1.bf16.msra.mxu0 %v2088_v42  ;;  %5812 = vmatpush1.bf16.msra.mxu1 %v2090_v4 }
 0x73c   : > { %5485 = vmatprep.subr.bf16.mxu0 %v2105_v44  ;;  %5813 = vmatprep.subr.bf16.mxu1 %v2107_v43  ;;  %v2152_v43 = vunpack.c.l.s8.bf16 %v696_v55 }
 0x73f   : > { %5486 = vmatpush1.bf16.msra.mxu0 %v2104_v53  ;;  %5814 = vmatpush1.bf16.msra.mxu1 %v2106_v54  ;;  %v2169_v54 = vunpack.c.h.s8.bf16 %v697_v24  ;;  %v2184_v24 = vunpack.c.l.s8.bf16 %v712_v8 }
 0x740   : > { %5487 = vmatprep.subr.bf16.mxu0 %v2121_v12  ;;  %5815 = vmatprep.subr.bf16.mxu1 %v2123_v56  ;;  %v2171_v12 = vunpack.c.h.s8.bf16 %v699_v9 }
 0x743   : > { %5488 = vmatpush1.bf16.msra.mxu0 %v2120_v61  ;;  %5816 = vmatpush1.bf16.msra.mxu1 %v2122_v0  ;;  %v715_v61 = vld [vmem:[%s7088_s22 + $0xe78] sm:$0xff]  ;;  %v2168_v0 = vunpack.c.h.s8.bf16 %v696_v55  ;;  %v730_v55 = vld [vmem:[%s7088_s22 + $0xef0] sm:$0xff] }
 0x744   : > { %5489 = vmatprep.subr.bf16.mxu0 %v2137_v2  ;;  %5817 = vmatprep.subr.bf16.mxu1 %v2139_v7  ;;  %v2185_v2 = vunpack.c.l.s8.bf16 %v713_v38  ;;  %v2187_v7 = vunpack.c.l.s8.bf16 %v715_v61 }
 0x745   : > { %v5021_v35 = vpop.f32.mrb[8].mxu0  ;;  %v5349_v37 = vpop.f32.mrb[8].mxu1 }
 0x746   : > { %v6106_v58 = vmul.f32 %v6053_v25, %v5021_v35  ;;  %v6108_v27 = vmul.f32 %v6061_v10, %v5349_v37  ;;  %v5023_v30 = vpop.f32.mrb[9].mxu0  ;;  %v5351_v42 = vpop.f32.mrb[9].mxu1  ;;  %v714_v25 = vld [vmem:[%s7088_s22 + $0xe70] sm:$0xff]  ;;  %v2201_v10 = vunpack.c.h.s8.bf16 %v713_v38  ;;  %v2218_v35 = vunpack.c.l.s8.bf16 %v730_v55 }
 0x747   : > { %v6107_v4 = vmul.f32 %v6057_v16, %v5023_v30  ;;  %v6109_v62 = vmul.f32 %v6065_v17, %v5351_v42  ;;  %v5025_v44 = vpop.f32.mrb[10].mxu0  ;;  %v5353_v63 = vpop.f32.mrb[10].mxu1  ;;  %5490 = vmatpush1.bf16.msra.mxu0 %v2136_v20  ;;  %5818 = vmatpush1.bf16.msra.mxu1 %v2138_v32  ;;  %v2186_v9 = vunpack.c.l.s8.bf16 %v714_v25  ;;  %v2203_v16 = vunpack.c.h.s8.bf16 %v715_v61  ;;  %v729_v17 = vld [vmem:[%s7088_s22 + $0xee8] sm:$0xff]  ;;  %v731_v20 = vld [vmem:[%s7088_s22 + $0xef8] sm:$0xff] }
 0x748   : > { %v8271_v47 = vadd.f32 %v6154_v21, %v6106_v58  ;;  %v8273_v53 = vadd.f32 %v6162_v33, %v6108_v27  ;;  %v5026_v3 = vpop.f32.mrb[11].mxu0  ;;  %v5354_v6 = vpop.f32.mrb[11].mxu1  ;;  %5491 = vmatprep.subr.bf16.mxu0 %v2153_v29  ;;  %5819 = vmatprep.subr.bf16.mxu1 %v2155_v50  ;;  %v2200_v32 = vunpack.c.h.s8.bf16 %v712_v8  ;;  %v2202_v21 = vunpack.c.h.s8.bf16 %v714_v25  ;;  %v728_v50 = vld [vmem:[%s7088_s22 + $0xee0] sm:$0xff]  ;;  %v747_v58 = vld [vmem:[%s7088_s22 + $0xf78] sm:$0xff]  ;;  %v746_v44 = vld [vmem:[%s7088_s22 + $0xf70] sm:$0xff] }
 0x749   : > { %v8275_v56 = vadd.f32 %v6158_v40, %v6107_v4  ;;  %v8277_v57 = vadd.f32 %v6166_v41, %v6109_v62  ;;  %v2217_v33 = vunpack.c.l.s8.bf16 %v729_v17  ;;  %v2219_v29 = vunpack.c.l.s8.bf16 %v731_v20  ;;  %v745_v41 = vld [vmem:[%s7088_s22 + $0xf68] sm:$0xff]  ;;  %v744_v62 = vld [vmem:[%s7088_s22 + $0xf60] sm:$0xff] }
 0x74a   : > { %v2216_v23 = vunpack.c.l.s8.bf16 %v728_v50  ;;  %v2233_v37 = vunpack.c.h.s8.bf16 %v729_v17  ;;  %v2235_v40 = vunpack.c.h.s8.bf16 %v731_v20  ;;  %v2232_v27 = vunpack.c.h.s8.bf16 %v728_v50  ;;  %v761_v6 = vld [vmem:[%s7088_s22 + $0xfe8] sm:$0xff] }
 0x74b   : > { %5492 = vmatpush1.bf16.msra.mxu0 %v2152_v43  ;;  %5820 = vmatpush1.bf16.msra.mxu1 %v2154_v45  ;;  %v2234_v30 = vunpack.c.h.s8.bf16 %v730_v55  ;;  %v2249_v42 = vunpack.c.l.s8.bf16 %v745_v41  ;;  %v2251_v4 = vunpack.c.l.s8.bf16 %v747_v58  ;;  %v2248_v63 = vunpack.c.l.s8.bf16 %v744_v62 }
 0x74c   : > { %5493 = vmatprep.subr.bf16.mxu0 %v2169_v54  ;;  %5821 = vmatprep.subr.bf16.mxu1 %v2171_v12  ;;  %v2250_v43 = vunpack.c.l.s8.bf16 %v746_v44  ;;  %v2265_v45 = vunpack.c.h.s8.bf16 %v745_v41  ;;  %v2267_v3 = vunpack.c.h.s8.bf16 %v747_v58  ;;  %v763_v54 = vld [vmem:[%s7088_s22 + $0xff8] sm:$0xff]  ;;  %v2264_v12 = vunpack.c.h.s8.bf16 %v744_v62 }
 0x74d   : > { %v2266_v38 = vunpack.c.h.s8.bf16 %v746_v44  ;;  %v2281_v61 = vunpack.c.l.s8.bf16 %v761_v6  ;;  %v2297_v25 = vunpack.c.h.s8.bf16 %v761_v6  ;;  %6764 = vtanh.f32 (!%p6419_p10), %v8271_v47 }
 0x74e   : > { %6766 = vtanh.f32 (!%p6419_p10), %v8275_v56 }
 0x74f   : > { %5494 = vmatpush1.bf16.msra.mxu0 %v2168_v0  ;;  %5822 = vmatpush1.bf16.msra.mxu1 %v2170_v1  ;;  %v2283_v0 = vunpack.c.l.s8.bf16 %v763_v54  ;;  %v760_v1 = vld [vmem:[%s7088_s22 + $0xfe0] sm:$0xff]  ;;  %6768 = vtanh.f32 (!%p6419_p10), %v8273_v53 }
 0x750   : > { %5495 = vmatprep.subr.bf16.mxu0 %v2185_v2  ;;  %5823 = vmatprep.subr.bf16.mxu1 %v2187_v7  ;;  %v762_v2 = vld [vmem:[%s7088_s22 + $0xff0] sm:$0xff]  ;;  %v2280_v7 = vunpack.c.l.s8.bf16 %v760_v1  ;;  %6770 = vtanh.f32 (!%p6419_p10), %v8277_v57 }
 0x751   : > { %v2282_v8 = vunpack.c.l.s8.bf16 %v762_v2  ;;  %v2298_v17 = vunpack.c.h.s8.bf16 %v762_v2  ;;  %v825_v2 = vld [vmem:[%s7088_s22 + $0x11e8] sm:$0xff] }
 0x753   : > { %5496 = vmatpush1.bf16.msra.mxu0 %v2184_v24  ;;  %5824 = vmatpush1.bf16.msra.mxu1 %v2186_v9  ;;  %v2299_v24 = vunpack.c.h.s8.bf16 %v763_v54  ;;  %v777_v9 = vld [vmem:[%s7088_s22 + $0x1068] sm:$0xff]  ;;  %v808_v54 = vld [vmem:[%s7088_s22 + $0x1160] sm:$0xff] }
 0x754   : > { %5497 = vmatprep.subr.bf16.mxu0 %v2201_v10  ;;  %5825 = vmatprep.subr.bf16.mxu1 %v2203_v16  ;;  %v779_v10 = vld [vmem:[%s7088_s22 + $0x1078] sm:$0xff]  ;;  %v2296_v16 = vunpack.c.h.s8.bf16 %v760_v1  ;;  %v2313_v20 = vunpack.c.l.s8.bf16 %v777_v9  ;;  %v2329_v55 = vunpack.c.h.s8.bf16 %v777_v9 }
 0x757   : > { %5498 = vmatpush1.bf16.msra.mxu0 %v2200_v32  ;;  %5826 = vmatpush1.bf16.msra.mxu1 %v2202_v21  ;;  %v2315_v32 = vunpack.c.l.s8.bf16 %v779_v10  ;;  %v776_v21 = vld [vmem:[%s7088_s22 + $0x1060] sm:$0xff] }
 0x758   : > { %5499 = vmatprep.subr.bf16.mxu0 %v2217_v33  ;;  %5827 = vmatprep.subr.bf16.mxu1 %v2219_v29  ;;  %v778_v33 = vld [vmem:[%s7088_s22 + $0x1070] sm:$0xff]  ;;  %v2312_v29 = vunpack.c.l.s8.bf16 %v776_v21 }
 0x759   : > { %v2314_v50 = vunpack.c.l.s8.bf16 %v778_v33  ;;  %v2330_v41 = vunpack.c.h.s8.bf16 %v778_v33  ;;  %v841_v33 = vld [vmem:[%s7088_s22 + $0x1268] sm:$0xff] }
 0x75b   : > { %5500 = vmatpush1.bf16.msra.mxu0 %v2216_v23  ;;  %5828 = vmatpush1.bf16.msra.mxu1 %v2218_v35  ;;  %v2331_v23 = vunpack.c.h.s8.bf16 %v779_v10  ;;  %v793_v35 = vld [vmem:[%s7088_s22 + $0x10e8] sm:$0xff]  ;;  %v824_v10 = vld [vmem:[%s7088_s22 + $0x11e0] sm:$0xff] }
 0x75c   : > { %5501 = vmatprep.subr.bf16.mxu0 %v2233_v37  ;;  %5829 = vmatprep.subr.bf16.mxu1 %v2235_v40  ;;  %v795_v37 = vld [vmem:[%s7088_s22 + $0x10f8] sm:$0xff]  ;;  %v2328_v40 = vunpack.c.h.s8.bf16 %v776_v21  ;;  %v2345_v58 = vunpack.c.l.s8.bf16 %v793_v35  ;;  %v2361_v62 = vunpack.c.h.s8.bf16 %v793_v35 }
 0x75d   : > { %v2363_v44 = vunpack.c.h.s8.bf16 %v795_v37 }
 0x75f   : > { %5502 = vmatpush1.bf16.msra.mxu0 %v2232_v27  ;;  %5830 = vmatpush1.bf16.msra.mxu1 %v2234_v30  ;;  %v2347_v27 = vunpack.c.l.s8.bf16 %v795_v37  ;;  %v792_v30 = vld [vmem:[%s7088_s22 + $0x10e0] sm:$0xff] }
 0x760   : > { %5503 = vmatprep.subr.bf16.mxu0 %v2249_v42  ;;  %5831 = vmatprep.subr.bf16.mxu1 %v2251_v4  ;;  %v794_v42 = vld [vmem:[%s7088_s22 + $0x10f0] sm:$0xff]  ;;  %v2344_v4 = vunpack.c.l.s8.bf16 %v792_v30  ;;  %v840_v37 = vld [vmem:[%s7088_s22 + $0x1260] sm:$0xff] }
 0x763   : > { %5504 = vmatpush1.bf16.msra.mxu0 %v2248_v63  ;;  %5832 = vmatpush1.bf16.msra.mxu1 %v2250_v43  ;;  %v809_v63 = vld [vmem:[%s7088_s22 + $0x1168] sm:$0xff]  ;;  %v811_v43 = vld [vmem:[%s7088_s22 + $0x1178] sm:$0xff] }
 0x764   : > { %5505 = vmatprep.subr.bf16.mxu0 %v2265_v45  ;;  %5833 = vmatprep.subr.bf16.mxu1 %v2267_v3  ;;  %v2360_v45 = vunpack.c.h.s8.bf16 %v792_v30  ;;  %v2362_v3 = vunpack.c.h.s8.bf16 %v794_v42  ;;  %v2379_v6 = vunpack.c.l.s8.bf16 %v811_v43  ;;  %v2395_v1 = vunpack.c.h.s8.bf16 %v811_v43  ;;  %v856_v43 = vld [vmem:[%s7088_s22 + $0x12e0] sm:$0xff] }
 0x767   : > { %5506 = vmatpush1.bf16.msra.mxu0 %v2264_v12  ;;  %5834 = vmatpush1.bf16.msra.mxu1 %v2266_v38  ;;  %v810_v12 = vld [vmem:[%s7088_s22 + $0x1170] sm:$0xff]  ;;  %v2376_v38 = vunpack.c.l.s8.bf16 %v808_v54 }
 0x768   : > { %5507 = vmatprep.subr.bf16.mxu0 %v2281_v61  ;;  %5835 = vmatprep.subr.bf16.mxu1 %v2283_v0  ;;  %v2378_v61 = vunpack.c.l.s8.bf16 %v810_v12  ;;  %v2393_v0 = vunpack.c.h.s8.bf16 %v809_v63 }
 0x76b   : > { %5508 = vmatpush1.bf16.msra.mxu0 %v2280_v7  ;;  %5836 = vmatpush1.bf16.msra.mxu1 %v2282_v8  ;;  %v827_v7 = vld [vmem:[%s7088_s22 + $0x11f8] sm:$0xff]  ;;  %v2392_v8 = vunpack.c.h.s8.bf16 %v808_v54 }
 0x76c   : > { %5509 = vmatprep.subr.bf16.mxu0 %v2297_v25  ;;  %5837 = vmatprep.subr.bf16.mxu1 %v2299_v24  ;;  %v2394_v25 = vunpack.c.h.s8.bf16 %v810_v12  ;;  %v2409_v24 = vunpack.c.l.s8.bf16 %v825_v2  ;;  %v2411_v9 = vunpack.c.l.s8.bf16 %v827_v7  ;;  %v2427_v21 = vunpack.c.h.s8.bf16 %v827_v7  ;;  %v873_v12 = vld [vmem:[%s7088_s22 + $0x1368] sm:$0xff]  ;;  %v872_v7 = vld [vmem:[%s7088_s22 + $0x1360] sm:$0xff] }
 0x76f   : > { %5510 = vmatpush1.bf16.msra.mxu0 %v2296_v16  ;;  %5838 = vmatpush1.bf16.msra.mxu1 %v2298_v17  ;;  %v826_v16 = vld [vmem:[%s7088_s22 + $0x11f0] sm:$0xff]  ;;  %v2408_v17 = vunpack.c.l.s8.bf16 %v824_v10 }
 0x770   : > { %5520 = vmatprep.subr.bf16.mxu0 %v2313_v20  ;;  %5848 = vmatprep.subr.bf16.mxu1 %v2315_v32  ;;  %v2410_v20 = vunpack.c.l.s8.bf16 %v826_v16  ;;  %v2425_v32 = vunpack.c.h.s8.bf16 %v825_v2 }
 0x772   : > { %5512 = vmatmul.mubr.bf16.vlgmr.msra.gmra.mrb[12].mxu0 %v7308_v52  ;;  %5840 = vmatmul.mubr.bf16.vlgmr.msra.gmra.mrb[12].mxu1 %v7308_v52  ;;  %v2346_v52 = vunpack.c.l.s8.bf16 %v794_v42  ;;  %v857_v42 = vld [vmem:[%s7088_s22 + $0x12e8] sm:$0xff] }
 0x773   : > { %5521 = vmatpush1.bf16.msra.mxu0 %v2312_v29  ;;  %5849 = vmatpush1.bf16.msra.mxu1 %v2314_v50  ;;  %v843_v29 = vld [vmem:[%s7088_s22 + $0x1278] sm:$0xff]  ;;  %v2424_v50 = vunpack.c.h.s8.bf16 %v824_v10 }
 0x774   : > { %5522 = vmatprep.subr.bf16.mxu0 %v2329_v55  ;;  %5850 = vmatprep.subr.bf16.mxu1 %v2331_v23  ;;  %v2426_v55 = vunpack.c.h.s8.bf16 %v826_v16  ;;  %v2441_v23 = vunpack.c.l.s8.bf16 %v841_v33  ;;  %v2443_v35 = vunpack.c.l.s8.bf16 %v843_v29  ;;  %v2459_v30 = vunpack.c.h.s8.bf16 %v843_v29  ;;  %v889_v16 = vld [vmem:[%s7088_s22 + $0x13e8] sm:$0xff]  ;;  %v888_v29 = vld [vmem:[%s7088_s22 + $0x13e0] sm:$0xff] }
 0x775   : > { %5552 = vmatprep.mubr.bf16.mxu0 %v7316_v60  ;;  %5880 = vmatprep.mubr.bf16.mxu1 %v7316_v60  ;;  %v2377_v60 = vunpack.c.l.s8.bf16 %v809_v63 }
 0x777   : > { %5523 = vmatpush1.bf16.msra.mxu0 %v2328_v40  ;;  %5851 = vmatpush1.bf16.msra.mxu1 %v2330_v41  ;;  %v842_v40 = vld [vmem:[%s7088_s22 + $0x1270] sm:$0xff]  ;;  %v2440_v41 = vunpack.c.l.s8.bf16 %v840_v37 }
 0x778   : > { %5524 = vmatprep.subr.bf16.mxu0 %v2345_v58  ;;  %5852 = vmatprep.subr.bf16.mxu1 %v2347_v27  ;;  %v2442_v58 = vunpack.c.l.s8.bf16 %v842_v40  ;;  %v2457_v27 = vunpack.c.h.s8.bf16 %v841_v33 }
 0x77b   : > { %5525 = vmatpush1.bf16.msra.mxu0 %v2344_v4  ;;  %5853 = vmatpush1.bf16.msra.mxu1 %v2346_v52  ;;  %v859_v4 = vld [vmem:[%s7088_s22 + $0x12f8] sm:$0xff]  ;;  %v2456_v52 = vunpack.c.h.s8.bf16 %v840_v37 }
 0x77c   : > { %5526 = vmatprep.subr.bf16.mxu0 %v2361_v62  ;;  %5854 = vmatprep.subr.bf16.mxu1 %v2363_v44  ;;  %v2458_v62 = vunpack.c.h.s8.bf16 %v842_v40  ;;  %v2473_v44 = vunpack.c.l.s8.bf16 %v857_v42  ;;  %v2475_v63 = vunpack.c.l.s8.bf16 %v859_v4  ;;  %v2491_v54 = vunpack.c.h.s8.bf16 %v859_v4  ;;  %v905_v40 = vld [vmem:[%s7088_s22 + $0x1468] sm:$0xff]  ;;  %v904_v4 = vld [vmem:[%s7088_s22 + $0x1460] sm:$0xff] }
 0x77f   : > { %5527 = vmatpush1.bf16.msra.mxu0 %v2360_v45  ;;  %5855 = vmatpush1.bf16.msra.mxu1 %v2362_v3  ;;  %v858_v45 = vld [vmem:[%s7088_s22 + $0x12f0] sm:$0xff]  ;;  %v2472_v3 = vunpack.c.l.s8.bf16 %v856_v43 }
 0x780   : > { %5528 = vmatprep.subr.bf16.mxu0 %v2377_v60  ;;  %5856 = vmatprep.subr.bf16.mxu1 %v2379_v6  ;;  %v2474_v60 = vunpack.c.l.s8.bf16 %v858_v45  ;;  %v2489_v6 = vunpack.c.h.s8.bf16 %v857_v42 }
 0x783   : > { %5529 = vmatpush1.bf16.msra.mxu0 %v2376_v38  ;;  %5857 = vmatpush1.bf16.msra.mxu1 %v2378_v61  ;;  %v875_v38 = vld [vmem:[%s7088_s22 + $0x1378] sm:$0xff]  ;;  %v2488_v61 = vunpack.c.h.s8.bf16 %v856_v43 }
 0x784   : > { %5530 = vmatprep.subr.bf16.mxu0 %v2393_v0  ;;  %5858 = vmatprep.subr.bf16.mxu1 %v2395_v1  ;;  %v2490_v0 = vunpack.c.h.s8.bf16 %v858_v45  ;;  %v2505_v1 = vunpack.c.l.s8.bf16 %v873_v12  ;;  %v2507_v2 = vunpack.c.l.s8.bf16 %v875_v38  ;;  %v2523_v10 = vunpack.c.h.s8.bf16 %v875_v38  ;;  %v921_v45 = vld [vmem:[%s7088_s22 + $0x14e8] sm:$0xff]  ;;  %v920_v38 = vld [vmem:[%s7088_s22 + $0x14e0] sm:$0xff] }
 0x787   : > { %5531 = vmatpush1.bf16.msra.mxu0 %v2392_v8  ;;  %5859 = vmatpush1.bf16.msra.mxu1 %v2394_v25  ;;  %v874_v8 = vld [vmem:[%s7088_s22 + $0x1370] sm:$0xff]  ;;  %v2504_v25 = vunpack.c.l.s8.bf16 %v872_v7 }
 0x788   : > { %5532 = vmatprep.subr.bf16.mxu0 %v2409_v24  ;;  %5860 = vmatprep.subr.bf16.mxu1 %v2411_v9  ;;  %v2506_v24 = vunpack.c.l.s8.bf16 %v874_v8  ;;  %v2521_v9 = vunpack.c.h.s8.bf16 %v873_v12 }
 0x78b   : > { %5533 = vmatpush1.bf16.msra.mxu0 %v2408_v17  ;;  %5861 = vmatpush1.bf16.msra.mxu1 %v2410_v20  ;;  %v891_v17 = vld [vmem:[%s7088_s22 + $0x13f8] sm:$0xff]  ;;  %v2520_v20 = vunpack.c.h.s8.bf16 %v872_v7  ;;  %v937_v7 = vld [vmem:[%s7088_s22 + $0x1568] sm:$0xff] }
 0x78c   : > { %5534 = vmatprep.subr.bf16.mxu0 %v2425_v32  ;;  %5862 = vmatprep.subr.bf16.mxu1 %v2427_v21  ;;  %v2522_v32 = vunpack.c.h.s8.bf16 %v874_v8  ;;  %v2537_v21 = vunpack.c.l.s8.bf16 %v889_v16  ;;  %v2539_v33 = vunpack.c.l.s8.bf16 %v891_v17  ;;  %v2555_v37 = vunpack.c.h.s8.bf16 %v891_v17  ;;  %v939_v8 = vld [vmem:[%s7088_s22 + $0x1578] sm:$0xff] }
 0x78f   : > { %5535 = vmatpush1.bf16.msra.mxu0 %v2424_v50  ;;  %5863 = vmatpush1.bf16.msra.mxu1 %v2426_v55  ;;  %v890_v50 = vld [vmem:[%s7088_s22 + $0x13f0] sm:$0xff]  ;;  %v2536_v55 = vunpack.c.l.s8.bf16 %v888_v29 }
 0x790   : > { %5536 = vmatprep.subr.bf16.mxu0 %v2441_v23  ;;  %5864 = vmatprep.subr.bf16.mxu1 %v2443_v35  ;;  %v2538_v23 = vunpack.c.l.s8.bf16 %v890_v50  ;;  %v2553_v35 = vunpack.c.h.s8.bf16 %v889_v16  ;;  %v938_v16 = vld [vmem:[%s7088_s22 + $0x1570] sm:$0xff] }
 0x793   : > { %5537 = vmatpush1.bf16.msra.mxu0 %v2440_v41  ;;  %5865 = vmatpush1.bf16.msra.mxu1 %v2442_v58  ;;  %v907_v41 = vld [vmem:[%s7088_s22 + $0x1478] sm:$0xff]  ;;  %v2552_v58 = vunpack.c.h.s8.bf16 %v888_v29 }
 0x794   : > { %5538 = vmatprep.subr.bf16.mxu0 %v2457_v27  ;;  %5866 = vmatprep.subr.bf16.mxu1 %v2459_v30  ;;  %v2554_v27 = vunpack.c.h.s8.bf16 %v890_v50  ;;  %v2569_v30 = vunpack.c.l.s8.bf16 %v905_v40  ;;  %v2571_v42 = vunpack.c.l.s8.bf16 %v907_v41  ;;  %v2587_v43 = vunpack.c.h.s8.bf16 %v907_v41  ;;  %v955_v29 = vld [vmem:[%s7088_s22 + $0x15f8] sm:$0xff] }
 0x797   : > { %5539 = vmatpush1.bf16.msra.mxu0 %v2456_v52  ;;  %5867 = vmatpush1.bf16.msra.mxu1 %v2458_v62  ;;  %v906_v52 = vld [vmem:[%s7088_s22 + $0x1470] sm:$0xff]  ;;  %v2568_v62 = vunpack.c.l.s8.bf16 %v904_v4 }
 0x798   : > { %5540 = vmatprep.subr.bf16.mxu0 %v2473_v44  ;;  %5868 = vmatprep.subr.bf16.mxu1 %v2475_v63  ;;  %v2570_v44 = vunpack.c.l.s8.bf16 %v906_v52  ;;  %v2585_v63 = vunpack.c.h.s8.bf16 %v905_v40  ;;  %v954_v40 = vld [vmem:[%s7088_s22 + $0x15f0] sm:$0xff] }
 0x79b   : > { %5541 = vmatpush1.bf16.msra.mxu0 %v2472_v3  ;;  %5869 = vmatpush1.bf16.msra.mxu1 %v2474_v60  ;;  %v923_v3 = vld [vmem:[%s7088_s22 + $0x14f8] sm:$0xff]  ;;  %v2584_v60 = vunpack.c.h.s8.bf16 %v904_v4 }
 0x79c   : > { %5542 = vmatprep.subr.bf16.mxu0 %v2489_v6  ;;  %5870 = vmatprep.subr.bf16.mxu1 %v2491_v54  ;;  %v2586_v6 = vunpack.c.h.s8.bf16 %v906_v52  ;;  %v2601_v54 = vunpack.c.l.s8.bf16 %v921_v45  ;;  %v2603_v12 = vunpack.c.l.s8.bf16 %v923_v3  ;;  %v971_v4 = vld [vmem:[%s7088_s22 + $0x1678] sm:$0xff] }
 0x79f   : > { %5543 = vmatpush1.bf16.msra.mxu0 %v2488_v61  ;;  %5871 = vmatpush1.bf16.msra.mxu1 %v2490_v0  ;;  %v922_v61 = vld [vmem:[%s7088_s22 + $0x14f0] sm:$0xff]  ;;  %v2600_v0 = vunpack.c.l.s8.bf16 %v920_v38 }
 0x7a0   : > { %5544 = vmatprep.subr.bf16.mxu0 %v2505_v1  ;;  %5872 = vmatprep.subr.bf16.mxu1 %v2507_v2  ;;  %v2617_v1 = vunpack.c.h.s8.bf16 %v921_v45  ;;  %v2619_v2 = vunpack.c.h.s8.bf16 %v923_v3  ;;  %v970_v45 = vld [vmem:[%s7088_s22 + $0x1670] sm:$0xff] }
 0x7a3   : > { %5545 = vmatpush1.bf16.msra.mxu0 %v2504_v25  ;;  %5873 = vmatpush1.bf16.msra.mxu1 %v2506_v24  ;;  %v2616_v25 = vunpack.c.h.s8.bf16 %v920_v38  ;;  %v2618_v24 = vunpack.c.h.s8.bf16 %v922_v61  ;;  %v987_v38 = vld [vmem:[%s7088_s22 + $0x16f8] sm:$0xff] }
 0x7a4   : > { %5546 = vmatprep.subr.bf16.mxu0 %v2521_v9  ;;  %5874 = vmatprep.subr.bf16.mxu1 %v2523_v10  ;;  %v2635_v9 = vunpack.c.l.s8.bf16 %v939_v8  ;;  %v936_v10 = vld [vmem:[%s7088_s22 + $0x1560] sm:$0xff] }
 0x7a5   : > { %v2632_v17 = vunpack.c.l.s8.bf16 %v936_v10  ;;  %v2648_v50 = vunpack.c.h.s8.bf16 %v936_v10  ;;  %v1003_v10 = vld [vmem:[%s7088_s22 + $0x1778] sm:$0xff] }
 0x7a7   : > { %5547 = vmatpush1.bf16.msra.mxu0 %v2520_v20  ;;  %5875 = vmatpush1.bf16.msra.mxu1 %v2522_v32  ;;  %v2634_v20 = vunpack.c.l.s8.bf16 %v938_v16  ;;  %v2649_v32 = vunpack.c.h.s8.bf16 %v937_v7 }
 0x7a8   : > { %5548 = vmatprep.subr.bf16.mxu0 %v2537_v21  ;;  %5876 = vmatprep.subr.bf16.mxu1 %v2539_v33  ;;  %v2651_v21 = vunpack.c.h.s8.bf16 %v939_v8  ;;  %v953_v33 = vld [vmem:[%s7088_s22 + $0x15e8] sm:$0xff] }
 0x7ab   : > { %5549 = vmatpush1.bf16.msra.mxu0 %v2536_v55  ;;  %5877 = vmatpush1.bf16.msra.mxu1 %v2538_v23  ;;  %v2650_v55 = vunpack.c.h.s8.bf16 %v938_v16  ;;  %v2665_v23 = vunpack.c.l.s8.bf16 %v953_v33 }
 0x7ac   : > { %5550 = vmatprep.subr.bf16.mxu0 %v2553_v35  ;;  %5878 = vmatprep.subr.bf16.mxu1 %v2555_v37  ;;  %v2667_v35 = vunpack.c.l.s8.bf16 %v955_v29  ;;  %v952_v37 = vld [vmem:[%s7088_s22 + $0x15e0] sm:$0xff] }
 0x7ad   : > { %v2664_v41 = vunpack.c.l.s8.bf16 %v952_v37  ;;  %v2680_v52 = vunpack.c.h.s8.bf16 %v952_v37  ;;  %v1019_v37 = vld [vmem:[%s7088_s22 + $0x17f8] sm:$0xff] }
 0x7af   : > { %5551 = vmatpush1.bf16.msra.mxu0 %v2552_v58  ;;  %5879 = vmatpush1.bf16.msra.mxu1 %v2554_v27  ;;  %v2666_v58 = vunpack.c.l.s8.bf16 %v954_v40  ;;  %v2681_v27 = vunpack.c.h.s8.bf16 %v953_v33  ;;  %v1002_v33 = vld [vmem:[%s7088_s22 + $0x1770] sm:$0xff] }
 0x7b0   : > { %5561 = vmatprep.subr.bf16.mxu0 %v2569_v30  ;;  %5889 = vmatprep.subr.bf16.mxu1 %v2571_v42  ;;  %v2683_v30 = vunpack.c.h.s8.bf16 %v955_v29  ;;  %v969_v42 = vld [vmem:[%s7088_s22 + $0x1668] sm:$0xff] }
 0x7b2   : > { %5553 = vmatmul.mubr.bf16.vlgmr.msra.gmra.mrb[12].mxu0 %v7354_v36  ;;  %5881 = vmatmul.mubr.bf16.vlgmr.msra.gmra.mrb[12].mxu1 %v7354_v36  ;;  %v2602_v36 = vunpack.c.l.s8.bf16 %v922_v61 }
 0x7b3   : > { %5562 = vmatpush1.bf16.msra.mxu0 %v2568_v62  ;;  %5890 = vmatpush1.bf16.msra.mxu1 %v2570_v44  ;;  %v2682_v62 = vunpack.c.h.s8.bf16 %v954_v40  ;;  %v2697_v44 = vunpack.c.l.s8.bf16 %v969_v42 }
 0x7b4   : > { %5563 = vmatprep.subr.bf16.mxu0 %v2585_v63  ;;  %5891 = vmatprep.subr.bf16.mxu1 %v2587_v43  ;;  %v2699_v63 = vunpack.c.l.s8.bf16 %v971_v4  ;;  %v968_v43 = vld [vmem:[%s7088_s22 + $0x1660] sm:$0xff] }
 0x7b5   : > { %5593 = vmatprep.mubr.bf16.mxu0 %v7362_v46  ;;  %5921 = vmatprep.mubr.bf16.mxu1 %v7362_v46  ;;  %v2633_v46 = vunpack.c.l.s8.bf16 %v937_v7  ;;  %v2696_v3 = vunpack.c.l.s8.bf16 %v968_v43  ;;  %v2712_v61 = vunpack.c.h.s8.bf16 %v968_v43  ;;  %v986_v7 = vld [vmem:[%s7088_s22 + $0x16f0] sm:$0xff]  ;;  %v1035_v43 = vld [vmem:[%s7088_s22 + $0x1878] sm:$0xff] }
 0x7b7   : > { %5564 = vmatpush1.bf16.msra.mxu0 %v2584_v60  ;;  %5892 = vmatpush1.bf16.msra.mxu1 %v2586_v6  ;;  %v2698_v60 = vunpack.c.l.s8.bf16 %v970_v45  ;;  %v2713_v6 = vunpack.c.h.s8.bf16 %v969_v42  ;;  %v1018_v42 = vld [vmem:[%s7088_s22 + $0x17f0] sm:$0xff] }
 0x7b8   : > { %5565 = vmatprep.subr.bf16.mxu0 %v2601_v54  ;;  %5893 = vmatprep.subr.bf16.mxu1 %v2603_v12  ;;  %v2715_v54 = vunpack.c.h.s8.bf16 %v971_v4  ;;  %v985_v12 = vld [vmem:[%s7088_s22 + $0x16e8] sm:$0xff] }
 0x7bb   : > { %5566 = vmatpush1.bf16.msra.mxu0 %v2600_v0  ;;  %5894 = vmatpush1.bf16.msra.mxu1 %v2602_v36  ;;  %v2714_v0 = vunpack.c.h.s8.bf16 %v970_v45  ;;  %v2729_v36 = vunpack.c.l.s8.bf16 %v985_v12 }
 0x7bc   : > { %5567 = vmatprep.subr.bf16.mxu0 %v2617_v1  ;;  %5895 = vmatprep.subr.bf16.mxu1 %v2619_v2  ;;  %v2731_v1 = vunpack.c.l.s8.bf16 %v987_v38  ;;  %v984_v2 = vld [vmem:[%s7088_s22 + $0x16e0] sm:$0xff] }
 0x7bd   : > { %v2728_v8 = vunpack.c.l.s8.bf16 %v984_v2  ;;  %v2744_v16 = vunpack.c.h.s8.bf16 %v984_v2  ;;  %v1051_v2 = vld [vmem:[%s7088_s22 + $0x18f8] sm:$0xff] }
 0x7bf   : > { %5568 = vmatpush1.bf16.msra.mxu0 %v2616_v25  ;;  %5896 = vmatpush1.bf16.msra.mxu1 %v2618_v24  ;;  %v2730_v25 = vunpack.c.l.s8.bf16 %v986_v7  ;;  %v2745_v24 = vunpack.c.h.s8.bf16 %v985_v12  ;;  %v1034_v12 = vld [vmem:[%s7088_s22 + $0x1870] sm:$0xff] }
 0x7c0   : > { %5569 = vmatprep.subr.bf16.mxu0 %v2633_v46  ;;  %5897 = vmatprep.subr.bf16.mxu1 %v2635_v9  ;;  %v2747_v46 = vunpack.c.h.s8.bf16 %v987_v38  ;;  %v1001_v9 = vld [vmem:[%s7088_s22 + $0x1768] sm:$0xff] }
 0x7c3   : > { %5570 = vmatpush1.bf16.msra.mxu0 %v2632_v17  ;;  %5898 = vmatpush1.bf16.msra.mxu1 %v2634_v20  ;;  %v2746_v17 = vunpack.c.h.s8.bf16 %v986_v7  ;;  %v2761_v20 = vunpack.c.l.s8.bf16 %v1001_v9 }
 0x7c4   : > { %5571 = vmatprep.subr.bf16.mxu0 %v2649_v32  ;;  %5899 = vmatprep.subr.bf16.mxu1 %v2651_v21  ;;  %v2763_v32 = vunpack.c.l.s8.bf16 %v1003_v10  ;;  %v1000_v21 = vld [vmem:[%s7088_s22 + $0x1760] sm:$0xff] }
 0x7c5   : > { %v2760_v29 = vunpack.c.l.s8.bf16 %v1000_v21  ;;  %v2776_v40 = vunpack.c.h.s8.bf16 %v1000_v21 }
 0x7c7   : > { %5572 = vmatpush1.bf16.msra.mxu0 %v2648_v50  ;;  %5900 = vmatpush1.bf16.msra.mxu1 %v2650_v55  ;;  %v2762_v50 = vunpack.c.l.s8.bf16 %v1002_v33  ;;  %v2777_v55 = vunpack.c.h.s8.bf16 %v1001_v9  ;;  %v1050_v9 = vld [vmem:[%s7088_s22 + $0x18f0] sm:$0xff] }
 0x7c8   : > { %5573 = vmatprep.subr.bf16.mxu0 %v2665_v23  ;;  %5901 = vmatprep.subr.bf16.mxu1 %v2667_v35  ;;  %v2779_v23 = vunpack.c.h.s8.bf16 %v1003_v10  ;;  %v1017_v35 = vld [vmem:[%s7088_s22 + $0x17e8] sm:$0xff] }
 0x7cb   : > { %5574 = vmatpush1.bf16.msra.mxu0 %v2664_v41  ;;  %5902 = vmatpush1.bf16.msra.mxu1 %v2666_v58  ;;  %v2778_v41 = vunpack.c.h.s8.bf16 %v1002_v33  ;;  %v2793_v58 = vunpack.c.l.s8.bf16 %v1017_v35  ;;  %v2874_v33 = vunpack.c.h.s8.bf16 %v1050_v9 }
 0x7cc   : > { %5575 = vmatprep.subr.bf16.mxu0 %v2681_v27  ;;  %5903 = vmatprep.subr.bf16.mxu1 %v2683_v30  ;;  %v2795_v27 = vunpack.c.l.s8.bf16 %v1019_v37  ;;  %v1016_v30 = vld [vmem:[%s7088_s22 + $0x17e0] sm:$0xff] }
 0x7cd   : > { %v2792_v4 = vunpack.c.l.s8.bf16 %v1016_v30  ;;  %v2808_v45 = vunpack.c.h.s8.bf16 %v1016_v30 }
 0x7cf   : > { %5576 = vmatpush1.bf16.msra.mxu0 %v2680_v52  ;;  %5904 = vmatpush1.bf16.msra.mxu1 %v2682_v62  ;;  %v2794_v52 = vunpack.c.l.s8.bf16 %v1018_v42  ;;  %v2809_v62 = vunpack.c.h.s8.bf16 %v1017_v35 }
 0x7d0   : > { %5577 = vmatprep.subr.bf16.mxu0 %v2697_v44  ;;  %5905 = vmatprep.subr.bf16.mxu1 %v2699_v63  ;;  %v2811_v44 = vunpack.c.h.s8.bf16 %v1019_v37  ;;  %v1033_v63 = vld [vmem:[%s7088_s22 + $0x1868] sm:$0xff] }
 0x7d3   : > { %5578 = vmatpush1.bf16.msra.mxu0 %v2696_v3  ;;  %5906 = vmatpush1.bf16.msra.mxu1 %v2698_v60  ;;  %v2810_v3 = vunpack.c.h.s8.bf16 %v1018_v42  ;;  %v2825_v60 = vunpack.c.l.s8.bf16 %v1033_v63 }
 0x7d4   : > { %5579 = vmatprep.subr.bf16.mxu0 %v2713_v6  ;;  %5907 = vmatprep.subr.bf16.mxu1 %v2715_v54  ;;  %v2827_v6 = vunpack.c.l.s8.bf16 %v1035_v43  ;;  %v1032_v54 = vld [vmem:[%s7088_s22 + $0x1860] sm:$0xff] }
 0x7d5   : > { %v2824_v38 = vunpack.c.l.s8.bf16 %v1032_v54  ;;  %v2840_v7 = vunpack.c.h.s8.bf16 %v1032_v54 }
 0x7d7   : > { %5580 = vmatpush1.bf16.msra.mxu0 %v2712_v61  ;;  %5908 = vmatpush1.bf16.msra.mxu1 %v2714_v0  ;;  %v2826_v61 = vunpack.c.l.s8.bf16 %v1034_v12  ;;  %v2841_v0 = vunpack.c.h.s8.bf16 %v1033_v63 }
 0x7d8   : > { %5581 = vmatprep.subr.bf16.mxu0 %v2729_v36  ;;  %5909 = vmatprep.subr.bf16.mxu1 %v2731_v1  ;;  %v2843_v36 = vunpack.c.h.s8.bf16 %v1035_v43  ;;  %v1049_v1 = vld [vmem:[%s7088_s22 + $0x18e8] sm:$0xff] }
 0x7db   : > { %5582 = vmatpush1.bf16.msra.mxu0 %v2728_v8  ;;  %5910 = vmatpush1.bf16.msra.mxu1 %v2730_v25  ;;  %v2842_v8 = vunpack.c.h.s8.bf16 %v1034_v12  ;;  %v2857_v25 = vunpack.c.l.s8.bf16 %v1049_v1 }
 0x7dc   : > { %5583 = vmatprep.subr.bf16.mxu0 %v2745_v24  ;;  %5911 = vmatprep.subr.bf16.mxu1 %v2747_v46  ;;  %v2859_v24 = vunpack.c.l.s8.bf16 %v1051_v2  ;;  %v1048_v46 = vld [vmem:[%s7088_s22 + $0x18e0] sm:$0xff] }
 0x7dd   : > { %v2856_v10 = vunpack.c.l.s8.bf16 %v1048_v46  ;;  %v2872_v21 = vunpack.c.h.s8.bf16 %v1048_v46 }
 0x7df   : > { %5584 = vmatpush1.bf16.msra.mxu0 %v2744_v16  ;;  %5912 = vmatpush1.bf16.msra.mxu1 %v2746_v17  ;;  %v2873_v16 = vunpack.c.h.s8.bf16 %v1049_v1  ;;  %v2875_v17 = vunpack.c.h.s8.bf16 %v1051_v2 }
 0x7e0   : > { %5585 = vmatprep.subr.bf16.mxu0 %v2761_v20  ;;  %5913 = vmatprep.subr.bf16.mxu1 %v2763_v32  ;;  %v1065_v20 = vld [vmem:[%s7088_s22 + $0x1968] sm:$0xff]  ;;  %v1067_v32 = vld [vmem:[%s7088_s22 + $0x1978] sm:$0xff] }
 0x7e1   : > { %v2905_v37 = vunpack.c.h.s8.bf16 %v1065_v20 }
 0x7e3   : > { %5586 = vmatpush1.bf16.msra.mxu0 %v2760_v29  ;;  %5914 = vmatpush1.bf16.msra.mxu1 %v2762_v50  ;;  %v2891_v29 = vunpack.c.l.s8.bf16 %v1067_v32  ;;  %v1064_v50 = vld [vmem:[%s7088_s22 + $0x1960] sm:$0xff] }
 0x7e4   : > { %5587 = vmatprep.subr.bf16.mxu0 %v2777_v55  ;;  %5915 = vmatprep.subr.bf16.mxu1 %v2779_v23  ;;  %v1066_v55 = vld [vmem:[%s7088_s22 + $0x1970] sm:$0xff]  ;;  %v2888_v23 = vunpack.c.l.s8.bf16 %v1064_v50 }
 0x7e5   : > { %v2890_v35 = vunpack.c.l.s8.bf16 %v1066_v55  ;;  %v2906_v30 = vunpack.c.h.s8.bf16 %v1066_v55 }
 0x7e7   : > { %5588 = vmatpush1.bf16.msra.mxu0 %v2776_v40  ;;  %5916 = vmatpush1.bf16.msra.mxu1 %v2778_v41  ;;  %v2907_v40 = vunpack.c.h.s8.bf16 %v1067_v32  ;;  %v1081_v41 = vld [vmem:[%s7088_s22 + $0x19e8] sm:$0xff] }
 0x7e8   : > { %5589 = vmatprep.subr.bf16.mxu0 %v2793_v58  ;;  %5917 = vmatprep.subr.bf16.mxu1 %v2795_v27  ;;  %v1083_v58 = vld [vmem:[%s7088_s22 + $0x19f8] sm:$0xff]  ;;  %v2904_v27 = vunpack.c.h.s8.bf16 %v1064_v50  ;;  %v2921_v42 = vunpack.c.l.s8.bf16 %v1081_v41  ;;  %v2937_v43 = vunpack.c.h.s8.bf16 %v1081_v41 }
 0x7eb   : > { %5590 = vmatpush1.bf16.msra.mxu0 %v2792_v4  ;;  %5918 = vmatpush1.bf16.msra.mxu1 %v2794_v52  ;;  %v2923_v4 = vunpack.c.l.s8.bf16 %v1083_v58  ;;  %v1080_v52 = vld [vmem:[%s7088_s22 + $0x19e0] sm:$0xff] }
 0x7ec   : > { %5591 = vmatprep.subr.bf16.mxu0 %v2809_v62  ;;  %5919 = vmatprep.subr.bf16.mxu1 %v2811_v44  ;;  %v1082_v62 = vld [vmem:[%s7088_s22 + $0x19f0] sm:$0xff]  ;;  %v2920_v44 = vunpack.c.l.s8.bf16 %v1080_v52 }
 0x7ed   : > { %v2922_v63 = vunpack.c.l.s8.bf16 %v1082_v62  ;;  %v2938_v54 = vunpack.c.h.s8.bf16 %v1082_v62 }
 0x7ef   : > { %5592 = vmatpush1.bf16.msra.mxu0 %v2808_v45  ;;  %5920 = vmatpush1.bf16.msra.mxu1 %v2810_v3  ;;  %v2939_v45 = vunpack.c.h.s8.bf16 %v1083_v58  ;;  %v1097_v3 = vld [vmem:[%s7088_s22 + $0x1a68] sm:$0xff] }
 0x7f0   : > { %5602 = vmatprep.subr.bf16.mxu0 %v2825_v60  ;;  %5930 = vmatprep.subr.bf16.mxu1 %v2827_v6  ;;  %v1099_v60 = vld [vmem:[%s7088_s22 + $0x1a78] sm:$0xff]  ;;  %v2936_v6 = vunpack.c.h.s8.bf16 %v1080_v52  ;;  %v2953_v12 = vunpack.c.l.s8.bf16 %v1097_v3  ;;  %v2969_v2 = vunpack.c.h.s8.bf16 %v1097_v3 }
 0x7f2   : > { %5594 = vmatmul.mubr.bf16.vlgmr.msra.gmra.mrb[12].mxu0 %v7400_v28  ;;  %5922 = vmatmul.mubr.bf16.vlgmr.msra.gmra.mrb[12].mxu1 %v7400_v28  ;;  %v2858_v28 = vunpack.c.l.s8.bf16 %v1050_v9 }
 0x7f3   : > { %5603 = vmatpush1.bf16.msra.mxu0 %v2824_v38  ;;  %5931 = vmatpush1.bf16.msra.mxu1 %v2826_v61  ;;  %v2955_v38 = vunpack.c.l.s8.bf16 %v1099_v60  ;;  %v1096_v61 = vld [vmem:[%s7088_s22 + $0x1a60] sm:$0xff] }
 0x7f4   : > { %5604 = vmatprep.subr.bf16.mxu0 %v2841_v0  ;;  %5932 = vmatprep.subr.bf16.mxu1 %v2843_v36  ;;  %v1098_v0 = vld [vmem:[%s7088_s22 + $0x1a70] sm:$0xff]  ;;  %v2952_v36 = vunpack.c.l.s8.bf16 %v1096_v61 }
 0x7f5   : > { %5634 = vmatprep.mubr.bf16.mxu0 %v7408_v39  ;;  %5962 = vmatprep.mubr.bf16.mxu1 %v7408_v39  ;;  %v2889_v39 = vunpack.c.l.s8.bf16 %v1065_v20  ;;  %v2954_v1 = vunpack.c.l.s8.bf16 %v1098_v0  ;;  %v2970_v46 = vunpack.c.h.s8.bf16 %v1098_v0 }
 0x7f7   : > { %5605 = vmatpush1.bf16.msra.mxu0 %v2840_v7  ;;  %5933 = vmatpush1.bf16.msra.mxu1 %v2842_v8  ;;  %v2971_v7 = vunpack.c.h.s8.bf16 %v1099_v60  ;;  %v1113_v8 = vld [vmem:[%s7088_s22 + $0x1ae8] sm:$0xff] }
 0x7f8   : > { %5606 = vmatprep.subr.bf16.mxu0 %v2857_v25  ;;  %5934 = vmatprep.subr.bf16.mxu1 %v2859_v24  ;;  %v1115_v25 = vld [vmem:[%s7088_s22 + $0x1af8] sm:$0xff]  ;;  %v2968_v24 = vunpack.c.h.s8.bf16 %v1096_v61  ;;  %v2985_v9 = vunpack.c.l.s8.bf16 %v1113_v8  ;;  %v3001_v32 = vunpack.c.h.s8.bf16 %v1113_v8 }
 0x7fb   : > { %5607 = vmatpush1.bf16.msra.mxu0 %v2856_v10  ;;  %5935 = vmatpush1.bf16.msra.mxu1 %v2858_v28  ;;  %v2987_v10 = vunpack.c.l.s8.bf16 %v1115_v25  ;;  %v1112_v28 = vld [vmem:[%s7088_s22 + $0x1ae0] sm:$0xff] }
 0x7fc   : > { %5608 = vmatprep.subr.bf16.mxu0 %v2873_v16  ;;  %5936 = vmatprep.subr.bf16.mxu1 %v2875_v17  ;;  %v1114_v16 = vld [vmem:[%s7088_s22 + $0x1af0] sm:$0xff]  ;;  %v2984_v17 = vunpack.c.l.s8.bf16 %v1112_v28 }
 0x7fd   : > { %v2986_v20 = vunpack.c.l.s8.bf16 %v1114_v16  ;;  %v3002_v50 = vunpack.c.h.s8.bf16 %v1114_v16 }
 0x7ff   : > { %5609 = vmatpush1.bf16.msra.mxu0 %v2872_v21  ;;  %5937 = vmatpush1.bf16.msra.mxu1 %v2874_v33  ;;  %v3003_v21 = vunpack.c.h.s8.bf16 %v1115_v25  ;;  %v1129_v33 = vld [vmem:[%s7088_s22 + $0x1b68] sm:$0xff] }
 0x800   : > { %5610 = vmatprep.subr.bf16.mxu0 %v2889_v39  ;;  %5938 = vmatprep.subr.bf16.mxu1 %v2891_v29  ;;  %v1131_v39 = vld [vmem:[%s7088_s22 + $0x1b78] sm:$0xff]  ;;  %v3000_v29 = vunpack.c.h.s8.bf16 %v1112_v28  ;;  %v3017_v55 = vunpack.c.l.s8.bf16 %v1129_v33  ;;  %v3033_v58 = vunpack.c.h.s8.bf16 %v1129_v33 }
 0x803   : > { %5611 = vmatpush1.bf16.msra.mxu0 %v2888_v23  ;;  %5939 = vmatpush1.bf16.msra.mxu1 %v2890_v35  ;;  %v3019_v23 = vunpack.c.l.s8.bf16 %v1131_v39  ;;  %v1128_v35 = vld [vmem:[%s7088_s22 + $0x1b60] sm:$0xff] }
 0x804   : > { %5612 = vmatprep.subr.bf16.mxu0 %v2905_v37  ;;  %5940 = vmatprep.subr.bf16.mxu1 %v2907_v40  ;;  %v1130_v37 = vld [vmem:[%s7088_s22 + $0x1b70] sm:$0xff]  ;;  %v3016_v40 = vunpack.c.l.s8.bf16 %v1128_v35 }
 0x805   : > { %v3018_v41 = vunpack.c.l.s8.bf16 %v1130_v37  ;;  %v3034_v52 = vunpack.c.h.s8.bf16 %v1130_v37  ;;  %v1192_v37 = vld [vmem:[%s7088_s22 + $0x1d60] sm:$0xff] }
 0x807   : > { %5613 = vmatpush1.bf16.msra.mxu0 %v2904_v27  ;;  %5941 = vmatpush1.bf16.msra.mxu1 %v2906_v30  ;;  %v3035_v27 = vunpack.c.h.s8.bf16 %v1131_v39  ;;  %v1145_v30 = vld [vmem:[%s7088_s22 + $0x1be8] sm:$0xff] }
 0x808   : > { %5614 = vmatprep.subr.bf16.mxu0 %v2921_v42  ;;  %5942 = vmatprep.subr.bf16.mxu1 %v2923_v4  ;;  %v1147_v42 = vld [vmem:[%s7088_s22 + $0x1bf8] sm:$0xff]  ;;  %v3032_v4 = vunpack.c.h.s8.bf16 %v1128_v35  ;;  %v3049_v62 = vunpack.c.l.s8.bf16 %v1145_v30  ;;  %v3065_v60 = vunpack.c.h.s8.bf16 %v1145_v30 }
 0x80b   : > { %5615 = vmatpush1.bf16.msra.mxu0 %v2920_v44  ;;  %5943 = vmatpush1.bf16.msra.mxu1 %v2922_v63  ;;  %v3051_v44 = vunpack.c.l.s8.bf16 %v1147_v42  ;;  %v1144_v63 = vld [vmem:[%s7088_s22 + $0x1be0] sm:$0xff] }
 0x80c   : > { %5616 = vmatprep.subr.bf16.mxu0 %v2937_v43  ;;  %5944 = vmatprep.subr.bf16.mxu1 %v2939_v45  ;;  %v1146_v43 = vld [vmem:[%s7088_s22 + $0x1bf0] sm:$0xff]  ;;  %v3048_v45 = vunpack.c.l.s8.bf16 %v1144_v63 }
 0x80d   : > { %v3050_v3 = vunpack.c.l.s8.bf16 %v1146_v43  ;;  %v3066_v61 = vunpack.c.h.s8.bf16 %v1146_v43  ;;  %v1208_v43 = vld [vmem:[%s7088_s22 + $0x1de0] sm:$0xff] }
 0x80f   : > { %5617 = vmatpush1.bf16.msra.mxu0 %v2936_v6  ;;  %5945 = vmatpush1.bf16.msra.mxu1 %v2938_v54  ;;  %v3067_v6 = vunpack.c.h.s8.bf16 %v1147_v42  ;;  %v1161_v54 = vld [vmem:[%s7088_s22 + $0x1c68] sm:$0xff] }
 0x810   : > { %5618 = vmatprep.subr.bf16.mxu0 %v2953_v12  ;;  %5946 = vmatprep.subr.bf16.mxu1 %v2955_v38  ;;  %v1163_v12 = vld [vmem:[%s7088_s22 + $0x1c78] sm:$0xff]  ;;  %v3064_v38 = vunpack.c.h.s8.bf16 %v1144_v63  ;;  %v3081_v0 = vunpack.c.l.s8.bf16 %v1161_v54  ;;  %v3097_v25 = vunpack.c.h.s8.bf16 %v1161_v54  ;;  %v1209_v42 = vld [vmem:[%s7088_s22 + $0x1de8] sm:$0xff] }
 0x813   : > { %5619 = vmatpush1.bf16.msra.mxu0 %v2952_v36  ;;  %5947 = vmatpush1.bf16.msra.mxu1 %v2954_v1  ;;  %v3083_v36 = vunpack.c.l.s8.bf16 %v1163_v12  ;;  %v1160_v1 = vld [vmem:[%s7088_s22 + $0x1c60] sm:$0xff] }
 0x814   : > { %5620 = vmatprep.subr.bf16.mxu0 %v2969_v2  ;;  %5948 = vmatprep.subr.bf16.mxu1 %v2971_v7  ;;  %v1162_v2 = vld [vmem:[%s7088_s22 + $0x1c70] sm:$0xff]  ;;  %v3080_v7 = vunpack.c.l.s8.bf16 %v1160_v1 }
 0x815   : > { %v3082_v8 = vunpack.c.l.s8.bf16 %v1162_v2  ;;  %v3098_v28 = vunpack.c.h.s8.bf16 %v1162_v2  ;;  %v1224_v2 = vld [vmem:[%s7088_s22 + $0x1e60] sm:$0xff] }
 0x817   : > { %5621 = vmatpush1.bf16.msra.mxu0 %v2968_v24  ;;  %5949 = vmatpush1.bf16.msra.mxu1 %v2970_v46  ;;  %v3099_v24 = vunpack.c.h.s8.bf16 %v1163_v12  ;;  %v1177_v46 = vld [vmem:[%s7088_s22 + $0x1ce8] sm:$0xff] }
 0x818   : > { %5622 = vmatprep.subr.bf16.mxu0 %v2985_v9  ;;  %5950 = vmatprep.subr.bf16.mxu1 %v2987_v10  ;;  %v1179_v9 = vld [vmem:[%s7088_s22 + $0x1cf8] sm:$0xff]  ;;  %v3096_v10 = vunpack.c.h.s8.bf16 %v1160_v1  ;;  %v3113_v16 = vunpack.c.l.s8.bf16 %v1177_v46  ;;  %v3129_v33 = vunpack.c.h.s8.bf16 %v1177_v46  ;;  %v1225_v12 = vld [vmem:[%s7088_s22 + $0x1e68] sm:$0xff] }
 0x819   : > { %v3131_v39 = vunpack.c.h.s8.bf16 %v1179_v9 }
 0x81b   : > { %5623 = vmatpush1.bf16.msra.mxu0 %v2984_v17  ;;  %5951 = vmatpush1.bf16.msra.mxu1 %v2986_v20  ;;  %v3115_v17 = vunpack.c.l.s8.bf16 %v1179_v9  ;;  %v1176_v20 = vld [vmem:[%s7088_s22 + $0x1ce0] sm:$0xff]  ;;  %v1241_v9 = vld [vmem:[%s7088_s22 + $0x1ee8] sm:$0xff] }
 0x81c   : > { %5624 = vmatprep.subr.bf16.mxu0 %v3001_v32  ;;  %5952 = vmatprep.subr.bf16.mxu1 %v3003_v21  ;;  %v1178_v32 = vld [vmem:[%s7088_s22 + $0x1cf0] sm:$0xff]  ;;  %v3112_v21 = vunpack.c.l.s8.bf16 %v1176_v20 }
 0x81f   : > { %5625 = vmatpush1.bf16.msra.mxu0 %v3000_v29  ;;  %5953 = vmatpush1.bf16.msra.mxu1 %v3002_v50  ;;  %v1193_v29 = vld [vmem:[%s7088_s22 + $0x1d68] sm:$0xff]  ;;  %v1195_v50 = vld [vmem:[%s7088_s22 + $0x1d78] sm:$0xff] }
 0x820   : > { %5626 = vmatprep.subr.bf16.mxu0 %v3017_v55  ;;  %5954 = vmatprep.subr.bf16.mxu1 %v3019_v23  ;;  %v3128_v55 = vunpack.c.h.s8.bf16 %v1176_v20  ;;  %v3130_v23 = vunpack.c.h.s8.bf16 %v1178_v32  ;;  %v3147_v35 = vunpack.c.l.s8.bf16 %v1195_v50  ;;  %v3163_v30 = vunpack.c.h.s8.bf16 %v1195_v50  ;;  %v1257_v50 = vld [vmem:[%s7088_s22 + $0x1f68] sm:$0xff] }
 0x823   : > { %5627 = vmatpush1.bf16.msra.mxu0 %v3016_v40  ;;  %5955 = vmatpush1.bf16.msra.mxu1 %v3018_v41  ;;  %v1194_v40 = vld [vmem:[%s7088_s22 + $0x1d70] sm:$0xff]  ;;  %v3144_v41 = vunpack.c.l.s8.bf16 %v1192_v37 }
 0x824   : > { %5628 = vmatprep.subr.bf16.mxu0 %v3033_v58  ;;  %5956 = vmatprep.subr.bf16.mxu1 %v3035_v27  ;;  %v3146_v58 = vunpack.c.l.s8.bf16 %v1194_v40  ;;  %v3161_v27 = vunpack.c.h.s8.bf16 %v1193_v29 }
 0x827   : > { %5629 = vmatpush1.bf16.msra.mxu0 %v3032_v4  ;;  %5957 = vmatpush1.bf16.msra.mxu1 %v3034_v52  ;;  %v1211_v4 = vld [vmem:[%s7088_s22 + $0x1df8] sm:$0xff]  ;;  %v3160_v52 = vunpack.c.h.s8.bf16 %v1192_v37 }
 0x828   : > { %5630 = vmatprep.subr.bf16.mxu0 %v3049_v62  ;;  %5958 = vmatprep.subr.bf16.mxu1 %v3051_v44  ;;  %v3162_v62 = vunpack.c.h.s8.bf16 %v1194_v40  ;;  %v3177_v44 = vunpack.c.l.s8.bf16 %v1209_v42  ;;  %v3179_v63 = vunpack.c.l.s8.bf16 %v1211_v4  ;;  %v3195_v54 = vunpack.c.h.s8.bf16 %v1211_v4  ;;  %v1256_v40 = vld [vmem:[%s7088_s22 + $0x1f60] sm:$0xff]  ;;  %v1273_v4 = vld [vmem:[%s7088_s22 + $0x1fe8] sm:$0xff] }
 0x82b   : > { %5631 = vmatpush1.bf16.msra.mxu0 %v3048_v45  ;;  %5959 = vmatpush1.bf16.msra.mxu1 %v3050_v3  ;;  %v1210_v45 = vld [vmem:[%s7088_s22 + $0x1df0] sm:$0xff]  ;;  %v3176_v3 = vunpack.c.l.s8.bf16 %v1208_v43 }
 0x82c   : > { %5632 = vmatprep.subr.bf16.mxu0 %v3065_v60  ;;  %5960 = vmatprep.subr.bf16.mxu1 %v3067_v6  ;;  %v3178_v60 = vunpack.c.l.s8.bf16 %v1210_v45  ;;  %v3193_v6 = vunpack.c.h.s8.bf16 %v1209_v42 }
 0x82f   : > { %5633 = vmatpush1.bf16.msra.mxu0 %v3064_v38  ;;  %5961 = vmatpush1.bf16.msra.mxu1 %v3066_v61  ;;  %v1227_v38 = vld [vmem:[%s7088_s22 + $0x1e78] sm:$0xff]  ;;  %v3192_v61 = vunpack.c.h.s8.bf16 %v1208_v43 }
 0x830   : > { %5643 = vmatprep.subr.bf16.mxu0 %v3081_v0  ;;  %5971 = vmatprep.subr.bf16.mxu1 %v3083_v36  ;;  %v3194_v0 = vunpack.c.h.s8.bf16 %v1210_v45  ;;  %v3209_v36 = vunpack.c.l.s8.bf16 %v1225_v12  ;;  %v3211_v1 = vunpack.c.l.s8.bf16 %v1227_v38  ;;  %v3227_v46 = vunpack.c.h.s8.bf16 %v1227_v38  ;;  %v1272_v45 = vld [vmem:[%s7088_s22 + $0x1fe0] sm:$0xff] }
 0x831   : > { %v3320_v38 = vunpack.c.h.s8.bf16 %v1272_v45 }
 0x832   : > { %5635 = vmatmul.mubr.bf16.vlgmr.msra.gmra.mrb[12].mxu0 %v7446_v22  ;;  %5963 = vmatmul.mubr.bf16.vlgmr.msra.gmra.mrb[12].mxu1 %v7446_v22  ;;  %v3114_v22 = vunpack.c.l.s8.bf16 %v1178_v32  ;;  %v1240_v32 = vld [vmem:[%s7088_s22 + $0x1ee0] sm:$0xff] }
 0x833   : > { %5644 = vmatpush1.bf16.msra.mxu0 %v3080_v7  ;;  %5972 = vmatpush1.bf16.msra.mxu1 %v3082_v8  ;;  %v1226_v7 = vld [vmem:[%s7088_s22 + $0x1e70] sm:$0xff]  ;;  %v3208_v8 = vunpack.c.l.s8.bf16 %v1224_v2 }
 0x834   : > { %5645 = vmatprep.subr.bf16.mxu0 %v3097_v25  ;;  %5973 = vmatprep.subr.bf16.mxu1 %v3099_v24  ;;  %v3210_v25 = vunpack.c.l.s8.bf16 %v1226_v7  ;;  %v3225_v24 = vunpack.c.h.s8.bf16 %v1225_v12 }
 0x835   : > { %5675 = vmatprep.mubr.bf16.mxu0 %v7454_v34  ;;  %6003 = vmatprep.mubr.bf16.mxu1 %v7454_v34  ;;  %v3145_v34 = vunpack.c.l.s8.bf16 %v1193_v29 }
 0x837   : > { %5646 = vmatpush1.bf16.msra.mxu0 %v3096_v10  ;;  %5974 = vmatpush1.bf16.msra.mxu1 %v3098_v28  ;;  %v1243_v10 = vld [vmem:[%s7088_s22 + $0x1ef8] sm:$0xff]  ;;  %v3224_v28 = vunpack.c.h.s8.bf16 %v1224_v2 }
 0x838   : > { %5647 = vmatprep.subr.bf16.mxu0 %v3113_v16  ;;  %5975 = vmatprep.subr.bf16.mxu1 %v3115_v17  ;;  %v3226_v16 = vunpack.c.h.s8.bf16 %v1226_v7  ;;  %v3241_v17 = vunpack.c.l.s8.bf16 %v1241_v9  ;;  %v3243_v20 = vunpack.c.l.s8.bf16 %v1243_v10  ;;  %v3259_v29 = vunpack.c.h.s8.bf16 %v1243_v10 }
 0x83b   : > { %5648 = vmatpush1.bf16.msra.mxu0 %v3112_v21  ;;  %5976 = vmatpush1.bf16.msra.mxu1 %v3114_v22  ;;  %v1242_v21 = vld [vmem:[%s7088_s22 + $0x1ef0] sm:$0xff]  ;;  %v3240_v22 = vunpack.c.l.s8.bf16 %v1240_v32 }
 0x83c   : > { %5649 = vmatprep.subr.bf16.mxu0 %v3129_v33  ;;  %5977 = vmatprep.subr.bf16.mxu1 %v3131_v39  ;;  %v3242_v33 = vunpack.c.l.s8.bf16 %v1242_v21  ;;  %v3257_v39 = vunpack.c.h.s8.bf16 %v1241_v9 }
 0x83f   : > { %5650 = vmatpush1.bf16.msra.mxu0 %v3128_v55  ;;  %5978 = vmatpush1.bf16.msra.mxu1 %v3130_v23  ;;  %v1259_v55 = vld [vmem:[%s7088_s22 + $0x1f78] sm:$0xff]  ;;  %v3256_v23 = vunpack.c.h.s8.bf16 %v1240_v32 }
 0x840   : > { %5651 = vmatprep.subr.bf16.mxu0 %v3145_v34  ;;  %5979 = vmatprep.subr.bf16.mxu1 %v3147_v35  ;;  %v3258_v34 = vunpack.c.h.s8.bf16 %v1242_v21  ;;  %v3273_v35 = vunpack.c.l.s8.bf16 %v1257_v50  ;;  %v3275_v37 = vunpack.c.l.s8.bf16 %v1259_v55  ;;  %v3291_v42 = vunpack.c.h.s8.bf16 %v1259_v55 }
 0x843   : > { %5652 = vmatpush1.bf16.msra.mxu0 %v3144_v41  ;;  %5980 = vmatpush1.bf16.msra.mxu1 %v3146_v58  ;;  %v1258_v41 = vld [vmem:[%s7088_s22 + $0x1f70] sm:$0xff]  ;;  %v3272_v58 = vunpack.c.l.s8.bf16 %v1256_v40 }
 0x844   : > { %5653 = vmatprep.subr.bf16.mxu0 %v3161_v27  ;;  %5981 = vmatprep.subr.bf16.mxu1 %v3163_v30  ;;  %v3274_v27 = vunpack.c.l.s8.bf16 %v1258_v41  ;;  %v3289_v30 = vunpack.c.h.s8.bf16 %v1257_v50 }
 0x847   : > { %5654 = vmatpush1.bf16.msra.mxu0 %v3160_v52  ;;  %5982 = vmatpush1.bf16.msra.mxu1 %v3162_v62  ;;  %v1275_v52 = vld [vmem:[%s7088_s22 + $0x1ff8] sm:$0xff]  ;;  %v3288_v62 = vunpack.c.h.s8.bf16 %v1256_v40 }
 0x848   : > { %5655 = vmatprep.subr.bf16.mxu0 %v3177_v44  ;;  %5983 = vmatprep.subr.bf16.mxu1 %v3179_v63  ;;  %v3290_v44 = vunpack.c.h.s8.bf16 %v1258_v41  ;;  %v3305_v63 = vunpack.c.l.s8.bf16 %v1273_v4  ;;  %v3307_v43 = vunpack.c.l.s8.bf16 %v1275_v52  ;;  %v3323_v12 = vunpack.c.h.s8.bf16 %v1275_v52 }
 0x84b   : > { %5656 = vmatpush1.bf16.msra.mxu0 %v3176_v3  ;;  %5984 = vmatpush1.bf16.msra.mxu1 %v3178_v60  ;;  %v1274_v3 = vld [vmem:[%s7088_s22 + $0x1ff0] sm:$0xff]  ;;  %v3304_v60 = vunpack.c.l.s8.bf16 %v1272_v45 }
 0x84c   : > { %5657 = vmatprep.subr.bf16.mxu0 %v3193_v6  ;;  %5985 = vmatprep.subr.bf16.mxu1 %v3195_v54  ;;  %v3306_v6 = vunpack.c.l.s8.bf16 %v1274_v3  ;;  %v3321_v54 = vunpack.c.h.s8.bf16 %v1273_v4 }
 0x84f   : > { %5658 = vmatpush1.bf16.msra.mxu0 %v3192_v61  ;;  %5986 = vmatpush1.bf16.msra.mxu1 %v3194_v0  ;;  %v3322_v61 = vunpack.c.h.s8.bf16 %v1274_v3  ;;  %v6746_v0 = vld [vmem:[%s7623_s13 + $0x8] sm:$0xff] }
 0x850   : > { %5659 = vmatprep.subr.bf16.mxu0 %v3209_v36  ;;  %5987 = vmatprep.subr.bf16.mxu1 %v3211_v1  ;;  %v6069_v36 = vrot.slane %v6746_v0, %v7940_v14  ;;  %v6077_v1 = vrot.slane %v6746_v0, %v7943_v15  ;;  %v6073_v2 = vrot.slane %v6746_v0, %v7946_v18 }
 0x851   : > { %v6081_v7 = vrot.slane %v6746_v0, %v7949_v19 }
 0x853   : > { %5660 = vmatpush1.bf16.msra.mxu0 %v3208_v8  ;;  %5988 = vmatpush1.bf16.msra.mxu1 %v3210_v25  ;;  %v6747_v8 = vld [vmem:[%s7632_s14 + $0x8] sm:$0xff] }
 0x854   : > { %5661 = vmatprep.subr.bf16.mxu0 %v3225_v24  ;;  %5989 = vmatprep.subr.bf16.mxu1 %v3227_v46  ;;  %v6170_v25 = vrot.slane %v6747_v8, %v7940_v14  ;;  %v6178_v24 = vrot.slane %v6747_v8, %v7943_v15  ;;  %v6174_v10 = vrot.slane %v6747_v8, %v7946_v18  ;;  %v6749_v18 = vpop.eup (!%p6419_p10), %6748 }
 0x857   : > { %5662 = vmatpush1.bf16.msra.mxu0 %v3224_v28  ;;  %5990 = vmatpush1.bf16.msra.mxu1 %v3226_v16 }
 0x858   : > { %5663 = vmatprep.subr.bf16.mxu0 %v3241_v17  ;;  %5991 = vmatprep.subr.bf16.mxu1 %v3243_v20 }
 0x85b   : > { %5664 = vmatpush1.bf16.msra.mxu0 %v3240_v22  ;;  %5992 = vmatpush1.bf16.msra.mxu1 %v3242_v33 }
 0x85c   : > { %5665 = vmatprep.subr.bf16.mxu0 %v3257_v39  ;;  %5993 = vmatprep.subr.bf16.mxu1 %v3259_v29 }
 0x85f   : > { %5666 = vmatpush1.bf16.msra.mxu0 %v3256_v23  ;;  %5994 = vmatpush1.bf16.msra.mxu1 %v3258_v34 }
 0x860   : > { %5667 = vmatprep.subr.bf16.mxu0 %v3273_v35  ;;  %5995 = vmatprep.subr.bf16.mxu1 %v3275_v37 }
 0x863   : > { %5668 = vmatpush1.bf16.msra.mxu0 %v3272_v58  ;;  %5996 = vmatpush1.bf16.msra.mxu1 %v3274_v27 }
 0x864   : > { %5669 = vmatprep.subr.bf16.mxu0 %v3289_v30  ;;  %5997 = vmatprep.subr.bf16.mxu1 %v3291_v42 }
 0x867   : > { %5670 = vmatpush1.bf16.msra.mxu0 %v3288_v62  ;;  %5998 = vmatpush1.bf16.msra.mxu1 %v3290_v44 }
 0x868   : > { %5671 = vmatprep.subr.bf16.mxu0 %v3305_v63  ;;  %5999 = vmatprep.subr.bf16.mxu1 %v3307_v43 }
 0x86b   : > { %5672 = vmatpush1.bf16.msra.mxu0 %v3304_v60  ;;  %6000 = vmatpush1.bf16.msra.mxu1 %v3306_v6 }
 0x86c   : > { %5673 = vmatprep.subr.bf16.mxu0 %v3321_v54  ;;  %6001 = vmatprep.subr.bf16.mxu1 %v3323_v12 }
 0x86f   : > { %5674 = vmatpush1.bf16.msra.mxu0 %v3320_v38  ;;  %6002 = vmatpush1.bf16.msra.mxu1 %v3322_v61 }
 0x872   : > { %5676 = vmatmul.mubr.bf16.vlgmr.msra.gmra.mrb[12].mxu0 %v7492_v26  ;;  %6004 = vmatmul.mubr.bf16.vlgmr.msra.gmra.mrb[12].mxu1 %v7492_v26  ;;  %v6182_v26 = vrot.slane %v6747_v8, %v7949_v19  ;;  %v6751_v19 = vpop.eup (!%p6419_p10), %6750 }
 0x873   : > { %v6753_v23 = vpop.eup (!%p6419_p10), %6752  ;;  %v6432_v34 = vpack.c.bf16 (!%p6419_p10), %v6751_v19, %v6749_v18 }
 0x874   : > { %v6755_v35 = vpop.eup (!%p6419_p10), %6754 }
 0x875   : > { %v6757_v37 = vpop.eup (!%p6419_p10), %6756  ;;  %6299 = vst [vmem:[#allocation2] sm:$0xff] (!%p6419_p10), %v6432_v34  ;;  %v6433_v40 = vpack.c.bf16 (!%p6419_p10), %v6755_v35, %v6753_v23 }
 0x876   : > { %v6759_v41 = vpop.eup (!%p6419_p10), %6758 }
 0x877   : > { %v6761_v58 = vpop.eup (!%p6419_p10), %6760  ;;  %6300 = vst [vmem:[#allocation2 + $0x8] sm:$0xff] (!%p6419_p10), %v6433_v40  ;;  %v6434_v27 = vpack.c.bf16 (!%p6419_p10), %v6759_v41, %v6757_v37 }
 0x878   : > { %v6763_v30 = vpop.eup (!%p6419_p10), %6762 }
 0x879   : > { %v6765_v42 = vpop.eup (!%p6419_p10), %6764  ;;  %6301 = vst [vmem:[#allocation2 + $0x10] sm:$0xff] (!%p6419_p10), %v6434_v27  ;;  %v6435_v4 = vpack.c.bf16 (!%p6419_p10), %v6763_v30, %v6761_v58 }
 0x87a   : > { %v6767_v52 = vpop.eup (!%p6419_p10), %6766 }
 0x87b   : > { %v6769_v62 = vpop.eup (!%p6419_p10), %6768  ;;  %6302 = vst [vmem:[#allocation2 + $0x18] sm:$0xff] (!%p6419_p10), %v6435_v4  ;;  %v6436_v44 = vpack.c.bf16 (!%p6419_p10), %v6767_v52, %v6765_v42 }
 0x87c   : > { %v6771_v63 = vpop.eup (!%p6419_p10), %6770 }
 0x87d   : > { %6303 = vst [vmem:[#allocation2 + $0x20] sm:$0xff] (!%p6419_p10), %v6436_v44  ;;  %v6437_v45 = vpack.c.bf16 (!%p6419_p10), %v6771_v63, %v6769_v62 }
 0x87f   : > { %6304 = vst [vmem:[#allocation2 + $0x28] sm:$0xff] (!%p6419_p10), %v6437_v45 }
 0x943   : > { %6218 = sbr.rel (%p6419_p10) target bundleno = 2395 (0x95b), region = 56 }
 0x945   : > { %v5677_v46 = vpop.f32.mrb[12].mxu0  ;;  %v6005_v9 = vpop.f32.mrb[12].mxu1 }
 0x946   : > { %v6110_v28 = vmul.f32 %v6069_v36, %v5677_v46  ;;  %v6112_v16 = vmul.f32 %v6077_v1, %v6005_v9  ;;  %v5679_v17 = vpop.f32.mrb[13].mxu0  ;;  %v6007_v20 = vpop.f32.mrb[13].mxu1 }
 0x947   : > { %v6111_v32 = vmul.f32 %v6073_v2, %v5679_v17  ;;  %v6113_v21 = vmul.f32 %v6081_v7, %v6007_v20  ;;  %v5681_v22 = vpop.f32.mrb[14].mxu0  ;;  %v6009_v33 = vpop.f32.mrb[14].mxu1 }
 0x948   : > { %v8451_v39 = vadd.f32 %v6170_v25, %v6110_v28  ;;  %v8453_v29 = vadd.f32 %v6178_v24, %v6112_v16  ;;  %v5682_v14 = vpop.f32.mrb[15].mxu0  ;;  %v6010_v15 = vpop.f32.mrb[15].mxu1 }
 0x949   : > { %v8455_v50 = vadd.f32 %v6174_v10, %v6111_v32  ;;  %v8457_v55 = vadd.f32 %v6182_v26, %v6113_v21 }
 0x94a   : > { %6772 = vtanh.f32 %v8451_v39 }
 0x94b   : > { %6774 = vtanh.f32 %v8455_v50 }
 0x94c   : > { %6776 = vtanh.f32 %v8453_v29 }
 0x94d   : > { %6778 = vtanh.f32 %v8457_v55 }
 0x954   : > { %v6773_v43 = vpop.eup %6772 }
 0x955   : > { %v6775_v3 = vpop.eup %6774 }
 0x956   : > { %v6777_v60 = vpop.eup %6776  ;;  %v6438_v6 = vpack.c.bf16 %v6775_v3, %v6773_v43 }
 0x957   : > { %v6779_v54 = vpop.eup %6778 }
 0x958   : > { %6305 = vst [vmem:[#allocation2 + $0x30] sm:$0xff] %v6438_v6  ;;  %v6439_v12 = vpack.c.bf16 %v6779_v54, %v6777_v60 }
 0x95a   : > { %6306 = vst [vmem:[#allocation2 + $0x38] sm:$0xff] %v6439_v12 }
 0x95b PF: > { %p6428_p9 = scmp.ne.s32.totalorder %s6957_s19, 6 }
 0x95c   : > { %6311 = vst [vmem:[%s8558_s4] sm:$0xff] (!%p6428_p9), %v7647_v48  ;;  %6312 = vst [vmem:[%s8558_s4 + $0x8] sm:$0xff] (!%p6428_p9), %v7651_v59 }
 0x95d   : > { %6310 = sbr.rel (%p6428_p9) target bundleno = 2404 (0x964), region = 60  ;;  %6313 = vst [vmem:[%s8558_s4 + $0x10] sm:$0xff] (!%p6428_p9), %v7649_v49  ;;  %6314 = vst [vmem:[%s8558_s4 + $0x18] sm:$0xff] (!%p6428_p9), %v7653_v5 }
 0x95e   : > { %6315 = vst [vmem:[%s8558_s4 + $0x20] sm:$0xff] (!%p6428_p9), %v7965_v11  ;;  %6316 = vst [vmem:[%s8558_s4 + $0x28] sm:$0xff] (!%p6428_p9), %v7969_v31 }
 0x95f   : > { %6317 = vst [vmem:[%s8558_s4 + $0x30] sm:$0xff] (!%p6428_p9), %v7967_v13  ;;  %6318 = vst [vmem:[%s8558_s4 + $0x38] sm:$0xff] (!%p6428_p9), %v7971_v51 }
 0x960   : > { %6319 = vst [vmem:[%s8558_s4 + $0x40] sm:$0xff] (!%p6428_p9), %v8271_v47  ;;  %6320 = vst [vmem:[%s8558_s4 + $0x48] sm:$0xff] (!%p6428_p9), %v8275_v56 }
 0x961   : > { %6321 = vst [vmem:[%s8558_s4 + $0x50] sm:$0xff] (!%p6428_p9), %v8273_v53  ;;  %6322 = vst [vmem:[%s8558_s4 + $0x58] sm:$0xff] (!%p6428_p9), %v8277_v57 }
 0x962   : > { %6323 = vst [vmem:[%s8558_s4 + $0x60] sm:$0xff] (!%p6428_p9), %v8451_v39  ;;  %6324 = vst [vmem:[%s8558_s4 + $0x68] sm:$0xff] (!%p6428_p9), %v8455_v50 }
 0x963   : > { %6325 = vst [vmem:[%s8558_s4 + $0x70] sm:$0xff] (!%p6428_p9), %v8453_v29  ;;  %6326 = vst [vmem:[%s8558_s4 + $0x78] sm:$0xff] (!%p6428_p9), %v8457_v55 }
 0x964 PF: > { %p15_p1 = scmp.ge.s32.totalorder %s7032_s5, 9   ;;  %s8571_s15 = smov %s6896_s16 }
 0x965   : > { %s8572_s16 = smov %s6900_s17  ;;  %s8573_s17 = smov %s7043_s8 }
 0x966   : > { %s8574_s18 = smov %s7032_s5  ;;  %17 = sbr.rel (!%p15_p1) target bundleno = 4 (0x4), region = 94 }
 0x96d   :  { %6338 = vsyncpa [#allocation4], 1 }
 0x96e   :  { %6340 = vsyncpa [#allocation4 + $0x1], 1 }
 0x96f   :  { %6341 = vsyncpa [#allocation6], 1 }

</bundles_post_ra>
